<compile_context>
chip_gen: v7x
topology: tpu7x:2x2x1
jax: 0.10.0
libtpu: 0.0.40
codegen_flags: <defaults>
</compile_context>

<pallas_src>
import math
import functools

import numpy as np
import jax
import jax.numpy as jnp
from jax.experimental import pallas as pl
from jax.experimental.pallas import tpu as pltpu

F32 = jnp.float32
BF16 = jnp.bfloat16

# ----------------------- model hyper-parameters (small) -----------------------
BS = 2                  # batch size
IMG = 64                # image H = W
D_MODEL = 32            # config['coarse']['d_model'] == config['predict']['input_c']
NHEAD = 4
LAYER_NAMES = ("self", "cross")     # kernel below hard-codes this order
HP = IMG // 8           # coarse feature h = w (backbone downsample 8x)
L_COARSE = HP * HP      # tokens per image
_L2_OUT = ((L_COARSE // 2) - 3) // 3 + 1
FC_IN = (_L2_OUT - 3) // 3 + 1          # config['predict']['fc_in']


# ------------------------------ fused Pallas kernel ----------------------------
def _loftr_fused_kernel(p_ref, wc_ref, wm_ref, wbb_ref, aux_ref, o_ref, *,
                        nhead, L, eps):
    """Patchify + PE + full coarse transformer for ONE batch element.

    p_ref   : (1, 2L, 64)   f32   im2col'd 8x8 patches; rows [0,L)=img0, [L,2L)=img1
    wc_ref  : (2, C, 6C)    bf16  per layer: [ Wvm (4C) | Wq (C) | Wk (C) ]
    wm_ref  : (2, 2C, 3C)   bf16  per layer: [ W1 (2C)  | W2 (C) ]
    wbb_ref : (64, C)       bf16  patchify conv weight
    aux_ref : (2L+64, C)    f32   rows [0,2L): sine-PE + conv bias;
                                  rows 2L+8*j: LN vectors (g1,b1,g2,b2) x 2 layers
    o_ref   : (1, 2L, C)    f32   updated feat0 (rows [0,L)) and feat1 (rows [L,2L))
    """
    C = o_ref.shape[-1]
    D = C // nhead
    scale = 1.0 / math.sqrt(D)

    def wdot(a, w):                       # bf16 MXU matmul, f32 accumulation
        return jnp.dot(a.astype(BF16), w, preferred_element_type=F32)

    def layer_norm(v, g, b):
        mu = jnp.mean(v, axis=-1, keepdims=True)
        var = jnp.mean(jnp.square(v - mu), axis=-1, keepdims=True)
        return (v - mu) * jax.lax.rsqrt(var + eps) * g + b

    def ln_vec(j):                        # LN vectors live on 8-row tile boundaries
        r = 2 * L + 8 * j
        return aux_ref[r:r + 1, :]        # (1, C)

    # ---- patchify conv (stride-8 8x8) + bias + sine PE, both images at once ----
    x = wdot(p_ref[0], wbb_ref[...]) + aux_ref[:2 * L, :]            # (2L, C)

    def attend(q, k, vprime):
        """Single-sequence MHA (softmax); merge matmul pre-folded into vprime."""
        kT = k.T                                                      # one shared transpose
        msg = None
        for h in range(nhead):
            qh = q[:, h * D:(h + 1) * D]                              # (Lq, D)
            kTh = kT[h * D:(h + 1) * D, :]                            # (D, Lk) sublane slice
            sc = jnp.dot(qh, kTh, preferred_element_type=F32) * scale
            m = jnp.max(sc, axis=-1, keepdims=True)
            p = jnp.exp(sc - m)
            p = p * pl.reciprocal(jnp.sum(p, axis=-1, keepdims=True), approx=True)
            ph = jnp.dot(p, vprime[:, h * C:(h + 1) * C],
                         preferred_element_type=F32)
            msg = ph if msg is None else msg + ph
        return msg                                                    # (Lq, C)

    def mlp_residual(xin, msg, wmm, ln0):
        g1, b1, g2, b2 = ln_vec(ln0), ln_vec(ln0 + 1), ln_vec(ln0 + 2), ln_vec(ln0 + 3)
        msg = layer_norm(msg, g1, b1)
        w1 = wmm[:, :2 * C]                                           # (2C, 2C)
        w2 = wmm[:, 2 * C:]                                           # (2C, C)
        # concat([x, msg]) @ w1  ==  x @ w1[:C] + msg @ w1[C:]   (no lane concat)
        h = jnp.maximum(wdot(xin, w1[:C]) + wdot(msg, w1[C:]), 0.0)
        out = layer_norm(wdot(h, w2), g2, b2)
        return xin + out

    # ---- layer "self": projections/MLP batched over both sequences (M = 2L) ----
    wc, wmm = wc_ref[0], wm_ref[0]
    proj = wdot(x, wc)                                                # (2L, 6C)
    msg = jnp.concatenate(
        [attend(proj[s * L:(s + 1) * L, 4 * C:5 * C],                 # q
                proj[s * L:(s + 1) * L, 5 * C:6 * C],                 # k
                proj[s * L:(s + 1) * L, :4 * C])                      # v' (merge folded)
         for s in range(2)], axis=0)                                  # (2L, C)
    x = mlp_residual(x, msg, wmm, 0)

    # ---- layer "cross": feat0 <- feat1, then feat1 <- UPDATED feat0 ----
    wc, wmm = wc_ref[1], wm_ref[1]
    f0, f1 = x[:L], x[L:]
    p0 = wdot(f0, wc)
    p1 = wdot(f1, wc)
    f0 = mlp_residual(
        f0, attend(p0[:, 4 * C:5 * C], p1[:, 5 * C:6 * C], p1[:, :4 * C]), wmm, 4)
    p0 = wdot(f0, wc)                                                 # re-project updated feat0
    f1 = mlp_residual(
        f1, attend(p1[:, 4 * C:5 * C], p0[:, 5 * C:6 * C], p0[:, :4 * C]), wmm, 4)

    o_ref[0] = jnp.concatenate([f0, f1], axis=0).astype(o_ref.dtype)


def loftr_coarse_fused(patches, prep):
    """patches:[bs, 2L, 64] -> feats:[bs, 2L, C].  Backbone projection + PE +
    whole coarse transformer in ONE pallas_call; grid over batch elements only."""
    bs, twoL, K = patches.shape
    L = twoL // 2
    C = D_MODEL
    kern = functools.partial(_loftr_fused_kernel, nhead=NHEAD, L=L, eps=1e-5)
    return pl.pallas_call(
        kern,
        out_shape=jax.ShapeDtypeStruct((bs, twoL, C), F32),
        grid=(bs,),
        in_specs=[
            pl.BlockSpec((1, twoL, K), lambda i: (i, 0, 0)),
            pl.BlockSpec((2, C, 6 * C), lambda i: (0, 0, 0)),
            pl.BlockSpec((2, 2 * C, 3 * C), lambda i: (0, 0, 0)),
            pl.BlockSpec((K, C), lambda i: (0, 0)),
            pl.BlockSpec((twoL + 64, C), lambda i: (0, 0)),
        ],
        out_specs=pl.BlockSpec((1, twoL, C), lambda i: (i, 0, 0)),
        compiler_params=pltpu.CompilerParams(dimension_semantics=("parallel",)),
    )(patches.astype(F32), prep["w_c"], prep["w_m"], prep["w_bb"], prep["aux"])


# ------------------------------ glue / submodules ------------------------------
def sine_pos_encoding(d_model, h, w):
    """LoFTR PositionEncodingSine, returned as [(h*w), d_model]."""
    pe = np.zeros((d_model, h, w), np.float32)
    y_pos = np.cumsum(np.ones((h, w), np.float32), axis=0)
    x_pos = np.cumsum(np.ones((h, w), np.float32), axis=1)
    div = np.exp(np.arange(0, d_model // 2, 2, dtype=np.float32)
                 * (-math.log(10000.0) / (d_model // 2)))
    div = div[:, None, None]
    pe[0::4] = np.sin(x_pos[None] * div)
    pe[1::4] = np.cos(x_pos[None] * div)
    pe[2::4] = np.sin(y_pos[None] * div)
    pe[3::4] = np.cos(y_pos[None] * div)
    return jnp.asarray(pe.transpose(1, 2, 0).reshape(h * w, d_model))


def fold_bn(w, b, gamma, beta, eps=1e-5):
    """Fold inference-mode BatchNorm (mean=0, var=1) into matmul weights.
    w: [K, OutC], b: [OutC]."""
    scale = gamma / jnp.sqrt(1.0 + eps)
    return w * scale[None, :], b * scale + beta


# --------------------------------- parameters ----------------------------------
def init_params(key):
    ks = iter(jax.random.split(key, 64))

    def nrm(shape, s=0.05):
        return s * jax.random.normal(next(ks), shape, F32)

    C = D_MODEL
    p = {}
    # "backbone": stride-8 8x8 conv (patchify), weight stored torch-style [out, in*kh*kw]
    p["bb_w"] = nrm((C, 1 * 8 * 8), 0.1)
    p["bb_b"] = nrm((C,), 0.1)
    # coarse transformer layers
    p["layers"] = []
    for _ in LAYER_NAMES:
        p["layers"].append(dict(
            wq=nrm((C, C)), wk=nrm((C, C)), wv=nrm((C, C)), wm=nrm((C, C)),
            w1=nrm((2 * C, 2 * C)), w2=nrm((2 * C, C)),
            ln1_g=jnp.ones((C,), F32), ln1_b=jnp.zeros((C,), F32),
            ln2_g=jnp.ones((C,), F32), ln2_b=jnp.zeros((C,), F32),
        ))
    # predict head
    c1, c2 = C // 4, C // 16
    p["l1_w"] = nrm((c1, C * 2 * 2), 0.1); p["l1_b"] = nrm((c1,), 0.1)
    p["bn1_g"] = jnp.ones((c1,), F32);     p["bn1_b"] = jnp.zeros((c1,), F32)
    p["l2_w"] = nrm((c2, c1 * 3), 0.1);    p["l2_b"] = nrm((c2,), 0.1)
    p["bn2_g"] = jnp.ones((c2,), F32);     p["bn2_b"] = jnp.zeros((c2,), F32)
    p["l3_w"] = nrm((1, c2 * 3), 0.1);     p["l3_b"] = nrm((1,), 0.1)
    p["fc_w"] = nrm((FC_IN, 4), 0.1);      p["fc_b"] = nrm((4,), 0.1)
    return p


def prepare_params(params):
    """One-time (per model) weight fusion / packing, hoisted out of the forward."""
    C, D = D_MODEL, D_MODEL // NHEAD
    w_c, w_m, ln_rows = [], [], []
    for lp in params["layers"]:
        # fold the merge matmul into the V projection, per head: Wvm_h = Wv_h @ Wm_h
        wvm = jnp.concatenate(
            [lp["wv"][:, h * D:(h + 1) * D] @ lp["wm"][h * D:(h + 1) * D, :]
             for h in range(NHEAD)], axis=1)                            # (C, nhead*C)
        w_c.append(jnp.concatenate([wvm, lp["wq"], lp["wk"]], axis=1))  # (C, 6C)
        w_m.append(jnp.concatenate([lp["w1"], lp["w2"]], axis=1))       # (2C, 3C)
        ln_rows += [lp["ln1_g"], lp["ln1_b"], lp["ln2_g"], lp["ln2_b"]]

    pe = sine_pos_encoding(C, HP, HP)                                    # (L, C)
    pe2b = jnp.tile(pe, (2, 1)) + params["bb_b"][None, :]                # PE + conv bias
    # each LN vector on its own 8-row tile (aligned sublane-0 broadcasts in-kernel)
    ln_block = jnp.concatenate(
        [jnp.pad(r[None, :], ((0, 7), (0, 0))) for r in ln_rows], axis=0)  # (64, C)
    aux = jnp.concatenate([pe2b, ln_block], axis=0)                      # (2L+64, C)

    h1_w, h1_b = fold_bn(params["l1_w"].T, params["l1_b"],
                         params["bn1_g"], params["bn1_b"])
    h2_w, h2_b = fold_bn(params["l2_w"].T, params["l2_b"],
                         params["bn2_g"], params["bn2_b"])
    return dict(
        w_c=jnp.stack(w_c).astype(BF16),          # (2, C, 6C)
        w_m=jnp.stack(w_m).astype(BF16),          # (2, 2C, 3C)
        w_bb=params["bb_w"].T.astype(BF16),       # (64, C)
        aux=aux.astype(F32),                      # (2L+64, C)
        h1_w=h1_w, h1_b=h1_b, h2_w=h2_w, h2_b=h2_b,
        h3_w=params["l3_w"].T, h3_b=params["l3_b"],
        fc_w=params["fc_w"], fc_b=params["fc_b"],
    )


# ---------------------------------- forward ------------------------------------
def loftr_forward(prep, image0, image1):
    bs = image0.shape[0]
    Hi, Wi = image0.shape[2], image0.shape[3]
    hp, wp = Hi // 8, Wi // 8
    L = hp * wp
    C = D_MODEL

    # im2col for the stride-8 8x8 patchify conv; per batch element rows
    # [0,L) = image0 tokens, [L,2L) = image1 tokens (raster order, matches PE).
    imgs = jnp.stack([image0, image1], axis=1)                    # (bs, 2, 1, H, W)
    patches = (imgs.reshape(bs, 2, 1, hp, 8, wp, 8)
                   .transpose(0, 1, 3, 5, 2, 4, 6)
                   .reshape(bs, 2 * L, 64))

    # backbone projection + PE + full coarse transformer: ONE pallas_call
    feats = loftr_coarse_fused(patches.astype(F32), prep)         # (bs, 2L, C)

    # --- prediction head: micro-sized matmuls, left to XLA per perf review ---
    # TODO(synk): could be folded into the kernel epilogue; skipped because the
    #             strided im2col reshapes would force in-kernel relayouts on <2 KB data.
    c1, c2 = C // 4, C // 16
    xh = feats.reshape(bs, 2, L, C).transpose(0, 3, 1, 2)         # (bs, C, 2, L) NCHW

    # layer1: Conv2d(C, C//4, k=2, s=2) + BN1 + ReLU  (im2col + matmul)
    ow = L // 2
    cols = (xh.reshape(bs, C, 1, 2, ow, 2)
              .transpose(0, 2, 4, 1, 3, 5)
              .reshape(bs * ow, C * 4))
    y = jnp.maximum(cols @ prep["h1_w"] + prep["h1_b"], 0.0)      # (bs*ow, c1)
    y = y.reshape(bs, ow, c1).transpose(0, 2, 1)                  # (bs, c1, ow)

    # layer2: Conv1d(c1, c2, k=3, s=3) + BN2 + ReLU
    l2o = (ow - 3) // 3 + 1
    cols = (y[:, :, : l2o * 3].reshape(bs, c1, l2o, 3)
             .transpose(0, 2, 1, 3).reshape(bs * l2o, c1 * 3))
    y = jnp.maximum(cols @ prep["h2_w"] + prep["h2_b"], 0.0)      # (bs*l2o, c2)
    y = y.reshape(bs, l2o, c2).transpose(0, 2, 1)                 # (bs, c2, l2o)

    # layer3: Conv1d(c2, 1, k=3, s=3) + ReLU
    l3o = (l2o - 3) // 3 + 1
    cols = (y[:, :, : l3o * 3].reshape(bs, c2, l3o, 3)
             .transpose(0, 2, 1, 3).reshape(bs * l3o, c2 * 3))
    y = jnp.maximum(cols @ prep["h3_w"] + prep["h3_b"], 0.0)      # (bs*l3o, 1)
    y = y.reshape(bs, l3o)                                        # Flatten

    # fc: Linear(fc_in, 4)
    return y @ prep["fc_w"] + prep["fc_b"]                        # (bs, 4)


# ------------------------------------ main --------------------------------------
if __name__ == "__main__":
    key = jax.random.PRNGKey(0)
    k_i0, k_i1, k_par = jax.random.split(key, 3)
    image0 = jax.random.normal(k_i0, (BS, 1, IMG, IMG), F32)
    image1 = jax.random.normal(k_i1, (BS, 1, IMG, IMG), F32)
    params = init_params(k_par)
    prep = prepare_params(params)        # one-time weight fusion / packing (hoisted)
    prep = jax.device_put(prep)

    fwd = jax.jit(loftr_forward)
    pred = fwd(prep, image0, image1)
    jax.block_until_ready(pred)
    assert pred.shape == (BS, 4) and pred.dtype == jnp.float32
    assert bool(jnp.all(jnp.isfinite(pred)))
    print("KERNEL_OK")
</pallas_src>

<mosaic_0001>
module attributes {stable_mosaic.version = 11 : i64} {
  func.func @_loftr_fused_kernel(%arg0: i32, %arg1: memref<1x128x64xf32, #tpu.memory_space<vmem>>, %arg2: memref<2x32x192xbf16, #tpu.memory_space<vmem>>, %arg3: memref<2x64x96xbf16, #tpu.memory_space<vmem>>, %arg4: memref<64x32xbf16, #tpu.memory_space<vmem>>, %arg5: memref<192x32xf32, #tpu.memory_space<vmem>>, %arg6: memref<1x128x32xf32, #tpu.memory_space<vmem>>) attributes {dimension_semantics = [#tpu.dimension_semantics<parallel>], iteration_bounds = array<i64: 2>, scalar_prefetch = 0 : i64, scratch_operands = 0 : i64, tpu.core_type = #tpu.core_type<tc>, window_params = [{transform_indices = @transform_0, window_bounds = array<i64: 1, 128, 64>}, {pipeline_mode = #tpu.pipeline_mode<synchronous>, transform_indices = @transform_1, window_bounds = array<i64: 2, 32, 192>}, {pipeline_mode = #tpu.pipeline_mode<synchronous>, transform_indices = @transform_2, window_bounds = array<i64: 2, 64, 96>}, {pipeline_mode = #tpu.pipeline_mode<synchronous>, transform_indices = @transform_3, window_bounds = array<i64: 64, 32>}, {pipeline_mode = #tpu.pipeline_mode<synchronous>, transform_indices = @transform_4, window_bounds = array<i64: 192, 32>}, {transform_indices = @transform_5, window_bounds = array<i64: 1, 128, 32>}]} {
    %c0 = arith.constant 0 : index
    %c0_0 = arith.constant 0 : index
    %c0_1 = arith.constant 0 : index
    %0 = vector.load %arg1[%c0, %c0_0, %c0_1] : memref<1x128x64xf32, #tpu.memory_space<vmem>>, vector<1x128x64xf32>
    %1 = vector.shape_cast %0 : vector<1x128x64xf32> to vector<128x64xf32>
    %c0_2 = arith.constant 0 : index
    %c0_3 = arith.constant 0 : index
    %2 = vector.load %arg4[%c0_2, %c0_3] : memref<64x32xbf16, #tpu.memory_space<vmem>>, vector<64x32xbf16>
    %3 = arith.truncf %1 : vector<128x64xf32> to vector<128x64xbf16>
    %cst = arith.constant dense<0.000000e+00> : vector<128x32xf32>
    %4 = tpu.matmul %3, %2, %cst {dimension_numbers = #tpu.dot_dimension_numbers<[1], [0], [0], [1], [0, 0, 1, 1], [], []>} : vector<128x64xbf16>, vector<64x32xbf16>, vector<128x32xf32> -> vector<128x32xf32>
    %c0_4 = arith.constant 0 : index
    %c0_5 = arith.constant 0 : index
    %5 = vector.load %arg5[%c0_4, %c0_5] : memref<192x32xf32, #tpu.memory_space<vmem>>, vector<128x32xf32>
    %6 = arith.addf %4, %5 : vector<128x32xf32>
    %c0_6 = arith.constant 0 : index
    %c0_7 = arith.constant 0 : index
    %c0_8 = arith.constant 0 : index
    %7 = vector.load %arg2[%c0_6, %c0_7, %c0_8] : memref<2x32x192xbf16, #tpu.memory_space<vmem>>, vector<1x32x192xbf16>
    %8 = vector.shape_cast %7 : vector<1x32x192xbf16> to vector<32x192xbf16>
    %c0_9 = arith.constant 0 : index
    %c0_10 = arith.constant 0 : index
    %c0_11 = arith.constant 0 : index
    %9 = vector.load %arg3[%c0_9, %c0_10, %c0_11] : memref<2x64x96xbf16, #tpu.memory_space<vmem>>, vector<1x64x96xbf16>
    %10 = vector.shape_cast %9 : vector<1x64x96xbf16> to vector<64x96xbf16>
    %11 = arith.truncf %6 : vector<128x32xf32> to vector<128x32xbf16>
    %cst_12 = arith.constant dense<0.000000e+00> : vector<128x192xf32>
    %12 = tpu.matmul %11, %8, %cst_12 {dimension_numbers = #tpu.dot_dimension_numbers<[1], [0], [0], [1], [0, 0, 1, 1], [], []>} : vector<128x32xbf16>, vector<32x192xbf16>, vector<128x192xf32> -> vector<128x192xf32>
    %13 = vector.extract_strided_slice %12 {offsets = [0, 128], sizes = [64, 32], strides = [1, 1]} : vector<128x192xf32> to vector<64x32xf32>
    %14 = vector.extract_strided_slice %12 {offsets = [0, 160], sizes = [64, 32], strides = [1, 1]} : vector<128x192xf32> to vector<64x32xf32>
    %15 = vector.extract_strided_slice %12 {offsets = [0, 0], sizes = [64, 128], strides = [1, 1]} : vector<128x192xf32> to vector<64x128xf32>
    %16 = tpu.transpose %14, [1, 0] : vector<64x32xf32> -> vector<32x64xf32>
    %17 = vector.extract_strided_slice %13 {offsets = [0, 0], sizes = [64, 8], strides = [1, 1]} : vector<64x32xf32> to vector<64x8xf32>
    %18 = vector.extract_strided_slice %16 {offsets = [0, 0], sizes = [8, 64], strides = [1, 1]} : vector<32x64xf32> to vector<8x64xf32>
    %cst_13 = arith.constant dense<0.000000e+00> : vector<64x64xf32>
    %19 = tpu.matmul %17, %18, %cst_13 {dimension_numbers = #tpu.dot_dimension_numbers<[1], [0], [0], [1], [0, 0, 1, 1], [], []>} : vector<64x8xf32>, vector<8x64xf32>, vector<64x64xf32> -> vector<64x64xf32>
    %cst_14 = arith.constant 0.353553385 : f32
    %20 = vector.broadcast %cst_14 : f32 to vector<64x64xf32>
    %21 = arith.mulf %19, %20 : vector<64x64xf32>
    %cst_15 = arith.constant dense<0xFF800000> : vector<64xf32>
    %22 = vector.multi_reduction <maximumf>, %21, %cst_15 [1] : vector<64x64xf32> to vector<64xf32>
    %23 = vector.shape_cast %22 : vector<64xf32> to vector<64x1xf32>
    %24 = vector.broadcast %23 : vector<64x1xf32> to vector<64x64xf32>
    %25 = arith.subf %21, %24 : vector<64x64xf32>
    %26 = math.exp %25 : vector<64x64xf32>
    %cst_16 = arith.constant dense<0.000000e+00> : vector<64xf32>
    %27 = vector.multi_reduction <add>, %26, %cst_16 [1] : vector<64x64xf32> to vector<64xf32>
    %28 = vector.shape_cast %27 : vector<64xf32> to vector<64x1xf32>
    %29 = tpu.reciprocal %28 {approx = true} : vector<64x1xf32> -> vector<64x1xf32>
    %30 = vector.broadcast %29 : vector<64x1xf32> to vector<64x64xf32>
    %31 = arith.mulf %26, %30 : vector<64x64xf32>
    %32 = vector.extract_strided_slice %15 {offsets = [0, 0], sizes = [64, 32], strides = [1, 1]} : vector<64x128xf32> to vector<64x32xf32>
    %cst_17 = arith.constant dense<0.000000e+00> : vector<64x32xf32>
    %33 = tpu.matmul %31, %32, %cst_17 {dimension_numbers = #tpu.dot_dimension_numbers<[1], [0], [0], [1], [0, 0, 1, 1], [], []>} : vector<64x64xf32>, vector<64x32xf32>, vector<64x32xf32> -> vector<64x32xf32>
    %34 = vector.extract_strided_slice %13 {offsets = [0, 8], sizes = [64, 8], strides = [1, 1]} : vector<64x32xf32> to vector<64x8xf32>
    %35 = vector.extract_strided_slice %16 {offsets = [8, 0], sizes = [8, 64], strides = [1, 1]} : vector<32x64xf32> to vector<8x64xf32>
    %cst_18 = arith.constant dense<0.000000e+00> : vector<64x64xf32>
    %36 = tpu.matmul %34, %35, %cst_18 {dimension_numbers = #tpu.dot_dimension_numbers<[1], [0], [0], [1], [0, 0, 1, 1], [], []>} : vector<64x8xf32>, vector<8x64xf32>, vector<64x64xf32> -> vector<64x64xf32>
    %cst_19 = arith.constant 0.353553385 : f32
    %37 = vector.broadcast %cst_19 : f32 to vector<64x64xf32>
    %38 = arith.mulf %36, %37 : vector<64x64xf32>
    %cst_20 = arith.constant dense<0xFF800000> : vector<64xf32>
    %39 = vector.multi_reduction <maximumf>, %38, %cst_20 [1] : vector<64x64xf32> to vector<64xf32>
    %40 = vector.shape_cast %39 : vector<64xf32> to vector<64x1xf32>
    %41 = vector.broadcast %40 : vector<64x1xf32> to vector<64x64xf32>
    %42 = arith.subf %38, %41 : vector<64x64xf32>
    %43 = math.exp %42 : vector<64x64xf32>
    %cst_21 = arith.constant dense<0.000000e+00> : vector<64xf32>
    %44 = vector.multi_reduction <add>, %43, %cst_21 [1] : vector<64x64xf32> to vector<64xf32>
    %45 = vector.shape_cast %44 : vector<64xf32> to vector<64x1xf32>
    %46 = tpu.reciprocal %45 {approx = true} : vector<64x1xf32> -> vector<64x1xf32>
    %47 = vector.broadcast %46 : vector<64x1xf32> to vector<64x64xf32>
    %48 = arith.mulf %43, %47 : vector<64x64xf32>
    %49 = vector.extract_strided_slice %15 {offsets = [0, 32], sizes = [64, 32], strides = [1, 1]} : vector<64x128xf32> to vector<64x32xf32>
    %cst_22 = arith.constant dense<0.000000e+00> : vector<64x32xf32>
    %50 = tpu.matmul %48, %49, %cst_22 {dimension_numbers = #tpu.dot_dimension_numbers<[1], [0], [0], [1], [0, 0, 1, 1], [], []>} : vector<64x64xf32>, vector<64x32xf32>, vector<64x32xf32> -> vector<64x32xf32>
    %51 = arith.addf %33, %50 : vector<64x32xf32>
    %52 = vector.extract_strided_slice %13 {offsets = [0, 16], sizes = [64, 8], strides = [1, 1]} : vector<64x32xf32> to vector<64x8xf32>
    %53 = vector.extract_strided_slice %16 {offsets = [16, 0], sizes = [8, 64], strides = [1, 1]} : vector<32x64xf32> to vector<8x64xf32>
    %cst_23 = arith.constant dense<0.000000e+00> : vector<64x64xf32>
    %54 = tpu.matmul %52, %53, %cst_23 {dimension_numbers = #tpu.dot_dimension_numbers<[1], [0], [0], [1], [0, 0, 1, 1], [], []>} : vector<64x8xf32>, vector<8x64xf32>, vector<64x64xf32> -> vector<64x64xf32>
    %cst_24 = arith.constant 0.353553385 : f32
    %55 = vector.broadcast %cst_24 : f32 to vector<64x64xf32>
    %56 = arith.mulf %54, %55 : vector<64x64xf32>
    %cst_25 = arith.constant dense<0xFF800000> : vector<64xf32>
    %57 = vector.multi_reduction <maximumf>, %56, %cst_25 [1] : vector<64x64xf32> to vector<64xf32>
    %58 = vector.shape_cast %57 : vector<64xf32> to vector<64x1xf32>
    %59 = vector.broadcast %58 : vector<64x1xf32> to vector<64x64xf32>
    %60 = arith.subf %56, %59 : vector<64x64xf32>
    %61 = math.exp %60 : vector<64x64xf32>
    %cst_26 = arith.constant dense<0.000000e+00> : vector<64xf32>
    %62 = vector.multi_reduction <add>, %61, %cst_26 [1] : vector<64x64xf32> to vector<64xf32>
    %63 = vector.shape_cast %62 : vector<64xf32> to vector<64x1xf32>
    %64 = tpu.reciprocal %63 {approx = true} : vector<64x1xf32> -> vector<64x1xf32>
    %65 = vector.broadcast %64 : vector<64x1xf32> to vector<64x64xf32>
    %66 = arith.mulf %61, %65 : vector<64x64xf32>
    %67 = vector.extract_strided_slice %15 {offsets = [0, 64], sizes = [64, 32], strides = [1, 1]} : vector<64x128xf32> to vector<64x32xf32>
    %cst_27 = arith.constant dense<0.000000e+00> : vector<64x32xf32>
    %68 = tpu.matmul %66, %67, %cst_27 {dimension_numbers = #tpu.dot_dimension_numbers<[1], [0], [0], [1], [0, 0, 1, 1], [], []>} : vector<64x64xf32>, vector<64x32xf32>, vector<64x32xf32> -> vector<64x32xf32>
    %69 = arith.addf %51, %68 : vector<64x32xf32>
    %70 = vector.extract_strided_slice %13 {offsets = [0, 24], sizes = [64, 8], strides = [1, 1]} : vector<64x32xf32> to vector<64x8xf32>
    %71 = vector.extract_strided_slice %16 {offsets = [24, 0], sizes = [8, 64], strides = [1, 1]} : vector<32x64xf32> to vector<8x64xf32>
    %cst_28 = arith.constant dense<0.000000e+00> : vector<64x64xf32>
    %72 = tpu.matmul %70, %71, %cst_28 {dimension_numbers = #tpu.dot_dimension_numbers<[1], [0], [0], [1], [0, 0, 1, 1], [], []>} : vector<64x8xf32>, vector<8x64xf32>, vector<64x64xf32> -> vector<64x64xf32>
    %cst_29 = arith.constant 0.353553385 : f32
    %73 = vector.broadcast %cst_29 : f32 to vector<64x64xf32>
    %74 = arith.mulf %72, %73 : vector<64x64xf32>
    %cst_30 = arith.constant dense<0xFF800000> : vector<64xf32>
    %75 = vector.multi_reduction <maximumf>, %74, %cst_30 [1] : vector<64x64xf32> to vector<64xf32>
    %76 = vector.shape_cast %75 : vector<64xf32> to vector<64x1xf32>
    %77 = vector.broadcast %76 : vector<64x1xf32> to vector<64x64xf32>
    %78 = arith.subf %74, %77 : vector<64x64xf32>
    %79 = math.exp %78 : vector<64x64xf32>
    %cst_31 = arith.constant dense<0.000000e+00> : vector<64xf32>
    %80 = vector.multi_reduction <add>, %79, %cst_31 [1] : vector<64x64xf32> to vector<64xf32>
    %81 = vector.shape_cast %80 : vector<64xf32> to vector<64x1xf32>
    %82 = tpu.reciprocal %81 {approx = true} : vector<64x1xf32> -> vector<64x1xf32>
    %83 = vector.broadcast %82 : vector<64x1xf32> to vector<64x64xf32>
    %84 = arith.mulf %79, %83 : vector<64x64xf32>
    %85 = vector.extract_strided_slice %15 {offsets = [0, 96], sizes = [64, 32], strides = [1, 1]} : vector<64x128xf32> to vector<64x32xf32>
    %cst_32 = arith.constant dense<0.000000e+00> : vector<64x32xf32>
    %86 = tpu.matmul %84, %85, %cst_32 {dimension_numbers = #tpu.dot_dimension_numbers<[1], [0], [0], [1], [0, 0, 1, 1], [], []>} : vector<64x64xf32>, vector<64x32xf32>, vector<64x32xf32> -> vector<64x32xf32>
    %87 = arith.addf %69, %86 : vector<64x32xf32>
    %88 = vector.extract_strided_slice %12 {offsets = [64, 128], sizes = [64, 32], strides = [1, 1]} : vector<128x192xf32> to vector<64x32xf32>
    %89 = vector.extract_strided_slice %12 {offsets = [64, 160], sizes = [64, 32], strides = [1, 1]} : vector<128x192xf32> to vector<64x32xf32>
    %90 = vector.extract_strided_slice %12 {offsets = [64, 0], sizes = [64, 128], strides = [1, 1]} : vector<128x192xf32> to vector<64x128xf32>
    %91 = tpu.transpose %89, [1, 0] : vector<64x32xf32> -> vector<32x64xf32>
    %92 = vector.extract_strided_slice %88 {offsets = [0, 0], sizes = [64, 8], strides = [1, 1]} : vector<64x32xf32> to vector<64x8xf32>
    %93 = vector.extract_strided_slice %91 {offsets = [0, 0], sizes = [8, 64], strides = [1, 1]} : vector<32x64xf32> to vector<8x64xf32>
    %cst_33 = arith.constant dense<0.000000e+00> : vector<64x64xf32>
    %94 = tpu.matmul %92, %93, %cst_33 {dimension_numbers = #tpu.dot_dimension_numbers<[1], [0], [0], [1], [0, 0, 1, 1], [], []>} : vector<64x8xf32>, vector<8x64xf32>, vector<64x64xf32> -> vector<64x64xf32>
    %cst_34 = arith.constant 0.353553385 : f32
    %95 = vector.broadcast %cst_34 : f32 to vector<64x64xf32>
    %96 = arith.mulf %94, %95 : vector<64x64xf32>
    %cst_35 = arith.constant dense<0xFF800000> : vector<64xf32>
    %97 = vector.multi_reduction <maximumf>, %96, %cst_35 [1] : vector<64x64xf32> to vector<64xf32>
    %98 = vector.shape_cast %97 : vector<64xf32> to vector<64x1xf32>
    %99 = vector.broadcast %98 : vector<64x1xf32> to vector<64x64xf32>
    %100 = arith.subf %96, %99 : vector<64x64xf32>
    %101 = math.exp %100 : vector<64x64xf32>
    %cst_36 = arith.constant dense<0.000000e+00> : vector<64xf32>
    %102 = vector.multi_reduction <add>, %101, %cst_36 [1] : vector<64x64xf32> to vector<64xf32>
    %103 = vector.shape_cast %102 : vector<64xf32> to vector<64x1xf32>
    %104 = tpu.reciprocal %103 {approx = true} : vector<64x1xf32> -> vector<64x1xf32>
    %105 = vector.broadcast %104 : vector<64x1xf32> to vector<64x64xf32>
    %106 = arith.mulf %101, %105 : vector<64x64xf32>
    %107 = vector.extract_strided_slice %90 {offsets = [0, 0], sizes = [64, 32], strides = [1, 1]} : vector<64x128xf32> to vector<64x32xf32>
    %cst_37 = arith.constant dense<0.000000e+00> : vector<64x32xf32>
    %108 = tpu.matmul %106, %107, %cst_37 {dimension_numbers = #tpu.dot_dimension_numbers<[1], [0], [0], [1], [0, 0, 1, 1], [], []>} : vector<64x64xf32>, vector<64x32xf32>, vector<64x32xf32> -> vector<64x32xf32>
    %109 = vector.extract_strided_slice %88 {offsets = [0, 8], sizes = [64, 8], strides = [1, 1]} : vector<64x32xf32> to vector<64x8xf32>
    %110 = vector.extract_strided_slice %91 {offsets = [8, 0], sizes = [8, 64], strides = [1, 1]} : vector<32x64xf32> to vector<8x64xf32>
    %cst_38 = arith.constant dense<0.000000e+00> : vector<64x64xf32>
    %111 = tpu.matmul %109, %110, %cst_38 {dimension_numbers = #tpu.dot_dimension_numbers<[1], [0], [0], [1], [0, 0, 1, 1], [], []>} : vector<64x8xf32>, vector<8x64xf32>, vector<64x64xf32> -> vector<64x64xf32>
    %cst_39 = arith.constant 0.353553385 : f32
    %112 = vector.broadcast %cst_39 : f32 to vector<64x64xf32>
    %113 = arith.mulf %111, %112 : vector<64x64xf32>
    %cst_40 = arith.constant dense<0xFF800000> : vector<64xf32>
    %114 = vector.multi_reduction <maximumf>, %113, %cst_40 [1] : vector<64x64xf32> to vector<64xf32>
    %115 = vector.shape_cast %114 : vector<64xf32> to vector<64x1xf32>
    %116 = vector.broadcast %115 : vector<64x1xf32> to vector<64x64xf32>
    %117 = arith.subf %113, %116 : vector<64x64xf32>
    %118 = math.exp %117 : vector<64x64xf32>
    %cst_41 = arith.constant dense<0.000000e+00> : vector<64xf32>
    %119 = vector.multi_reduction <add>, %118, %cst_41 [1] : vector<64x64xf32> to vector<64xf32>
    %120 = vector.shape_cast %119 : vector<64xf32> to vector<64x1xf32>
    %121 = tpu.reciprocal %120 {approx = true} : vector<64x1xf32> -> vector<64x1xf32>
    %122 = vector.broadcast %121 : vector<64x1xf32> to vector<64x64xf32>
    %123 = arith.mulf %118, %122 : vector<64x64xf32>
    %124 = vector.extract_strided_slice %90 {offsets = [0, 32], sizes = [64, 32], strides = [1, 1]} : vector<64x128xf32> to vector<64x32xf32>
    %cst_42 = arith.constant dense<0.000000e+00> : vector<64x32xf32>
    %125 = tpu.matmul %123, %124, %cst_42 {dimension_numbers = #tpu.dot_dimension_numbers<[1], [0], [0], [1], [0, 0, 1, 1], [], []>} : vector<64x64xf32>, vector<64x32xf32>, vector<64x32xf32> -> vector<64x32xf32>
    %126 = arith.addf %108, %125 : vector<64x32xf32>
    %127 = vector.extract_strided_slice %88 {offsets = [0, 16], sizes = [64, 8], strides = [1, 1]} : vector<64x32xf32> to vector<64x8xf32>
    %128 = vector.extract_strided_slice %91 {offsets = [16, 0], sizes = [8, 64], strides = [1, 1]} : vector<32x64xf32> to vector<8x64xf32>
    %cst_43 = arith.constant dense<0.000000e+00> : vector<64x64xf32>
    %129 = tpu.matmul %127, %128, %cst_43 {dimension_numbers = #tpu.dot_dimension_numbers<[1], [0], [0], [1], [0, 0, 1, 1], [], []>} : vector<64x8xf32>, vector<8x64xf32>, vector<64x64xf32> -> vector<64x64xf32>
    %cst_44 = arith.constant 0.353553385 : f32
    %130 = vector.broadcast %cst_44 : f32 to vector<64x64xf32>
    %131 = arith.mulf %129, %130 : vector<64x64xf32>
    %cst_45 = arith.constant dense<0xFF800000> : vector<64xf32>
    %132 = vector.multi_reduction <maximumf>, %131, %cst_45 [1] : vector<64x64xf32> to vector<64xf32>
    %133 = vector.shape_cast %132 : vector<64xf32> to vector<64x1xf32>
    %134 = vector.broadcast %133 : vector<64x1xf32> to vector<64x64xf32>
    %135 = arith.subf %131, %134 : vector<64x64xf32>
    %136 = math.exp %135 : vector<64x64xf32>
    %cst_46 = arith.constant dense<0.000000e+00> : vector<64xf32>
    %137 = vector.multi_reduction <add>, %136, %cst_46 [1] : vector<64x64xf32> to vector<64xf32>
    %138 = vector.shape_cast %137 : vector<64xf32> to vector<64x1xf32>
    %139 = tpu.reciprocal %138 {approx = true} : vector<64x1xf32> -> vector<64x1xf32>
    %140 = vector.broadcast %139 : vector<64x1xf32> to vector<64x64xf32>
    %141 = arith.mulf %136, %140 : vector<64x64xf32>
    %142 = vector.extract_strided_slice %90 {offsets = [0, 64], sizes = [64, 32], strides = [1, 1]} : vector<64x128xf32> to vector<64x32xf32>
    %cst_47 = arith.constant dense<0.000000e+00> : vector<64x32xf32>
    %143 = tpu.matmul %141, %142, %cst_47 {dimension_numbers = #tpu.dot_dimension_numbers<[1], [0], [0], [1], [0, 0, 1, 1], [], []>} : vector<64x64xf32>, vector<64x32xf32>, vector<64x32xf32> -> vector<64x32xf32>
    %144 = arith.addf %126, %143 : vector<64x32xf32>
    %145 = vector.extract_strided_slice %88 {offsets = [0, 24], sizes = [64, 8], strides = [1, 1]} : vector<64x32xf32> to vector<64x8xf32>
    %146 = vector.extract_strided_slice %91 {offsets = [24, 0], sizes = [8, 64], strides = [1, 1]} : vector<32x64xf32> to vector<8x64xf32>
    %cst_48 = arith.constant dense<0.000000e+00> : vector<64x64xf32>
    %147 = tpu.matmul %145, %146, %cst_48 {dimension_numbers = #tpu.dot_dimension_numbers<[1], [0], [0], [1], [0, 0, 1, 1], [], []>} : vector<64x8xf32>, vector<8x64xf32>, vector<64x64xf32> -> vector<64x64xf32>
    %cst_49 = arith.constant 0.353553385 : f32
    %148 = vector.broadcast %cst_49 : f32 to vector<64x64xf32>
    %149 = arith.mulf %147, %148 : vector<64x64xf32>
    %cst_50 = arith.constant dense<0xFF800000> : vector<64xf32>
    %150 = vector.multi_reduction <maximumf>, %149, %cst_50 [1] : vector<64x64xf32> to vector<64xf32>
    %151 = vector.shape_cast %150 : vector<64xf32> to vector<64x1xf32>
    %152 = vector.broadcast %151 : vector<64x1xf32> to vector<64x64xf32>
    %153 = arith.subf %149, %152 : vector<64x64xf32>
    %154 = math.exp %153 : vector<64x64xf32>
    %cst_51 = arith.constant dense<0.000000e+00> : vector<64xf32>
    %155 = vector.multi_reduction <add>, %154, %cst_51 [1] : vector<64x64xf32> to vector<64xf32>
    %156 = vector.shape_cast %155 : vector<64xf32> to vector<64x1xf32>
    %157 = tpu.reciprocal %156 {approx = true} : vector<64x1xf32> -> vector<64x1xf32>
    %158 = vector.broadcast %157 : vector<64x1xf32> to vector<64x64xf32>
    %159 = arith.mulf %154, %158 : vector<64x64xf32>
    %160 = vector.extract_strided_slice %90 {offsets = [0, 96], sizes = [64, 32], strides = [1, 1]} : vector<64x128xf32> to vector<64x32xf32>
    %cst_52 = arith.constant dense<0.000000e+00> : vector<64x32xf32>
    %161 = tpu.matmul %159, %160, %cst_52 {dimension_numbers = #tpu.dot_dimension_numbers<[1], [0], [0], [1], [0, 0, 1, 1], [], []>} : vector<64x64xf32>, vector<64x32xf32>, vector<64x32xf32> -> vector<64x32xf32>
    %162 = arith.addf %144, %161 : vector<64x32xf32>
    %163 = tpu.concatenate %87, %162 in 0 : vector<64x32xf32>, vector<64x32xf32> -> vector<128x32xf32>
    %c128 = arith.constant 128 : index
    %c0_53 = arith.constant 0 : index
    %164 = vector.load %arg5[%c128, %c0_53] : memref<192x32xf32, #tpu.memory_space<vmem>>, vector<1x32xf32>
    %c136 = arith.constant 136 : index
    %c0_54 = arith.constant 0 : index
    %165 = vector.load %arg5[%c136, %c0_54] : memref<192x32xf32, #tpu.memory_space<vmem>>, vector<1x32xf32>
    %c144 = arith.constant 144 : index
    %c0_55 = arith.constant 0 : index
    %166 = vector.load %arg5[%c144, %c0_55] : memref<192x32xf32, #tpu.memory_space<vmem>>, vector<1x32xf32>
    %c152 = arith.constant 152 : index
    %c0_56 = arith.constant 0 : index
    %167 = vector.load %arg5[%c152, %c0_56] : memref<192x32xf32, #tpu.memory_space<vmem>>, vector<1x32xf32>
    %cst_57 = arith.constant dense<0.000000e+00> : vector<128xf32>
    %168 = vector.multi_reduction <add>, %163, %cst_57 [1] : vector<128x32xf32> to vector<128xf32>
    %169 = vector.shape_cast %168 : vector<128xf32> to vector<128x1xf32>
    %cst_58 = arith.constant 3.200000e+01 : f32
    %170 = vector.broadcast %cst_58 : f32 to vector<128x1xf32>
    %171 = arith.divf %169, %170 : vector<128x1xf32>
    %172 = vector.broadcast %171 : vector<128x1xf32> to vector<128x32xf32>
    %173 = arith.subf %163, %172 : vector<128x32xf32>
    %174 = arith.mulf %173, %173 : vector<128x32xf32>
    %cst_59 = arith.constant dense<0.000000e+00> : vector<128xf32>
    %175 = vector.multi_reduction <add>, %174, %cst_59 [1] : vector<128x32xf32> to vector<128xf32>
    %176 = vector.shape_cast %175 : vector<128xf32> to vector<128x1xf32>
    %cst_60 = arith.constant 3.200000e+01 : f32
    %177 = vector.broadcast %cst_60 : f32 to vector<128x1xf32>
    %178 = arith.divf %176, %177 : vector<128x1xf32>
    %179 = vector.broadcast %171 : vector<128x1xf32> to vector<128x32xf32>
    %180 = arith.subf %163, %179 : vector<128x32xf32>
    %cst_61 = arith.constant 9.99999974E-6 : f32
    %181 = vector.broadcast %cst_61 : f32 to vector<128x1xf32>
    %182 = arith.addf %178, %181 : vector<128x1xf32>
    %183 = math.rsqrt %182 : vector<128x1xf32>
    %184 = vector.broadcast %183 : vector<128x1xf32> to vector<128x32xf32>
    %185 = arith.mulf %180, %184 : vector<128x32xf32>
    %186 = vector.broadcast %164 : vector<1x32xf32> to vector<128x32xf32>
    %187 = arith.mulf %185, %186 : vector<128x32xf32>
    %188 = vector.broadcast %165 : vector<1x32xf32> to vector<128x32xf32>
    %189 = arith.addf %187, %188 : vector<128x32xf32>
    %190 = vector.extract_strided_slice %10 {offsets = [0, 0], sizes = [64, 64], strides = [1, 1]} : vector<64x96xbf16> to vector<64x64xbf16>
    %191 = vector.extract_strided_slice %10 {offsets = [0, 64], sizes = [64, 32], strides = [1, 1]} : vector<64x96xbf16> to vector<64x32xbf16>
    %192 = vector.extract_strided_slice %190 {offsets = [0, 0], sizes = [32, 64], strides = [1, 1]} : vector<64x64xbf16> to vector<32x64xbf16>
    %193 = arith.truncf %6 : vector<128x32xf32> to vector<128x32xbf16>
    %cst_62 = arith.constant dense<0.000000e+00> : vector<128x64xf32>
    %194 = tpu.matmul %193, %192, %cst_62 {dimension_numbers = #tpu.dot_dimension_numbers<[1], [0], [0], [1], [0, 0, 1, 1], [], []>} : vector<128x32xbf16>, vector<32x64xbf16>, vector<128x64xf32> -> vector<128x64xf32>
    %195 = vector.extract_strided_slice %190 {offsets = [32, 0], sizes = [32, 64], strides = [1, 1]} : vector<64x64xbf16> to vector<32x64xbf16>
    %196 = arith.truncf %189 : vector<128x32xf32> to vector<128x32xbf16>
    %cst_63 = arith.constant dense<0.000000e+00> : vector<128x64xf32>
    %197 = tpu.matmul %196, %195, %cst_63 {dimension_numbers = #tpu.dot_dimension_numbers<[1], [0], [0], [1], [0, 0, 1, 1], [], []>} : vector<128x32xbf16>, vector<32x64xbf16>, vector<128x64xf32> -> vector<128x64xf32>
    %198 = arith.addf %194, %197 : vector<128x64xf32>
    %cst_64 = arith.constant 0.000000e+00 : f32
    %199 = vector.broadcast %cst_64 : f32 to vector<128x64xf32>
    %200 = arith.maximumf %198, %199 : vector<128x64xf32>
    %201 = arith.truncf %200 : vector<128x64xf32> to vector<128x64xbf16>
    %cst_65 = arith.constant dense<0.000000e+00> : vector<128x32xf32>
    %202 = tpu.matmul %201, %191, %cst_65 {dimension_numbers = #tpu.dot_dimension_numbers<[1], [0], [0], [1], [0, 0, 1, 1], [], []>} : vector<128x64xbf16>, vector<64x32xbf16>, vector<128x32xf32> -> vector<128x32xf32>
    %cst_66 = arith.constant dense<0.000000e+00> : vector<128xf32>
    %203 = vector.multi_reduction <add>, %202, %cst_66 [1] : vector<128x32xf32> to vector<128xf32>
    %204 = vector.shape_cast %203 : vector<128xf32> to vector<128x1xf32>
    %cst_67 = arith.constant 3.200000e+01 : f32
    %205 = vector.broadcast %cst_67 : f32 to vector<128x1xf32>
    %206 = arith.divf %204, %205 : vector<128x1xf32>
    %207 = vector.broadcast %206 : vector<128x1xf32> to vector<128x32xf32>
    %208 = arith.subf %202, %207 : vector<128x32xf32>
    %209 = arith.mulf %208, %208 : vector<128x32xf32>
    %cst_68 = arith.constant dense<0.000000e+00> : vector<128xf32>
    %210 = vector.multi_reduction <add>, %209, %cst_68 [1] : vector<128x32xf32> to vector<128xf32>
    %211 = vector.shape_cast %210 : vector<128xf32> to vector<128x1xf32>
    %cst_69 = arith.constant 3.200000e+01 : f32
    %212 = vector.broadcast %cst_69 : f32 to vector<128x1xf32>
    %213 = arith.divf %211, %212 : vector<128x1xf32>
    %214 = vector.broadcast %206 : vector<128x1xf32> to vector<128x32xf32>
    %215 = arith.subf %202, %214 : vector<128x32xf32>
    %cst_70 = arith.constant 9.99999974E-6 : f32
    %216 = vector.broadcast %cst_70 : f32 to vector<128x1xf32>
    %217 = arith.addf %213, %216 : vector<128x1xf32>
    %218 = math.rsqrt %217 : vector<128x1xf32>
    %219 = vector.broadcast %218 : vector<128x1xf32> to vector<128x32xf32>
    %220 = arith.mulf %215, %219 : vector<128x32xf32>
    %221 = vector.broadcast %166 : vector<1x32xf32> to vector<128x32xf32>
    %222 = arith.mulf %220, %221 : vector<128x32xf32>
    %223 = vector.broadcast %167 : vector<1x32xf32> to vector<128x32xf32>
    %224 = arith.addf %222, %223 : vector<128x32xf32>
    %225 = arith.addf %6, %224 : vector<128x32xf32>
    %c1 = arith.constant 1 : index
    %c0_71 = arith.constant 0 : index
    %c0_72 = arith.constant 0 : index
    %226 = vector.load %arg2[%c1, %c0_71, %c0_72] : memref<2x32x192xbf16, #tpu.memory_space<vmem>>, vector<1x32x192xbf16>
    %227 = vector.shape_cast %226 : vector<1x32x192xbf16> to vector<32x192xbf16>
    %c1_73 = arith.constant 1 : index
    %c0_74 = arith.constant 0 : index
    %c0_75 = arith.constant 0 : index
    %228 = vector.load %arg3[%c1_73, %c0_74, %c0_75] : memref<2x64x96xbf16, #tpu.memory_space<vmem>>, vector<1x64x96xbf16>
    %229 = vector.shape_cast %228 : vector<1x64x96xbf16> to vector<64x96xbf16>
    %230 = vector.extract_strided_slice %225 {offsets = [0, 0], sizes = [64, 32], strides = [1, 1]} : vector<128x32xf32> to vector<64x32xf32>
    %231 = vector.extract_strided_slice %225 {offsets = [64, 0], sizes = [64, 32], strides = [1, 1]} : vector<128x32xf32> to vector<64x32xf32>
    %232 = arith.truncf %230 : vector<64x32xf32> to vector<64x32xbf16>
    %cst_76 = arith.constant dense<0.000000e+00> : vector<64x192xf32>
    %233 = tpu.matmul %232, %227, %cst_76 {dimension_numbers = #tpu.dot_dimension_numbers<[1], [0], [0], [1], [0, 0, 1, 1], [], []>} : vector<64x32xbf16>, vector<32x192xbf16>, vector<64x192xf32> -> vector<64x192xf32>
    %234 = arith.truncf %231 : vector<64x32xf32> to vector<64x32xbf16>
    %cst_77 = arith.constant dense<0.000000e+00> : vector<64x192xf32>
    %235 = tpu.matmul %234, %227, %cst_77 {dimension_numbers = #tpu.dot_dimension_numbers<[1], [0], [0], [1], [0, 0, 1, 1], [], []>} : vector<64x32xbf16>, vector<32x192xbf16>, vector<64x192xf32> -> vector<64x192xf32>
    %236 = vector.extract_strided_slice %233 {offsets = [0, 128], sizes = [64, 32], strides = [1, 1]} : vector<64x192xf32> to vector<64x32xf32>
    %237 = vector.extract_strided_slice %235 {offsets = [0, 160], sizes = [64, 32], strides = [1, 1]} : vector<64x192xf32> to vector<64x32xf32>
    %238 = vector.extract_strided_slice %235 {offsets = [0, 0], sizes = [64, 128], strides = [1, 1]} : vector<64x192xf32> to vector<64x128xf32>
    %239 = tpu.transpose %237, [1, 0] : vector<64x32xf32> -> vector<32x64xf32>
    %240 = vector.extract_strided_slice %236 {offsets = [0, 0], sizes = [64, 8], strides = [1, 1]} : vector<64x32xf32> to vector<64x8xf32>
    %241 = vector.extract_strided_slice %239 {offsets = [0, 0], sizes = [8, 64], strides = [1, 1]} : vector<32x64xf32> to vector<8x64xf32>
    %cst_78 = arith.constant dense<0.000000e+00> : vector<64x64xf32>
    %242 = tpu.matmul %240, %241, %cst_78 {dimension_numbers = #tpu.dot_dimension_numbers<[1], [0], [0], [1], [0, 0, 1, 1], [], []>} : vector<64x8xf32>, vector<8x64xf32>, vector<64x64xf32> -> vector<64x64xf32>
    %cst_79 = arith.constant 0.353553385 : f32
    %243 = vector.broadcast %cst_79 : f32 to vector<64x64xf32>
    %244 = arith.mulf %242, %243 : vector<64x64xf32>
    %cst_80 = arith.constant dense<0xFF800000> : vector<64xf32>
    %245 = vector.multi_reduction <maximumf>, %244, %cst_80 [1] : vector<64x64xf32> to vector<64xf32>
    %246 = vector.shape_cast %245 : vector<64xf32> to vector<64x1xf32>
    %247 = vector.broadcast %246 : vector<64x1xf32> to vector<64x64xf32>
    %248 = arith.subf %244, %247 : vector<64x64xf32>
    %249 = math.exp %248 : vector<64x64xf32>
    %cst_81 = arith.constant dense<0.000000e+00> : vector<64xf32>
    %250 = vector.multi_reduction <add>, %249, %cst_81 [1] : vector<64x64xf32> to vector<64xf32>
    %251 = vector.shape_cast %250 : vector<64xf32> to vector<64x1xf32>
    %252 = tpu.reciprocal %251 {approx = true} : vector<64x1xf32> -> vector<64x1xf32>
    %253 = vector.broadcast %252 : vector<64x1xf32> to vector<64x64xf32>
    %254 = arith.mulf %249, %253 : vector<64x64xf32>
    %255 = vector.extract_strided_slice %238 {offsets = [0, 0], sizes = [64, 32], strides = [1, 1]} : vector<64x128xf32> to vector<64x32xf32>
    %cst_82 = arith.constant dense<0.000000e+00> : vector<64x32xf32>
    %256 = tpu.matmul %254, %255, %cst_82 {dimension_numbers = #tpu.dot_dimension_numbers<[1], [0], [0], [1], [0, 0, 1, 1], [], []>} : vector<64x64xf32>, vector<64x32xf32>, vector<64x32xf32> -> vector<64x32xf32>
    %257 = vector.extract_strided_slice %236 {offsets = [0, 8], sizes = [64, 8], strides = [1, 1]} : vector<64x32xf32> to vector<64x8xf32>
    %258 = vector.extract_strided_slice %239 {offsets = [8, 0], sizes = [8, 64], strides = [1, 1]} : vector<32x64xf32> to vector<8x64xf32>
    %cst_83 = arith.constant dense<0.000000e+00> : vector<64x64xf32>
    %259 = tpu.matmul %257, %258, %cst_83 {dimension_numbers = #tpu.dot_dimension_numbers<[1], [0], [0], [1], [0, 0, 1, 1], [], []>} : vector<64x8xf32>, vector<8x64xf32>, vector<64x64xf32> -> vector<64x64xf32>
    %cst_84 = arith.constant 0.353553385 : f32
    %260 = vector.broadcast %cst_84 : f32 to vector<64x64xf32>
    %261 = arith.mulf %259, %260 : vector<64x64xf32>
    %cst_85 = arith.constant dense<0xFF800000> : vector<64xf32>
    %262 = vector.multi_reduction <maximumf>, %261, %cst_85 [1] : vector<64x64xf32> to vector<64xf32>
    %263 = vector.shape_cast %262 : vector<64xf32> to vector<64x1xf32>
    %264 = vector.broadcast %263 : vector<64x1xf32> to vector<64x64xf32>
    %265 = arith.subf %261, %264 : vector<64x64xf32>
    %266 = math.exp %265 : vector<64x64xf32>
    %cst_86 = arith.constant dense<0.000000e+00> : vector<64xf32>
    %267 = vector.multi_reduction <add>, %266, %cst_86 [1] : vector<64x64xf32> to vector<64xf32>
    %268 = vector.shape_cast %267 : vector<64xf32> to vector<64x1xf32>
    %269 = tpu.reciprocal %268 {approx = true} : vector<64x1xf32> -> vector<64x1xf32>
    %270 = vector.broadcast %269 : vector<64x1xf32> to vector<64x64xf32>
    %271 = arith.mulf %266, %270 : vector<64x64xf32>
    %272 = vector.extract_strided_slice %238 {offsets = [0, 32], sizes = [64, 32], strides = [1, 1]} : vector<64x128xf32> to vector<64x32xf32>
    %cst_87 = arith.constant dense<0.000000e+00> : vector<64x32xf32>
    %273 = tpu.matmul %271, %272, %cst_87 {dimension_numbers = #tpu.dot_dimension_numbers<[1], [0], [0], [1], [0, 0, 1, 1], [], []>} : vector<64x64xf32>, vector<64x32xf32>, vector<64x32xf32> -> vector<64x32xf32>
    %274 = arith.addf %256, %273 : vector<64x32xf32>
    %275 = vector.extract_strided_slice %236 {offsets = [0, 16], sizes = [64, 8], strides = [1, 1]} : vector<64x32xf32> to vector<64x8xf32>
    %276 = vector.extract_strided_slice %239 {offsets = [16, 0], sizes = [8, 64], strides = [1, 1]} : vector<32x64xf32> to vector<8x64xf32>
    %cst_88 = arith.constant dense<0.000000e+00> : vector<64x64xf32>
    %277 = tpu.matmul %275, %276, %cst_88 {dimension_numbers = #tpu.dot_dimension_numbers<[1], [0], [0], [1], [0, 0, 1, 1], [], []>} : vector<64x8xf32>, vector<8x64xf32>, vector<64x64xf32> -> vector<64x64xf32>
    %cst_89 = arith.constant 0.353553385 : f32
    %278 = vector.broadcast %cst_89 : f32 to vector<64x64xf32>
    %279 = arith.mulf %277, %278 : vector<64x64xf32>
    %cst_90 = arith.constant dense<0xFF800000> : vector<64xf32>
    %280 = vector.multi_reduction <maximumf>, %279, %cst_90 [1] : vector<64x64xf32> to vector<64xf32>
    %281 = vector.shape_cast %280 : vector<64xf32> to vector<64x1xf32>
    %282 = vector.broadcast %281 : vector<64x1xf32> to vector<64x64xf32>
    %283 = arith.subf %279, %282 : vector<64x64xf32>
    %284 = math.exp %283 : vector<64x64xf32>
    %cst_91 = arith.constant dense<0.000000e+00> : vector<64xf32>
    %285 = vector.multi_reduction <add>, %284, %cst_91 [1] : vector<64x64xf32> to vector<64xf32>
    %286 = vector.shape_cast %285 : vector<64xf32> to vector<64x1xf32>
    %287 = tpu.reciprocal %286 {approx = true} : vector<64x1xf32> -> vector<64x1xf32>
    %288 = vector.broadcast %287 : vector<64x1xf32> to vector<64x64xf32>
    %289 = arith.mulf %284, %288 : vector<64x64xf32>
    %290 = vector.extract_strided_slice %238 {offsets = [0, 64], sizes = [64, 32], strides = [1, 1]} : vector<64x128xf32> to vector<64x32xf32>
    %cst_92 = arith.constant dense<0.000000e+00> : vector<64x32xf32>
    %291 = tpu.matmul %289, %290, %cst_92 {dimension_numbers = #tpu.dot_dimension_numbers<[1], [0], [0], [1], [0, 0, 1, 1], [], []>} : vector<64x64xf32>, vector<64x32xf32>, vector<64x32xf32> -> vector<64x32xf32>
    %292 = arith.addf %274, %291 : vector<64x32xf32>
    %293 = vector.extract_strided_slice %236 {offsets = [0, 24], sizes = [64, 8], strides = [1, 1]} : vector<64x32xf32> to vector<64x8xf32>
    %294 = vector.extract_strided_slice %239 {offsets = [24, 0], sizes = [8, 64], strides = [1, 1]} : vector<32x64xf32> to vector<8x64xf32>
    %cst_93 = arith.constant dense<0.000000e+00> : vector<64x64xf32>
    %295 = tpu.matmul %293, %294, %cst_93 {dimension_numbers = #tpu.dot_dimension_numbers<[1], [0], [0], [1], [0, 0, 1, 1], [], []>} : vector<64x8xf32>, vector<8x64xf32>, vector<64x64xf32> -> vector<64x64xf32>
    %cst_94 = arith.constant 0.353553385 : f32
    %296 = vector.broadcast %cst_94 : f32 to vector<64x64xf32>
    %297 = arith.mulf %295, %296 : vector<64x64xf32>
    %cst_95 = arith.constant dense<0xFF800000> : vector<64xf32>
    %298 = vector.multi_reduction <maximumf>, %297, %cst_95 [1] : vector<64x64xf32> to vector<64xf32>
    %299 = vector.shape_cast %298 : vector<64xf32> to vector<64x1xf32>
    %300 = vector.broadcast %299 : vector<64x1xf32> to vector<64x64xf32>
    %301 = arith.subf %297, %300 : vector<64x64xf32>
    %302 = math.exp %301 : vector<64x64xf32>
    %cst_96 = arith.constant dense<0.000000e+00> : vector<64xf32>
    %303 = vector.multi_reduction <add>, %302, %cst_96 [1] : vector<64x64xf32> to vector<64xf32>
    %304 = vector.shape_cast %303 : vector<64xf32> to vector<64x1xf32>
    %305 = tpu.reciprocal %304 {approx = true} : vector<64x1xf32> -> vector<64x1xf32>
    %306 = vector.broadcast %305 : vector<64x1xf32> to vector<64x64xf32>
    %307 = arith.mulf %302, %306 : vector<64x64xf32>
    %308 = vector.extract_strided_slice %238 {offsets = [0, 96], sizes = [64, 32], strides = [1, 1]} : vector<64x128xf32> to vector<64x32xf32>
    %cst_97 = arith.constant dense<0.000000e+00> : vector<64x32xf32>
    %309 = tpu.matmul %307, %308, %cst_97 {dimension_numbers = #tpu.dot_dimension_numbers<[1], [0], [0], [1], [0, 0, 1, 1], [], []>} : vector<64x64xf32>, vector<64x32xf32>, vector<64x32xf32> -> vector<64x32xf32>
    %310 = arith.addf %292, %309 : vector<64x32xf32>
    %c160 = arith.constant 160 : index
    %c0_98 = arith.constant 0 : index
    %311 = vector.load %arg5[%c160, %c0_98] : memref<192x32xf32, #tpu.memory_space<vmem>>, vector<1x32xf32>
    %c168 = arith.constant 168 : index
    %c0_99 = arith.constant 0 : index
    %312 = vector.load %arg5[%c168, %c0_99] : memref<192x32xf32, #tpu.memory_space<vmem>>, vector<1x32xf32>
    %c176 = arith.constant 176 : index
    %c0_100 = arith.constant 0 : index
    %313 = vector.load %arg5[%c176, %c0_100] : memref<192x32xf32, #tpu.memory_space<vmem>>, vector<1x32xf32>
    %c184 = arith.constant 184 : index
    %c0_101 = arith.constant 0 : index
    %314 = vector.load %arg5[%c184, %c0_101] : memref<192x32xf32, #tpu.memory_space<vmem>>, vector<1x32xf32>
    %cst_102 = arith.constant dense<0.000000e+00> : vector<64xf32>
    %315 = vector.multi_reduction <add>, %310, %cst_102 [1] : vector<64x32xf32> to vector<64xf32>
    %316 = vector.shape_cast %315 : vector<64xf32> to vector<64x1xf32>
    %cst_103 = arith.constant 3.200000e+01 : f32
    %317 = vector.broadcast %cst_103 : f32 to vector<64x1xf32>
    %318 = arith.divf %316, %317 : vector<64x1xf32>
    %319 = vector.broadcast %318 : vector<64x1xf32> to vector<64x32xf32>
    %320 = arith.subf %310, %319 : vector<64x32xf32>
    %321 = arith.mulf %320, %320 : vector<64x32xf32>
    %cst_104 = arith.constant dense<0.000000e+00> : vector<64xf32>
    %322 = vector.multi_reduction <add>, %321, %cst_104 [1] : vector<64x32xf32> to vector<64xf32>
    %323 = vector.shape_cast %322 : vector<64xf32> to vector<64x1xf32>
    %cst_105 = arith.constant 3.200000e+01 : f32
    %324 = vector.broadcast %cst_105 : f32 to vector<64x1xf32>
    %325 = arith.divf %323, %324 : vector<64x1xf32>
    %326 = vector.broadcast %318 : vector<64x1xf32> to vector<64x32xf32>
    %327 = arith.subf %310, %326 : vector<64x32xf32>
    %cst_106 = arith.constant 9.99999974E-6 : f32
    %328 = vector.broadcast %cst_106 : f32 to vector<64x1xf32>
    %329 = arith.addf %325, %328 : vector<64x1xf32>
    %330 = math.rsqrt %329 : vector<64x1xf32>
    %331 = vector.broadcast %330 : vector<64x1xf32> to vector<64x32xf32>
    %332 = arith.mulf %327, %331 : vector<64x32xf32>
    %333 = vector.broadcast %311 : vector<1x32xf32> to vector<64x32xf32>
    %334 = arith.mulf %332, %333 : vector<64x32xf32>
    %335 = vector.broadcast %312 : vector<1x32xf32> to vector<64x32xf32>
    %336 = arith.addf %334, %335 : vector<64x32xf32>
    %337 = vector.extract_strided_slice %229 {offsets = [0, 0], sizes = [64, 64], strides = [1, 1]} : vector<64x96xbf16> to vector<64x64xbf16>
    %338 = vector.extract_strided_slice %229 {offsets = [0, 64], sizes = [64, 32], strides = [1, 1]} : vector<64x96xbf16> to vector<64x32xbf16>
    %339 = vector.extract_strided_slice %337 {offsets = [0, 0], sizes = [32, 64], strides = [1, 1]} : vector<64x64xbf16> to vector<32x64xbf16>
    %340 = arith.truncf %230 : vector<64x32xf32> to vector<64x32xbf16>
    %cst_107 = arith.constant dense<0.000000e+00> : vector<64x64xf32>
    %341 = tpu.matmul %340, %339, %cst_107 {dimension_numbers = #tpu.dot_dimension_numbers<[1], [0], [0], [1], [0, 0, 1, 1], [], []>} : vector<64x32xbf16>, vector<32x64xbf16>, vector<64x64xf32> -> vector<64x64xf32>
    %342 = vector.extract_strided_slice %337 {offsets = [32, 0], sizes = [32, 64], strides = [1, 1]} : vector<64x64xbf16> to vector<32x64xbf16>
    %343 = arith.truncf %336 : vector<64x32xf32> to vector<64x32xbf16>
    %cst_108 = arith.constant dense<0.000000e+00> : vector<64x64xf32>
    %344 = tpu.matmul %343, %342, %cst_108 {dimension_numbers = #tpu.dot_dimension_numbers<[1], [0], [0], [1], [0, 0, 1, 1], [], []>} : vector<64x32xbf16>, vector<32x64xbf16>, vector<64x64xf32> -> vector<64x64xf32>
    %345 = arith.addf %341, %344 : vector<64x64xf32>
    %cst_109 = arith.constant 0.000000e+00 : f32
    %346 = vector.broadcast %cst_109 : f32 to vector<64x64xf32>
    %347 = arith.maximumf %345, %346 : vector<64x64xf32>
    %348 = arith.truncf %347 : vector<64x64xf32> to vector<64x64xbf16>
    %cst_110 = arith.constant dense<0.000000e+00> : vector<64x32xf32>
    %349 = tpu.matmul %348, %338, %cst_110 {dimension_numbers = #tpu.dot_dimension_numbers<[1], [0], [0], [1], [0, 0, 1, 1], [], []>} : vector<64x64xbf16>, vector<64x32xbf16>, vector<64x32xf32> -> vector<64x32xf32>
    %cst_111 = arith.constant dense<0.000000e+00> : vector<64xf32>
    %350 = vector.multi_reduction <add>, %349, %cst_111 [1] : vector<64x32xf32> to vector<64xf32>
    %351 = vector.shape_cast %350 : vector<64xf32> to vector<64x1xf32>
    %cst_112 = arith.constant 3.200000e+01 : f32
    %352 = vector.broadcast %cst_112 : f32 to vector<64x1xf32>
    %353 = arith.divf %351, %352 : vector<64x1xf32>
    %354 = vector.broadcast %353 : vector<64x1xf32> to vector<64x32xf32>
    %355 = arith.subf %349, %354 : vector<64x32xf32>
    %356 = arith.mulf %355, %355 : vector<64x32xf32>
    %cst_113 = arith.constant dense<0.000000e+00> : vector<64xf32>
    %357 = vector.multi_reduction <add>, %356, %cst_113 [1] : vector<64x32xf32> to vector<64xf32>
    %358 = vector.shape_cast %357 : vector<64xf32> to vector<64x1xf32>
    %cst_114 = arith.constant 3.200000e+01 : f32
    %359 = vector.broadcast %cst_114 : f32 to vector<64x1xf32>
    %360 = arith.divf %358, %359 : vector<64x1xf32>
    %361 = vector.broadcast %353 : vector<64x1xf32> to vector<64x32xf32>
    %362 = arith.subf %349, %361 : vector<64x32xf32>
    %cst_115 = arith.constant 9.99999974E-6 : f32
    %363 = vector.broadcast %cst_115 : f32 to vector<64x1xf32>
    %364 = arith.addf %360, %363 : vector<64x1xf32>
    %365 = math.rsqrt %364 : vector<64x1xf32>
    %366 = vector.broadcast %365 : vector<64x1xf32> to vector<64x32xf32>
    %367 = arith.mulf %362, %366 : vector<64x32xf32>
    %368 = vector.broadcast %313 : vector<1x32xf32> to vector<64x32xf32>
    %369 = arith.mulf %367, %368 : vector<64x32xf32>
    %370 = vector.broadcast %314 : vector<1x32xf32> to vector<64x32xf32>
    %371 = arith.addf %369, %370 : vector<64x32xf32>
    %372 = arith.addf %230, %371 : vector<64x32xf32>
    %373 = arith.truncf %372 : vector<64x32xf32> to vector<64x32xbf16>
    %cst_116 = arith.constant dense<0.000000e+00> : vector<64x192xf32>
    %374 = tpu.matmul %373, %227, %cst_116 {dimension_numbers = #tpu.dot_dimension_numbers<[1], [0], [0], [1], [0, 0, 1, 1], [], []>} : vector<64x32xbf16>, vector<32x192xbf16>, vector<64x192xf32> -> vector<64x192xf32>
    %375 = vector.extract_strided_slice %235 {offsets = [0, 128], sizes = [64, 32], strides = [1, 1]} : vector<64x192xf32> to vector<64x32xf32>
    %376 = vector.extract_strided_slice %374 {offsets = [0, 160], sizes = [64, 32], strides = [1, 1]} : vector<64x192xf32> to vector<64x32xf32>
    %377 = vector.extract_strided_slice %374 {offsets = [0, 0], sizes = [64, 128], strides = [1, 1]} : vector<64x192xf32> to vector<64x128xf32>
    %378 = tpu.transpose %376, [1, 0] : vector<64x32xf32> -> vector<32x64xf32>
    %379 = vector.extract_strided_slice %375 {offsets = [0, 0], sizes = [64, 8], strides = [1, 1]} : vector<64x32xf32> to vector<64x8xf32>
    %380 = vector.extract_strided_slice %378 {offsets = [0, 0], sizes = [8, 64], strides = [1, 1]} : vector<32x64xf32> to vector<8x64xf32>
    %cst_117 = arith.constant dense<0.000000e+00> : vector<64x64xf32>
    %381 = tpu.matmul %379, %380, %cst_117 {dimension_numbers = #tpu.dot_dimension_numbers<[1], [0], [0], [1], [0, 0, 1, 1], [], []>} : vector<64x8xf32>, vector<8x64xf32>, vector<64x64xf32> -> vector<64x64xf32>
    %cst_118 = arith.constant 0.353553385 : f32
    %382 = vector.broadcast %cst_118 : f32 to vector<64x64xf32>
    %383 = arith.mulf %381, %382 : vector<64x64xf32>
    %cst_119 = arith.constant dense<0xFF800000> : vector<64xf32>
    %384 = vector.multi_reduction <maximumf>, %383, %cst_119 [1] : vector<64x64xf32> to vector<64xf32>
    %385 = vector.shape_cast %384 : vector<64xf32> to vector<64x1xf32>
    %386 = vector.broadcast %385 : vector<64x1xf32> to vector<64x64xf32>
    %387 = arith.subf %383, %386 : vector<64x64xf32>
    %388 = math.exp %387 : vector<64x64xf32>
    %cst_120 = arith.constant dense<0.000000e+00> : vector<64xf32>
    %389 = vector.multi_reduction <add>, %388, %cst_120 [1] : vector<64x64xf32> to vector<64xf32>
    %390 = vector.shape_cast %389 : vector<64xf32> to vector<64x1xf32>
    %391 = tpu.reciprocal %390 {approx = true} : vector<64x1xf32> -> vector<64x1xf32>
    %392 = vector.broadcast %391 : vector<64x1xf32> to vector<64x64xf32>
    %393 = arith.mulf %388, %392 : vector<64x64xf32>
    %394 = vector.extract_strided_slice %377 {offsets = [0, 0], sizes = [64, 32], strides = [1, 1]} : vector<64x128xf32> to vector<64x32xf32>
    %cst_121 = arith.constant dense<0.000000e+00> : vector<64x32xf32>
    %395 = tpu.matmul %393, %394, %cst_121 {dimension_numbers = #tpu.dot_dimension_numbers<[1], [0], [0], [1], [0, 0, 1, 1], [], []>} : vector<64x64xf32>, vector<64x32xf32>, vector<64x32xf32> -> vector<64x32xf32>
    %396 = vector.extract_strided_slice %375 {offsets = [0, 8], sizes = [64, 8], strides = [1, 1]} : vector<64x32xf32> to vector<64x8xf32>
    %397 = vector.extract_strided_slice %378 {offsets = [8, 0], sizes = [8, 64], strides = [1, 1]} : vector<32x64xf32> to vector<8x64xf32>
    %cst_122 = arith.constant dense<0.000000e+00> : vector<64x64xf32>
    %398 = tpu.matmul %396, %397, %cst_122 {dimension_numbers = #tpu.dot_dimension_numbers<[1], [0], [0], [1], [0, 0, 1, 1], [], []>} : vector<64x8xf32>, vector<8x64xf32>, vector<64x64xf32> -> vector<64x64xf32>
    %cst_123 = arith.constant 0.353553385 : f32
    %399 = vector.broadcast %cst_123 : f32 to vector<64x64xf32>
    %400 = arith.mulf %398, %399 : vector<64x64xf32>
    %cst_124 = arith.constant dense<0xFF800000> : vector<64xf32>
    %401 = vector.multi_reduction <maximumf>, %400, %cst_124 [1] : vector<64x64xf32> to vector<64xf32>
    %402 = vector.shape_cast %401 : vector<64xf32> to vector<64x1xf32>
    %403 = vector.broadcast %402 : vector<64x1xf32> to vector<64x64xf32>
    %404 = arith.subf %400, %403 : vector<64x64xf32>
    %405 = math.exp %404 : vector<64x64xf32>
    %cst_125 = arith.constant dense<0.000000e+00> : vector<64xf32>
    %406 = vector.multi_reduction <add>, %405, %cst_125 [1] : vector<64x64xf32> to vector<64xf32>
    %407 = vector.shape_cast %406 : vector<64xf32> to vector<64x1xf32>
    %408 = tpu.reciprocal %407 {approx = true} : vector<64x1xf32> -> vector<64x1xf32>
    %409 = vector.broadcast %408 : vector<64x1xf32> to vector<64x64xf32>
    %410 = arith.mulf %405, %409 : vector<64x64xf32>
    %411 = vector.extract_strided_slice %377 {offsets = [0, 32], sizes = [64, 32], strides = [1, 1]} : vector<64x128xf32> to vector<64x32xf32>
    %cst_126 = arith.constant dense<0.000000e+00> : vector<64x32xf32>
    %412 = tpu.matmul %410, %411, %cst_126 {dimension_numbers = #tpu.dot_dimension_numbers<[1], [0], [0], [1], [0, 0, 1, 1], [], []>} : vector<64x64xf32>, vector<64x32xf32>, vector<64x32xf32> -> vector<64x32xf32>
    %413 = arith.addf %395, %412 : vector<64x32xf32>
    %414 = vector.extract_strided_slice %375 {offsets = [0, 16], sizes = [64, 8], strides = [1, 1]} : vector<64x32xf32> to vector<64x8xf32>
    %415 = vector.extract_strided_slice %378 {offsets = [16, 0], sizes = [8, 64], strides = [1, 1]} : vector<32x64xf32> to vector<8x64xf32>
    %cst_127 = arith.constant dense<0.000000e+00> : vector<64x64xf32>
    %416 = tpu.matmul %414, %415, %cst_127 {dimension_numbers = #tpu.dot_dimension_numbers<[1], [0], [0], [1], [0, 0, 1, 1], [], []>} : vector<64x8xf32>, vector<8x64xf32>, vector<64x64xf32> -> vector<64x64xf32>
    %cst_128 = arith.constant 0.353553385 : f32
    %417 = vector.broadcast %cst_128 : f32 to vector<64x64xf32>
    %418 = arith.mulf %416, %417 : vector<64x64xf32>
    %cst_129 = arith.constant dense<0xFF800000> : vector<64xf32>
    %419 = vector.multi_reduction <maximumf>, %418, %cst_129 [1] : vector<64x64xf32> to vector<64xf32>
    %420 = vector.shape_cast %419 : vector<64xf32> to vector<64x1xf32>
    %421 = vector.broadcast %420 : vector<64x1xf32> to vector<64x64xf32>
    %422 = arith.subf %418, %421 : vector<64x64xf32>
    %423 = math.exp %422 : vector<64x64xf32>
    %cst_130 = arith.constant dense<0.000000e+00> : vector<64xf32>
    %424 = vector.multi_reduction <add>, %423, %cst_130 [1] : vector<64x64xf32> to vector<64xf32>
    %425 = vector.shape_cast %424 : vector<64xf32> to vector<64x1xf32>
    %426 = tpu.reciprocal %425 {approx = true} : vector<64x1xf32> -> vector<64x1xf32>
    %427 = vector.broadcast %426 : vector<64x1xf32> to vector<64x64xf32>
    %428 = arith.mulf %423, %427 : vector<64x64xf32>
    %429 = vector.extract_strided_slice %377 {offsets = [0, 64], sizes = [64, 32], strides = [1, 1]} : vector<64x128xf32> to vector<64x32xf32>
    %cst_131 = arith.constant dense<0.000000e+00> : vector<64x32xf32>
    %430 = tpu.matmul %428, %429, %cst_131 {dimension_numbers = #tpu.dot_dimension_numbers<[1], [0], [0], [1], [0, 0, 1, 1], [], []>} : vector<64x64xf32>, vector<64x32xf32>, vector<64x32xf32> -> vector<64x32xf32>
    %431 = arith.addf %413, %430 : vector<64x32xf32>
    %432 = vector.extract_strided_slice %375 {offsets = [0, 24], sizes = [64, 8], strides = [1, 1]} : vector<64x32xf32> to vector<64x8xf32>
    %433 = vector.extract_strided_slice %378 {offsets = [24, 0], sizes = [8, 64], strides = [1, 1]} : vector<32x64xf32> to vector<8x64xf32>
    %cst_132 = arith.constant dense<0.000000e+00> : vector<64x64xf32>
    %434 = tpu.matmul %432, %433, %cst_132 {dimension_numbers = #tpu.dot_dimension_numbers<[1], [0], [0], [1], [0, 0, 1, 1], [], []>} : vector<64x8xf32>, vector<8x64xf32>, vector<64x64xf32> -> vector<64x64xf32>
    %cst_133 = arith.constant 0.353553385 : f32
    %435 = vector.broadcast %cst_133 : f32 to vector<64x64xf32>
    %436 = arith.mulf %434, %435 : vector<64x64xf32>
    %cst_134 = arith.constant dense<0xFF800000> : vector<64xf32>
    %437 = vector.multi_reduction <maximumf>, %436, %cst_134 [1] : vector<64x64xf32> to vector<64xf32>
    %438 = vector.shape_cast %437 : vector<64xf32> to vector<64x1xf32>
    %439 = vector.broadcast %438 : vector<64x1xf32> to vector<64x64xf32>
    %440 = arith.subf %436, %439 : vector<64x64xf32>
    %441 = math.exp %440 : vector<64x64xf32>
    %cst_135 = arith.constant dense<0.000000e+00> : vector<64xf32>
    %442 = vector.multi_reduction <add>, %441, %cst_135 [1] : vector<64x64xf32> to vector<64xf32>
    %443 = vector.shape_cast %442 : vector<64xf32> to vector<64x1xf32>
    %444 = tpu.reciprocal %443 {approx = true} : vector<64x1xf32> -> vector<64x1xf32>
    %445 = vector.broadcast %444 : vector<64x1xf32> to vector<64x64xf32>
    %446 = arith.mulf %441, %445 : vector<64x64xf32>
    %447 = vector.extract_strided_slice %377 {offsets = [0, 96], sizes = [64, 32], strides = [1, 1]} : vector<64x128xf32> to vector<64x32xf32>
    %cst_136 = arith.constant dense<0.000000e+00> : vector<64x32xf32>
    %448 = tpu.matmul %446, %447, %cst_136 {dimension_numbers = #tpu.dot_dimension_numbers<[1], [0], [0], [1], [0, 0, 1, 1], [], []>} : vector<64x64xf32>, vector<64x32xf32>, vector<64x32xf32> -> vector<64x32xf32>
    %449 = arith.addf %431, %448 : vector<64x32xf32>
    %c160_137 = arith.constant 160 : index
    %c0_138 = arith.constant 0 : index
    %450 = vector.load %arg5[%c160_137, %c0_138] : memref<192x32xf32, #tpu.memory_space<vmem>>, vector<1x32xf32>
    %c168_139 = arith.constant 168 : index
    %c0_140 = arith.constant 0 : index
    %451 = vector.load %arg5[%c168_139, %c0_140] : memref<192x32xf32, #tpu.memory_space<vmem>>, vector<1x32xf32>
    %c176_141 = arith.constant 176 : index
    %c0_142 = arith.constant 0 : index
    %452 = vector.load %arg5[%c176_141, %c0_142] : memref<192x32xf32, #tpu.memory_space<vmem>>, vector<1x32xf32>
    %c184_143 = arith.constant 184 : index
    %c0_144 = arith.constant 0 : index
    %453 = vector.load %arg5[%c184_143, %c0_144] : memref<192x32xf32, #tpu.memory_space<vmem>>, vector<1x32xf32>
    %cst_145 = arith.constant dense<0.000000e+00> : vector<64xf32>
    %454 = vector.multi_reduction <add>, %449, %cst_145 [1] : vector<64x32xf32> to vector<64xf32>
    %455 = vector.shape_cast %454 : vector<64xf32> to vector<64x1xf32>
    %cst_146 = arith.constant 3.200000e+01 : f32
    %456 = vector.broadcast %cst_146 : f32 to vector<64x1xf32>
    %457 = arith.divf %455, %456 : vector<64x1xf32>
    %458 = vector.broadcast %457 : vector<64x1xf32> to vector<64x32xf32>
    %459 = arith.subf %449, %458 : vector<64x32xf32>
    %460 = arith.mulf %459, %459 : vector<64x32xf32>
    %cst_147 = arith.constant dense<0.000000e+00> : vector<64xf32>
    %461 = vector.multi_reduction <add>, %460, %cst_147 [1] : vector<64x32xf32> to vector<64xf32>
    %462 = vector.shape_cast %461 : vector<64xf32> to vector<64x1xf32>
    %cst_148 = arith.constant 3.200000e+01 : f32
    %463 = vector.broadcast %cst_148 : f32 to vector<64x1xf32>
    %464 = arith.divf %462, %463 : vector<64x1xf32>
    %465 = vector.broadcast %457 : vector<64x1xf32> to vector<64x32xf32>
    %466 = arith.subf %449, %465 : vector<64x32xf32>
    %cst_149 = arith.constant 9.99999974E-6 : f32
    %467 = vector.broadcast %cst_149 : f32 to vector<64x1xf32>
    %468 = arith.addf %464, %467 : vector<64x1xf32>
    %469 = math.rsqrt %468 : vector<64x1xf32>
    %470 = vector.broadcast %469 : vector<64x1xf32> to vector<64x32xf32>
    %471 = arith.mulf %466, %470 : vector<64x32xf32>
    %472 = vector.broadcast %450 : vector<1x32xf32> to vector<64x32xf32>
    %473 = arith.mulf %471, %472 : vector<64x32xf32>
    %474 = vector.broadcast %451 : vector<1x32xf32> to vector<64x32xf32>
    %475 = arith.addf %473, %474 : vector<64x32xf32>
    %476 = vector.extract_strided_slice %229 {offsets = [0, 0], sizes = [64, 64], strides = [1, 1]} : vector<64x96xbf16> to vector<64x64xbf16>
    %477 = vector.extract_strided_slice %229 {offsets = [0, 64], sizes = [64, 32], strides = [1, 1]} : vector<64x96xbf16> to vector<64x32xbf16>
    %478 = vector.extract_strided_slice %476 {offsets = [0, 0], sizes = [32, 64], strides = [1, 1]} : vector<64x64xbf16> to vector<32x64xbf16>
    %479 = arith.truncf %231 : vector<64x32xf32> to vector<64x32xbf16>
    %cst_150 = arith.constant dense<0.000000e+00> : vector<64x64xf32>
    %480 = tpu.matmul %479, %478, %cst_150 {dimension_numbers = #tpu.dot_dimension_numbers<[1], [0], [0], [1], [0, 0, 1, 1], [], []>} : vector<64x32xbf16>, vector<32x64xbf16>, vector<64x64xf32> -> vector<64x64xf32>
    %481 = vector.extract_strided_slice %476 {offsets = [32, 0], sizes = [32, 64], strides = [1, 1]} : vector<64x64xbf16> to vector<32x64xbf16>
    %482 = arith.truncf %475 : vector<64x32xf32> to vector<64x32xbf16>
    %cst_151 = arith.constant dense<0.000000e+00> : vector<64x64xf32>
    %483 = tpu.matmul %482, %481, %cst_151 {dimension_numbers = #tpu.dot_dimension_numbers<[1], [0], [0], [1], [0, 0, 1, 1], [], []>} : vector<64x32xbf16>, vector<32x64xbf16>, vector<64x64xf32> -> vector<64x64xf32>
    %484 = arith.addf %480, %483 : vector<64x64xf32>
    %cst_152 = arith.constant 0.000000e+00 : f32
    %485 = vector.broadcast %cst_152 : f32 to vector<64x64xf32>
    %486 = arith.maximumf %484, %485 : vector<64x64xf32>
    %487 = arith.truncf %486 : vector<64x64xf32> to vector<64x64xbf16>
    %cst_153 = arith.constant dense<0.000000e+00> : vector<64x32xf32>
    %488 = tpu.matmul %487, %477, %cst_153 {dimension_numbers = #tpu.dot_dimension_numbers<[1], [0], [0], [1], [0, 0, 1, 1], [], []>} : vector<64x64xbf16>, vector<64x32xbf16>, vector<64x32xf32> -> vector<64x32xf32>
    %cst_154 = arith.constant dense<0.000000e+00> : vector<64xf32>
    %489 = vector.multi_reduction <add>, %488, %cst_154 [1] : vector<64x32xf32> to vector<64xf32>
    %490 = vector.shape_cast %489 : vector<64xf32> to vector<64x1xf32>
    %cst_155 = arith.constant 3.200000e+01 : f32
    %491 = vector.broadcast %cst_155 : f32 to vector<64x1xf32>
    %492 = arith.divf %490, %491 : vector<64x1xf32>
    %493 = vector.broadcast %492 : vector<64x1xf32> to vector<64x32xf32>
    %494 = arith.subf %488, %493 : vector<64x32xf32>
    %495 = arith.mulf %494, %494 : vector<64x32xf32>
    %cst_156 = arith.constant dense<0.000000e+00> : vector<64xf32>
    %496 = vector.multi_reduction <add>, %495, %cst_156 [1] : vector<64x32xf32> to vector<64xf32>
    %497 = vector.shape_cast %496 : vector<64xf32> to vector<64x1xf32>
    %cst_157 = arith.constant 3.200000e+01 : f32
    %498 = vector.broadcast %cst_157 : f32 to vector<64x1xf32>
    %499 = arith.divf %497, %498 : vector<64x1xf32>
    %500 = vector.broadcast %492 : vector<64x1xf32> to vector<64x32xf32>
    %501 = arith.subf %488, %500 : vector<64x32xf32>
    %cst_158 = arith.constant 9.99999974E-6 : f32
    %502 = vector.broadcast %cst_158 : f32 to vector<64x1xf32>
    %503 = arith.addf %499, %502 : vector<64x1xf32>
    %504 = math.rsqrt %503 : vector<64x1xf32>
    %505 = vector.broadcast %504 : vector<64x1xf32> to vector<64x32xf32>
    %506 = arith.mulf %501, %505 : vector<64x32xf32>
    %507 = vector.broadcast %452 : vector<1x32xf32> to vector<64x32xf32>
    %508 = arith.mulf %506, %507 : vector<64x32xf32>
    %509 = vector.broadcast %453 : vector<1x32xf32> to vector<64x32xf32>
    %510 = arith.addf %508, %509 : vector<64x32xf32>
    %511 = arith.addf %231, %510 : vector<64x32xf32>
    %512 = tpu.concatenate %372, %511 in 0 : vector<64x32xf32>, vector<64x32xf32> -> vector<128x32xf32>
    %c0_159 = arith.constant 0 : index
    %c0_160 = arith.constant 0 : index
    %c0_161 = arith.constant 0 : index
    %513 = vector.load %arg6[%c0_159, %c0_160, %c0_161] : memref<1x128x32xf32, #tpu.memory_space<vmem>>, vector<1x128x32xf32>
    %514 = vector.shape_cast %513 : vector<1x128x32xf32> to vector<128x32xf32>
    %515 = vector.shape_cast %512 : vector<128x32xf32> to vector<1x128x32xf32>
    tpu.vector_store %arg6[%c0_159, %c0_160, %c0_161], %515 {strides = array<i32>} : memref<1x128x32xf32, #tpu.memory_space<vmem>>, vector<1x128x32xf32>,
    return
  }
  func.func @transform_0(%arg0: i32) -> (i32, i32, i32) {
    %c0_i32 = arith.constant 0 : i32
    %c0_i32_0 = arith.constant 0 : i32
    %c0_i32_1 = arith.constant 0 : i32
    return %arg0, %c0_i32, %c0_i32_0 : i32, i32, i32
  }
  func.func @transform_1(%arg0: i32) -> (i32, i32, i32) {
    %c0_i32 = arith.constant 0 : i32
    %c0_i32_0 = arith.constant 0 : i32
    %c0_i32_1 = arith.constant 0 : i32
    %c0_i32_2 = arith.constant 0 : i32
    return %c0_i32, %c0_i32_0, %c0_i32_1 : i32, i32, i32
  }
  func.func @transform_2(%arg0: i32) -> (i32, i32, i32) {
    %c0_i32 = arith.constant 0 : i32
    %c0_i32_0 = arith.constant 0 : i32
    %c0_i32_1 = arith.constant 0 : i32
    %c0_i32_2 = arith.constant 0 : i32
    return %c0_i32, %c0_i32_0, %c0_i32_1 : i32, i32, i32
  }
  func.func @transform_3(%arg0: i32) -> (i32, i32) {
    %c0_i32 = arith.constant 0 : i32
    %c0_i32_0 = arith.constant 0 : i32
    %c0_i32_1 = arith.constant 0 : i32
    return %c0_i32, %c0_i32_0 : i32, i32
  }
  func.func @transform_4(%arg0: i32) -> (i32, i32) {
    %c0_i32 = arith.constant 0 : i32
    %c0_i32_0 = arith.constant 0 : i32
    %c0_i32_1 = arith.constant 0 : i32
    return %c0_i32, %c0_i32_0 : i32, i32
  }
  func.func @transform_5(%arg0: i32) -> (i32, i32, i32) {
    %c0_i32 = arith.constant 0 : i32
    %c0_i32_0 = arith.constant 0 : i32
    %c0_i32_1 = arith.constant 0 : i32
    return %arg0, %c0_i32, %c0_i32_0 : i32, i32, i32
  }
}

</mosaic_0001>

<bundles_post_ra>
// kernel: loftr_forward.1
= control target key start
LH: loop header
LB: loop body
LE: loop exit
PB: predicated region body
PF: predicated region fallthrough
CT: control target
= control target key end

     0   :  { %s13816_s18 = smov 0   ;;  %s17671_s0 = inlined_call_operand.vmem [shape: f32[2,128,64], index: 0, kind: input, shape index: {}]   ;;  %s17672_s1 = inlined_call_operand.vmem [shape: bf16[2,32,192], index: 1, kind: input, shape index: {}]   ;;  %s17673_s2 = inlined_call_operand.vmem [shape: bf16[2,64,96], index: 2, kind: input, shape index: {}]   ;;  %s17674_s3 = inlined_call_operand.vmem [shape: bf16[64,32], index: 3, kind: input, shape index: {}]   ;;  %s17675_s4 = inlined_call_operand.vmem [shape: f32[192,32], index: 4, kind: input, shape index: {}]   ;;  %s17676_s5 = inlined_call_operand.vmem [shape: f32[2,128,32], index: 5, kind: output, shape index: {}]  }
   0x1 LB: > { %s9573_s19 = sadd.s32 4294967295, %s13774_s18   ;;  %p9577_p0 = scmp.ge.s32.totalorder %s13774_s18, 1  ;;  %s13774_s18 = sphi %s13816_s18, %s15_s18  }
   0x2   : > { %p187_p1 = scmp.lt.s32.totalorder %s13774_s18, 3 }
   0x4   : > { %p188_p2 = pnand %p9577_p0, %p187_p1 }
   0x6   : > { %191 = sbr.rel (%p188_p2) target bundleno = 8714 (0x220a), region = 40 }
   0xd   : > { %v13092_v0 = vld [vmem:[%s17674_s3] sm:$0xff]   ;;  %p215_p3 = scmp.lt.s32.totalorder %s9573_s19, 1  ;;  %v13093_v1 = vld [vmem:[%s17674_s3 + $0x8] sm:$0xff]   ;;  %v13094_v2 = vld [vmem:[%s17674_s3 + $0x10] sm:$0xff]   ;;  %vm298_vm0 = vcmask 523264   ;;  %v17677_v32 = vmov 0  }
   0xe   : > { %10682 = vmatprep.subr.bf16.mxu0 %v13092_v0  ;;  %v13095_v6 = vld [vmem:[%s17674_s3 + $0x18] sm:$0xff]   ;;  %v13096_v28 = vld [vmem:[%s17672_s1 + $0x4] ss:$8 sps:$4 sm:$0xff]   ;;  %v13098_v29 = vld [vmem:[%s17672_s1] ss:$8 sps:$4 sm:$0xff]   ;;  %517 = vmatprep.mubr.bf16.mxu1 %v17677_v32  ;;  %vm460_vm1 = vcmask 261120  }
   0xf   : > { %s17969_s19 = smov (!%p215_p3, %s9573_s19), 1  ;;  %10683 = vmatpush3.bf16.msra.mxu0 %v13092_v0  ;;  %485 = vmatprep.subr.bf16.mxu1 %v13096_v28  ;;  %v13099_v30 = vld [vmem:[%s17672_s1 + $0x14] ss:$8 sps:$4 sm:$0xff]   ;;  %v13101_v31 = vld [vmem:[%s17672_s1 + $0x10] ss:$8 sps:$4 sm:$0xff]   ;;  %v258_v35 = vld [vmem:[%s17675_s4] sm:$0xff] }
  0x10   : > { %10684 = vmatprep.subr.bf16.mxu0 %v13093_v1  ;;  %s10084_s26 = sshll.u32 %s17969_s19, 7  ;;  %486 = vmatpush1.bf16.msra.mxu1 %v13098_v29  ;;  %v259_v36 = vld [vmem:[%s17675_s4 + $0x8] sm:$0xff]  ;;  %v261_v42 = vld [vmem:[%s17675_s4 + $0x18] sm:$0xff]  ;;  %v260_v44 = vld [vmem:[%s17675_s4 + $0x10] sm:$0xff]  ;;  %vm622_vm2 = vcmask 64512   ;;  %s13777_s28 = smov 96  }
  0x11   : > { %s13841_s29 = scalar_lea.vmem %s17671_s0, %s10084_s26  ;;  %487 = vmatprep.subr.bf16.mxu1 %v13099_v30  ;;  %v262_v51 = vld [vmem:[%s17675_s4 + $0x20] sm:$0xff]  ;;  %v263_v52 = vld [vmem:[%s17675_s4 + $0x28] sm:$0xff]  ;;  %v264_v60 = vld [vmem:[%s17675_s4 + $0x30] sm:$0xff]  ;;  %s13779_s30 = smov 120  }
  0x12   : > { %v226_v3 = vld [vmem:[%s13841_s29] sm:$0xff]  ;;  %v227_v4 = vld [vmem:[%s13841_s29 + $0x8] sm:$0xff]  ;;  %v228_v7 = vld [vmem:[%s13841_s29 + $0x10] sm:$0xff]  ;;  %s13780_s6 = smov 80   ;;  %s13781_s7 = smov 112  }
  0x13   : > { %10685 = vmatpush3.bf16.msra.mxu0 %v13093_v1  ;;  %v250_v5 = vpack.c.bf16 %v227_v4, %v226_v3  ;;  %v229_v8 = vld [vmem:[%s13841_s29 + $0x18] sm:$0xff]  ;;  %v230_v9 = vld [vmem:[%s13841_s29 + $0x20] sm:$0xff]  ;;  %v231_v10 = vld [vmem:[%s13841_s29 + $0x28] sm:$0xff]  ;;  %s13782_s8 = smov 64   ;;  %s13783_s9 = smov 72  }
  0x14   : > { %10686 = vmatprep.subr.bf16.mxu0 %v13094_v2  ;;  %v251_v11 = vpack.c.bf16 %v229_v8, %v228_v7  ;;  %v252_v12 = vpack.c.bf16 %v231_v10, %v230_v9  ;;  %v232_v13 = vld [vmem:[%s13841_s29 + $0x30] sm:$0xff]  ;;  %v233_v14 = vld [vmem:[%s13841_s29 + $0x38] sm:$0xff]  ;;  %v234_v15 = vld [vmem:[%s13841_s29 + $0x40] sm:$0xff]  ;;  %488 = vmatpush1.bf16.msra.mxu1 %v13101_v31  ;;  %s13784_s10 = smov 104   ;;  %s13785_s11 = smov 32  }
  0x15   : > { %10690 = vmatprep.mubr.msk.bf16.mxu0 %vm298_vm0, %v250_v5  ;;  %v235_v16 = vld [vmem:[%s13841_s29 + $0x48] sm:$0xff]  ;;  %v253_v17 = vpack.c.bf16 %v233_v14, %v232_v13  ;;  %v236_v19 = vld [vmem:[%s13841_s29 + $0x50] sm:$0xff]  ;;  %v237_v20 = vld [vmem:[%s13841_s29 + $0x58] sm:$0xff]  ;;  %s16847_s25 = scalar_lea.vmem %s17676_s5, %s10084_s26 }
  0x16   : > { %v254_v18 = vpack.c.bf16 %v235_v16, %v234_v15  ;;  %v238_v21 = vld [vmem:[%s13841_s29 + $0x60] sm:$0xff]  ;;  %v239_v22 = vld [vmem:[%s13841_s29 + $0x68] sm:$0xff]  ;;  %v255_v23 = vpack.c.bf16 %v237_v20, %v236_v19  ;;  %v240_v25 = vld [vmem:[%s13841_s29 + $0x70] sm:$0xff] }
  0x17   : > { %10687 = vmatpush3.bf16.msra.mxu0 %v13094_v2  ;;  %v256_v24 = vpack.c.bf16 %v239_v22, %v238_v21  ;;  %v241_v26 = vld [vmem:[%s13841_s29 + $0x78] sm:$0xff]  ;;  %v266_v4 = vld [vmem:[%s17675_s4 + $0x40] sm:$0xff]  ;;  %v267_v5 = vld [vmem:[%s17675_s4 + $0x48] sm:$0xff]  ;;  %s13778_s29 = smov 88  }
  0x18   : > { %10688 = vmatprep.subr.bf16.mxu0 %v13095_v6  ;;  %v257_v27 = vpack.c.bf16 %v241_v26, %v240_v25  ;;  %v265_v61 = vld [vmem:[%s17675_s4 + $0x38] sm:$0xff]  ;;  %v268_v10 = vld [vmem:[%s17675_s4 + $0x50] sm:$0xff]  ;;  %v270_v15 = vld [vmem:[%s17675_s4 + $0x60] sm:$0xff] }
  0x19   : > { %v271_v16 = vld [vmem:[%s17675_s4 + $0x68] sm:$0xff]  ;;  %v272_v20 = vld [vmem:[%s17675_s4 + $0x70] sm:$0xff]  ;;  %v273_v21 = vld [vmem:[%s17675_s4 + $0x78] sm:$0xff] }
  0x1a   : > { %vm14218_vm3 = vmpackc.low %vm622_vm2, %vm622_vm2 }
  0x1b   : > { %10689 = vmatpush3.bf16.msra.mxu0 %v13095_v6 }
  0x1e   : > { %10691 = vmatmul.mubr.msk.bf16.vlgmr.msra.gmra.mrb[0].mxu0 %vm298_vm0, %v251_v11  ;;  %v269_v11 = vld [vmem:[%s17675_s4 + $0x58] sm:$0xff] }
  0x1f   : > { %10694 = vmatprep.mubr.msk.bf16.mxu0 %vm298_vm0, %v252_v12 }
  0x26   : > { %10695 = vmatmul.mubr.msk.bf16.gmra.mrb[4].mxu0 %vm298_vm0, %v253_v17 }
  0x27   : > { %10698 = vmatprep.mubr.msk.bf16.mxu0 %vm298_vm0, %v254_v18 }
  0x2e   : > { %10699 = vmatmul.mubr.msk.bf16.gmra.mrb[8].mxu0 %vm298_vm0, %v255_v23 }
  0x2f   : > { %10702 = vmatprep.mubr.msk.bf16.mxu0 %vm298_vm0, %v256_v24 }
  0x36   : > { %10703 = vmatmul.mubr.msk.bf16.gmra.mrb[12].mxu0 %vm298_vm0, %v257_v27 }
  0xf1   : > { %v10692_v33 = vpop.f32.mrb[0].mxu0 }
  0xf2   : > { %v357_v34 = vpop.f32.mrb[1].mxu0  ;;  %v13908_v49 = vadd.f32 %v10692_v33, %v260_v44 }
  0xf3   : > { %v10693_v37 = vpop.f32.mrb[2].mxu0  ;;  %v13889_v39 = vadd.f32 %v357_v34, %v258_v35 }
  0xf4   : > { %v360_v38 = vpop.f32.mrb[3].mxu0  ;;  %v13906_v46 = vadd.f32 %v10693_v37, %v261_v42  ;;  %17779 = vst [vmem:[#allocation6_spill] sm:$0xff] %v13908_v49 }
  0xf5   : > { %17775 = vst [vmem:[#allocation2_spill] sm:$0xff] %v13889_v39  ;;  %v13891_v40 = vadd.f32 %v360_v38, %v259_v36 }
  0xf6   : > { %17778 = vst [vmem:[#allocation5_spill] sm:$0xff] %v13906_v46  ;;  %v13912_v50 = vpack.c.bf16 %v13906_v46, %v13908_v49 }
  0xf7   : > { %17776 = vst [vmem:[#allocation3_spill] sm:$0xff] %v13891_v40  ;;  %v13895_v41 = vpack.c.bf16 %v13891_v40, %v13889_v39 }
  0xf8   : > { %17780 = vst [vmem:[#allocation7_spill] sm:$0xff] %v13912_v50 }
  0xf9   : > { %17777 = vst [vmem:[#allocation4_spill] sm:$0xff] %v13895_v41  ;;  %9598 = vmatmul.mubr.msk.bf16.vlgmr.msra.gmra.mrb[0].mxu1 %vm460_vm1, %v13895_v41  ;;  %v10696_v43 = vpop.f32.mrb[4].mxu0 }
  0xfa   : > { %527 = vmatprep.mubr.bf16.mxu1 %v17677_v32  ;;  %v373_v45 = vpop.f32.mrb[5].mxu0  ;;  %v13940_v0 = vadd.f32 %v10696_v43, %v264_v60 }
  0xfb   : > { %v10697_v47 = vpop.f32.mrb[6].mxu0  ;;  %v13923_v55 = vadd.f32 %v373_v45, %v262_v51 }
  0xfc   : > { %v376_v48 = vpop.f32.mrb[7].mxu0  ;;  %17784 = vst [vmem:[#allocation11_spill] sm:$0xff] %v13940_v0  ;;  %v13942_v1 = vadd.f32 %v10697_v47, %v265_v61 }
  0xfd   : > { %17781 = vst [vmem:[#allocation8_spill] sm:$0xff] %v13923_v55  ;;  %v13925_v56 = vadd.f32 %v376_v48, %v263_v52 }
  0xfe   : > { %17785 = vst [vmem:[#allocation12_spill] sm:$0xff] %v13942_v1  ;;  %v13952_v6 = vpack.c.bf16 %v13942_v1, %v13940_v0 }
  0xff   : > { %17782 = vst [vmem:[#allocation9_spill] sm:$0xff] %v13925_v56  ;;  %v13929_v59 = vpack.c.bf16 %v13925_v56, %v13923_v55 }
 0x100   : > { %17786 = vst [vmem:[#allocation13_spill] sm:$0xff] %v13952_v6 }
 0x101   : > { %9599 = vmatmul.mubr.msk.bf16.gmra.mrb[4].mxu1 %vm460_vm1, %v13912_v50  ;;  %v10700_v53 = vpop.f32.mrb[8].mxu0  ;;  %17783 = vst [vmem:[#allocation10_spill] sm:$0xff] %v13929_v59 }
 0x102   : > { %537 = vmatprep.mubr.bf16.mxu1 %v17677_v32  ;;  %v389_v54 = vpop.f32.mrb[9].mxu0  ;;  %v13971_v12 = vadd.f32 %v10700_v53, %v268_v10 }
 0x103   : > { %v10701_v57 = vpop.f32.mrb[10].mxu0  ;;  %v13956_v7 = vadd.f32 %v389_v54, %v266_v4 }
 0x104   : > { %v392_v58 = vpop.f32.mrb[11].mxu0  ;;  %17790 = vst [vmem:[#allocation17_spill] sm:$0xff] %v13971_v12  ;;  %v13973_v13 = vadd.f32 %v10701_v57, %v269_v11 }
 0x105   : > { %17787 = vst [vmem:[#allocation14_spill] sm:$0xff] %v13956_v7  ;;  %v13958_v8 = vadd.f32 %v392_v58, %v267_v5 }
 0x106   : > { %17791 = vst [vmem:[#allocation18_spill] sm:$0xff] %v13973_v13  ;;  %v13980_v14 = vpack.c.bf16 %v13973_v13, %v13971_v12 }
 0x107   : > { %17788 = vst [vmem:[#allocation15_spill] sm:$0xff] %v13958_v8  ;;  %v13963_v9 = vpack.c.bf16 %v13958_v8, %v13956_v7 }
 0x108   : > { %17792 = vst [vmem:[#allocation19_spill] sm:$0xff] %v13980_v14 }
 0x109   : > { %9600 = vmatmul.mubr.msk.bf16.gmra.mrb[8].mxu1 %vm460_vm1, %v13929_v59  ;;  %v10704_v62 = vpop.f32.mrb[12].mxu0  ;;  %17789 = vst [vmem:[#allocation16_spill] sm:$0xff] %v13963_v9 }
 0x10a   : > { %547 = vmatprep.mubr.bf16.mxu1 %v17677_v32  ;;  %v405_v63 = vpop.f32.mrb[13].mxu0  ;;  %v14005_v22 = vadd.f32 %v10704_v62, %v272_v20 }
 0x10b   : > { %v10705_v2 = vpop.f32.mrb[14].mxu0  ;;  %v13990_v17 = vadd.f32 %v405_v63, %v270_v15 }
 0x10c   : > { %v408_v3 = vpop.f32.mrb[15].mxu0  ;;  %17796 = vst [vmem:[#allocation23_spill] sm:$0xff] %v14005_v22  ;;  %v14007_v23 = vadd.f32 %v10705_v2, %v273_v21 }
 0x10d   : > { %17793 = vst [vmem:[#allocation20_spill] sm:$0xff] %v13990_v17  ;;  %v13992_v18 = vadd.f32 %v408_v3, %v271_v16 }
 0x10e   : > { %17797 = vst [vmem:[#allocation24_spill] sm:$0xff] %v14007_v23  ;;  %v14014_v24 = vpack.c.bf16 %v14007_v23, %v14005_v22 }
 0x10f   : > { %17794 = vst [vmem:[#allocation21_spill] sm:$0xff] %v13992_v18  ;;  %v13997_v19 = vpack.c.bf16 %v13992_v18, %v13990_v17 }
 0x110   : > { %17798 = vst [vmem:[#allocation25_spill] sm:$0xff] %v14014_v24 }
 0x111   : > { %9601 = vmatmul.mubr.msk.bf16.gmra.mrb[12].mxu1 %vm460_vm1, %v13952_v6  ;;  %17795 = vst [vmem:[#allocation22_spill] sm:$0xff] %v13997_v19 }
 0x112   : > { %557 = vmatprep.mubr.bf16.mxu1 %v17677_v32 }
 0x119   : > { %9602 = vmatmul.mubr.msk.bf16.gmra.mrb[16].mxu1 %vm460_vm1, %v13963_v9 }
 0x11a   : > { %567 = vmatprep.mubr.bf16.mxu1 %v17677_v32 }
 0x121   : > { %9603 = vmatmul.mubr.msk.bf16.gmra.mrb[20].mxu1 %vm460_vm1, %v13980_v14 }
 0x122   : > { %577 = vmatprep.mubr.bf16.mxu1 %v17677_v32 }
 0x129   : > { %9604 = vmatmul.mubr.msk.bf16.gmra.mrb[24].mxu1 %vm460_vm1, %v13997_v19 }
 0x12a   : > { %587 = vmatprep.mubr.bf16.mxu1 %v17677_v32 }
 0x131   : > { %9605 = vmatmul.mubr.msk.bf16.gmra.mrb[28].mxu1 %vm460_vm1, %v14014_v24 }
 0x1cc   : > { %v519_v25 = vpop.f32.mrb[0].mxu1 }
 0x1cd   : > { %v14018_v26 = vpop.f32.mrb[1].mxu1 }
 0x1ce   : > { %v523_v27 = vpop.f32.mrb[2].mxu1  ;;  %10722 = vmatprep.mubr.msk.f32.mxu0 %vm622_vm2, %v14018_v26 }
 0x1cf   : > { %v14022_v28 = vpack.i.bf16 %v523_v27, %v519_v25  ;;  %v14024_v29 = vpop.f32.mrb[3].mxu1  ;;  %v14026_v30 = vpack.c.bf16 %v523_v27, %v519_v25 }
 0x1d0   : > { %v14030_v31 = vpack.i.bf16 %v14024_v29, %v14018_v26 }
 0x1d1   : > { %17799 = vst [vmem:[#allocation26_spill] sm:$0xff] %v14022_v28 }
 0x1d2   : > { %12543 = vrot.lane.b32.xlu1 %v14030_v31, %s13777_s28  ;;  %12533 = vrot.lane.b32.xlu0 %v14030_v31, %s13778_s29 }
 0x1d4   : > { %v529_v33 = vpop.f32.mrb[4].mxu1 }
 0x1d5   : > { %v14036_v34 = vpop.f32.mrb[5].mxu1 }
 0x1d6   : > { %v533_v35 = vpop.f32.mrb[6].mxu1 }
 0x1d7   : > { %v14038_v36 = vpack.i.bf16 %v533_v35, %v529_v33  ;;  %v14040_v37 = vpop.f32.mrb[7].mxu1  ;;  %v14042_v38 = vpack.c.bf16 %v533_v35, %v529_v33 }
 0x1d8   : > { %v14046_v42 = vpack.i.bf16 %v14040_v37, %v14036_v34 }
 0x1d9   : > { %17800 = vst [vmem:[#allocation27_spill] sm:$0xff] %v14038_v36 }
 0x1da   : > { %12538 = vrot.lane.b32.xlu0 %v14046_v42, %s13778_s29 }
 0x1dc   : > { %v539_v43 = vpop.f32.mrb[8].mxu1 }
 0x1dd   : > { %v14050_v44 = vpop.f32.mrb[9].mxu1 }
 0x1de   : > { %12553 = vrot.lane.b32.xlu0 %v14046_v42, %s13777_s28  ;;  %v543_v45 = vpop.f32.mrb[10].mxu1 }
 0x1df   : > { %v14054_v47 = vpack.i.bf16 %v543_v45, %v539_v43  ;;  %v14056_v48 = vpop.f32.mrb[11].mxu1  ;;  %v14058_v51 = vpack.c.bf16 %v543_v45, %v539_v43 }
 0x1e0   : > { %v14062_v52 = vpack.i.bf16 %v14056_v48, %v14050_v44 }
 0x1e1   : > { %17801 = vst [vmem:[#allocation28_spill] sm:$0xff] %v14054_v47 }
 0x1e2   : > { %12558 = vrot.lane.b32.xlu0 %v14062_v52, %s13777_s28  ;;  %12548 = vrot.lane.b32.xlu1 %v14062_v52, %s13778_s29 }
 0x1e4   : > { %v549_v53 = vpop.f32.mrb[12].mxu1 }
 0x1e5   : > { %v14068_v54 = vpop.f32.mrb[13].mxu1 }
 0x1e6   : > { %858 = vrot.lane.b32.xlu0 %v14024_v29, %s13779_s30  ;;  %v553_v57 = vpop.f32.mrb[14].mxu1 }
 0x1e7   : > { %v14072_v58 = vpack.i.bf16 %v553_v57, %v549_v53  ;;  %v14074_v60 = vpop.f32.mrb[15].mxu1  ;;  %v14076_v61 = vpack.c.bf16 %v553_v57, %v549_v53 }
 0x1e8   : > { %v12562_v62 = vpack.i.bf16 %v14074_v60, %v14068_v54 }
 0x1e9   : > { %17802 = vst [vmem:[#allocation29_spill] sm:$0xff] %v14072_v58 }
 0x1ea   : > { %12568 = vrot.lane.b32.xlu0 %v14030_v31, %s13780_s6  ;;  %12563 = vrot.lane.b32.xlu1 %v12562_v62, %s13778_s29 }
 0x1ec   : > { %v14083_v63 = vpop.f32.mrb[16].mxu1 }
 0x1ed   : > { %v14085_v2 = vpop.f32.mrb[17].mxu1 }
 0x1ee   : > { %12573 = vrot.lane.b32.xlu0 %v12562_v62, %s13777_s28  ;;  %856 = vrot.lane.b32.xlu1 %v14018_v26, %s13779_s30  ;;  %v14090_v3 = vpop.f32.mrb[18].mxu1 }
 0x1ef   : > { %v14092_v4 = vpop.f32.mrb[19].mxu1  ;;  %v14126_v25 = vpack.i.bf16 %v14090_v3, %v14083_v63 }
 0x1f0   : > { %v14096_v5 = vpack.i.bf16 %v14092_v4, %v14085_v2 }
 0x1f1   : > { %17805 = vst [vmem:[#allocation32_spill] sm:$0xff] %v14126_v25 }
 0x1f2   : > { %866 = vrot.lane.b32.xlu0 %v14056_v48, %s13779_s30  ;;  %860 = vrot.lane.b32.xlu1 %v14036_v34, %s13779_s30 }
 0x1f4   : > { %v14102_v10 = vpop.f32.mrb[20].mxu1 }
 0x1f5   : > { %v14104_v11 = vpop.f32.mrb[21].mxu1 }
 0x1f6   : > { %17803 = vst [vmem:[#allocation30_spill] sm:$0xff] %v14104_v11  ;;  %12578 = vrot.lane.b32.xlu0 %v14046_v42, %s13780_s6  ;;  %862 = vrot.lane.b32.xlu1 %v14040_v37, %s13779_s30  ;;  %v14110_v15 = vpop.f32.mrb[22].mxu1 }
 0x1f7   : > { %v14112_v16 = vpop.f32.mrb[23].mxu1  ;;  %v14150_v53 = vpack.i.bf16 %v14110_v15, %v14102_v10 }
 0x1f8   : > { %v14116_v20 = vpack.i.bf16 %v14112_v16, %v14104_v11 }
 0x1f9   : > { %17807 = vst [vmem:[#allocation34_spill] sm:$0xff] %v14150_v53 }
 0x1fa   : > { %17804 = vst [vmem:[#allocation31_spill] sm:$0xff] %v14116_v20  ;;  %12583 = vrot.lane.b32.xlu0 %v14062_v52, %s13780_s6  ;;  %864 = vrot.lane.b32.xlu1 %v14050_v44, %s13779_s30 }
 0x1fc   : > { %v14122_v21 = vpop.f32.mrb[24].mxu1 }
 0x1fd   : > { %v14128_v27 = vpop.f32.mrb[25].mxu1 }
 0x1fe   : > { %17806 = vst [vmem:[#allocation33_spill] sm:$0xff] %v14128_v27  ;;  %1411 = vrot.lane.b32.xlu0 %v14018_v26, %s13781_s7  ;;  %868 = vrot.lane.b32.xlu1 %v14068_v54, %s13779_s30  ;;  %v14134_v33 = vpop.f32.mrb[26].mxu1 }
 0x1ff   : > { %v14136_v35 = vpop.f32.mrb[27].mxu1  ;;  %v14175_v55 = vpack.i.bf16 %v14134_v33, %v14122_v21 }
 0x200   : > { %v14140_v43 = vpack.i.bf16 %v14136_v35, %v14128_v27 }
 0x201   : > { %17809 = vst [vmem:[#allocation36_spill] sm:$0xff] %v14175_v55 }
 0x202   : > { %1415 = vrot.lane.b32.xlu0 %v14036_v34, %s13781_s7  ;;  %870 = vrot.lane.b32.xlu1 %v14074_v60, %s13779_s30 }
 0x204   : > { %v14146_v45 = vpop.f32.mrb[28].mxu1 }
 0x205   : > { %v14152_v57 = vpop.f32.mrb[29].mxu1 }
 0x206   : > { %17808 = vst [vmem:[#allocation35_spill] sm:$0xff] %v14152_v57  ;;  %1419 = vrot.lane.b32.xlu0 %v14050_v44, %s13781_s7  ;;  %12588 = vrot.lane.b32.xlu1 %v12562_v62, %s13780_s6  ;;  %v14157_v32 = vpop.f32.mrb[30].mxu1 }
 0x207   : > { %v14159_v0 = vpop.f32.mrb[31].mxu1  ;;  %v14187_v56 = vpack.i.bf16 %v14157_v32, %v14146_v45 }
 0x208   : > { %v14163_v1 = vpack.i.bf16 %v14159_v0, %v14152_v57 }
 0x209   : > { %17810 = vst [vmem:[#allocation37_spill] sm:$0xff] %v14187_v56 }
 0x20a   : > { %1423 = vrot.lane.b32.xlu0 %v14068_v54, %s13781_s7  ;;  %1413 = vrot.lane.b32.xlu1 %v14024_v29, %s13781_s7 }
 0x20e   : > { %12598 = vrot.lane.b32.xlu0 %v14038_v36, %s13777_s28  ;;  %1417 = vrot.lane.b32.xlu1 %v14040_v37, %s13781_s7 }
 0x212   : > { %12608 = vrot.lane.b32.xlu0 %v14072_v58, %s13777_s28  ;;  %1421 = vrot.lane.b32.xlu1 %v14056_v48, %s13781_s7 }
 0x216   : > { %12618 = vrot.lane.b32.xlu0 %v14038_v36, %s13782_s8  ;;  %1425 = vrot.lane.b32.xlu1 %v14074_v60, %s13781_s7 }
 0x21a   : > { %12628 = vrot.lane.b32.xlu0 %v14072_v58, %s13782_s8  ;;  %12593 = vrot.lane.b32.xlu1 %v14022_v28, %s13777_s28 }
 0x21e   : > { %12648 = vrot.lane.b32.xlu0 %v12562_v62, %s13783_s9  ;;  %12603 = vrot.lane.b32.xlu1 %v14054_v47, %s13777_s28 }
 0x222   : > { %12613 = vrot.lane.b32.xlu1 %v14022_v28, %s13782_s8  ;;  %12673 = vrot.lane.b32.xlu0 %v14140_v43, %s13777_s28 }
 0x226   : > { %12623 = vrot.lane.b32.xlu1 %v14054_v47, %s13782_s8  ;;  %12678 = vrot.lane.b32.xlu0 %v14163_v1, %s13777_s28 }
 0x22a   : > { %12633 = vrot.lane.b32.xlu1 %v14030_v31, %s13783_s9 }
 0x22e   : > { %12638 = vrot.lane.b32.xlu1 %v14046_v42, %s13783_s9  ;;  %v17811_v42 = vmov 0 }
 0x22f   : > { %v17812_v42 = vsel %vm14218_vm3, 4294967295, %v17811_v42 }
 0x230   : > { %17813 = vst [vmem:[#allocation38_spill] sm:$0xff] %v17812_v42 }
 0x232   : > { %12643 = vrot.lane.b32.xlu1 %v14062_v52, %s13783_s9 }
 0x236   : > { %12653 = vrot.lane.b32.xlu1 %v14096_v5, %s13777_s28 }
 0x23a   : > { %12658 = vrot.lane.b32.xlu1 %v14096_v5, %s13778_s29 }
 0x23e   : > { %12663 = vrot.lane.b32.xlu1 %v14116_v20, %s13777_s28 }
 0x242   : > { %12668 = vrot.lane.b32.xlu1 %v14116_v20, %s13778_s29 }
 0x244   : > { %v12544_v62 = vpop.permute.xlu1 %12543  ;;  %v12534_v49 = vpop.permute.xlu0 %12533 }
 0x245   : > { %v12546_v46 = vunpack.i.h.bf16 %v12544_v62  ;;  %v12545_v22 = vunpack.i.l.bf16 %v12544_v62  ;;  %v12536_v31 = vunpack.i.h.bf16 %v12534_v49  ;;  %v12535_v23 = vunpack.i.l.bf16 %v12534_v49 }
 0x247   : > { %v11746_v52 = vpack.c.bf16 %v12546_v46, %v12545_v22  ;;  %v11770_v40 = vpack.c.bf16 %v12536_v31, %v12535_v23 }
 0x249   : > { %11748 = vmatprep.subr.msk.bf16.mxu0 %vm14218_vm3, %v11746_v52  ;;  %11772 = vmatprep.subr.msk.bf16.mxu1 %vm14218_vm3, %v11770_v40 }
 0x24a   : > { %11751 = vmatpush3.bf16.xpose.msk.msra.mxu0 %vm14218_vm3, %v11746_v52  ;;  %11775 = vmatpush3.bf16.xpose.msk.msra.mxu1 %vm14218_vm3, %v11770_v40 }
 0x24c   : > { %v12539_v49 = vpop.permute.xlu0 %12538 }
 0x24d   : > { %v12541_v62 = vunpack.i.h.bf16 %v12539_v49  ;;  %v12540_v39 = vunpack.i.l.bf16 %v12539_v49 }
 0x24f   : > { %v11776_v17 = vpack.c.bf16 %v12541_v62, %v12540_v39 }
 0x250   : > { %v12554_v46 = vpop.permute.xlu0 %12553 }
 0x251   : > { %v12556_v22 = vunpack.i.h.bf16 %v12554_v46  ;;  %v12555_v23 = vunpack.i.l.bf16 %v12554_v46  ;;  %11778 = vmatprep.subr.msk.bf16.mxu1 %vm14218_vm3, %v11776_v17 }
 0x252   : > { %11781 = vmatpush3.bf16.xpose.msk.msra.mxu1 %vm14218_vm3, %v11776_v17 }
 0x253   : > { %v11752_v31 = vpack.c.bf16 %v12556_v22, %v12555_v23 }
 0x254   : > { %v12559_v52 = vpop.permute.xlu0 %12558  ;;  %v12549_v18 = vpop.permute.xlu1 %12548 }
 0x255   : > { %v12561_v40 = vunpack.i.h.bf16 %v12559_v52  ;;  %v12560_v13 = vunpack.i.l.bf16 %v12559_v52  ;;  %v12551_v12 = vunpack.i.h.bf16 %v12549_v18  ;;  %v12550_v49 = vunpack.i.l.bf16 %v12549_v18  ;;  %11754 = vmatprep.subr.msk.bf16.mxu0 %vm14218_vm3, %v11752_v31 }
 0x256   : > { %11757 = vmatpush3.bf16.xpose.msk.msra.mxu0 %vm14218_vm3, %v11752_v31 }
 0x257   : > { %v11758_v39 = vpack.c.bf16 %v12561_v40, %v12560_v13  ;;  %v11782_v62 = vpack.c.bf16 %v12551_v12, %v12550_v49 }
 0x258   : > { %v859_v46 = vpop.permute.xlu0 %858 }
 0x259   : > { %11784 = vmatprep.subr.msk.bf16.mxu1 %vm14218_vm3, %v11782_v62  ;;  %11760 = vmatprep.subr.msk.bf16.mxu0 %vm14218_vm3, %v11758_v39 }
 0x25a   : > { %11787 = vmatpush3.bf16.xpose.msk.msra.mxu1 %vm14218_vm3, %v11782_v62 }
 0x25c   : > { %v12569_v17 = vpop.permute.xlu0 %12568  ;;  %v12564_v18 = vpop.permute.xlu1 %12563 }
 0x25d   : > { %v12571_v22 = vunpack.i.h.bf16 %v12569_v17  ;;  %v12570_v23 = vunpack.i.l.bf16 %v12569_v17  ;;  %v12566_v52 = vunpack.i.h.bf16 %v12564_v18  ;;  %v12565_v8 = vunpack.i.l.bf16 %v12564_v18 }
 0x25e   : > { %11763 = vmatpush3.bf16.xpose.msk.msra.mxu0 %vm14218_vm3, %v11758_v39 }
 0x25f   : > { %v11788_v12 = vpack.c.bf16 %v12566_v52, %v12565_v8  ;;  %v11826_v40 = vpack.c.bf16 %v12571_v22, %v12570_v23 }
 0x260   : > { %v12574_v13 = vpop.permute.xlu0 %12573  ;;  %v857_v31 = vpop.permute.xlu1 %856 }
 0x261   : > { %v12576_v49 = vunpack.i.h.bf16 %v12574_v13  ;;  %v12575_v7 = vunpack.i.l.bf16 %v12574_v13  ;;  %11790 = vmatprep.subr.msk.bf16.mxu1 %vm14218_vm3, %v11788_v12  ;;  %10750 = vmatprep.mubr.msk.f32.mxu1 %vm622_vm2, %v857_v31 }
 0x262   : > { %11793 = vmatpush3.bf16.xpose.msk.msra.mxu1 %vm14218_vm3, %v11788_v12 }
 0x263   : > { %v11764_v62 = vpack.c.bf16 %v12576_v49, %v12575_v7  ;;  %11828 = vmatprep.subr.msk.bf16.mxu1 %vm14218_vm3, %v11826_v40 }
 0x264   : > { %v867_v17 = vpop.permute.xlu0 %866  ;;  %v861_v39 = vpop.permute.xlu1 %860 }
 0x265   : > { %11766 = vmatprep.subr.msk.bf16.mxu0 %vm14218_vm3, %v11764_v62 }
 0x266   : > { %11769 = vmatpush3.bf16.xpose.msk.msra.mxu0 %vm14218_vm3, %v11764_v62 }
 0x268   : > { %v12579_v8 = vpop.permute.xlu0 %12578  ;;  %v863_v18 = vpop.permute.xlu1 %862 }
 0x269   : > { %v12581_v22 = vunpack.i.h.bf16 %v12579_v8  ;;  %v12580_v23 = vunpack.i.l.bf16 %v12579_v8  ;;  %10751 = vmatmul.mubr.msk.f32.vlgmr.msra.gmra.mrb[32].mxu1 %vm622_vm2, %v859_v46 }
 0x26a   : > { %10753 = vmatprep.mubr.msk.f32.mxu1 %vm622_vm2, %v861_v39  ;;  %11831 = vmatpush3.bf16.xpose.msk.msra.mxu1 %vm14218_vm3, %v11826_v40 }
 0x26b   : > { %v11832_v7 = vpack.c.bf16 %v12581_v22, %v12580_v23 }
 0x26c   : > { %v12584_v52 = vpop.permute.xlu0 %12583  ;;  %v865_v12 = vpop.permute.xlu1 %864 }
 0x26d   : > { %10723 = vmatmul.mubr.msk.f32.vlgmr.msra.gmra.mrb[16].mxu0 %vm622_vm2, %v14024_v29  ;;  %10754 = vmatmul.mubr.msk.f32.gmra.mrb[34].mxu1 %vm622_vm2, %v863_v18  ;;  %v12586_v13 = vunpack.i.h.bf16 %v12584_v52  ;;  %v12585_v31 = vunpack.i.l.bf16 %v12584_v52 }
 0x26e   : > { %11834 = vmatprep.subr.msk.bf16.mxu1 %vm14218_vm3, %v11832_v7  ;;  %10725 = vmatprep.mubr.msk.f32.mxu0 %vm622_vm2, %v14036_v34 }
 0x26f   : > { %10756 = vmatprep.mubr.msk.f32.mxu1 %vm622_vm2, %v865_v12  ;;  %v11838_v40 = vpack.c.bf16 %v12586_v13, %v12585_v31 }
 0x270   : > { %v869_v46 = vpop.permute.xlu1 %868  ;;  %v1412_v49 = vpop.permute.xlu0 %1411 }
 0x271   : > { %10726 = vmatmul.mubr.msk.f32.gmra.mrb[18].mxu0 %vm622_vm2, %v14040_v37  ;;  %10757 = vmatmul.mubr.msk.f32.gmra.mrb[36].mxu1 %vm622_vm2, %v867_v17 }
 0x272   : > { %10728 = vmatprep.mubr.msk.f32.mxu0 %vm622_vm2, %v14050_v44  ;;  %10759 = vmatprep.mubr.msk.f32.mxu1 %vm622_vm2, %v869_v46  ;;  %v14297_v46 = vpack.c.bf16 %v14090_v3, %v14083_v63 }
 0x273   : > { %11837 = vmatpush3.bf16.xpose.msk.msra.mxu1 %vm14218_vm3, %v11832_v7 }
 0x274   : > { %11840 = vmatprep.subr.msk.bf16.mxu1 %vm14218_vm3, %v11838_v40  ;;  %v871_v62 = vpop.permute.xlu1 %870  ;;  %v1416_v17 = vpop.permute.xlu0 %1415  ;;  %17814 = vst [vmem:[#allocation39_spill] sm:$0xff] %v14297_v46 }
 0x275   : > { %10729 = vmatmul.mubr.msk.f32.gmra.mrb[20].mxu0 %vm622_vm2, %v14056_v48  ;;  %10760 = vmatmul.mubr.msk.f32.gmra.mrb[38].mxu1 %vm622_vm2, %v871_v62 }
 0x276   : > { %10731 = vmatprep.mubr.msk.f32.mxu0 %vm622_vm2, %v14068_v54  ;;  %10834 = vmatprep.mubr.msk.f32.mxu1 %vm622_vm2, %v1412_v49  ;;  %v14301_v49 = vpack.c.bf16 %v14110_v15, %v14102_v10 }
 0x278   : > { %v12589_v39 = vpop.permute.xlu1 %12588  ;;  %v1420_v7 = vpop.permute.xlu0 %1419  ;;  %17815 = vst [vmem:[#allocation40_spill] sm:$0xff] %v14301_v49 }
 0x279   : > { %v12591_v8 = vunpack.i.h.bf16 %v12589_v39  ;;  %v12590_v18 = vunpack.i.l.bf16 %v12589_v39  ;;  %10732 = vmatmul.mubr.msk.f32.gmra.mrb[22].mxu0 %vm622_vm2, %v14074_v60 }
 0x27b   : > { %v11844_v22 = vpack.c.bf16 %v12591_v8, %v12590_v18  ;;  %11843 = vmatpush3.bf16.xpose.msk.msra.mxu1 %vm14218_vm3, %v11838_v40 }
 0x27c   : > { %v1414_v23 = vpop.permute.xlu1 %1413  ;;  %v1424_v12 = vpop.permute.xlu0 %1423 }
 0x27d   : > { %11846 = vmatprep.subr.msk.bf16.mxu1 %vm14218_vm3, %v11844_v22 }
 0x280   : > { %v1418_v52 = vpop.permute.xlu1 %1417  ;;  %v12599_v40 = vpop.permute.xlu0 %12598 }
 0x281   : > { %v12601_v39 = vunpack.i.h.bf16 %v12599_v40  ;;  %v12600_v8 = vunpack.i.l.bf16 %v12599_v40 }
 0x283   : > { %11849 = vmatpush3.bf16.xpose.msk.msra.mxu1 %vm14218_vm3, %v11844_v22  ;;  %v11798_v10 = vpack.c.bf16 %v12601_v39, %v12600_v8 }
 0x284   : > { %v1422_v13 = vpop.permute.xlu1 %1421  ;;  %v12609_v15 = vpop.permute.xlu0 %12608 }
 0x285   : > { %v12610_v40 = vunpack.i.l.bf16 %v12609_v15 }
 0x288   : > { %v1426_v31 = vpop.permute.xlu1 %1425 }
 0x28a   : > { %10835 = vmatmul.mubr.msk.f32.vlgmr.msra.gmra.mrb[40].mxu1 %vm622_vm2, %v1414_v23  ;;  %v12611_v23 = vunpack.i.h.bf16 %v12609_v15 }
 0x28b   : > { %10837 = vmatprep.mubr.msk.f32.mxu1 %vm622_vm2, %v1416_v17 }
 0x28c   : > { %v12594_v62 = vpop.permute.xlu1 %12593 }
 0x28d   : > { %v12596_v18 = vunpack.i.h.bf16 %v12594_v62  ;;  %v12595_v22 = vunpack.i.l.bf16 %v12594_v62  ;;  %v11806_v62 = vpack.c.bf16 %v12611_v23, %v12610_v40 }
 0x28e   : > { %10838 = vmatmul.mubr.msk.f32.gmra.mrb[42].mxu1 %vm622_vm2, %v1418_v52 }
 0x28f   : > { %10840 = vmatprep.mubr.msk.f32.mxu1 %vm622_vm2, %v1420_v7  ;;  %v11794_v63 = vpack.c.bf16 %v12596_v18, %v12595_v22 }
 0x290   : > { %v12604_v3 = vpop.permute.xlu1 %12603 }
 0x291   : > { %v12606_v24 = vunpack.i.h.bf16 %v12604_v3  ;;  %v12605_v19 = vunpack.i.l.bf16 %v12604_v3  ;;  %11795 = vmatprep.subr.bf16.mxu0 %v11794_v63 }
 0x292   : > { %10841 = vmatmul.mubr.msk.f32.gmra.mrb[44].mxu1 %vm622_vm2, %v1422_v13  ;;  %11797 = vmatpush3.bf16.msra.mxu0 %v11794_v63  ;;  %v14318_v13 = vpack.c.bf16 %v14134_v33, %v14122_v21 }
 0x293   : > { %10843 = vmatprep.mubr.msk.f32.mxu1 %vm622_vm2, %v1424_v12  ;;  %11799 = vmatprep.subr.bf16.mxu0 %v11798_v10  ;;  %v11802_v52 = vpack.c.bf16 %v12606_v24, %v12605_v19  ;;  %v14322_v12 = vpack.c.bf16 %v14157_v32, %v14146_v45  ;;  %v14324_v19 = vpop.permute.xlu0 %12618 }
 0x294   : > { %v14309_v17 = vpop.permute.xlu1 %12613  ;;  %17817 = vst [vmem:[#allocation42_spill] sm:$0xff] %v14318_v13 }
 0x295   : > { %17818 = vst [vmem:[#allocation43_spill] sm:$0xff] %v14322_v12 }
 0x296   : > { %10844 = vmatmul.mubr.msk.f32.gmra.mrb[46].mxu1 %vm622_vm2, %v1426_v31  ;;  %11801 = vmatpush3.bf16.msra.mxu0 %v11798_v10 }
 0x297   : > { %11803 = vmatprep.subr.bf16.mxu0 %v11802_v52  ;;  %10946 = vmatprep.mubr.msk.f32.mxu1 %vm622_vm2, %v14085_v2  ;;  %v14331_v39 = vpop.permute.xlu0 %12628 }
 0x298   : > { %v14314_v7 = vpop.permute.xlu1 %12623  ;;  %17821 = vst [vmem:[#allocation46_spill] sm:$0xff] %v14331_v39 }
 0x299   : > { %17816 = vst [vmem:[#allocation41_spill] sm:$0xff] %v14314_v7 }
 0x29a   : > { %11805 = vmatpush3.bf16.msra.mxu0 %v11802_v52 }
 0x29b   : > { %11807 = vmatprep.subr.bf16.mxu0 %v11806_v62  ;;  %v14335_v33 = vpop.permute.xlu0 %12648 }
 0x29c   : > { %v14326_v24 = vpop.permute.xlu1 %12633  ;;  %17823 = vst [vmem:[#allocation48_spill] sm:$0xff] %v14335_v33 }
 0x29d   : > { %17819 = vst [vmem:[#allocation44_spill] sm:$0xff] %v14326_v24 }
 0x29e   : > { %11809 = vmatpush3.bf16.msra.mxu0 %v11806_v62 }
 0x29f   : > { %11811 = vmatprep.subr.bf16.mxu0 %v14026_v30  ;;  %v12674_v63 = vpop.permute.xlu0 %12673 }
 0x2a0   : > { %v14329_v31 = vpop.permute.xlu1 %12638  ;;  %v12676_v3 = vunpack.i.h.bf16 %v12674_v63  ;;  %v12675_v10 = vunpack.i.l.bf16 %v12674_v63 }
 0x2a1   : > { %17820 = vst [vmem:[#allocation45_spill] sm:$0xff] %v14329_v31 }
 0x2a2   : > { %v11918_v62 = vpack.c.bf16 %v12676_v3, %v12675_v10 }
 0x2a3   : > { %v12679_v14 = vpop.permute.xlu0 %12678 }
 0x2a4   : > { %v14333_v21 = vpop.permute.xlu1 %12643 }
 0x2a5   : > { %17822 = vst [vmem:[#allocation47_spill] sm:$0xff] %v14333_v21 }
 0x2a8   : > { %v12654_v32 = vpop.permute.xlu1 %12653 }
 0x2a9   : > { %v12656_v45 = vunpack.i.h.bf16 %v12654_v32  ;;  %v12655_v8 = vunpack.i.l.bf16 %v12654_v32  ;;  %v12681_v32 = vunpack.i.h.bf16 %v12679_v14 }
 0x2ab   : > { %v11906_v18 = vpack.c.bf16 %v12656_v45, %v12655_v8  ;;  %v12680_v45 = vunpack.i.l.bf16 %v12679_v14 }
 0x2ac   : > { %v12659_v22 = vpop.permute.xlu1 %12658 }
 0x2ad   : > { %11908 = vmatprep.subr.msk.bf16.mxu1 %vm14218_vm3, %v11906_v18  ;;  %v11924_v8 = vpack.c.bf16 %v12681_v32, %v12680_v45  ;;  %v12660_v63 = vunpack.i.l.bf16 %v12659_v22 }
 0x2ae   : > { %11911 = vmatpush3.bf16.xpose.msk.msra.mxu1 %vm14218_vm3, %v11906_v18  ;;  %v12661_v18 = vunpack.i.h.bf16 %v12659_v22 }
 0x2b0   : > { %v12664_v15 = vpop.permute.xlu1 %12663  ;;  %v11930_v3 = vpack.c.bf16 %v12661_v18, %v12660_v63 }
 0x2b1   : > { %v12666_v23 = vunpack.i.h.bf16 %v12664_v15  ;;  %v12665_v40 = vunpack.i.l.bf16 %v12664_v15 }
 0x2b3   : > { %v11912_v52 = vpack.c.bf16 %v12666_v23, %v12665_v40 }
 0x2b4   : > { %v12669_v14 = vpop.permute.xlu1 %12668 }
 0x2b5   : > { %11914 = vmatprep.subr.msk.bf16.mxu1 %vm14218_vm3, %v11912_v52  ;;  %v12671_v22 = vunpack.i.h.bf16 %v12669_v14  ;;  %v12670_v10 = vunpack.i.l.bf16 %v12669_v14 }
 0x2b6   : > { %11917 = vmatpush3.bf16.xpose.msk.msra.mxu1 %vm14218_vm3, %v11912_v52 }
 0x2b7   : > { %11920 = vmatprep.subr.msk.bf16.mxu1 %vm14218_vm3, %v11918_v62  ;;  %v11936_v15 = vpack.c.bf16 %v12671_v22, %v12670_v10 }
 0x2be   : > { %11923 = vmatpush3.bf16.xpose.msk.msra.mxu1 %vm14218_vm3, %v11918_v62 }
 0x2bf   : > { %11926 = vmatprep.subr.msk.bf16.mxu1 %vm14218_vm3, %v11924_v8 }
 0x2c6   : > { %11929 = vmatpush3.bf16.xpose.msk.msra.mxu1 %vm14218_vm3, %v11924_v8 }
 0x2c7   : > { %11932 = vmatprep.subr.msk.bf16.mxu1 %vm14218_vm3, %v11930_v3 }
 0x2cd   : > { %10947 = vmatmul.mubr.msk.f32.vlgmr.msra.gmra.mrb[48].mxu1 %vm622_vm2, %v14092_v4 }
 0x2ce   : > { %10949 = vmatprep.mubr.msk.f32.mxu1 %vm622_vm2, %v14104_v11  ;;  %11935 = vmatpush3.bf16.xpose.msk.msra.mxu1 %vm14218_vm3, %v11930_v3 }
 0x2cf   : > { %11938 = vmatprep.subr.msk.bf16.mxu1 %vm14218_vm3, %v11936_v15 }
 0x2d1   : > { %10950 = vmatmul.mubr.msk.f32.gmra.mrb[50].mxu1 %vm622_vm2, %v14112_v16 }
 0x2d2   : > { %10952 = vmatprep.mubr.msk.f32.mxu1 %vm622_vm2, %v14128_v27 }
 0x2d5   : > { %10953 = vmatmul.mubr.msk.f32.gmra.mrb[52].mxu1 %vm622_vm2, %v14136_v35 }
 0x2d6   : > { %10955 = vmatprep.mubr.msk.f32.mxu1 %vm622_vm2, %v14152_v57  ;;  %11941 = vmatpush3.bf16.xpose.msk.msra.mxu1 %vm14218_vm3, %v11936_v15 }
 0x2d9   : > { %10956 = vmatmul.mubr.msk.f32.gmra.mrb[54].mxu1 %vm622_vm2, %v14159_v0 }
 0x33c   : > { %v10752_v23 = vpop.f32.mrb[32].mxu1 }
 0x33d   : > { %v14375_v40 = vmul.f32 0.35355338, %v10752_v23  ;;  %v986_v52 = vpop.f32.mrb[33].mxu1 }
 0x33e   : > { %v14383_v14 = vmul.f32 0.35355338, %v986_v52 }
 0x33f   : > { %v1036_v62 = vsel %vm298_vm0, %v14375_v40, -inf }
 0x340   : > { %v10724_v32 = vpop.f32.mrb[16].mxu0  ;;  %1037 = vmax.xlane.f32.xlu1 %v1036_v62  ;;  %v10755_v45 = vpop.f32.mrb[34].mxu1  ;;  %v1033_v52 = vsel %vm298_vm0, %v14383_v14, -inf }
 0x341   : > { %v14379_v8 = vmul.f32 0.35355338, %v10724_v32  ;;  %v721_v18 = vpop.f32.mrb[17].mxu0  ;;  %v996_v63 = vpop.f32.mrb[35].mxu1  ;;  %v14391_v6 = vmul.f32 0.35355338, %v10755_v45 }
 0x342   : > { %v14381_v3 = vmul.f32 0.35355338, %v721_v18  ;;  %v14407_v49 = vmul.f32 0.35355338, %v996_v63 }
 0x343   : > { %v771_v22 = vsel %vm298_vm0, %v14379_v8, -inf }
 0x344   : > { %v10727_v10 = vpop.f32.mrb[18].mxu0  ;;  %772 = vmax.xlane.f32.xlu0 %v771_v22  ;;  %v10758_v15 = vpop.f32.mrb[36].mxu1  ;;  %v768_v23 = vsel %vm298_vm0, %v14381_v3, -inf }
 0x345   : > { %v731_v9 = vpop.f32.mrb[19].mxu0  ;;  %769 = vmax.xlane.f32.xlu1 %v768_v23  ;;  %v1006_v62 = vpop.f32.mrb[37].mxu1  ;;  %v14399_v23 = vmul.f32 0.35355338, %v10727_v10 }
 0x346   : > { %v14389_v32 = vmul.f32 0.35355338, %v731_v9  ;;  %v14395_v18 = vmul.f32 0.35355338, %v1006_v62  ;;  %v1042_v9 = vsel %vm298_vm0, %v14391_v6, -inf }
 0x348   : > { %v10730_v59 = vpop.f32.mrb[20].mxu0  ;;  %1034 = vmax.xlane.f32.xlu0 %v1033_v52  ;;  %v10761_v50 = vpop.f32.mrb[38].mxu1  ;;  %v774_v22 = vsel %vm298_vm0, %v14389_v32, -inf  ;;  %v1045_v62 = vsel %vm298_vm0, %v14395_v18, -inf }
 0x349   : > { %v741_v41 = vpop.f32.mrb[21].mxu0  ;;  %775 = vmax.xlane.f32.xlu1 %v774_v22  ;;  %v1016_v12 = vpop.f32.mrb[39].mxu1  ;;  %v777_v22 = vsel %vm298_vm0, %v14399_v23, -inf }
 0x34a   : > { %v14403_v45 = vmul.f32 0.35355338, %v741_v41  ;;  %v14411_v46 = vmul.f32 0.35355338, %v1016_v12  ;;  %v14415_v41 = vmul.f32 0.35355338, %v10758_v15 }
 0x34c   : > { %v10733_v13 = vpop.f32.mrb[22].mxu0  ;;  %1043 = vmax.xlane.f32.xlu0 %v1042_v9  ;;  %v780_v10 = vsel %vm298_vm0, %v14403_v45, -inf  ;;  %v1039_v9 = vsel %vm298_vm0, %v14407_v49, -inf  ;;  %v1051_v63 = vsel %vm298_vm0, %v14411_v46, -inf  ;;  %v1048_v12 = vsel %vm298_vm0, %v14415_v41, -inf }
 0x34d   : > { %v751_v52 = vpop.f32.mrb[23].mxu0  ;;  %1046 = vmax.xlane.f32.xlu1 %v1045_v62  ;;  %v14423_v62 = vmul.f32 0.35355338, %v10730_v59  ;;  %v14433_v55 = vmul.f32 0.35355338, %v10733_v13 }
 0x34e   : > { %v14419_v56 = vmul.f32 0.35355338, %v751_v52 }
 0x34f   : > { %v783_v52 = vsel %vm298_vm0, %v14423_v62, -inf }
 0x350   : > { %778 = vmax.xlane.f32.xlu0 %v777_v22  ;;  %v786_v15 = vsel %vm298_vm0, %v14419_v56, -inf  ;;  %v14429_v22 = vmul.f32 0.35355338, %v10761_v50  ;;  %v789_v50 = vsel %vm298_vm0, %v14433_v55, -inf }
 0x351   : > { %781 = vmax.xlane.f32.xlu1 %v780_v10 }
 0x352   : > { %v1054_v59 = vsel %vm298_vm0, %v14429_v22, -inf }
 0x354   : > { %1040 = vmax.xlane.f32.xlu0 %v1039_v9 }
 0x355   : > { %1052 = vmax.xlane.f32.xlu1 %v1051_v63 }
 0x358   : > { %1049 = vmax.xlane.f32.xlu0 %v1048_v12 }
 0x359   : > { %787 = vmax.xlane.f32.xlu1 %v786_v15 }
 0x35c   : > { %784 = vmax.xlane.f32.xlu0 %v783_v52 }
 0x35d   : > { %v10836_v10 = vpop.f32.mrb[40].mxu1 }
 0x35e   : > { %v1541_v9 = vpop.f32.mrb[41].mxu1  ;;  %v14437_v25 = vmul.f32 0.35355338, %v10836_v10 }
 0x35f   : > { %v14447_v10 = vmul.f32 0.35355338, %v1541_v9 }
 0x360   : > { %1055 = vmax.xlane.f32.xlu0 %v1054_v59  ;;  %v1591_v52 = vsel %vm298_vm0, %v14437_v25, -inf }
 0x361   : > { %v10839_v63 = vpop.f32.mrb[42].mxu1 }
 0x362   : > { %v1551_v12 = vpop.f32.mrb[43].mxu1  ;;  %v14461_v9 = vmul.f32 0.35355338, %v10839_v63 }
 0x363   : > { %v14449_v59 = vmul.f32 0.35355338, %v1551_v12 }
 0x364   : > { %790 = vmax.xlane.f32.xlu0 %v789_v50  ;;  %v1588_v50 = vsel %vm298_vm0, %v14447_v10, -inf }
 0x365   : > { %v10842_v15 = vpop.f32.mrb[44].mxu1 }
 0x366   : > { %v1561_v53 = vpop.f32.mrb[45].mxu1  ;;  %v14465_v28 = vmul.f32 0.35355338, %v10842_v15 }
 0x367   : > { %v14453_v58 = vmul.f32 0.35355338, %v1561_v53  ;;  %v1597_v53 = vsel %vm298_vm0, %v14461_v9, -inf }
 0x368   : > { %1592 = vmax.xlane.f32.xlu0 %v1591_v52  ;;  %v1594_v52 = vsel %vm298_vm0, %v14449_v59, -inf }
 0x369   : > { %v10845_v13 = vpop.f32.mrb[46].mxu1 }
 0x36a   : > { %v1571_v47 = vpop.f32.mrb[47].mxu1  ;;  %1837 = vrot.lane.b32.xlu1 %v14018_v26, %s13784_s10  ;;  %v1600_v26 = vsel %vm298_vm0, %v14453_v58, -inf }
 0x36b   : > { %v14457_v36 = vmul.f32 0.35355338, %v1571_v47  ;;  %v1603_v47 = vsel %vm298_vm0, %v14465_v28, -inf }
 0x36d   : > { %v1606_v12 = vsel %vm298_vm0, %v14457_v36, -inf }
 0x37e   : > { %12683 = vrot.lane.b32.xlu0 %v14140_v43, %s13778_s29 }
 0x38e   : > { %1589 = vmax.xlane.f32.xlu1 %v1588_v50  ;;  %v14469_v50 = vmul.f32 0.35355338, %v10845_v13 }
 0x392   : > { %1595 = vmax.xlane.f32.xlu1 %v1594_v52 }
 0x396   : > { %1601 = vmax.xlane.f32.xlu1 %v1600_v26  ;;  %v1609_v26 = vsel %vm298_vm0, %v14469_v50, -inf }
 0x39a   : > { %1607 = vmax.xlane.f32.xlu1 %v1606_v12 }
 0x39d   : > { %1598 = vmax.xlane.f32.xlu0 %v1597_v53 }
 0x3a0   : > { %v14473_v52 = vpop.f32.mrb[48].mxu1 }
 0x3a1   : > { %17824 = vst [vmem:[#allocation49_spill] sm:$0xff] %v14473_v52  ;;  %1604 = vmax.xlane.f32.xlu0 %v1603_v47  ;;  %v14475_v63 = vpop.f32.mrb[49].mxu1 }
 0x3a2   : > { %17825 = vst [vmem:[#allocation50_spill] sm:$0xff] %v14475_v63 }
 0x3a4   : > { %v14479_v12 = vpop.f32.mrb[50].mxu1 }
 0x3a5   : > { %17826 = vst [vmem:[#allocation51_spill] sm:$0xff] %v14479_v12  ;;  %1610 = vmax.xlane.f32.xlu0 %v1609_v26  ;;  %v14481_v15 = vpop.f32.mrb[51].mxu1 }
 0x3a6   : > { %17827 = vst [vmem:[#allocation52_spill] sm:$0xff] %v14481_v15 }
 0x3a8   : > { %v14483_v33 = vpop.f32.mrb[52].mxu1 }
 0x3a9   : > { %17828 = vst [vmem:[#allocation53_spill] sm:$0xff] %v14483_v33  ;;  %v14485_v13 = vpop.f32.mrb[53].mxu1 }
 0x3aa   : > { %17829 = vst [vmem:[#allocation54_spill] sm:$0xff] %v14485_v13 }
 0x3ac   : > { %v14487_v53 = vpop.f32.mrb[54].mxu1 }
 0x3ad   : > { %17830 = vst [vmem:[#allocation55_spill] sm:$0xff] %v14487_v53  ;;  %v14489_v21 = vpop.f32.mrb[55].mxu1 }
 0x3ae   : > { %17831 = vst [vmem:[#allocation56_spill] sm:$0xff] %v14489_v21 }
 0x3cd   : > { %v1038_v52 = vpop.xlane.xlu1 %1037 }
 0x3ce   : > { %v1058_v47 = vsub.f32 %v14375_v40, %v1038_v52 }
 0x3d0   : > { %v1067_v63 = vmul.f32 1.442695, %v1058_v47 }
 0x3d1   : > { %v773_v31 = vpop.xlane.xlu0 %772 }
 0x3d2   : > { %13116 = vpow2.f32 %v1067_v63  ;;  %v793_v24 = vsub.f32 %v14379_v8, %v773_v31  ;;  %v770_v12 = vpop.xlane.xlu1 %769 }
 0x3d3   : > { %v792_v15 = vsub.f32 %v14381_v3, %v770_v12 }
 0x3d4   : > { %v802_v26 = vmul.f32 1.442695, %v793_v24 }
 0x3d5   : > { %v1035_v39 = vpop.xlane.xlu0 %1034  ;;  %v800_v53 = vmul.f32 1.442695, %v792_v15 }
 0x3d6   : > { %13118 = vpow2.f32 %v802_v26  ;;  %v1057_v13 = vsub.f32 %v14383_v14, %v1035_v39  ;;  %v776_v33 = vpop.xlane.xlu1 %775 }
 0x3d7   : > { %v794_v14 = vsub.f32 %v14389_v32, %v776_v33 }
 0x3d8   : > { %v1065_v7 = vmul.f32 1.442695, %v1057_v13 }
 0x3d9   : > { %v1044_v21 = vpop.xlane.xlu0 %1043 }
 0x3da   : > { %13120 = vpow2.f32 %v1065_v7  ;;  %v1060_v40 = vsub.f32 %v14391_v6, %v1044_v21  ;;  %v1047_v31 = vpop.xlane.xlu1 %1046 }
 0x3db   : > { %13122 = vpow2.f32 %v800_v53  ;;  %v804_v53 = vmul.f32 1.442695, %v794_v14 }
 0x3dc   : > { %v14496_v52 = vpop.eup %13116  ;;  %v1071_v63 = vmul.f32 1.442695, %v1060_v40 }
 0x3dd   : > { %v779_v8 = vpop.xlane.xlu0 %778  ;;  %v1084_v24 = vsel %vm298_vm0, %v14496_v52, 0.0 }
 0x3de   : > { %13124 = vpow2.f32 %v1071_v63  ;;  %v795_v3 = vsub.f32 %v14399_v23, %v779_v8  ;;  %1085 = vadd.xlane.f32.xlu0 %v1084_v24  ;;  %v782_v21 = vpop.xlane.xlu1 %781  ;;  %v1061_v8 = vsub.f32 %v14395_v18, %v1047_v31 }
 0x3e0   : > { %v14501_v39 = vpop.eup %13118  ;;  %v806_v7 = vmul.f32 1.442695, %v795_v3 }
 0x3e1   : > { %v1041_v12 = vpop.xlane.xlu0 %1040  ;;  %v819_v6 = vsel %vm298_vm0, %v14501_v39, 0.0 }
 0x3e2   : > { %13126 = vpow2.f32 %v806_v7  ;;  %v1059_v15 = vsub.f32 %v14407_v49, %v1041_v12  ;;  %820 = vadd.xlane.f32.xlu0 %v819_v6  ;;  %v1053_v63 = vpop.xlane.xlu1 %1052  ;;  %v1073_v6 = vmul.f32 1.442695, %v1061_v8 }
 0x3e4   : > { %v14507_v13 = vpop.eup %13120  ;;  %v1069_v47 = vmul.f32 1.442695, %v1059_v15  ;;  %v796_v15 = vsub.f32 %v14403_v45, %v782_v21 }
 0x3e5   : > { %v1050_v23 = vpop.xlane.xlu0 %1049  ;;  %v1081_v26 = vsel %vm298_vm0, %v14507_v13, 0.0  ;;  %v14511_v40 = vpop.eup %13122 }
 0x3e6   : > { %13128 = vpow2.f32 %v1069_v47  ;;  %v1062_v33 = vsub.f32 %v14415_v41, %v1050_v23  ;;  %1082 = vadd.xlane.f32.xlu1 %v1081_v26  ;;  %v816_v14 = vsel %vm298_vm0, %v14511_v40, 0.0  ;;  %v788_v31 = vpop.xlane.xlu1 %787 }
 0x3e7   : > { %13130 = vpow2.f32 %v804_v53 }
 0x3e8   : > { %v14514_v32 = vpop.eup %13124  ;;  %v1075_v49 = vmul.f32 1.442695, %v1062_v33  ;;  %v808_v33 = vmul.f32 1.442695, %v796_v15 }
 0x3e9   : > { %v785_v24 = vpop.xlane.xlu0 %784  ;;  %v1090_v3 = vsel %vm298_vm0, %v14514_v32, 0.0 }
 0x3ea   : > { %13132 = vpow2.f32 %v1075_v49  ;;  %v797_v7 = vsub.f32 %v14423_v62, %v785_v24  ;;  %1091 = vadd.xlane.f32.xlu0 %v1090_v3  ;;  %817 = vadd.xlane.f32.xlu1 %v816_v14  ;;  %v1063_v62 = vsub.f32 %v14411_v46, %v1053_v63  ;;  %v798_v49 = vsub.f32 %v14419_v56, %v788_v31 }
 0x3ec   : > { %v14522_v41 = vpop.eup %13126  ;;  %v810_v12 = vmul.f32 1.442695, %v797_v7  ;;  %v1077_v3 = vmul.f32 1.442695, %v1063_v62  ;;  %v812_v46 = vmul.f32 1.442695, %v798_v49 }
 0x3ed   : > { %v1056_v53 = vpop.xlane.xlu0 %1055  ;;  %v825_v18 = vsel %vm298_vm0, %v14522_v41, 0.0 }
 0x3ee   : > { %13134 = vpow2.f32 %v810_v12  ;;  %v1064_v47 = vsub.f32 %v14429_v22, %v1056_v53  ;;  %826 = vadd.xlane.f32.xlu0 %v825_v18 }
 0x3ef   : > { %13136 = vpow2.f32 %v1073_v6 }
 0x3f0   : > { %v14528_v23 = vpop.eup %13128  ;;  %v1079_v26 = vmul.f32 1.442695, %v1064_v47 }
 0x3f1   : > { %v791_v8 = vpop.xlane.xlu0 %790  ;;  %v1087_v45 = vsel %vm298_vm0, %v14528_v23, 0.0  ;;  %v14534_v21 = vpop.eup %13130 }
 0x3f2   : > { %13138 = vpow2.f32 %v1079_v26  ;;  %v799_v24 = vsub.f32 %v14433_v55, %v791_v8  ;;  %1088 = vadd.xlane.f32.xlu1 %v1087_v45  ;;  %v822_v7 = vsel %vm298_vm0, %v14534_v21, 0.0 }
 0x3f3   : > { %13140 = vpow2.f32 %v808_v33 }
 0x3f4   : > { %v14537_v22 = vpop.eup %13132  ;;  %v814_v14 = vmul.f32 1.442695, %v799_v24 }
 0x3f5   : > { %v1593_v63 = vpop.xlane.xlu0 %1592  ;;  %v1096_v56 = vsel %vm298_vm0, %v14537_v22, 0.0 }
 0x3f6   : > { %13142 = vpow2.f32 %v814_v14  ;;  %v1613_v12 = vsub.f32 %v14437_v25, %v1593_v63  ;;  %1097 = vadd.xlane.f32.xlu0 %v1096_v56  ;;  %823 = vadd.xlane.f32.xlu1 %v822_v7 }
 0x3f7   : > { %13144 = vpow2.f32 %v1077_v3 }
 0x3f8   : > { %v14544_v55 = vpop.eup %13134  ;;  %v1622_v6 = vmul.f32 1.442695, %v1613_v12  ;;  %13146 = vpow2.f32 %v812_v46  ;;  %v14582_v12 = vpop.permute.xlu1 %1837 }
 0x3f9   : > { %v12684_v15 = vpop.permute.xlu0 %12683  ;;  %v831_v53 = vsel %vm298_vm0, %v14544_v55, 0.0  ;;  %v14548_v47 = vpop.eup %13136 }
 0x3fa   : > { %v12686_v18 = vunpack.i.h.bf16 %v12684_v15  ;;  %v12685_v31 = vunpack.i.l.bf16 %v12684_v15  ;;  %832 = vadd.xlane.f32.xlu1 %v831_v53  ;;  %13148 = vpow2.f32 %v1622_v6  ;;  %v1093_v33 = vsel %vm298_vm0, %v14548_v47, 0.0 }
 0x3fc   : > { %v14550_v62 = vpop.eup %13138  ;;  %v11942_v25 = vpack.c.bf16 %v12686_v18, %v12685_v31 }
 0x3fd   : > { %v1102_v26 = vsel %vm298_vm0, %v14550_v62, 0.0  ;;  %v14558_v49 = vpop.eup %13140 }
 0x3fe   : > { %11944 = vmatprep.subr.msk.bf16.mxu1 %vm14218_vm3, %v11942_v25  ;;  %1103 = vadd.xlane.f32.xlu0 %v1102_v26  ;;  %v828_v3 = vsel %vm298_vm0, %v14558_v49, 0.0 }
 0x3ff   : > { %1094 = vadd.xlane.f32.xlu1 %v1093_v33  ;;  %11947 = vmatpush3.bf16.xpose.msk.msra.mxu1 %vm14218_vm3, %v11942_v25 }
 0x400   : > { %v14562_v8 = vpop.eup %13142 }
 0x401   : > { %v837_v45 = vsel %vm298_vm0, %v14562_v8, 0.0  ;;  %v14566_v24 = vpop.eup %13144 }
 0x402   : > { %838 = vadd.xlane.f32.xlu0 %v837_v45  ;;  %v14570_v14 = vpop.eup %13146  ;;  %v1099_v46 = vsel %vm298_vm0, %v14566_v24, 0.0 }
 0x403   : > { %829 = vadd.xlane.f32.xlu1 %v828_v3  ;;  %v834_v56 = vsel %vm298_vm0, %v14570_v14, 0.0 }
 0x404   : > { %v14574_v63 = vpop.eup %13148 }
 0x405   : > { %v1639_v7 = vsel %vm298_vm0, %v14574_v63, 0.0 }
 0x406   : > { %1100 = vadd.xlane.f32.xlu0 %v1099_v46 }
 0x407   : > { %835 = vadd.xlane.f32.xlu1 %v834_v56 }
 0x40a   : > { %1640 = vadd.xlane.f32.xlu0 %v1639_v7 }
 0x418   : > { %1841 = vrot.lane.b32.xlu1 %v14036_v34, %s13784_s10 }
 0x41b   : > { %v1590_v6 = vpop.xlane.xlu1 %1589 }
 0x41c   : > { %v1612_v15 = vsub.f32 %v14447_v10, %v1590_v6 }
 0x41e   : > { %v1620_v31 = vmul.f32 1.442695, %v1612_v15 }
 0x41f   : > { %v1596_v53 = vpop.xlane.xlu1 %1595 }
 0x420   : > { %1839 = vrot.lane.b32.xlu0 %v14024_v29, %s13784_s10  ;;  %v1614_v18 = vsub.f32 %v14449_v59, %v1596_v53  ;;  %13150 = vpow2.f32 %v1620_v31 }
 0x422   : > { %v1624_v33 = vmul.f32 1.442695, %v1614_v18 }
 0x423   : > { %v1602_v45 = vpop.xlane.xlu1 %1601 }
 0x424   : > { %13152 = vpow2.f32 %v1624_v33  ;;  %v1616_v56 = vsub.f32 %v14453_v58, %v1602_v45 }
 0x426   : > { %v1628_v7 = vmul.f32 1.442695, %v1616_v56 }
 0x42a   : > { %v1599_v25 = vpop.xlane.xlu0 %1598  ;;  %v14592_v6 = vpop.eup %13150 }
 0x42b   : > { %v1615_v26 = vsub.f32 %v14461_v9, %v1599_v25  ;;  %v1636_v53 = vsel %vm298_vm0, %v14592_v6, 0.0 }
 0x42d   : > { %v1626_v3 = vmul.f32 1.442695, %v1615_v26 }
 0x42e   : > { %v1605_v34 = vpop.xlane.xlu0 %1604  ;;  %v14594_v15 = vpop.eup %13152 }
 0x42f   : > { %v1617_v46 = vsub.f32 %v14465_v28, %v1605_v34  ;;  %13154 = vpow2.f32 %v1626_v3  ;;  %v1642_v58 = vsel %vm298_vm0, %v14594_v15, 0.0  ;;  %v1608_v3 = vpop.xlane.xlu1 %1607 }
 0x430   : > { %v1618_v34 = vsub.f32 %v14457_v36, %v1608_v3  ;;  %v12615_v3 = vunpack.i.l.bf16 %v14309_v17 }
 0x431   : > { %v1630_v29 = vmul.f32 1.442695, %v1617_v46 }
 0x432   : > { %v1611_v10 = vpop.xlane.xlu0 %1610  ;;  %v1632_v46 = vmul.f32 1.442695, %v1618_v34 }
 0x433   : > { %13156 = vpow2.f32 %v1630_v29  ;;  %v1619_v59 = vsub.f32 %v14469_v50, %v1611_v10 }
 0x434   : > { %13158 = vpow2.f32 %v1628_v7 }
 0x435   : > { %v1634_v9 = vmul.f32 1.442695, %v1619_v59 }
 0x437   : > { %13160 = vpow2.f32 %v1634_v9 }
 0x438   : > { %13162 = vpow2.f32 %v1632_v46 }
 0x439   : > { %v14598_v28 = vpop.eup %13154 }
 0x43a   : > { %v1645_v50 = vsel %vm298_vm0, %v14598_v28, 0.0 }
 0x43c   : > { %1637 = vadd.xlane.f32.xlu1 %v1636_v53 }
 0x43d   : > { %v14602_v18 = vpop.eup %13156 }
 0x43e   : > { %v1651_v31 = vsel %vm298_vm0, %v14602_v18, 0.0  ;;  %v14608_v25 = vpop.eup %13158 }
 0x43f   : > { %1643 = vadd.xlane.f32.xlu0 %v1642_v58  ;;  %v1648_v26 = vsel %vm298_vm0, %v14608_v25, 0.0 }
 0x440   : > { %1646 = vadd.xlane.f32.xlu1 %v1645_v50 }
 0x441   : > { %v14612_v33 = vpop.eup %13160 }
 0x442   : > { %v1657_v45 = vsel %vm298_vm0, %v14612_v33, 0.0  ;;  %v14627_v29 = vpop.eup %13162 }
 0x443   : > { %1652 = vadd.xlane.f32.xlu0 %v1651_v31 }
 0x447   : > { %1649 = vadd.xlane.f32.xlu0 %v1648_v26 }
 0x44b   : > { %1658 = vadd.xlane.f32.xlu0 %v1657_v45  ;;  %v12616_v45 = vunpack.i.h.bf16 %v14309_v17 }
 0x451   : > { %12688 = vrot.lane.b32.xlu1 %v14163_v1, %s13778_s29 }
 0x461   : > { %1843 = vrot.lane.b32.xlu0 %v14040_v37, %s13784_s10  ;;  %v1654_v37 = vsel %vm298_vm0, %v14627_v29, 0.0 }
 0x465   : > { %1845 = vrot.lane.b32.xlu0 %v14050_v44, %s13784_s10 }
 0x469   : > { %1849 = vrot.lane.b32.xlu0 %v14068_v54, %s13784_s10 }
 0x46b   : > { %v1086_v56 = vpop.xlane.xlu0 %1085 }
 0x46c   : > { %13164 = vrcp.f32 %v1086_v56 }
 0x46d   : > { %2520 = vrot.lane.b32.xlu0 %v14085_v2, %s13779_s30 }
 0x46f   : > { %v821_v44 = vpop.xlane.xlu0 %820 }
 0x471   : > { %2524 = vrot.lane.b32.xlu0 %v14104_v11, %s13779_s30 }
 0x473   : > { %v1083_v36 = vpop.xlane.xlu1 %1082 }
 0x474   : > { %13166 = vrcp.f32 %v1083_v36 }
 0x475   : > { %1655 = vadd.xlane.f32.xlu1 %v1654_v37  ;;  %2526 = vrot.lane.b32.xlu0 %v14112_v16, %s13779_s30 }
 0x476   : > { %v13165_v7 = vpop.eup %13164 }
 0x477   : > { %v818_v54 = vpop.xlane.xlu1 %817  ;;  %v1092_v10 = vpop.xlane.xlu0 %1091  ;;  %v1114_v58 = vmul.f32 %v13165_v7, %v14496_v52 }
 0x478   : > { %13168 = vrcp.f32 %v1092_v10 }
 0x479   : > { %2530 = vrot.lane.b32.xlu0 %v14136_v35, %s13779_s30 }
 0x47b   : > { %v827_v50 = vpop.xlane.xlu0 %826 }
 0x47d   : > { %12698 = vrot.lane.b32.xlu0 %v14116_v20, %s13780_s6 }
 0x47e   : > { %v13167_v59 = vpop.eup %13166 }
 0x47f   : > { %v1089_v9 = vpop.xlane.xlu1 %1088  ;;  %v1113_v53 = vmul.f32 %v13167_v59, %v14507_v13 }
 0x480   : > { %13170 = vrcp.f32 %v1089_v9 }
 0x481   : > { %12703 = vrot.lane.b32.xlu0 %v14140_v43, %s13780_s6  ;;  %10778 = vmatprep.mubr.msk.f32.mxu0 %vm298_vm0, %v1113_v53  ;;  %v12621_v53 = vunpack.i.h.bf16 %v14324_v19 }
 0x482   : > { %10779 = vmatmul.mubr.msk.f32.vlgmr.msra.gmra.mrb[24].mxu0 %vm298_vm0, %v1114_v58  ;;  %v13169_v26 = vpop.eup %13168  ;;  %v12620_v58 = vunpack.i.l.bf16 %v14324_v19 }
 0x483   : > { %11813 = vmatpush3.bf16.msra.mxu0 %v14026_v30  ;;  %v824_v31 = vpop.xlane.xlu1 %823  ;;  %v1098_v52 = vpop.xlane.xlu0 %1097  ;;  %v1116_v46 = vmul.f32 %v13169_v26, %v14514_v32 }
 0x484   : > { %11815 = vmatprep.subr.bf16.mxu0 %v14042_v38  ;;  %13172 = vrcp.f32 %v1098_v52  ;;  %v11854_v19 = vpack.c.bf16 %v12621_v53, %v12620_v58 }
 0x485   : > { %3075 = vrot.lane.b32.xlu0 %v14085_v2, %s13781_s7 }
 0x486   : > { %1847 = vrot.lane.b32.xlu1 %v14056_v48, %s13784_s10 }
 0x487   : > { %11817 = vmatpush3.bf16.msra.mxu0 %v14042_v38  ;;  %v833_v13 = vpop.xlane.xlu1 %832 }
 0x488   : > { %11819 = vmatprep.subr.bf16.mxu0 %v14058_v51 }
 0x489   : > { %3079 = vrot.lane.b32.xlu0 %v14104_v11, %s13781_s7 }
 0x48a   : > { %v13171_v30 = vpop.eup %13170  ;;  %1851 = vrot.lane.b32.xlu1 %v14074_v60, %s13784_s10 }
 0x48b   : > { %11821 = vmatpush3.bf16.msra.mxu0 %v14058_v51  ;;  %v1104_v48 = vpop.xlane.xlu0 %1103  ;;  %v1115_v38 = vmul.f32 %v13171_v30, %v14528_v23  ;;  %v11850_v51 = vpack.c.bf16 %v12616_v45, %v12615_v3  ;;  %v17833_v45 = vld [vmem:[#allocation46_spill] sm:$0xff] }
 0x48c   : > { %11823 = vmatprep.subr.bf16.mxu0 %v14076_v61  ;;  %v1095_v34 = vpop.xlane.xlu1 %1094  ;;  %v12631_v3 = vunpack.i.h.bf16 %v17833_v45 }
 0x48d   : > { %13174 = vrcp.f32 %v1095_v34  ;;  %3083 = vrot.lane.b32.xlu0 %v14128_v27, %s13781_s7  ;;  %10781 = vmatprep.mubr.msk.f32.mxu0 %vm298_vm0, %v1115_v38 }
 0x48e   : > { %2522 = vrot.lane.b32.xlu1 %v14092_v4, %s13779_s30  ;;  %10782 = vmatmul.mubr.msk.f32.gmra.mrb[26].mxu0 %vm298_vm0, %v1116_v46  ;;  %13176 = vrcp.f32 %v818_v54  ;;  %v13173_v32 = vpop.eup %13172  ;;  %v17834_v46 = vld [vmem:[#allocation44_spill] sm:$0xff] }
 0x48f   : > { %11825 = vmatpush3.bf16.msra.mxu0 %v14076_v61  ;;  %v839_v60 = vpop.xlane.xlu0 %838  ;;  %13178 = vrcp.f32 %v1104_v48  ;;  %v1118_v36 = vmul.f32 %v13173_v32, %v14537_v22  ;;  %v12630_v48 = vunpack.i.l.bf16 %v17833_v45 }
 0x490   : > { %11851 = vmatprep.subr.bf16.mxu0 %v11850_v51  ;;  %v830_v56 = vpop.xlane.xlu1 %829 }
 0x491   : > { %3087 = vrot.lane.b32.xlu0 %v14152_v57, %s13781_s7 }
 0x492   : > { %12693 = vrot.lane.b32.xlu1 %v14096_v5, %s13780_s6 }
 0x493   : > { %v1101_v17 = vpop.xlane.xlu0 %1100 }
 0x494   : > { %13180 = vrcp.f32 %v1101_v17  ;;  %v836_v10 = vpop.xlane.xlu1 %835  ;;  %v11862_v17 = vpack.c.bf16 %v12631_v3, %v12630_v48  ;;  %v17837_v48 = vld [vmem:[#allocation48_spill] sm:$0xff] }
 0x495   : > { %13182 = vrcp.f32 %v821_v44 }
 0x496   : > { %2528 = vrot.lane.b32.xlu1 %v14128_v27, %s13779_s30  ;;  %13184 = vrcp.f32 %v824_v31 }
 0x497   : > { %v13175_v23 = vpop.eup %13174  ;;  %13186 = vrcp.f32 %v827_v50 }
 0x498   : > { %v1117_v61 = vmul.f32 %v13175_v23, %v14548_v47  ;;  %v13177_v37 = vpop.eup %13176  ;;  %13188 = vrcp.f32 %v830_v56  ;;  %v14724_v23 = vpop.permute.xlu1 %1841 }
 0x499   : > { %v13179_v54 = vpop.eup %13178  ;;  %13190 = vrcp.f32 %v833_v13  ;;  %v848_v59 = vmul.f32 %v13177_v37, %v14511_v40  ;;  %v17832_v40 = vld [vmem:[#allocation41_spill] sm:$0xff] }
 0x49a   : > { %2532 = vrot.lane.b32.xlu1 %v14152_v57, %s13779_s30  ;;  %10784 = vmatprep.mubr.msk.f32.mxu0 %vm298_vm0, %v1117_v61  ;;  %13192 = vrcp.f32 %v836_v10  ;;  %v1120_v22 = vmul.f32 %v13179_v54, %v14550_v62  ;;  %v12626_v52 = vunpack.i.h.bf16 %v17832_v40  ;;  %v12625_v13 = vunpack.i.l.bf16 %v17832_v40 }
 0x49b   : > { %10785 = vmatmul.mubr.msk.f32.gmra.mrb[28].mxu0 %vm298_vm0, %v1118_v36  ;;  %13194 = vrcp.f32 %v839_v60  ;;  %v12635_v60 = vunpack.i.l.bf16 %v17834_v46 }
 0x49c   : > { %v11858_v38 = vpack.c.bf16 %v12626_v52, %v12625_v13 }
 0x49e   : > { %v13181_v7 = vpop.eup %13180  ;;  %2534 = vrot.lane.b32.xlu1 %v14159_v0, %s13779_s30 }
 0x49f   : > { %v1119_v47 = vmul.f32 %v13181_v7, %v14566_v24  ;;  %v13183_v44 = vpop.eup %13182 }
 0x4a0   : > { %v13185_v9 = vpop.eup %13184  ;;  %v849_v62 = vmul.f32 %v13183_v44, %v14501_v39  ;;  %v17835_v44 = vld [vmem:[#allocation45_spill] sm:$0xff] }
 0x4a1   : > { %10787 = vmatprep.mubr.msk.f32.mxu0 %vm298_vm0, %v1119_v47  ;;  %v13187_v24 = vpop.eup %13186  ;;  %v850_v50 = vmul.f32 %v13185_v9, %v14534_v21  ;;  %v12640_v9 = vunpack.i.l.bf16 %v17835_v44 }
 0x4a2   : > { %12708 = vrot.lane.b32.xlu1 %v14163_v1, %s13780_s6  ;;  %10788 = vmatmul.mubr.msk.f32.gmra.mrb[30].mxu0 %vm298_vm0, %v1120_v22  ;;  %v13189_v31 = vpop.eup %13188  ;;  %v851_v39 = vmul.f32 %v13187_v24, %v14522_v41 }
 0x4a3   : > { %10806 = vmatprep.mubr.msk.f32.mxu0 %vm298_vm0, %v848_v59  ;;  %v13191_v26 = vpop.eup %13190  ;;  %v852_v21 = vmul.f32 %v13189_v31, %v14558_v49  ;;  %v12641_v59 = vunpack.i.h.bf16 %v17835_v44 }
 0x4a4   : > { %v13193_v30 = vpop.eup %13192  ;;  %v853_v41 = vmul.f32 %v13191_v26, %v14544_v55 }
 0x4a5   : > { %v13195_v34 = vpop.eup %13194  ;;  %v854_v49 = vmul.f32 %v13193_v30, %v14570_v14  ;;  %v1641_v14 = vpop.xlane.xlu0 %1640  ;;  %v11872_v40 = vpack.c.bf16 %v12641_v59, %v12640_v9 }
 0x4a6   : > { %3077 = vrot.lane.b32.xlu1 %v14092_v4, %s13781_s7  ;;  %10807 = vmatmul.mubr.msk.f32.vlgmr.msra.gmra.mrb[24].mxu0 %vm298_vm0, %v849_v62  ;;  %v855_v32 = vmul.f32 %v13195_v34, %v14562_v8  ;;  %13196 = vrcp.f32 %v1641_v14 }
 0x4a7   : > { %11853 = vmatpush3.bf16.msra.mxu0 %v11850_v51  ;;  %10809 = vmatprep.mubr.msk.f32.mxu0 %vm298_vm0, %v850_v50  ;;  %v12636_v51 = vunpack.i.h.bf16 %v17834_v46 }
 0x4a8   : > { %11855 = vmatprep.subr.bf16.mxu0 %v11854_v19 }
 0x4a9   : > { %v11866_v55 = vpack.c.bf16 %v12636_v51, %v12635_v60  ;;  %v14726_v56 = vpop.permute.xlu0 %1839 }
 0x4aa   : > { %3081 = vrot.lane.b32.xlu1 %v14112_v16, %s13781_s7  ;;  %10810 = vmatmul.mubr.msk.f32.gmra.mrb[26].mxu0 %vm298_vm0, %v851_v39 }
 0x4ab   : > { %11857 = vmatpush3.bf16.msra.mxu0 %v11854_v19  ;;  %10812 = vmatprep.mubr.msk.f32.mxu0 %vm298_vm0, %v852_v21 }
 0x4ac   : > { %11859 = vmatprep.subr.bf16.mxu0 %v11858_v38 }
 0x4ae   : > { %3085 = vrot.lane.b32.xlu1 %v14136_v35, %s13781_s7  ;;  %10813 = vmatmul.mubr.msk.f32.gmra.mrb[28].mxu0 %vm298_vm0, %v853_v41  ;;  %v12650_v41 = vunpack.i.l.bf16 %v17837_v48 }
 0x4af   : > { %11861 = vmatpush3.bf16.msra.mxu0 %v11858_v38  ;;  %10815 = vmatprep.mubr.msk.f32.mxu0 %vm298_vm0, %v854_v49  ;;  %v12651_v38 = vunpack.i.h.bf16 %v17837_v48 }
 0x4b0   : > { %11863 = vmatprep.subr.bf16.mxu0 %v11862_v17  ;;  %v13197_v47 = vpop.eup %13196 }
 0x4b1   : > { %v1669_v24 = vmul.f32 %v13197_v47, %v14574_v63  ;;  %v11884_v49 = vpack.c.bf16 %v12651_v38, %v12650_v41 }
 0x4b2   : > { %3089 = vrot.lane.b32.xlu1 %v14159_v0, %s13781_s7  ;;  %10816 = vmatmul.mubr.msk.f32.gmra.mrb[30].mxu0 %vm298_vm0, %v855_v32 }
 0x4b3   : > { %11865 = vmatpush3.bf16.msra.mxu0 %v11862_v17 }
 0x4b4   : > { %11868 = vmatprep.subr.msk.bf16.mxu0 %vm14218_vm3, %v11866_v55 }
 0x4c9   : > { %v1638_v61 = vpop.xlane.xlu1 %1637 }
 0x4ca   : > { %13198 = vrcp.f32 %v1638_v61 }
 0x4cc   : > { %v1644_v36 = vpop.xlane.xlu0 %1643 }
 0x4cd   : > { %13200 = vrcp.f32 %v1644_v36  ;;  %v1647_v8 = vpop.xlane.xlu1 %1646 }
 0x4ce   : > { %13202 = vrcp.f32 %v1647_v8 }
 0x4d0   : > { %v1653_v37 = vpop.xlane.xlu0 %1652 }
 0x4d1   : > { %v12689_v54 = vpop.permute.xlu1 %12688  ;;  %13204 = vrcp.f32 %v1653_v37 }
 0x4d2   : > { %v12691_v10 = vunpack.i.h.bf16 %v12689_v54  ;;  %v12690_v7 = vunpack.i.l.bf16 %v12689_v54 }
 0x4d4   : > { %v13199_v22 = vpop.eup %13198  ;;  %v11948_v53 = vpack.c.bf16 %v12691_v10, %v12690_v7  ;;  %v1650_v58 = vpop.xlane.xlu0 %1649 }
 0x4d5   : > { %13206 = vrcp.f32 %v1650_v58  ;;  %v1668_v62 = vmul.f32 %v13199_v22, %v14592_v6  ;;  %v17836_v6 = vld [vmem:[#allocation47_spill] sm:$0xff] }
 0x4d6   : > { %11950 = vmatprep.subr.msk.bf16.mxu1 %vm14218_vm3, %v11948_v53  ;;  %v12646_v19 = vunpack.i.h.bf16 %v17836_v6  ;;  %v12645_v39 = vunpack.i.l.bf16 %v17836_v6 }
 0x4d7   : > { %v13201_v50 = vpop.eup %13200  ;;  %10862 = vmatprep.mubr.msk.f32.mxu0 %vm298_vm0, %v1668_v62  ;;  %11953 = vmatpush3.bf16.xpose.msk.msra.mxu1 %vm14218_vm3, %v11948_v53 }
 0x4d8   : > { %v13203_v31 = vpop.eup %13202  ;;  %10863 = vmatmul.mubr.msk.f32.vlgmr.msra.gmra.mrb[24].mxu0 %vm298_vm0, %v1669_v24  ;;  %v1659_v52 = vpop.xlane.xlu0 %1658  ;;  %v1670_v13 = vmul.f32 %v13201_v50, %v14594_v15  ;;  %v11878_v15 = vpack.c.bf16 %v12646_v19, %v12645_v39 }
 0x4d9   : > { %11871 = vmatpush3.bf16.xpose.msk.msra.mxu0 %vm14218_vm3, %v11866_v55  ;;  %v1671_v63 = vmul.f32 %v13203_v31, %v14598_v28  ;;  %13208 = vrcp.f32 %v1659_v52 }
 0x4da   : > { %11874 = vmatprep.subr.msk.bf16.mxu0 %vm14218_vm3, %v11872_v40  ;;  %10865 = vmatprep.mubr.msk.f32.mxu0 %vm298_vm0, %v1670_v13 }
 0x4db   : > { %v13205_v21 = vpop.eup %13204 }
 0x4dc   : > { %10866 = vmatmul.mubr.msk.f32.gmra.mrb[26].mxu0 %vm298_vm0, %v1671_v63  ;;  %v1844_v26 = vpop.permute.xlu0 %1843  ;;  %v1673_v28 = vmul.f32 %v13205_v21, %v14602_v18 }
 0x4df   : > { %v13207_v30 = vpop.eup %13206 }
 0x4e0   : > { %v1846_v45 = vpop.permute.xlu0 %1845  ;;  %v1672_v3 = vmul.f32 %v13207_v30, %v14608_v25 }
 0x4e1   : > { %11877 = vmatpush3.bf16.xpose.msk.msra.mxu0 %vm14218_vm3, %v11872_v40 }
 0x4e2   : > { %11880 = vmatprep.subr.msk.bf16.mxu0 %vm14218_vm3, %v11878_v15  ;;  %10868 = vmatprep.mubr.msk.f32.mxu0 %vm298_vm0, %v1672_v3 }
 0x4e3   : > { %10869 = vmatmul.mubr.msk.f32.gmra.mrb[28].mxu0 %vm298_vm0, %v1673_v28  ;;  %v13209_v55 = vpop.eup %13208 }
 0x4e4   : > { %v1850_v34 = vpop.permute.xlu0 %1849  ;;  %v1675_v8 = vmul.f32 %v13209_v55, %v14612_v33 }
 0x4e8   : > { %v2521_v46 = vpop.permute.xlu0 %2520 }
 0x4e9   : > { %11883 = vmatpush3.bf16.xpose.msk.msra.mxu0 %vm14218_vm3, %v11878_v15  ;;  %10974 = vmatprep.mubr.msk.f32.mxu1 %vm622_vm2, %v2521_v46 }
 0x4ea   : > { %11886 = vmatprep.subr.msk.bf16.mxu0 %vm14218_vm3, %v11884_v49 }
 0x4ec   : > { %v2525_v18 = vpop.permute.xlu0 %2524 }
 0x4f0   : > { %v2527_v51 = vpop.permute.xlu0 %2526 }
 0x4f1   : > { %11889 = vmatpush3.bf16.xpose.msk.msra.mxu0 %vm14218_vm3, %v11884_v49 }
 0x4f4   : > { %v2531_v32 = vpop.permute.xlu0 %2530 }
 0x4f8   : > { %v12699_v37 = vpop.permute.xlu0 %12698 }
 0x4f9   : > { %v12700_v47 = vunpack.i.l.bf16 %v12699_v37 }
 0x4fc   : > { %v12704_v44 = vpop.permute.xlu0 %12703 }
 0x4fd   : > { %v12705_v59 = vunpack.i.l.bf16 %v12704_v44 }
 0x500   : > { %v3076_v53 = vpop.permute.xlu0 %3075 }
 0x502   : > { %v1656_v25 = vpop.xlane.xlu1 %1655 }
 0x503   : > { %13210 = vrcp.f32 %v1656_v25 }
 0x504   : > { %v3080_v52 = vpop.permute.xlu0 %3079 }
 0x506   : > { %v1848_v60 = vpop.permute.xlu1 %1847 }
 0x508   : > { %v3084_v63 = vpop.permute.xlu0 %3083 }
 0x50a   : > { %v1852_v17 = vpop.permute.xlu1 %1851 }
 0x50c   : > { %v3088_v19 = vpop.permute.xlu0 %3087 }
 0x50d   : > { %v13211_v14 = vpop.eup %13210 }
 0x50e   : > { %v2523_v61 = vpop.permute.xlu1 %2522  ;;  %v1674_v36 = vmul.f32 %v13211_v14, %v14627_v29  ;;  %v12701_v29 = vunpack.i.h.bf16 %v12699_v37 }
 0x50f   : > { %10975 = vmatmul.mubr.msk.f32.vlgmr.msra.gmra.mrb[56].mxu1 %vm622_vm2, %v2523_v61 }
 0x510   : > { %10871 = vmatprep.mubr.msk.f32.mxu0 %vm298_vm0, %v1674_v36  ;;  %10977 = vmatprep.mubr.msk.f32.mxu1 %vm622_vm2, %v2525_v18 }
 0x511   : > { %10872 = vmatmul.mubr.msk.f32.gmra.mrb[30].mxu0 %vm298_vm0, %v1675_v8 }
 0x512   : > { %10890 = vmatprep.mubr.msk.f32.mxu0 %vm622_vm2, %v14582_v12  ;;  %v12694_v54 = vpop.permute.xlu1 %12693  ;;  %v11992_v12 = vpack.c.bf16 %v12701_v29, %v12700_v47  ;;  %v17838_v47 = vld [vmem:[#allocation49_spill] sm:$0xff] }
 0x513   : > { %v12696_v10 = vunpack.i.h.bf16 %v12694_v54  ;;  %v12695_v7 = vunpack.i.l.bf16 %v12694_v54  ;;  %10978 = vmatmul.mubr.msk.f32.gmra.mrb[58].mxu1 %vm622_vm2, %v2527_v51 }
 0x515   : > { %v11986_v22 = vpack.c.bf16 %v12696_v10, %v12695_v7  ;;  %10891 = vmatmul.mubr.msk.f32.vlgmr.msra.gmra.mrb[32].mxu0 %vm622_vm2, %v14726_v56  ;;  %v12706_v56 = vunpack.i.h.bf16 %v12704_v44  ;;  %v17839_v44 = vld [vmem:[#allocation50_spill] sm:$0xff] }
 0x516   : > { %10893 = vmatprep.mubr.msk.f32.mxu0 %vm622_vm2, %v14724_v23  ;;  %v2529_v33 = vpop.permute.xlu1 %2528 }
 0x517   : > { %10980 = vmatprep.mubr.msk.f32.mxu1 %vm622_vm2, %v2529_v33  ;;  %11988 = vmatprep.subr.msk.bf16.mxu1 %vm14218_vm3, %v11986_v22  ;;  %v11998_v58 = vpack.c.bf16 %v12706_v56, %v12705_v59  ;;  %v17840_v59 = vld [vmem:[#allocation51_spill] sm:$0xff] }
 0x518   : > { %10981 = vmatmul.mubr.msk.f32.gmra.mrb[60].mxu1 %vm622_vm2, %v2531_v32 }
 0x519   : > { %11991 = vmatpush3.bf16.xpose.msk.msra.mxu1 %vm14218_vm3, %v11986_v22  ;;  %10894 = vmatmul.mubr.msk.f32.gmra.mrb[34].mxu0 %vm622_vm2, %v1844_v26  ;;  %v14854_v22 = vmul.f32 0.35355338, %v17838_v47 }
 0x51a   : > { %11994 = vmatprep.subr.msk.bf16.mxu1 %vm14218_vm3, %v11992_v12  ;;  %10896 = vmatprep.mubr.msk.f32.mxu0 %vm622_vm2, %v1846_v45  ;;  %v2533_v23 = vpop.permute.xlu1 %2532 }
 0x51b   : > { %10983 = vmatprep.mubr.msk.f32.mxu1 %vm622_vm2, %v2533_v23  ;;  %v14861_v23 = vmul.f32 0.35355338, %v17839_v44 }
 0x51d   : > { %10897 = vmatmul.mubr.msk.f32.gmra.mrb[36].mxu0 %vm622_vm2, %v1848_v60 }
 0x51e   : > { %10899 = vmatprep.mubr.msk.f32.mxu0 %vm622_vm2, %v1850_v34  ;;  %v2535_v9 = vpop.permute.xlu1 %2534 }
 0x51f   : > { %10984 = vmatmul.mubr.msk.f32.gmra.mrb[62].mxu1 %vm622_vm2, %v2535_v9  ;;  %v14866_v9 = vmul.f32 0.35355338, %v17840_v59 }
 0x520   : > { %11058 = vmatprep.mubr.msk.f32.mxu1 %vm622_vm2, %v3076_v53  ;;  %v2435_v53 = vsel %vm298_vm0, %v14854_v22, -inf }
 0x521   : > { %11997 = vmatpush3.bf16.xpose.msk.msra.mxu1 %vm14218_vm3, %v11992_v12  ;;  %10900 = vmatmul.mubr.msk.f32.gmra.mrb[38].mxu0 %vm622_vm2, %v1852_v17 }
 0x522   : > { %12000 = vmatprep.subr.msk.bf16.mxu1 %vm14218_vm3, %v11998_v58  ;;  %v12709_v62 = vpop.permute.xlu1 %12708 }
 0x523   : > { %v12711_v24 = vunpack.i.h.bf16 %v12709_v62  ;;  %v12710_v50 = vunpack.i.l.bf16 %v12709_v62 }
 0x525   : > { %v12004_v31 = vpack.c.bf16 %v12711_v24, %v12710_v50  ;;  %v2432_v24 = vsel %vm298_vm0, %v14861_v23, -inf  ;;  %v17842_v50 = vld [vmem:[#allocation53_spill] sm:$0xff] }
 0x526   : > { %v3078_v40 = vpop.permute.xlu1 %3077 }
 0x529   : > { %12003 = vmatpush3.bf16.xpose.msk.msra.mxu1 %vm14218_vm3, %v11998_v58  ;;  %v17841_v58 = vld [vmem:[#allocation52_spill] sm:$0xff] }
 0x52a   : > { %12006 = vmatprep.subr.msk.bf16.mxu1 %vm14218_vm3, %v12004_v31  ;;  %v3082_v13 = vpop.permute.xlu1 %3081  ;;  %v14871_v62 = vmul.f32 0.35355338, %v17841_v58 }
 0x52e   : > { %v3086_v6 = vpop.permute.xlu1 %3085 }
 0x531   : > { %12009 = vmatpush3.bf16.xpose.msk.msra.mxu1 %vm14218_vm3, %v12004_v31  ;;  %v14876_v31 = vmul.f32 0.35355338, %v17842_v50 }
 0x532   : > { %v3090_v39 = vpop.permute.xlu1 %3089 }
 0x538   : > { %11059 = vmatmul.mubr.msk.f32.vlgmr.msra.gmra.mrb[64].mxu1 %vm622_vm2, %v3078_v40  ;;  %v2441_v40 = vsel %vm298_vm0, %v14866_v9, -inf }
 0x539   : > { %11061 = vmatprep.mubr.msk.f32.mxu1 %vm622_vm2, %v3080_v52  ;;  %v17843_v52 = vld [vmem:[#allocation54_spill] sm:$0xff] }
 0x53c   : > { %11062 = vmatmul.mubr.msk.f32.gmra.mrb[66].mxu1 %vm622_vm2, %v3082_v13  ;;  %v14881_v13 = vmul.f32 0.35355338, %v17843_v52 }
 0x53d   : > { %11064 = vmatprep.mubr.msk.f32.mxu1 %vm622_vm2, %v3084_v63  ;;  %v2438_v63 = vsel %vm298_vm0, %v14871_v62, -inf }
 0x540   : > { %11065 = vmatmul.mubr.msk.f32.gmra.mrb[68].mxu1 %vm622_vm2, %v3086_v6  ;;  %v17844_v6 = vld [vmem:[#allocation55_spill] sm:$0xff] }
 0x541   : > { %11067 = vmatprep.mubr.msk.f32.mxu1 %vm622_vm2, %v3088_v19  ;;  %v14886_v19 = vmul.f32 0.35355338, %v17844_v6 }
 0x544   : > { %11068 = vmatmul.mubr.msk.f32.gmra.mrb[70].mxu1 %vm622_vm2, %v3090_v39  ;;  %v2447_v39 = vsel %vm298_vm0, %v14876_v31, -inf }
 0x5e2   : > { %v10976_v26 = vpop.f32.mrb[56].mxu1 }
 0x5e3   : > { %v14811_v21 = vmul.f32 0.35355338, %v10976_v26  ;;  %v2650_v30 = vpop.f32.mrb[57].mxu1  ;;  %v17845_v26 = vld [vmem:[#allocation56_spill] sm:$0xff] }
 0x5e4   : > { %v14813_v15 = vmul.f32 0.35355338, %v2650_v30  ;;  %v14891_v30 = vmul.f32 0.35355338, %v17845_v26 }
 0x5e5   : > { %v2700_v45 = vsel %vm298_vm0, %v14811_v21, -inf }
 0x5e6   : > { %2701 = vmax.xlane.f32.xlu0 %v2700_v45  ;;  %v10979_v3 = vpop.f32.mrb[58].mxu1  ;;  %v2697_v28 = vsel %vm298_vm0, %v14813_v15, -inf  ;;  %v2444_v45 = vsel %vm298_vm0, %v14881_v13, -inf }
 0x5e7   : > { %v14819_v48 = vmul.f32 0.35355338, %v10979_v3  ;;  %2698 = vmax.xlane.f32.xlu1 %v2697_v28  ;;  %v2660_v38 = vpop.f32.mrb[59].mxu1  ;;  %v2453_v3 = vsel %vm298_vm0, %v14886_v19, -inf  ;;  %v2450_v28 = vsel %vm298_vm0, %v14891_v30, -inf }
 0x5e8   : > { %v14821_v41 = vmul.f32 0.35355338, %v2660_v38  ;;  %v14823_v34 = vpop.f32.mrb[32].mxu0 }
 0x5e9   : > { %v14825_v49 = vpop.f32.mrb[33].mxu0  ;;  %v2706_v46 = vsel %vm298_vm0, %v14819_v48, -inf }
 0x5ea   : > { %2707 = vmax.xlane.f32.xlu0 %v2706_v46  ;;  %v2703_v18 = vsel %vm298_vm0, %v14821_v41, -inf }
 0x5eb   : > { %2704 = vmax.xlane.f32.xlu1 %v2703_v18  ;;  %v10982_v25 = vpop.f32.mrb[60].mxu1 }
 0x5ec   : > { %v14831_v51 = vmul.f32 0.35355338, %v10982_v25  ;;  %v14833_v60 = vpop.f32.mrb[34].mxu0  ;;  %v2670_v17 = vpop.f32.mrb[61].mxu1 }
 0x5ed   : > { %v14835_v32 = vmul.f32 0.35355338, %v2670_v17  ;;  %v14837_v55 = vpop.f32.mrb[35].mxu0 }
 0x5ee   : > { %v2712_v14 = vsel %vm298_vm0, %v14831_v51, -inf }
 0x5ef   : > { %2713 = vmax.xlane.f32.xlu0 %v2712_v14  ;;  %v2709_v61 = vsel %vm298_vm0, %v14835_v32, -inf }
 0x5f0   : > { %v14843_v36 = vpop.f32.mrb[36].mxu0  ;;  %2710 = vmax.xlane.f32.xlu1 %v2709_v61 }
 0x5f1   : > { %v14845_v8 = vpop.f32.mrb[37].mxu0 }
 0x5f2   : > { %v10985_v37 = vpop.f32.mrb[62].mxu1 }
 0x5f3   : > { %v14847_v54 = vmul.f32 0.35355338, %v10985_v37  ;;  %v2680_v10 = vpop.f32.mrb[63].mxu1 }
 0x5f4   : > { %v14849_v7 = vmul.f32 0.35355338, %v2680_v10  ;;  %v14851_v29 = vpop.f32.mrb[38].mxu0 }
 0x5f5   : > { %v14856_v33 = vpop.f32.mrb[39].mxu0  ;;  %v2718_v12 = vsel %vm298_vm0, %v14847_v54, -inf }
 0x5f6   : > { %2719 = vmax.xlane.f32.xlu0 %v2718_v12  ;;  %v2715_v56 = vsel %vm298_vm0, %v14849_v7, -inf }
 0x5f7   : > { %2716 = vmax.xlane.f32.xlu1 %v2715_v56 }
 0x5fa   : > { %2436 = vmax.xlane.f32.xlu0 %v2435_v53 }
 0x5fb   : > { %2433 = vmax.xlane.f32.xlu1 %v2432_v24 }
 0x5fe   : > { %2442 = vmax.xlane.f32.xlu0 %v2441_v40 }
 0x5ff   : > { %2439 = vmax.xlane.f32.xlu1 %v2438_v63 }
 0x602   : > { %2448 = vmax.xlane.f32.xlu0 %v2447_v39 }
 0x603   : > { %2445 = vmax.xlane.f32.xlu1 %v2444_v45  ;;  %v17846_v45 = vld [vmem:[#allocation26_spill] sm:$0xff] }
 0x606   : > { %2454 = vmax.xlane.f32.xlu0 %v2453_v3  ;;  %v17847_v3 = vld [vmem:[#allocation27_spill] sm:$0xff] }
 0x607   : > { %2451 = vmax.xlane.f32.xlu1 %v2450_v28  ;;  %v17848_v28 = vld [vmem:[#allocation29_spill] sm:$0xff] }
 0x60b   : > { %v11060_v38 = vpop.f32.mrb[64].mxu1 }
 0x60c   : > { %v14899_v46 = vmul.f32 0.35355338, %v11060_v38  ;;  %v3205_v18 = vpop.f32.mrb[65].mxu1  ;;  %v17849_v38 = vld [vmem:[#allocation28_spill] sm:$0xff] }
 0x60d   : > { %v14901_v25 = vmul.f32 0.35355338, %v3205_v18  ;;  %v17850_v18 = vld [vmem:[#allocation34_spill] sm:$0xff] }
 0x60e   : > { %v3255_v17 = vsel %vm298_vm0, %v14899_v46, -inf }
 0x60f   : > { %3256 = vmax.xlane.f32.xlu0 %v3255_v17  ;;  %v11063_v14 = vpop.f32.mrb[66].mxu1  ;;  %v3252_v61 = vsel %vm298_vm0, %v14901_v25, -inf  ;;  %v17851_v17 = vld [vmem:[#allocation32_spill] sm:$0xff] }
 0x610   : > { %v14907_v37 = vmul.f32 0.35355338, %v11063_v14  ;;  %v3215_v10 = vpop.f32.mrb[67].mxu1  ;;  %3253 = vmax.xlane.f32.xlu1 %v3252_v61  ;;  %v17852_v14 = vld [vmem:[#allocation36_spill] sm:$0xff] }
 0x611   : > { %v14909_v47 = vmul.f32 0.35355338, %v3215_v10 }
 0x612   : > { %v3261_v12 = vsel %vm298_vm0, %v14907_v37, -inf }
 0x613   : > { %3262 = vmax.xlane.f32.xlu0 %v3261_v12  ;;  %v11066_v44 = vpop.f32.mrb[68].mxu1  ;;  %v3258_v56 = vsel %vm298_vm0, %v14909_v47, -inf }
 0x614   : > { %v14915_v59 = vmul.f32 0.35355338, %v11066_v44  ;;  %v3225_v53 = vpop.f32.mrb[69].mxu1  ;;  %3259 = vmax.xlane.f32.xlu1 %v3258_v56 }
 0x615   : > { %v14917_v58 = vmul.f32 0.35355338, %v3225_v53 }
 0x616   : > { %v3267_v24 = vsel %vm298_vm0, %v14915_v59, -inf }
 0x617   : > { %3268 = vmax.xlane.f32.xlu0 %v3267_v24  ;;  %v11069_v50 = vpop.f32.mrb[70].mxu1  ;;  %v3264_v40 = vsel %vm298_vm0, %v14917_v58, -inf }
 0x618   : > { %v14923_v52 = vmul.f32 0.35355338, %v11069_v50  ;;  %v3235_v63 = vpop.f32.mrb[71].mxu1  ;;  %3265 = vmax.xlane.f32.xlu1 %v3264_v40 }
 0x619   : > { %v14925_v6 = vmul.f32 0.35355338, %v3235_v63 }
 0x61a   : > { %v3273_v39 = vsel %vm298_vm0, %v14923_v52, -inf }
 0x61b   : > { %3274 = vmax.xlane.f32.xlu0 %v3273_v39  ;;  %v3270_v26 = vsel %vm298_vm0, %v14925_v6, -inf }
 0x61c   : > { %3271 = vmax.xlane.f32.xlu1 %v3270_v26 }
 0x62d   : > { %12713 = vrot.lane.b32.xlu1 %v17846_v45, %s13785_s11 }
 0x631   : > { %12718 = vrot.lane.b32.xlu0 %v17847_v3, %s13785_s11  ;;  %12728 = vrot.lane.b32.xlu1 %v17848_v28, %s13785_s11 }
 0x635   : > { %12723 = vrot.lane.b32.xlu0 %v17849_v38, %s13785_s11  ;;  %12738 = vrot.lane.b32.xlu1 %v17850_v18, %s13777_s28 }
 0x639   : > { %12733 = vrot.lane.b32.xlu0 %v17851_v17, %s13777_s28 }
 0x63d   : > { %12743 = vrot.lane.b32.xlu0 %v17852_v14, %s13777_s28 }
 0x673   : > { %v2702_v61 = vpop.xlane.xlu0 %2701 }
 0x674   : > { %v2699_v10 = vpop.xlane.xlu1 %2698  ;;  %v2722_v63 = vsub.f32 %v14811_v21, %v2702_v61 }
 0x675   : > { %v2721_v40 = vsub.f32 %v14813_v15, %v2699_v10 }
 0x676   : > { %v2731_v57 = vmul.f32 1.442695, %v2722_v63 }
 0x677   : > { %v2708_v12 = vpop.xlane.xlu0 %2707  ;;  %v2729_v28 = vmul.f32 1.442695, %v2721_v40 }
 0x678   : > { %v2705_v44 = vpop.xlane.xlu1 %2704  ;;  %v2724_v27 = vsub.f32 %v14819_v48, %v2708_v12 }
 0x679   : > { %v2723_v38 = vsub.f32 %v14821_v41, %v2705_v44 }
 0x67a   : > { %v2735_v61 = vmul.f32 1.442695, %v2724_v27 }
 0x67b   : > { %v2733_v21 = vmul.f32 1.442695, %v2723_v38 }
 0x67c   : > { %v2714_v56 = vpop.xlane.xlu0 %2713 }
 0x67d   : > { %v2711_v53 = vpop.xlane.xlu1 %2710 }
 0x683   : > { %v2720_v24 = vpop.xlane.xlu0 %2719 }
 0x684   : > { %v2717_v50 = vpop.xlane.xlu1 %2716  ;;  %v2728_v10 = vsub.f32 %v14847_v54, %v2720_v24 }
 0x686   : > { %v2743_v40 = vmul.f32 1.442695, %v2728_v10 }
 0x687   : > { %v2437_v39 = vpop.xlane.xlu0 %2436 }
 0x688   : > { %v2457_v26 = vsub.f32 %v14854_v22, %v2437_v39  ;;  %v2434_v45 = vpop.xlane.xlu1 %2433  ;;  %v2726_v22 = vsub.f32 %v14831_v51, %v2714_v56 }
 0x689   : > { %v2456_v3 = vsub.f32 %v14861_v23, %v2434_v45  ;;  %v2725_v23 = vsub.f32 %v14835_v32, %v2711_v53 }
 0x68a   : > { %v2466_v42 = vmul.f32 1.442695, %v2457_v26  ;;  %v2739_v41 = vmul.f32 1.442695, %v2726_v22 }
 0x68b   : > { %v2464_v11 = vmul.f32 1.442695, %v2456_v3  ;;  %v2443_v20 = vpop.xlane.xlu0 %2442  ;;  %v2737_v48 = vmul.f32 1.442695, %v2725_v23 }
 0x68c   : > { %13212 = vpow2.f32 %v2466_v42  ;;  %v14951_v15 = vpop.xlane.xlu1 %2439  ;;  %v2727_v42 = vsub.f32 %v14849_v7, %v2717_v50  ;;  %v2459_v3 = vsub.f32 %v14866_v9, %v2443_v20 }
 0x68d   : > { %13214 = vpow2.f32 %v2464_v11 }
 0x68e   : > { %13216 = vpow2.f32 %v2729_v28  ;;  %v2741_v27 = vmul.f32 1.442695, %v2727_v42 }
 0x68f   : > { %13218 = vpow2.f32 %v2731_v57  ;;  %v2449_v44 = vpop.xlane.xlu0 %2448 }
 0x690   : > { %13220 = vpow2.f32 %v2733_v21  ;;  %v2446_v11 = vpop.xlane.xlu1 %2445 }
 0x691   : > { %13222 = vpow2.f32 %v2735_v61  ;;  %v2460_v10 = vsub.f32 %v14881_v13, %v2446_v11  ;;  %v15011_v11 = vmul.f32 0.35355338, %v14823_v34  ;;  %v15026_v34 = vmul.f32 0.35355338, %v14845_v8 }
 0x692   : > { %13224 = vpow2.f32 %v2739_v41  ;;  %v2470_v41 = vmul.f32 1.442695, %v2459_v3 }
 0x693   : > { %13226 = vpow2.f32 %v2737_v48  ;;  %v14965_v32 = vpop.xlane.xlu0 %2454  ;;  %v2472_v13 = vmul.f32 1.442695, %v2460_v10 }
 0x694   : > { %v2452_v56 = vpop.xlane.xlu1 %2451  ;;  %13228 = vpow2.f32 %v2743_v40 }
 0x695   : > { %13230 = vpow2.f32 %v2741_v27  ;;  %v2461_v27 = vsub.f32 %v14876_v31, %v2449_v44  ;;  %v2462_v3 = vsub.f32 %v14891_v30, %v2452_v56  ;;  %v2463_v30 = vsub.f32 %v14886_v19, %v14965_v32 }
 0x696   : > { %v14957_v12 = vpop.eup %13212  ;;  %13232 = vpow2.f32 %v2470_v41 }
 0x697   : > { %17853 = vst [vmem:[#allocation41_spill] sm:$0xff] %v14957_v12  ;;  %v14959_v63 = vpop.eup %13214  ;;  %v2483_v57 = vsel %vm298_vm0, %v14957_v12, 0.0  ;;  %v2474_v44 = vmul.f32 1.442695, %v2461_v27  ;;  %13234 = vpow2.f32 %v2472_v13  ;;  %v2476_v56 = vmul.f32 1.442695, %v2462_v3 }
 0x698   : > { %17854 = vst [vmem:[#allocation46_spill] sm:$0xff] %v14959_v63  ;;  %v14963_v51 = vpop.eup %13216  ;;  %2484 = vadd.xlane.f32.xlu1 %v2483_v57  ;;  %v2480_v54 = vsel %vm298_vm0, %v14959_v63, 0.0  ;;  %v15053_v63 = vmul.f32 0.35355338, %v14843_v36  ;;  %v15062_v36 = vmul.f32 0.35355338, %v14851_v29 }
 0x699   : > { %v14969_v7 = vpop.eup %13218  ;;  %2481 = vadd.xlane.f32.xlu0 %v2480_v54  ;;  %v2745_v53 = vsel %vm298_vm0, %v14963_v51, 0.0  ;;  %13236 = vpow2.f32 %v2474_v44  ;;  %v2478_v44 = vmul.f32 1.442695, %v2463_v30 }
 0x69a   : > { %v14973_v24 = vpop.eup %13220  ;;  %v2748_v39 = vsel %vm298_vm0, %v14969_v7, 0.0  ;;  %13238 = vpow2.f32 %v2476_v56  ;;  %v2035_v29 = vsel %vm298_vm0, %v15062_v36, -inf }
 0x69b   : > { %v14979_v26 = vpop.eup %13222  ;;  %v2751_v28 = vsel %vm298_vm0, %v14973_v24, 0.0  ;;  %13240 = vpow2.f32 %v2478_v44 }
 0x69c   : > { %v14975_v50 = vpop.xlane.xlu0 %3256  ;;  %2746 = vadd.xlane.f32.xlu1 %v2745_v53  ;;  %v14986_v38 = vpop.eup %13224  ;;  %v2754_v22 = vsel %vm298_vm0, %v14979_v26, 0.0  ;;  %v15016_v53 = vmul.f32 0.35355338, %v14825_v49  ;;  %v2017_v49 = vsel %vm298_vm0, %v15011_v11, -inf }
 0x69d   : > { %v14981_v45 = vpop.xlane.xlu1 %3253  ;;  %2749 = vadd.xlane.f32.xlu0 %v2748_v39  ;;  %v14992_v61 = vpop.eup %13226  ;;  %v2760_v20 = vsel %vm298_vm0, %v14986_v38, 0.0 }
 0x69e   : > { %v14999_v9 = vpop.eup %13228  ;;  %v2757_v42 = vsel %vm298_vm0, %v14992_v61, 0.0  ;;  %v2014_v10 = vsel %vm298_vm0, %v15016_v53, -inf  ;;  %v3276_v3 = vsub.f32 %v14901_v25, %v14981_v45 }
 0x69f   : > { %17855 = vst [vmem:[#allocation44_spill] sm:$0xff] %v14999_v9  ;;  %v15005_v40 = vpop.eup %13230  ;;  %v2766_v54 = vsel %vm298_vm0, %v14999_v9, 0.0 }
 0x6a0   : > { %v14988_v21 = vpop.xlane.xlu0 %3262  ;;  %2752 = vadd.xlane.f32.xlu1 %v2751_v28  ;;  %17856 = vst [vmem:[#allocation45_spill] sm:$0xff] %v15005_v40  ;;  %v2763_v31 = vsel %vm298_vm0, %v15005_v40, 0.0  ;;  %v3284_v25 = vmul.f32 1.442695, %v3276_v3 }
 0x6a1   : > { %v14994_v23 = vpop.xlane.xlu1 %3259  ;;  %2755 = vadd.xlane.f32.xlu0 %v2754_v22  ;;  %v15031_v22 = vmul.f32 0.35355338, %v14833_v60  ;;  %v2026_v60 = vsel %vm298_vm0, %v15026_v34, -inf }
 0x6a2   : > { %13242 = vpow2.f32 %v3284_v25  ;;  %v15084_v25 = vmul.f32 0.35355338, %v14856_v33  ;;  %v3277_v33 = vsub.f32 %v14899_v46, %v14975_v50 }
 0x6a3   : > { %v2023_v19 = vsel %vm298_vm0, %v15031_v22, -inf }
 0x6a4   : > { %v15001_v48 = vpop.xlane.xlu0 %3268  ;;  %2761 = vadd.xlane.f32.xlu1 %v2760_v20 }
 0x6a5   : > { %v15008_v57 = vpop.xlane.xlu1 %3265  ;;  %2758 = vadd.xlane.f32.xlu0 %v2757_v42 }
 0x6a8   : > { %v15018_v39 = vpop.xlane.xlu0 %3274  ;;  %2767 = vadd.xlane.f32.xlu1 %v2766_v54  ;;  %v15039_v54 = vpop.eup %13232 }
 0x6a9   : > { %v15023_v28 = vpop.xlane.xlu1 %3271  ;;  %2764 = vadd.xlane.f32.xlu0 %v2763_v31  ;;  %17857 = vst [vmem:[#allocation47_spill] sm:$0xff] %v15039_v54  ;;  %v15042_v31 = vmul.f32 0.35355338, %v14837_v55  ;;  %v2489_v55 = vsel %vm298_vm0, %v15039_v54, 0.0 }
 0x6ab   : > { %v2020_v30 = vsel %vm298_vm0, %v15042_v31, -inf }
 0x6ac   : > { %v12719_v41 = vpop.permute.xlu0 %12718  ;;  %2018 = vmax.xlane.f32.xlu1 %v2017_v49 }
 0x6ad   : > { %v12714_v20 = vpop.permute.xlu1 %12713  ;;  %2015 = vmax.xlane.f32.xlu0 %v2014_v10  ;;  %v12721_v8 = vunpack.i.h.bf16 %v12719_v41  ;;  %v12720_v42 = vunpack.i.l.bf16 %v12719_v41 }
 0x6ae   : > { %v12716_v27 = vunpack.i.h.bf16 %v12714_v20  ;;  %v12715_v13 = vunpack.i.l.bf16 %v12714_v20 }
 0x6af   : > { %v11894_v20 = vpack.c.bf16 %v12721_v8, %v12720_v42 }
 0x6b0   : > { %v12724_v49 = vpop.permute.xlu0 %12723  ;;  %2027 = vmax.xlane.f32.xlu1 %v2026_v60  ;;  %v11890_v32 = vpack.c.bf16 %v12716_v27, %v12715_v13  ;;  %v15050_v60 = vpop.eup %13234 }
 0x6b1   : > { %2024 = vmax.xlane.f32.xlu0 %v2023_v19  ;;  %v12726_v41 = vunpack.i.h.bf16 %v12724_v49  ;;  %v12725_v10 = vunpack.i.l.bf16 %v12724_v49  ;;  %v12729_v12 = vpop.permute.xlu1 %12728  ;;  %17858 = vst [vmem:[#allocation48_spill] sm:$0xff] %v15050_v60  ;;  %v15057_v42 = vpop.eup %13236  ;;  %v2492_v13 = vsel %vm298_vm0, %v15050_v60, 0.0  ;;  %v2029_v49 = vsel %vm298_vm0, %v15053_v63, -inf }
 0x6b2   : > { %11891 = vmatprep.subr.bf16.mxu0 %v11890_v32  ;;  %v12731_v45 = vunpack.i.h.bf16 %v12729_v12  ;;  %v12730_v56 = vunpack.i.l.bf16 %v12729_v12  ;;  %17859 = vst [vmem:[#allocation49_spill] sm:$0xff] %v15057_v42  ;;  %v15066_v44 = vpop.eup %13238  ;;  %v2495_v3 = vsel %vm298_vm0, %v15057_v42, 0.0 }
 0x6b3   : > { %11893 = vmatpush3.bf16.msra.mxu0 %v11890_v32  ;;  %v11898_v8 = vpack.c.bf16 %v12726_v41, %v12725_v10  ;;  %17860 = vst [vmem:[#allocation50_spill] sm:$0xff] %v15066_v44  ;;  %v15074_v10 = vpop.eup %13240 }
 0x6b4   : > { %11895 = vmatprep.subr.bf16.mxu0 %v11894_v20  ;;  %2490 = vadd.xlane.f32.xlu1 %v2489_v55  ;;  %v12734_v27 = vpop.permute.xlu0 %12733  ;;  %v11902_v32 = vpack.c.bf16 %v12731_v45, %v12730_v56  ;;  %17861 = vst [vmem:[#allocation51_spill] sm:$0xff] %v15074_v10  ;;  %v2501_v55 = vsel %vm298_vm0, %v15074_v10, 0.0  ;;  %v2032_v56 = vsel %vm298_vm0, %v15084_v25, -inf }
 0x6b5   : > { %2021 = vmax.xlane.f32.xlu0 %v2020_v30  ;;  %v12736_v19 = vunpack.i.h.bf16 %v12734_v27  ;;  %v12735_v12 = vunpack.i.l.bf16 %v12734_v27  ;;  %v15081_v30 = vpop.eup %13242  ;;  %v2458_v27 = vsub.f32 %v14871_v62, %v14951_v15  ;;  %v15106_v15 = vpop.permute.xlu1 %12738 }
 0x6b6   : > { %17862 = vst [vmem:[#allocation52_spill] sm:$0xff] %v15081_v30  ;;  %v3300_v45 = vsel %vm298_vm0, %v15081_v30, 0.0 }
 0x6b7   : > { %11897 = vmatpush3.bf16.msra.mxu0 %v11894_v20  ;;  %v15072_v41 = vpack.c.bf16 %v12736_v19, %v12735_v12  ;;  %v2498_v20 = vsel %vm298_vm0, %v15066_v44, 0.0 }
 0x6b8   : > { %11899 = vmatprep.subr.bf16.mxu0 %v11898_v8  ;;  %2493 = vadd.xlane.f32.xlu1 %v2492_v13  ;;  %v2468_v13 = vmul.f32 1.442695, %v2458_v27 }
 0x6b9   : > { %2030 = vmax.xlane.f32.xlu0 %v2029_v49  ;;  %v3286_v49 = vmul.f32 1.442695, %v3277_v33 }
 0x6ba   : > { %13244 = vpow2.f32 %v2468_v13 }
 0x6bb   : > { %11901 = vmatpush3.bf16.msra.mxu0 %v11898_v8  ;;  %v17863_v8 = vld [vmem:[#allocation37_spill] sm:$0xff]  ;;  %13246 = vpow2.f32 %v3286_v49 }
 0x6bc   : > { %11903 = vmatprep.subr.bf16.mxu0 %v11902_v32  ;;  %2496 = vadd.xlane.f32.xlu1 %v2495_v3  ;;  %v15108_v3 = vpop.permute.xlu0 %12743 }
 0x6bd   : > { %2036 = vmax.xlane.f32.xlu0 %v2035_v29 }
 0x6bf   : > { %11905 = vmatpush3.bf16.msra.mxu0 %v11902_v32 }
 0x6c0   : > { %11955 = vmatprep.subr.bf16.mxu0 %v15072_v41  ;;  %2499 = vadd.xlane.f32.xlu1 %v2498_v20 }
 0x6c4   : > { %2502 = vadd.xlane.f32.xlu1 %v2501_v55  ;;  %v15098_v19 = vpop.eup %13244 }
 0x6c5   : > { %17864 = vst [vmem:[#allocation53_spill] sm:$0xff] %v15098_v19  ;;  %v2486_v12 = vsel %vm298_vm0, %v15098_v19, 0.0  ;;  %v15102_v32 = vpop.eup %13246 }
 0x6c6   : > { %17865 = vst [vmem:[#allocation54_spill] sm:$0xff] %v15102_v32  ;;  %v3303_v62 = vsel %vm298_vm0, %v15102_v32, 0.0 }
 0x6c8   : > { %3301 = vadd.xlane.f32.xlu1 %v3300_v45 }
 0x6cc   : > { %2033 = vmax.xlane.f32.xlu1 %v2032_v56 }
 0x6d3   : > { %12748 = vrot.lane.b32.xlu0 %v17863_v8, %s13777_s28 }
 0x6dd   : > { %12753 = vrot.lane.b32.xlu1 %v17851_v17, %s13782_s8 }
 0x6f2   : > { %2487 = vadd.xlane.f32.xlu0 %v2486_v12 }
 0x6f6   : > { %3304 = vadd.xlane.f32.xlu0 %v3303_v62 }
 0x725   : > { %v15110_v46 = vpop.xlane.xlu1 %2484 }
 0x726   : > { %v15112_v50 = vpop.xlane.xlu0 %2481 }
 0x729   : > { %v15114_v29 = vpop.xlane.xlu1 %2746 }
 0x72a   : > { %v15116_v20 = vpop.xlane.xlu0 %2749 }
 0x72d   : > { %v15118_v55 = vpop.xlane.xlu1 %2752 }
 0x72e   : > { %v15120_v45 = vpop.xlane.xlu0 %2755 }
 0x731   : > { %v15122_v56 = vpop.xlane.xlu1 %2761 }
 0x732   : > { %v15124_v27 = vpop.xlane.xlu0 %2758 }
 0x735   : > { %v15126_v13 = vpop.xlane.xlu1 %2767 }
 0x736   : > { %v15128_v33 = vpop.xlane.xlu0 %2764 }
 0x739   : > { %v2019_v49 = vpop.xlane.xlu1 %2018 }
 0x73a   : > { %v2039_v12 = vsub.f32 %v15011_v11, %v2019_v49  ;;  %v2016_v62 = vpop.xlane.xlu0 %2015 }
 0x73b   : > { %v2038_v17 = vsub.f32 %v15016_v53, %v2016_v62 }
 0x73c   : > { %v2048_v32 = vmul.f32 1.442695, %v2039_v12 }
 0x73d   : > { %v2046_v30 = vmul.f32 1.442695, %v2038_v17  ;;  %v2028_v10 = vpop.xlane.xlu1 %2027 }
 0x73e   : > { %13248 = vpow2.f32 %v2048_v32  ;;  %v2025_v44 = vpop.xlane.xlu0 %2024  ;;  %v2042_v60 = vsub.f32 %v15026_v34, %v2028_v10 }
 0x73f   : > { %13250 = vpow2.f32 %v2046_v30  ;;  %v2041_v42 = vsub.f32 %v15031_v22, %v2025_v44 }
 0x740   : > { %v2054_v49 = vmul.f32 1.442695, %v2042_v60 }
 0x741   : > { %v2052_v54 = vmul.f32 1.442695, %v2041_v42  ;;  %v15134_v19 = vpop.xlane.xlu1 %2490 }
 0x742   : > { %v2022_v9 = vpop.xlane.xlu0 %2021 }
 0x743   : > { %13252 = vpow2.f32 %v2052_v54  ;;  %v2040_v11 = vsub.f32 %v15042_v31, %v2022_v9 }
 0x745   : > { %v2050_v40 = vmul.f32 1.442695, %v2040_v11  ;;  %v15137_v53 = vpop.xlane.xlu1 %2493 }
 0x746   : > { %v2031_v17 = vpop.xlane.xlu0 %2030 }
 0x747   : > { %13254 = vpow2.f32 %v2050_v40  ;;  %v2043_v32 = vsub.f32 %v15053_v63, %v2031_v17 }
 0x748   : > { %v15140_v30 = vpop.eup %13248  ;;  %13256 = vpow2.f32 %v2054_v49 }
 0x749   : > { %v15142_v22 = vpop.eup %13250  ;;  %v2056_v34 = vmul.f32 1.442695, %v2043_v32  ;;  %v15144_v42 = vpop.xlane.xlu1 %2496  ;;  %v2065_v54 = vsel %vm298_vm0, %v15140_v30, 0.0 }
 0x74a   : > { %v2037_v9 = vpop.xlane.xlu0 %2036  ;;  %2066 = vadd.xlane.f32.xlu0 %v2065_v54  ;;  %v2062_v31 = vsel %vm298_vm0, %v15142_v22, 0.0 }
 0x74b   : > { %13258 = vpow2.f32 %v2056_v34  ;;  %v2045_v40 = vsub.f32 %v15062_v36, %v2037_v9  ;;  %2063 = vadd.xlane.f32.xlu1 %v2062_v31 }
 0x74d   : > { %v15151_v63 = vpop.eup %13252  ;;  %v2060_v60 = vmul.f32 1.442695, %v2045_v40  ;;  %v15153_v44 = vpop.xlane.xlu1 %2499 }
 0x74e   : > { %v2071_v10 = vsel %vm298_vm0, %v15151_v63, 0.0 }
 0x74f   : > { %13260 = vpow2.f32 %v2060_v60  ;;  %2072 = vadd.xlane.f32.xlu0 %v2071_v10 }
 0x751   : > { %v15157_v12 = vpop.eup %13254  ;;  %v15159_v62 = vpop.xlane.xlu1 %2502 }
 0x752   : > { %v2068_v11 = vsel %vm298_vm0, %v15157_v12, 0.0  ;;  %v15163_v49 = vpop.eup %13256 }
 0x753   : > { %2069 = vadd.xlane.f32.xlu1 %v2068_v11  ;;  %v2074_v34 = vsel %vm298_vm0, %v15163_v49, 0.0 }
 0x755   : > { %v15165_v36 = vpop.eup %13258  ;;  %v15167_v17 = vpop.xlane.xlu1 %3301 }
 0x756   : > { %v2077_v32 = vsel %vm298_vm0, %v15165_v36, 0.0 }
 0x757   : > { %2078 = vadd.xlane.f32.xlu0 %v2077_v32  ;;  %2075 = vadd.xlane.f32.xlu1 %v2074_v34  ;;  %v3278_v34 = vsub.f32 %v14909_v47, %v14994_v23  ;;  %v3282_v47 = vsub.f32 %v14925_v6, %v15023_v28  ;;  %v3283_v23 = vsub.f32 %v14923_v52, %v15018_v39  ;;  %v17867_v28 = vld [vmem:[#allocation30_spill] sm:$0xff] }
 0x759   : > { %v15173_v54 = vpop.eup %13260  ;;  %v2034_v9 = vpop.xlane.xlu1 %2033 }
 0x75a   : > { %v2044_v31 = vsub.f32 %v15084_v25, %v2034_v9  ;;  %v2083_v40 = vsel %vm298_vm0, %v15173_v54, 0.0  ;;  %v3279_v25 = vsub.f32 %v14907_v37, %v14988_v21  ;;  %v3281_v37 = vsub.f32 %v14915_v59, %v15001_v48 }
 0x75b   : > { %2084 = vadd.xlane.f32.xlu0 %v2083_v40  ;;  %v3280_v40 = vsub.f32 %v14917_v58, %v15008_v57  ;;  %v3298_v57 = vmul.f32 1.442695, %v3283_v23  ;;  %v12741_v23 = vunpack.i.h.bf16 %v15106_v15 }
 0x75c   : > { %v2058_v60 = vmul.f32 1.442695, %v2044_v31  ;;  %v3290_v32 = vmul.f32 1.442695, %v3279_v25  ;;  %v3288_v31 = vmul.f32 1.442695, %v3278_v34 }
 0x75d   : > { %v3292_v21 = vmul.f32 1.442695, %v3280_v40  ;;  %v3296_v25 = vmul.f32 1.442695, %v3282_v47 }
 0x75e   : > { %13262 = vpow2.f32 %v2058_v60 }
 0x75f   : > { %13264 = vpow2.f32 %v3290_v32 }
 0x760   : > { %13266 = vpow2.f32 %v3288_v31 }
 0x761   : > { %13268 = vpow2.f32 %v3292_v21 }
 0x768   : > { %v15178_v10 = vpop.eup %13262  ;;  %12763 = vrot.lane.b32.xlu1 %v17852_v14, %s13782_s8 }
 0x769   : > { %v2080_v11 = vsel %vm298_vm0, %v15178_v10, 0.0  ;;  %v15192_v9 = vpop.eup %13264 }
 0x76a   : > { %2081 = vadd.xlane.f32.xlu0 %v2080_v11  ;;  %v3309_v60 = vsel %vm298_vm0, %v15192_v9, 0.0  ;;  %v3294_v11 = vmul.f32 1.442695, %v3281_v37  ;;  %v15204_v58 = vpop.eup %13266 }
 0x76b   : > { %v3306_v32 = vsel %vm298_vm0, %v15204_v58, 0.0  ;;  %v15208_v34 = vpop.eup %13268 }
 0x76c   : > { %12768 = vrot.lane.b32.xlu1 %v17863_v8, %s13782_s8  ;;  %13270 = vpow2.f32 %v3294_v11  ;;  %v3312_v59 = vsel %vm298_vm0, %v15208_v34, 0.0 }
 0x76d   : > { %13272 = vpow2.f32 %v3296_v25  ;;  %v12740_v25 = vunpack.i.l.bf16 %v15106_v15 }
 0x76e   : > { %13274 = vpow2.f32 %v3298_v57 }
 0x776   : > { %v15214_v6 = vpop.eup %13270 }
 0x777   : > { %v3315_v52 = vsel %vm298_vm0, %v15214_v6, 0.0  ;;  %v15220_v48 = vpop.eup %13272 }
 0x778   : > { %v15226_v39 = vpop.eup %13274 }
 0x780   : > { %12758 = vrot.lane.b32.xlu0 %v17850_v18, %s13782_s8 }
 0x790   : > { %3310 = vadd.xlane.f32.xlu1 %v3309_v60 }
 0x79f   : > { %3307 = vadd.xlane.f32.xlu0 %v3306_v32 }
 0x7a1   : > { %12773 = vrot.lane.b32.xlu1 %v14096_v5, %s13783_s9  ;;  %v3318_v5 = vsel %vm298_vm0, %v15220_v48, 0.0 }
 0x7a3   : > { %3313 = vadd.xlane.f32.xlu0 %v3312_v59 }
 0x7a5   : > { %12783 = vrot.lane.b32.xlu1 %v14140_v43, %s13783_s9  ;;  %v3321_v43 = vsel %vm298_vm0, %v15226_v39, 0.0 }
 0x7a7   : > { %3316 = vadd.xlane.f32.xlu0 %v3315_v52 }
 0x7a9   : > { %12788 = vrot.lane.b32.xlu1 %v14163_v1, %s13783_s9  ;;  %v17866_v1 = vld [vmem:[#allocation31_spill] sm:$0xff] }
 0x7ab   : > { %3319 = vadd.xlane.f32.xlu0 %v3318_v5  ;;  %v12746_v5 = vunpack.i.h.bf16 %v15108_v3 }
 0x7ad   : > { %3501 = vrot.lane.b32.xlu1 %v14085_v2, %s13784_s10  ;;  %v12749_v2 = vpop.permute.xlu0 %12748 }
 0x7af   : > { %3322 = vadd.xlane.f32.xlu0 %v3321_v43  ;;  %v12745_v43 = vunpack.i.l.bf16 %v15108_v3 }
 0x7b1   : > { %3503 = vrot.lane.b32.xlu1 %v14092_v4, %s13784_s10  ;;  %v15244_v31 = vpop.xlane.xlu0 %2487  ;;  %v17868_v4 = vld [vmem:[#allocation33_spill] sm:$0xff] }
 0x7b5   : > { %3507 = vrot.lane.b32.xlu1 %v14112_v16, %s13784_s10  ;;  %v17869_v16 = vld [vmem:[#allocation35_spill] sm:$0xff]  ;;  %v15250_v40 = vpop.xlane.xlu0 %3304 }
 0x7b9   : > { %3511 = vrot.lane.b32.xlu1 %v14136_v35, %s13784_s10  ;;  %v15252_v35 = vpop.permute.xlu1 %12753 }
 0x7bd   : > { %3515 = vrot.lane.b32.xlu1 %v14159_v0, %s13784_s10 }
 0x7c5   : > { %12778 = vrot.lane.b32.xlu0 %v17866_v1, %s13783_s9  ;;  %v11958_v1 = vpack.c.bf16 %v12741_v23, %v12740_v25 }
 0x7c9   : > { %3505 = vrot.lane.b32.xlu0 %v17867_v28, %s13784_s10 }
 0x7cd   : > { %3509 = vrot.lane.b32.xlu0 %v17868_v4, %s13784_s10  ;;  %v12751_v4 = vunpack.i.h.bf16 %v12749_v2 }
 0x7d1   : > { %3513 = vrot.lane.b32.xlu0 %v17869_v16, %s13784_s10  ;;  %v11962_v16 = vpack.c.bf16 %v12746_v5, %v12745_v43  ;;  %v17876_v5 = vld [vmem:[#allocation46_spill] sm:$0xff] }
 0x7d7   : > { %v2067_v0 = vpop.xlane.xlu0 %2066 }
 0x7d8   : > { %13276 = vrcp.f32 %v2067_v0  ;;  %v2064_v60 = vpop.xlane.xlu1 %2063 }
 0x7d9   : > { %13278 = vrcp.f32 %v2064_v60 }
 0x7dc   : > { %v2073_v37 = vpop.xlane.xlu0 %2072 }
 0x7dd   : > { %13280 = vrcp.f32 %v2073_v37 }
 0x7e0   : > { %v2070_v21 = vpop.xlane.xlu1 %2069 }
 0x7e1   : > { %13282 = vrcp.f32 %v2070_v21 }
 0x7e2   : > { %v13277_v11 = vpop.eup %13276 }
 0x7e3   : > { %v13279_v47 = vpop.eup %13278  ;;  %v2095_v52 = vmul.f32 %v13277_v11, %v15140_v30 }
 0x7e4   : > { %v2079_v57 = vpop.xlane.xlu0 %2078  ;;  %v2076_v32 = vpop.xlane.xlu1 %2075  ;;  %v2094_v59 = vmul.f32 %v13279_v47, %v15142_v22  ;;  %v12750_v22 = vunpack.i.l.bf16 %v12749_v2 }
 0x7e5   : > { %13284 = vrcp.f32 %v2079_v57  ;;  %v12755_v57 = vunpack.i.l.bf16 %v15252_v35 }
 0x7e6   : > { %13286 = vrcp.f32 %v2076_v32  ;;  %10918 = vmatprep.mubr.msk.f32.mxu0 %vm298_vm0, %v2094_v59  ;;  %v11966_v60 = vpack.c.bf16 %v12751_v4, %v12750_v22 }
 0x7e7   : > { %10919 = vmatmul.mubr.msk.f32.vlgmr.msra.gmra.mrb[24].mxu0 %vm298_vm0, %v2095_v52  ;;  %v13281_v15 = vpop.eup %13280  ;;  %13288 = vrcp.f32 %v15114_v29 }
 0x7e8   : > { %11957 = vmatpush3.bf16.msra.mxu0 %v15072_v41  ;;  %v2097_v0 = vmul.f32 %v13281_v15, %v15151_v63  ;;  %v2085_v21 = vpop.xlane.xlu0 %2084  ;;  %v17870_v63 = vld [vmem:[#allocation39_spill] sm:$0xff] }
 0x7e9   : > { %11959 = vmatprep.subr.bf16.mxu0 %v11958_v1  ;;  %13290 = vrcp.f32 %v2085_v21  ;;  %v17880_v21 = vld [vmem:[#allocation48_spill] sm:$0xff] }
 0x7eb   : > { %v13283_v28 = vpop.eup %13282 }
 0x7ec   : > { %11961 = vmatpush3.bf16.msra.mxu0 %v11958_v1  ;;  %v2096_v30 = vmul.f32 %v13283_v28, %v15157_v12 }
 0x7ed   : > { %11963 = vmatprep.subr.bf16.mxu0 %v11962_v16 }
 0x7ee   : > { %10921 = vmatprep.mubr.msk.f32.mxu0 %vm298_vm0, %v2096_v30 }
 0x7ef   : > { %v13285_v3 = vpop.eup %13284  ;;  %10922 = vmatmul.mubr.msk.f32.gmra.mrb[26].mxu0 %vm298_vm0, %v2097_v0 }
 0x7f0   : > { %v13287_v37 = vpop.eup %13286  ;;  %11965 = vmatpush3.bf16.msra.mxu0 %v11962_v16  ;;  %v2099_v41 = vmul.f32 %v13285_v3, %v15165_v36  ;;  %v17878_v16 = vld [vmem:[#allocation53_spill] sm:$0xff] }
 0x7f1   : > { %11967 = vmatprep.subr.bf16.mxu0 %v11966_v60  ;;  %v2098_v2 = vmul.f32 %v13287_v37, %v15163_v49  ;;  %v13289_v49 = vpop.eup %13288 }
 0x7f3   : > { %10924 = vmatprep.mubr.msk.f32.mxu0 %vm298_vm0, %v2098_v2  ;;  %v13291_v36 = vpop.eup %13290 }
 0x7f4   : > { %10925 = vmatmul.mubr.msk.f32.gmra.mrb[28].mxu0 %vm298_vm0, %v2099_v41  ;;  %v2101_v47 = vmul.f32 %v13291_v36, %v15173_v54 }
 0x7f5   : > { %11969 = vmatpush3.bf16.msra.mxu0 %v11966_v60 }
 0x7f6   : > { %11971 = vmatprep.subr.bf16.mxu0 %v17870_v63 }
 0x7f7   : > { %v2082_v12 = vpop.xlane.xlu0 %2081 }
 0x7f8   : > { %13292 = vrcp.f32 %v2082_v12 }
 0x7f9   : > { %13294 = vrcp.f32 %v15116_v20  ;;  %v2777_v20 = vmul.f32 %v13289_v49, %v14963_v51  ;;  %v17871_v51 = vld [vmem:[#allocation40_spill] sm:$0xff] }
 0x7fa   : > { %13296 = vrcp.f32 %v15118_v55 }
 0x7fb   : > { %13298 = vrcp.f32 %v15120_v45  ;;  %v12759_v32 = vpop.permute.xlu0 %12758 }
 0x7fc   : > { %13300 = vrcp.f32 %v15124_v27  ;;  %v12761_v1 = vunpack.i.h.bf16 %v12759_v32  ;;  %v12760_v15 = vunpack.i.l.bf16 %v12759_v32 }
 0x7fd   : > { %13302 = vrcp.f32 %v15122_v56 }
 0x7fe   : > { %13304 = vrcp.f32 %v15128_v33  ;;  %v12014_v37 = vpack.c.bf16 %v12761_v1, %v12760_v15 }
 0x7ff   : > { %13306 = vrcp.f32 %v15126_v13 }
 0x800   : > { %13308 = vrcp.f32 %v15112_v50 }
 0x801   : > { %13310 = vrcp.f32 %v15110_v46 }
 0x802   : > { %v13293_v11 = vpop.eup %13292  ;;  %13312 = vrcp.f32 %v15244_v31 }
 0x803   : > { %v2100_v29 = vmul.f32 %v13293_v11, %v15178_v10  ;;  %v13295_v23 = vpop.eup %13294  ;;  %13314 = vrcp.f32 %v15134_v19  ;;  %v12764_v19 = vpop.permute.xlu1 %12763 }
 0x804   : > { %v13297_v55 = vpop.eup %13296  ;;  %v2778_v45 = vmul.f32 %v13295_v23, %v14969_v7  ;;  %13316 = vrcp.f32 %v15137_v53  ;;  %v17875_v53 = vld [vmem:[#allocation44_spill] sm:$0xff]  ;;  %v12766_v3 = vunpack.i.h.bf16 %v12764_v19  ;;  %v12765_v60 = vunpack.i.l.bf16 %v12764_v19 }
 0x805   : > { %10927 = vmatprep.mubr.msk.f32.mxu0 %vm298_vm0, %v2100_v29  ;;  %v13299_v56 = vpop.eup %13298  ;;  %v2779_v27 = vmul.f32 %v13297_v55, %v14973_v24  ;;  %v17872_v24 = vld [vmem:[#allocation42_spill] sm:$0xff]  ;;  %13318 = vrcp.f32 %v15144_v42 }
 0x806   : > { %10928 = vmatmul.mubr.msk.f32.gmra.mrb[30].mxu0 %vm298_vm0, %v2101_v47  ;;  %v13301_v33 = vpop.eup %13300  ;;  %v2780_v50 = vmul.f32 %v13299_v56, %v14979_v26  ;;  %v17873_v26 = vld [vmem:[#allocation45_spill] sm:$0xff]  ;;  %13320 = vrcp.f32 %v15153_v44  ;;  %v12018_v11 = vpack.c.bf16 %v12766_v3, %v12765_v60 }
 0x807   : > { %11002 = vmatprep.mubr.msk.f32.mxu0 %vm298_vm0, %v2777_v20  ;;  %v13303_v13 = vpop.eup %13302  ;;  %v2781_v7 = vmul.f32 %v13301_v33, %v14992_v61  ;;  %v12756_v61 = vunpack.i.h.bf16 %v15252_v35  ;;  %13322 = vrcp.f32 %v15159_v62  ;;  %v17877_v44 = vld [vmem:[#allocation41_spill] sm:$0xff]  ;;  %v12769_v22 = vpop.permute.xlu1 %12768  ;;  %v17879_v62 = vld [vmem:[#allocation47_spill] sm:$0xff]  ;;  %v17882_v20 = vld [vmem:[#allocation50_spill] sm:$0xff] }
 0x808   : > { %v13305_v54 = vpop.eup %13304  ;;  %v2782_v46 = vmul.f32 %v13303_v13, %v14986_v38  ;;  %v17874_v38 = vld [vmem:[#allocation43_spill] sm:$0xff]  ;;  %13324 = vrcp.f32 %v15167_v17  ;;  %v12771_v49 = vunpack.i.h.bf16 %v12769_v22  ;;  %v12770_v36 = vunpack.i.l.bf16 %v12769_v22 }
 0x809   : > { %v13307_v10 = vpop.eup %13306  ;;  %v2783_v31 = vmul.f32 %v13305_v54, %v17873_v26  ;;  %v12010_v42 = vpack.c.bf16 %v12756_v61, %v12755_v57  ;;  %13326 = vrcp.f32 %v15250_v40  ;;  %v17881_v40 = vld [vmem:[#allocation49_spill] sm:$0xff]  ;;  %v17884_v54 = vld [vmem:[#allocation52_spill] sm:$0xff] }
 0x80a   : > { %11003 = vmatmul.mubr.msk.f32.vlgmr.msra.gmra.mrb[40].mxu0 %vm298_vm0, %v2778_v45  ;;  %v13309_v25 = vpop.eup %13308  ;;  %v2784_v59 = vmul.f32 %v13307_v10, %v17875_v53  ;;  %v12022_v33 = vpack.c.bf16 %v12771_v49, %v12770_v36 }
 0x80b   : > { %11973 = vmatpush3.bf16.msra.mxu0 %v17870_v63  ;;  %11005 = vmatprep.mubr.msk.f32.mxu0 %vm298_vm0, %v2779_v27  ;;  %v13311_v52 = vpop.eup %13310  ;;  %v2512_v43 = vmul.f32 %v13309_v25, %v17876_v5 }
 0x80c   : > { %11975 = vmatprep.subr.bf16.mxu0 %v17871_v51  ;;  %v13313_v35 = vpop.eup %13312  ;;  %v2513_v28 = vmul.f32 %v13311_v52, %v17877_v44 }
 0x80d   : > { %v13315_v4 = vpop.eup %13314  ;;  %v2514_v30 = vmul.f32 %v13313_v35, %v17878_v16 }
 0x80e   : > { %11006 = vmatmul.mubr.msk.f32.gmra.mrb[42].mxu0 %vm298_vm0, %v2780_v50  ;;  %v13317_v0 = vpop.eup %13316  ;;  %v2515_v41 = vmul.f32 %v13315_v4, %v17879_v62  ;;  %v17883_v50 = vld [vmem:[#allocation51_spill] sm:$0xff] }
 0x80f   : > { %11977 = vmatpush3.bf16.msra.mxu0 %v17871_v51  ;;  %11008 = vmatprep.mubr.msk.f32.mxu0 %vm298_vm0, %v2781_v7  ;;  %v13319_v17 = vpop.eup %13318  ;;  %v2516_v63 = vmul.f32 %v13317_v0, %v17880_v21 }
 0x810   : > { %11979 = vmatprep.subr.bf16.mxu0 %v17872_v24  ;;  %v13321_v12 = vpop.eup %13320  ;;  %v2517_v29 = vmul.f32 %v13319_v17, %v17881_v40 }
 0x811   : > { %v13323_v47 = vpop.eup %13322  ;;  %v2518_v55 = vmul.f32 %v13321_v12, %v17882_v20 }
 0x812   : > { %11009 = vmatmul.mubr.msk.f32.gmra.mrb[44].mxu0 %vm298_vm0, %v2782_v46  ;;  %v13325_v45 = vpop.eup %13324  ;;  %v2519_v13 = vmul.f32 %v13323_v47, %v17883_v50  ;;  %v17885_v46 = vld [vmem:[#allocation54_spill] sm:$0xff] }
 0x813   : > { %11981 = vmatpush3.bf16.msra.mxu0 %v17872_v24  ;;  %11011 = vmatprep.mubr.msk.f32.mxu0 %vm298_vm0, %v2783_v31  ;;  %v13327_v7 = vpop.eup %13326  ;;  %v3332_v24 = vmul.f32 %v13325_v45, %v17884_v54 }
 0x814   : > { %11983 = vmatprep.subr.bf16.mxu0 %v17874_v38  ;;  %v3333_v10 = vmul.f32 %v13327_v7, %v17885_v46 }
 0x816   : > { %11012 = vmatmul.mubr.msk.f32.gmra.mrb[46].mxu0 %vm298_vm0, %v2784_v59 }
 0x817   : > { %11985 = vmatpush3.bf16.msra.mxu0 %v17874_v38  ;;  %11030 = vmatprep.mubr.msk.f32.mxu0 %vm298_vm0, %v2512_v43 }
 0x818   : > { %12011 = vmatprep.subr.bf16.mxu0 %v12010_v42 }
 0x81a   : > { %11031 = vmatmul.mubr.msk.f32.vlgmr.msra.gmra.mrb[40].mxu0 %vm298_vm0, %v2513_v28 }
 0x81b   : > { %12013 = vmatpush3.bf16.msra.mxu0 %v12010_v42  ;;  %11033 = vmatprep.mubr.msk.f32.mxu0 %vm298_vm0, %v2514_v30 }
 0x81c   : > { %12015 = vmatprep.subr.bf16.mxu0 %v12014_v37 }
 0x81d   : > { %v3311_v2 = vpop.xlane.xlu1 %3310 }
 0x81e   : > { %11034 = vmatmul.mubr.msk.f32.gmra.mrb[42].mxu0 %vm298_vm0, %v2515_v41  ;;  %13328 = vrcp.f32 %v3311_v2 }
 0x81f   : > { %12017 = vmatpush3.bf16.msra.mxu0 %v12014_v37  ;;  %11036 = vmatprep.mubr.msk.f32.mxu0 %vm298_vm0, %v2516_v63 }
 0x820   : > { %12019 = vmatprep.subr.bf16.mxu0 %v12018_v11 }
 0x821   : > { %v12774_v23 = vpop.permute.xlu1 %12773 }
 0x822   : > { %v12776_v56 = vunpack.i.h.bf16 %v12774_v23  ;;  %v12775_v27 = vunpack.i.l.bf16 %v12774_v23  ;;  %11037 = vmatmul.mubr.msk.f32.gmra.mrb[44].mxu0 %vm298_vm0, %v2517_v29 }
 0x823   : > { %12021 = vmatpush3.bf16.msra.mxu0 %v12018_v11  ;;  %11039 = vmatprep.mubr.msk.f32.mxu0 %vm298_vm0, %v2518_v55 }
 0x824   : > { %v12026_v51 = vpack.c.bf16 %v12776_v56, %v12775_v27  ;;  %12023 = vmatprep.subr.bf16.mxu0 %v12022_v33 }
 0x825   : > { %v12784_v43 = vpop.permute.xlu1 %12783 }
 0x826   : > { %11040 = vmatmul.mubr.msk.f32.gmra.mrb[46].mxu0 %vm298_vm0, %v2519_v13  ;;  %v12785_v42 = vunpack.i.l.bf16 %v12784_v43 }
 0x827   : > { %12025 = vmatpush3.bf16.msra.mxu0 %v12022_v33  ;;  %11086 = vmatprep.mubr.msk.f32.mxu0 %vm298_vm0, %v3332_v24 }
 0x828   : > { %12028 = vmatprep.subr.msk.bf16.mxu0 %vm14218_vm3, %v12026_v51  ;;  %v13329_v57 = vpop.eup %13328 }
 0x829   : > { %v3335_v53 = vmul.f32 %v13329_v57, %v15192_v9  ;;  %v12789_v22 = vpop.permute.xlu1 %12788 }
 0x82a   : > { %11087 = vmatmul.mubr.msk.f32.vlgmr.msra.gmra.mrb[40].mxu0 %vm298_vm0, %v3333_v10  ;;  %v12791_v0 = vunpack.i.h.bf16 %v12789_v22  ;;  %v12790_v3 = vunpack.i.l.bf16 %v12789_v22 }
 0x82c   : > { %v3308_v31 = vpop.xlane.xlu0 %3307 }
 0x82d   : > { %13330 = vrcp.f32 %v3308_v31  ;;  %v3502_v60 = vpop.permute.xlu1 %3501 }
 0x830   : > { %12031 = vmatpush3.bf16.xpose.msk.msra.mxu0 %vm14218_vm3, %v12026_v51  ;;  %v3314_v25 = vpop.xlane.xlu0 %3313 }
 0x831   : > { %13332 = vrcp.f32 %v3314_v25  ;;  %v3504_v37 = vpop.permute.xlu1 %3503 }
 0x834   : > { %v3317_v61 = vpop.xlane.xlu0 %3316 }
 0x835   : > { %13334 = vrcp.f32 %v3317_v61 }
 0x837   : > { %v13331_v19 = vpop.eup %13330 }
 0x838   : > { %v3320_v32 = vpop.xlane.xlu0 %3319  ;;  %v3334_v38 = vmul.f32 %v13331_v19, %v15204_v58  ;;  %v12786_v58 = vunpack.i.h.bf16 %v12784_v43 }
 0x839   : > { %13336 = vrcp.f32 %v3320_v32 }
 0x83a   : > { %11089 = vmatprep.mubr.msk.f32.mxu0 %vm298_vm0, %v3334_v38 }
 0x83b   : > { %v13333_v59 = vpop.eup %13332  ;;  %11090 = vmatmul.mubr.msk.f32.gmra.mrb[42].mxu0 %vm298_vm0, %v3335_v53 }
 0x83c   : > { %v3323_v52 = vpop.xlane.xlu0 %3322  ;;  %v3336_v5 = vmul.f32 %v13333_v59, %v15208_v34  ;;  %v12038_v34 = vpack.c.bf16 %v12786_v58, %v12785_v42 }
 0x83d   : > { %13338 = vrcp.f32 %v3323_v52  ;;  %v17887_v52 = vld [vmem:[#allocation32_spill] sm:$0xff] }
 0x83e   : > { %11092 = vmatprep.mubr.msk.f32.mxu0 %vm298_vm0, %v3336_v5 }
 0x83f   : > { %v13335_v35 = vpop.eup %13334 }
 0x840   : > { %v12779_v1 = vpop.permute.xlu0 %12778  ;;  %v3337_v15 = vmul.f32 %v13335_v35, %v15214_v6 }
 0x841   : > { %v12781_v44 = vunpack.i.h.bf16 %v12779_v1  ;;  %v12780_v9 = vunpack.i.l.bf16 %v12779_v1 }
 0x842   : > { %11093 = vmatmul.mubr.msk.f32.gmra.mrb[44].mxu0 %vm298_vm0, %v3337_v15 }
 0x843   : > { %v13337_v28 = vpop.eup %13336  ;;  %v12032_v4 = vpack.c.bf16 %v12781_v44, %v12780_v9 }
 0x844   : > { %v3338_v16 = vmul.f32 %v13337_v28, %v15220_v48  ;;  %v12044_v48 = vpack.c.bf16 %v12791_v0, %v12790_v3  ;;  %v3506_v62 = vpop.permute.xlu0 %3505 }
 0x845   : > { %12034 = vmatprep.subr.msk.bf16.mxu0 %vm14218_vm3, %v12032_v4 }
 0x846   : > { %11095 = vmatprep.mubr.msk.f32.mxu0 %vm298_vm0, %v3338_v16  ;;  %12037 = vmatpush3.bf16.xpose.msk.msra.mxu0 %vm14218_vm3, %v12032_v4 }
 0x847   : > { %v13339_v6 = vpop.eup %13338  ;;  %12040 = vmatprep.subr.msk.bf16.mxu0 %vm14218_vm3, %v12038_v34 }
 0x848   : > { %v3339_v30 = vmul.f32 %v13339_v6, %v15226_v39  ;;  %v3508_v39 = vpop.permute.xlu1 %3507  ;;  %v3510_v41 = vpop.permute.xlu0 %3509 }
 0x84a   : > { %11096 = vmatmul.mubr.msk.f32.gmra.mrb[46].mxu0 %vm298_vm0, %v3339_v30 }
 0x84b   : > { %11114 = vmatprep.mubr.msk.f32.mxu0 %vm622_vm2, %v3502_v60 }
 0x84c   : > { %v3512_v17 = vpop.permute.xlu1 %3511  ;;  %v3514_v2 = vpop.permute.xlu0 %3513 }
 0x84e   : > { %12043 = vmatpush3.bf16.xpose.msk.msra.mxu0 %vm14218_vm3, %v12038_v34 }
 0x84f   : > { %12046 = vmatprep.subr.msk.bf16.mxu0 %vm14218_vm3, %v12044_v48 }
 0x850   : > { %v3516_v21 = vpop.permute.xlu1 %3515 }
 0x856   : > { %12049 = vmatpush3.bf16.xpose.msk.msra.mxu0 %vm14218_vm3, %v12044_v48 }
 0x85d   : > { %11115 = vmatmul.mubr.msk.f32.vlgmr.msra.gmra.mrb[48].mxu0 %vm622_vm2, %v3504_v37 }
 0x85e   : > { %11117 = vmatprep.mubr.msk.f32.mxu0 %vm622_vm2, %v3506_v62 }
 0x861   : > { %11118 = vmatmul.mubr.msk.f32.gmra.mrb[50].mxu0 %vm622_vm2, %v3508_v39 }
 0x862   : > { %11120 = vmatprep.mubr.msk.f32.mxu0 %vm622_vm2, %v3510_v41 }
 0x865   : > { %11121 = vmatmul.mubr.msk.f32.gmra.mrb[52].mxu0 %vm622_vm2, %v3512_v17 }
 0x866   : > { %11123 = vmatprep.mubr.msk.f32.mxu0 %vm622_vm2, %v3514_v2 }
 0x869   : > { %11124 = vmatmul.mubr.msk.f32.gmra.mrb[54].mxu0 %vm622_vm2, %v3516_v21 }
 0x8ba   : > { %v15375_v63 = vpop.f32.mrb[24].mxu0 }
 0x8bb   : > { %v15377_v12 = vpop.f32.mrb[25].mxu0 }
 0x8c2   : > { %v15379_v49 = vpop.f32.mrb[26].mxu0 }
 0x8c3   : > { %v15381_v36 = vpop.f32.mrb[27].mxu0 }
 0x8c7   : > { %v15383_v11 = vpop.f32.mrb[28].mxu0 }
 0x8c8   : > { %v15385_v40 = vpop.f32.mrb[29].mxu0 }
 0x8d9   : > { %v15387_v29 = vpop.f32.mrb[30].mxu0 }
 0x8da   : > { %v15389_v47 = vpop.f32.mrb[31].mxu0 }
 0x930   : > { %v11116_v23 = vpop.f32.mrb[48].mxu0 }
 0x931   : > { %v3671_v20 = vmul.f32 0.35355338, %v11116_v23  ;;  %v3631_v55 = vpop.f32.mrb[49].mxu0 }
 0x932   : > { %v3670_v45 = vmul.f32 0.35355338, %v3631_v55 }
 0x933   : > { %v3681_v56 = vsel %vm298_vm0, %v3671_v20, -inf }
 0x934   : > { %3682 = vmax.xlane.f32.xlu1 %v3681_v56  ;;  %v11119_v27 = vpop.f32.mrb[50].mxu0  ;;  %v3678_v33 = vsel %vm298_vm0, %v3670_v45, -inf }
 0x935   : > { %3679 = vmax.xlane.f32.xlu0 %v3678_v33  ;;  %v3641_v51 = vpop.f32.mrb[51].mxu0  ;;  %v3673_v13 = vmul.f32 0.35355338, %v11119_v27 }
 0x936   : > { %v3672_v50 = vmul.f32 0.35355338, %v3641_v51 }
 0x937   : > { %v3687_v25 = vsel %vm298_vm0, %v3673_v13, -inf }
 0x938   : > { %v11122_v7 = vpop.f32.mrb[52].mxu0  ;;  %v3684_v54 = vsel %vm298_vm0, %v3672_v50, -inf }
 0x939   : > { %3685 = vmax.xlane.f32.xlu0 %v3684_v54  ;;  %v3651_v24 = vpop.f32.mrb[53].mxu0  ;;  %v3675_v10 = vmul.f32 0.35355338, %v11122_v7 }
 0x93a   : > { %v3674_v46 = vmul.f32 0.35355338, %v3651_v24 }
 0x93b   : > { %v3693_v38 = vsel %vm298_vm0, %v3675_v10, -inf }
 0x93c   : > { %v11125_v31 = vpop.f32.mrb[54].mxu0  ;;  %v3690_v61 = vsel %vm298_vm0, %v3674_v46, -inf }
 0x93d   : > { %3688 = vmax.xlane.f32.xlu0 %v3687_v25  ;;  %3691 = vmax.xlane.f32.xlu1 %v3690_v61  ;;  %v3661_v57 = vpop.f32.mrb[55].mxu0  ;;  %v3677_v32 = vmul.f32 0.35355338, %v11125_v31  ;;  %v3931_v61 = vsel %vm460_vm1, %v15377_v12, 0.0 }
 0x93e   : > { %v3676_v19 = vmul.f32 0.35355338, %v3661_v57  ;;  %v3937_v57 = vsel %vm460_vm1, %v15381_v36, 0.0 }
 0x93f   : > { %v3699_v59 = vsel %vm298_vm0, %v3677_v32, -inf }
 0x940   : > { %v3696_v53 = vsel %vm298_vm0, %v3676_v19, -inf }
 0x941   : > { %3694 = vmax.xlane.f32.xlu0 %v3693_v38  ;;  %3697 = vmax.xlane.f32.xlu1 %v3696_v53  ;;  %v3952_v38 = vsel %vm460_vm1, %v15387_v29, 0.0 }
 0x945   : > { %3700 = vmax.xlane.f32.xlu0 %v3699_v59 }
 0x952   : > { %12793 = vrot.lane.b32.xlu1 %v17887_v52, %s13785_s11 }
 0x9c1   : > { %v3683_v5 = vpop.xlane.xlu1 %3682 }
 0x9c2   : > { %v3703_v43 = vsub.f32 %v3671_v20, %v3683_v5  ;;  %v3680_v35 = vpop.xlane.xlu0 %3679 }
 0x9c3   : > { %v3702_v1 = vsub.f32 %v3670_v45, %v3680_v35 }
 0x9c4   : > { %v3712_v15 = vmul.f32 1.442695, %v3703_v43 }
 0x9c5   : > { %v3710_v58 = vmul.f32 1.442695, %v3702_v1 }
 0x9c6   : > { %13340 = vpow2.f32 %v3712_v15  ;;  %v3686_v42 = vpop.xlane.xlu0 %3685 }
 0x9c7   : > { %13342 = vpow2.f32 %v3710_v58  ;;  %v3704_v44 = vsub.f32 %v3672_v50, %v3686_v42 }
 0x9c9   : > { %v3714_v9 = vmul.f32 1.442695, %v3704_v44 }
 0x9ca   : > { %v3689_v28 = vpop.xlane.xlu0 %3688  ;;  %v3692_v4 = vpop.xlane.xlu1 %3691 }
 0x9cb   : > { %13344 = vpow2.f32 %v3714_v9  ;;  %v3705_v22 = vsub.f32 %v3673_v13, %v3689_v28  ;;  %v3706_v16 = vsub.f32 %v3674_v46, %v3692_v4 }
 0x9cd   : > { %v3716_v34 = vmul.f32 1.442695, %v3705_v22  ;;  %v3718_v6 = vmul.f32 1.442695, %v3706_v16 }
 0x9ce   : > { %v3695_v30 = vpop.xlane.xlu0 %3694  ;;  %v3698_v0 = vpop.xlane.xlu1 %3697 }
 0x9cf   : > { %13346 = vpow2.f32 %v3716_v34  ;;  %v3707_v3 = vsub.f32 %v3675_v10, %v3695_v30  ;;  %v3708_v62 = vsub.f32 %v3676_v19, %v3698_v0  ;;  %v3934_v19 = vsel %vm460_vm1, %v15375_v63, 0.0 }
 0x9d0   : > { %v15401_v60 = vpop.eup %13340  ;;  %13348 = vpow2.f32 %v3718_v6 }
 0x9d1   : > { %v15403_v48 = vpop.eup %13342  ;;  %v3720_v37 = vmul.f32 1.442695, %v3707_v3  ;;  %v3729_v39 = vsel %vm298_vm0, %v15401_v60, 0.0  ;;  %v3722_v45 = vmul.f32 1.442695, %v3708_v62 }
 0x9d2   : > { %3730 = vadd.xlane.f32.xlu0 %v3729_v39  ;;  %v3701_v41 = vpop.xlane.xlu0 %3700  ;;  %v12794_v17 = vpop.permute.xlu1 %12793  ;;  %v3726_v2 = vsel %vm298_vm0, %v15403_v48, 0.0 }
 0x9d3   : > { %13350 = vpow2.f32 %v3720_v37  ;;  %v3709_v21 = vsub.f32 %v3677_v32, %v3701_v41  ;;  %v12796_v23 = vunpack.i.h.bf16 %v12794_v17  ;;  %v12795_v20 = vunpack.i.l.bf16 %v12794_v17  ;;  %3727 = vadd.xlane.f32.xlu1 %v3726_v2 }
 0x9d4   : > { %v3946_v32 = vsel %vm460_vm1, %v15383_v11, 0.0 }
 0x9d5   : > { %v15409_v55 = vpop.eup %13344  ;;  %v3724_v56 = vmul.f32 1.442695, %v3709_v21  ;;  %v12050_v27 = vpack.c.bf16 %v12796_v23, %v12795_v20 }
 0x9d6   : > { %v3732_v33 = vsel %vm298_vm0, %v15409_v55, 0.0 }
 0x9d7   : > { %13352 = vpow2.f32 %v3724_v56  ;;  %3733 = vadd.xlane.f32.xlu1 %v3732_v33  ;;  %12051 = vmatprep.subr.bf16.mxu0 %v12050_v27 }
 0x9d8   : > { %12053 = vmatpush3.bf16.msra.mxu0 %v12050_v27  ;;  %13354 = vpow2.f32 %v3722_v45 }
 0x9d9   : > { %v15413_v51 = vpop.eup %13346 }
 0x9da   : > { %v15415_v50 = vpop.eup %13348  ;;  %v3735_v13 = vsel %vm298_vm0, %v15413_v51, 0.0 }
 0x9db   : > { %3736 = vadd.xlane.f32.xlu0 %v3735_v13  ;;  %v3738_v7 = vsel %vm298_vm0, %v15415_v50, 0.0 }
 0x9dc   : > { %3739 = vadd.xlane.f32.xlu1 %v3738_v7 }
 0x9dd   : > { %v15421_v54 = vpop.eup %13350 }
 0x9de   : > { %v3741_v24 = vsel %vm298_vm0, %v15421_v54, 0.0 }
 0x9df   : > { %3742 = vadd.xlane.f32.xlu0 %v3741_v24 }
 0x9e1   : > { %v15425_v46 = vpop.eup %13352 }
 0x9e2   : > { %v3747_v10 = vsel %vm298_vm0, %v15425_v46, 0.0  ;;  %v15429_v31 = vpop.eup %13354 }
 0x9e3   : > { %3748 = vadd.xlane.f32.xlu0 %v3747_v10  ;;  %v3744_v25 = vsel %vm298_vm0, %v15429_v31, 0.0 }
 0x9e7   : > { %3745 = vadd.xlane.f32.xlu0 %v3744_v25 }
 0x9ed   : > { %12803 = vrot.lane.b32.xlu1 %v17852_v14, %s13785_s11  ;;  %v3943_v14 = vsel %vm460_vm1, %v15385_v40, 0.0 }
 0x9f1   : > { %12808 = vrot.lane.b32.xlu1 %v17863_v8, %s13785_s11  ;;  %v3940_v8 = vsel %vm460_vm1, %v15379_v49, 0.0 }
 0x9fd   : > { %12798 = vrot.lane.b32.xlu0 %v17850_v18, %s13785_s11  ;;  %v3949_v18 = vsel %vm460_vm1, %v15389_v47, 0.0 }
 0xa15   : > { %3932 = vadd.xlane.f32.xlu1 %v3931_v61 }
 0xa19   : > { %3938 = vadd.xlane.f32.xlu1 %v3937_v57 }
 0xa1c   : > { %3935 = vadd.xlane.f32.xlu0 %v3934_v19 }
 0xa1d   : > { %3944 = vadd.xlane.f32.xlu1 %v3943_v14 }
 0xa20   : > { %3941 = vadd.xlane.f32.xlu0 %v3940_v8 }
 0xa21   : > { %3950 = vadd.xlane.f32.xlu1 %v3949_v18 }
 0xa24   : > { %3947 = vadd.xlane.f32.xlu0 %v3946_v32 }
 0xa28   : > { %3953 = vadd.xlane.f32.xlu0 %v3952_v38 }
 0xa5f   : > { %v3731_v59 = vpop.xlane.xlu0 %3730 }
 0xa60   : > { %v3728_v53 = vpop.xlane.xlu1 %3727 }
 0xa61   : > { %13356 = vrcp.f32 %v3728_v53 }
 0xa62   : > { %13358 = vrcp.f32 %v3731_v59 }
 0xa64   : > { %v3734_v52 = vpop.xlane.xlu1 %3733 }
 0xa65   : > { %13360 = vrcp.f32 %v3734_v52 }
 0xa68   : > { %v3737_v5 = vpop.xlane.xlu0 %3736 }
 0xa69   : > { %v3740_v15 = vpop.xlane.xlu1 %3739  ;;  %13362 = vrcp.f32 %v3737_v5 }
 0xa6a   : > { %13364 = vrcp.f32 %v3740_v15 }
 0xa6b   : > { %v13357_v43 = vpop.eup %13356 }
 0xa6c   : > { %v3743_v35 = vpop.xlane.xlu0 %3742  ;;  %v3758_v1 = vmul.f32 %v13357_v43, %v15403_v48  ;;  %v13359_v37 = vpop.eup %13358 }
 0xa6d   : > { %v12804_v42 = vpop.permute.xlu1 %12803  ;;  %13366 = vrcp.f32 %v3743_v35  ;;  %v3759_v39 = vmul.f32 %v13359_v37, %v15401_v60 }
 0xa6e   : > { %11142 = vmatprep.mubr.msk.f32.mxu0 %vm298_vm0, %v3758_v1  ;;  %v12806_v28 = vunpack.i.h.bf16 %v12804_v42  ;;  %v12805_v4 = vunpack.i.l.bf16 %v12804_v42 }
 0xa6f   : > { %v13361_v62 = vpop.eup %13360 }
 0xa70   : > { %v3749_v58 = vpop.xlane.xlu0 %3748  ;;  %v12058_v3 = vpack.c.bf16 %v12806_v28, %v12805_v4  ;;  %v3760_v17 = vmul.f32 %v13361_v62, %v15409_v55 }
 0xa71   : > { %v12809_v34 = vpop.permute.xlu1 %12808 }
 0xa72   : > { %v12811_v30 = vunpack.i.h.bf16 %v12809_v34  ;;  %v12810_v0 = vunpack.i.l.bf16 %v12809_v34 }
 0xa73   : > { %v13363_v41 = vpop.eup %13362 }
 0xa74   : > { %v3746_v44 = vpop.xlane.xlu0 %3745  ;;  %v12062_v48 = vpack.c.bf16 %v12811_v30, %v12810_v0  ;;  %v13365_v2 = vpop.eup %13364  ;;  %v3761_v21 = vmul.f32 %v13363_v41, %v15413_v51 }
 0xa75   : > { %13368 = vrcp.f32 %v3746_v44  ;;  %v3762_v20 = vmul.f32 %v13365_v2, %v15415_v50 }
 0xa76   : > { %13370 = vrcp.f32 %v3749_v58 }
 0xa77   : > { %v13367_v23 = vpop.eup %13366 }
 0xa78   : > { %v12799_v9 = vpop.permute.xlu0 %12798  ;;  %v3763_v60 = vmul.f32 %v13367_v23, %v15421_v54  ;;  %v15554_v23 = vld [vmem:[%s17673_s2 + $0x10] sm:$0xff]  }
 0xa79   : > { %v12801_v22 = vunpack.i.h.bf16 %v12799_v9  ;;  %v12800_v16 = vunpack.i.l.bf16 %v12799_v9  ;;  %11154 = vmatprep.subr.bf16.mxu1 %v15554_v23 }
 0xa7a   : > { %11155 = vmatpush3.bf16.msra.mxu1 %v15554_v23 }
 0xa7b   : > { %v12054_v6 = vpack.c.bf16 %v12801_v22, %v12800_v16 }
 0xa7d   : > { %12055 = vmatprep.subr.bf16.mxu0 %v12054_v6 }
 0xa7e   : > { %12057 = vmatpush3.bf16.msra.mxu0 %v12054_v6 }
 0xa7f   : > { %12059 = vmatprep.subr.bf16.mxu0 %v12058_v3  ;;  %v13369_v45 = vpop.eup %13368 }
 0xa80   : > { %v13371_v56 = vpop.eup %13370  ;;  %v3764_v55 = vmul.f32 %v13369_v45, %v15429_v31 }
 0xa81   : > { %v3765_v27 = vmul.f32 %v13371_v56, %v15425_v46 }
 0xa82   : > { %12061 = vmatpush3.bf16.msra.mxu0 %v12058_v3 }
 0xa83   : > { %12063 = vmatprep.subr.bf16.mxu0 %v12062_v48 }
 0xa86   : > { %12065 = vmatpush3.bf16.msra.mxu0 %v12062_v48 }
 0xa89   : > { %11143 = vmatmul.mubr.msk.f32.vlgmr.msra.gmra.mrb[40].mxu0 %vm298_vm0, %v3759_v39 }
 0xa8a   : > { %11145 = vmatprep.mubr.msk.f32.mxu0 %vm298_vm0, %v3760_v17 }
 0xa8d   : > { %11146 = vmatmul.mubr.msk.f32.gmra.mrb[42].mxu0 %vm298_vm0, %v3761_v21 }
 0xa8e   : > { %11148 = vmatprep.mubr.msk.f32.mxu0 %vm298_vm0, %v3762_v20  ;;  %v15561_v20 = vld [vmem:[%s17673_s2 + $0x18] sm:$0xff]  }
 0xa8f   : > { %11156 = vmatprep.subr.bf16.mxu1 %v15561_v20 }
 0xa90   : > { %11157 = vmatpush3.bf16.msra.mxu1 %v15561_v20 }
 0xa91   : > { %11149 = vmatmul.mubr.msk.f32.gmra.mrb[44].mxu0 %vm298_vm0, %v3763_v60 }
 0xa92   : > { %11151 = vmatprep.mubr.msk.f32.mxu0 %vm298_vm0, %v3764_v55 }
 0xa95   : > { %11152 = vmatmul.mubr.msk.f32.gmra.mrb[46].mxu0 %vm298_vm0, %v3765_v27 }
 0xaa2   : > { %v3933_v51 = vpop.xlane.xlu1 %3932 }
 0xaa3   : > { %v3980_v57 = vmul.f32 0.03125, %v3933_v51 }
 0xaa5   : > { %v15497_v52 = vsub.f32 %v15377_v12, %v3980_v57 }
 0xaa6   : > { %v3939_v10 = vpop.xlane.xlu1 %3938 }
 0xaa7   : > { %v3982_v5 = vmul.f32 0.03125, %v3939_v10 }
 0xaa9   : > { %v3936_v33 = vpop.xlane.xlu0 %3935  ;;  %v15513_v42 = vsub.f32 %v15381_v36, %v3982_v5 }
 0xaaa   : > { %v3981_v46 = vmul.f32 0.03125, %v3936_v33  ;;  %v3945_v32 = vpop.xlane.xlu1 %3944 }
 0xaab   : > { %v3984_v44 = vmul.f32 0.03125, %v3945_v32  ;;  %v4014_v3 = vmul.f32 %v15513_v42, %v15513_v42 }
 0xaac   : > { %v15490_v18 = vsub.f32 %v15375_v63, %v3981_v46 }
 0xaad   : > { %v3942_v54 = vpop.xlane.xlu0 %3941  ;;  %v15526_v6 = vsub.f32 %v15385_v40, %v3984_v44  ;;  %v4034_v40 = vsel %vm460_vm1, %v4014_v3, 0.0 }
 0xaae   : > { %v3983_v38 = vmul.f32 0.03125, %v3942_v54  ;;  %v4013_v12 = vmul.f32 %v15490_v18, %v15490_v18  ;;  %v3951_v4 = vpop.xlane.xlu1 %3950 }
 0xaaf   : > { %v3986_v30 = vmul.f32 0.03125, %v3951_v4  ;;  %v4016_v39 = vmul.f32 %v15526_v6, %v15526_v6 }
 0xab0   : > { %v15504_v63 = vsub.f32 %v15379_v49, %v3983_v38  ;;  %v4012_v49 = vmul.f32 %v15497_v52, %v15497_v52  ;;  %v4031_v34 = vsel %vm460_vm1, %v4013_v12, 0.0 }
 0xab1   : > { %v3948_v14 = vpop.xlane.xlu0 %3947  ;;  %v15538_v62 = vsub.f32 %v15389_v47, %v3986_v30  ;;  %v4040_v17 = vsel %vm460_vm1, %v4016_v39, 0.0 }
 0xab2   : > { %v3985_v1 = vmul.f32 0.03125, %v3948_v14  ;;  %v4015_v36 = vmul.f32 %v15504_v63, %v15504_v63  ;;  %v4028_v0 = vsel %vm460_vm1, %v4012_v49, 0.0 }
 0xab3   : > { %v4018_v2 = vmul.f32 %v15538_v62, %v15538_v62 }
 0xab4   : > { %v15520_v22 = vsub.f32 %v15383_v11, %v3985_v1  ;;  %v4037_v48 = vsel %vm460_vm1, %v4015_v36, 0.0 }
 0xab5   : > { %v3954_v9 = vpop.xlane.xlu0 %3953  ;;  %v4046_v21 = vsel %vm460_vm1, %v4018_v2, 0.0 }
 0xab6   : > { %v3987_v16 = vmul.f32 0.03125, %v3954_v9  ;;  %v4017_v37 = vmul.f32 %v15520_v22, %v15520_v22 }
 0xab8   : > { %v15532_v11 = vsub.f32 %v15387_v29, %v3987_v16  ;;  %v4043_v41 = vsel %vm460_vm1, %v4017_v37, 0.0 }
 0xaba   : > { %v4019_v29 = vmul.f32 %v15532_v11, %v15532_v11 }
 0xabc   : > { %v4049_v47 = vsel %vm460_vm1, %v4019_v29, 0.0 }
 0xb5c   : > { %v15471_v50 = vpop.f32.mrb[40].mxu0 }
 0xb5d   : > { %v15473_v13 = vpop.f32.mrb[41].mxu0  ;;  %v3958_v7 = vsel %vm460_vm1, %v15471_v50, 0.0 }
 0xb5e   : > { %3959 = vadd.xlane.f32.xlu0 %v3958_v7  ;;  %v3955_v24 = vsel %vm460_vm1, %v15473_v13, 0.0 }
 0xb5f   : > { %3956 = vadd.xlane.f32.xlu1 %v3955_v24 }
 0xb60   : > { %v15479_v31 = vpop.f32.mrb[42].mxu0 }
 0xb61   : > { %v15481_v25 = vpop.f32.mrb[43].mxu0  ;;  %v3964_v61 = vsel %vm460_vm1, %v15479_v31, 0.0 }
 0xb62   : > { %3965 = vadd.xlane.f32.xlu0 %v3964_v61  ;;  %v3961_v19 = vsel %vm460_vm1, %v15481_v25, 0.0 }
 0xb63   : > { %3962 = vadd.xlane.f32.xlu1 %v3961_v19 }
 0xb64   : > { %v15487_v8 = vpop.f32.mrb[44].mxu0 }
 0xb65   : > { %v15492_v53 = vpop.f32.mrb[45].mxu0  ;;  %v3970_v59 = vsel %vm460_vm1, %v15487_v8, 0.0 }
 0xb66   : > { %3971 = vadd.xlane.f32.xlu0 %v3970_v59  ;;  %v3967_v43 = vsel %vm460_vm1, %v15492_v53, 0.0 }
 0xb67   : > { %3968 = vadd.xlane.f32.xlu1 %v3967_v43 }
 0xb68   : > { %v15501_v35 = vpop.f32.mrb[46].mxu0 }
 0xb69   : > { %v15506_v15 = vpop.f32.mrb[47].mxu0  ;;  %v3976_v58 = vsel %vm460_vm1, %v15501_v35, 0.0 }
 0xb6a   : > { %3977 = vadd.xlane.f32.xlu0 %v3976_v58  ;;  %v3973_v28 = vsel %vm460_vm1, %v15506_v15, 0.0 }
 0xb6b   : > { %3974 = vadd.xlane.f32.xlu1 %v3973_v28 }
 0xb6e   : > { %4032 = vadd.xlane.f32.xlu0 %v4031_v34 }
 0xb6f   : > { %4029 = vadd.xlane.f32.xlu1 %v4028_v0 }
 0xb72   : > { %4038 = vadd.xlane.f32.xlu0 %v4037_v48 }
 0xb73   : > { %4035 = vadd.xlane.f32.xlu1 %v4034_v40 }
 0xb76   : > { %4044 = vadd.xlane.f32.xlu0 %v4043_v41 }
 0xb77   : > { %4041 = vadd.xlane.f32.xlu1 %v4040_v17 }
 0xb7a   : > { %4050 = vadd.xlane.f32.xlu0 %v4049_v47 }
 0xb7b   : > { %4047 = vadd.xlane.f32.xlu1 %v4046_v21 }
 0xbeb   : > { %v3960_v45 = vpop.xlane.xlu0 %3959 }
 0xbec   : > { %v3989_v60 = vmul.f32 0.03125, %v3960_v45  ;;  %v3957_v56 = vpop.xlane.xlu1 %3956 }
 0xbed   : > { %v3988_v55 = vmul.f32 0.03125, %v3957_v56 }
 0xbee   : > { %v15566_v27 = vsub.f32 %v15471_v50, %v3989_v60 }
 0xbef   : > { %v15569_v33 = vsub.f32 %v15473_v13, %v3988_v55  ;;  %v3966_v51 = vpop.xlane.xlu0 %3965 }
 0xbf0   : > { %v3991_v7 = vmul.f32 0.03125, %v3966_v51  ;;  %v3963_v54 = vpop.xlane.xlu1 %3962  ;;  %v4021_v24 = vmul.f32 %v15566_v27, %v15566_v27 }
 0xbf1   : > { %v3990_v10 = vmul.f32 0.03125, %v3963_v54  ;;  %v4020_v46 = vmul.f32 %v15569_v33, %v15569_v33 }
 0xbf2   : > { %v15576_v61 = vsub.f32 %v15479_v31, %v3991_v7  ;;  %v4055_v57 = vsel %vm460_vm1, %v4021_v24, 0.0 }
 0xbf3   : > { %v15580_v50 = vsub.f32 %v15481_v25, %v3990_v10  ;;  %v3972_v13 = vpop.xlane.xlu0 %3971  ;;  %4056 = vadd.xlane.f32.xlu0 %v4055_v57  ;;  %v4052_v19 = vsel %vm460_vm1, %v4020_v46, 0.0  ;;  %v15616_v57 = vld [vmem:[%s17675_s4 + $0x80] ss:$0 sm:$0xff] }
 0xbf4   : > { %v3993_v14 = vmul.f32 0.03125, %v3972_v13  ;;  %v3969_v32 = vpop.xlane.xlu1 %3968  ;;  %4053 = vadd.xlane.f32.xlu1 %v4052_v19  ;;  %v4023_v38 = vmul.f32 %v15576_v61, %v15576_v61 }
 0xbf5   : > { %v3992_v59 = vmul.f32 0.03125, %v3969_v32  ;;  %v4022_v31 = vmul.f32 %v15580_v50, %v15580_v50 }
 0xbf6   : > { %v15588_v5 = vsub.f32 %v15487_v8, %v3993_v14  ;;  %v4061_v25 = vsel %vm460_vm1, %v4023_v38, 0.0  ;;  %v15622_v38 = vld [vmem:[%s17675_s4 + $0x88] ss:$0 sm:$0xff] }
 0xbf7   : > { %v15592_v43 = vsub.f32 %v15492_v53, %v3992_v59  ;;  %4062 = vadd.xlane.f32.xlu0 %v4061_v25  ;;  %v3978_v1 = vpop.xlane.xlu0 %3977  ;;  %v4058_v58 = vsel %vm460_vm1, %v4022_v31, 0.0 }
 0xbf8   : > { %v3995_v12 = vmul.f32 0.03125, %v3978_v1  ;;  %4059 = vadd.xlane.f32.xlu1 %v4058_v58  ;;  %v3975_v44 = vpop.xlane.xlu1 %3974  ;;  %v4025_v9 = vmul.f32 %v15588_v5, %v15588_v5 }
 0xbf9   : > { %v3994_v28 = vmul.f32 0.03125, %v3975_v44  ;;  %v4024_v8 = vmul.f32 %v15592_v43, %v15592_v43 }
 0xbfa   : > { %v15600_v49 = vsub.f32 %v15501_v35, %v3995_v12  ;;  %v4067_v53 = vsel %vm460_vm1, %v4025_v9, 0.0 }
 0xbfb   : > { %v15604_v4 = vsub.f32 %v15506_v15, %v3994_v28  ;;  %4068 = vadd.xlane.f32.xlu0 %v4067_v53  ;;  %v4033_v16 = vpop.xlane.xlu0 %4032  ;;  %v4064_v34 = vsel %vm460_vm1, %v4024_v8, 0.0 }
 0xbfc   : > { %v4077_v36 = vmul.f32 0.03125, %v4033_v16  ;;  %4065 = vadd.xlane.f32.xlu1 %v4064_v34  ;;  %v4030_v30 = vpop.xlane.xlu1 %4029  ;;  %v4027_v0 = vmul.f32 %v15600_v49, %v15600_v49 }
 0xbfd   : > { %v4076_v3 = vmul.f32 0.03125, %v4030_v30  ;;  %v4026_v35 = vmul.f32 %v15604_v4, %v15604_v4 }
 0xbfe   : > { %v4093_v48 = vadd.f32 1e-05, %v4077_v36  ;;  %v4073_v37 = vsel %vm460_vm1, %v4027_v0, 0.0 }
 0xbff   : > { %v4092_v40 = vadd.f32 1e-05, %v4076_v3  ;;  %4074 = vadd.xlane.f32.xlu0 %v4073_v37  ;;  %v4039_v15 = vpop.xlane.xlu0 %4038  ;;  %v4070_v39 = vsel %vm460_vm1, %v4026_v35, 0.0 }
 0xc00   : > { %13372 = vrsqrt.f32 %v4093_v48  ;;  %v4079_v41 = vmul.f32 0.03125, %v4039_v15  ;;  %4071 = vadd.xlane.f32.xlu1 %v4070_v39  ;;  %v4036_v29 = vpop.xlane.xlu1 %4035 }
 0xc01   : > { %13374 = vrsqrt.f32 %v4092_v40  ;;  %v4078_v17 = vmul.f32 0.03125, %v4036_v29 }
 0xc02   : > { %v4095_v2 = vadd.f32 1e-05, %v4079_v41 }
 0xc03   : > { %v4094_v47 = vadd.f32 1e-05, %v4078_v17  ;;  %v4045_v21 = vpop.xlane.xlu0 %4044 }
 0xc04   : > { %13376 = vrsqrt.f32 %v4095_v2  ;;  %v4081_v45 = vmul.f32 0.03125, %v4045_v21  ;;  %v4042_v60 = vpop.xlane.xlu1 %4041 }
 0xc05   : > { %13378 = vrsqrt.f32 %v4094_v47  ;;  %v4080_v56 = vmul.f32 0.03125, %v4042_v60 }
 0xc06   : > { %v4097_v55 = vadd.f32 1e-05, %v4081_v45 }
 0xc07   : > { %v4096_v51 = vadd.f32 1e-05, %v4080_v56  ;;  %v4051_v7 = vpop.xlane.xlu0 %4050 }
 0xc08   : > { %13380 = vrsqrt.f32 %v4097_v55  ;;  %v4083_v54 = vmul.f32 0.03125, %v4051_v7  ;;  %v4048_v24 = vpop.xlane.xlu1 %4047 }
 0xc09   : > { %13382 = vrsqrt.f32 %v4096_v51  ;;  %v4082_v10 = vmul.f32 0.03125, %v4048_v24 }
 0xc0a   : > { %v13373_v46 = vpop.eup %13372  ;;  %v4099_v13 = vadd.f32 1e-05, %v4083_v54 }
 0xc0b   : > { %v13375_v19 = vpop.eup %13374  ;;  %v4098_v14 = vadd.f32 1e-05, %v4082_v10  ;;  %v4125_v32 = vmul.f32 %v13373_v46, %v15490_v18 }
 0xc0c   : > { %13384 = vrsqrt.f32 %v4099_v13  ;;  %v4124_v59 = vmul.f32 %v13375_v19, %v15497_v52 }
 0xc0d   : > { %13386 = vrsqrt.f32 %v4098_v14  ;;  %v4145_v31 = vmul.f32 %v15616_v57, %v4125_v32 }
 0xc0e   : > { %v13377_v25 = vpop.eup %13376  ;;  %v4144_v1 = vmul.f32 %v15616_v57, %v4124_v59 }
 0xc0f   : > { %v13379_v58 = vpop.eup %13378  ;;  %v4127_v12 = vmul.f32 %v13377_v25, %v15504_v63  ;;  %v4165_v44 = vadd.f32 %v15622_v38, %v4145_v31 }
 0xc10   : > { %v4126_v18 = vmul.f32 %v13379_v58, %v15513_v42  ;;  %v4164_v9 = vadd.f32 %v15622_v38, %v4144_v1 }
 0xc11   : > { %v4147_v28 = vmul.f32 %v15616_v57, %v4127_v12 }
 0xc12   : > { %v13381_v8 = vpop.eup %13380  ;;  %v4146_v52 = vmul.f32 %v15616_v57, %v4126_v18  ;;  %v4180_v53 = vpack.c.bf16 %v4165_v44, %v4164_v9 }
 0xc13   : > { %v13383_v16 = vpop.eup %13382  ;;  %v4167_v34 = vadd.f32 %v15622_v38, %v4147_v28  ;;  %v4129_v36 = vmul.f32 %v13381_v8, %v15520_v22 }
 0xc14   : > { %v4166_v30 = vadd.f32 %v15622_v38, %v4146_v52  ;;  %11158 = vmatprep.mubr.msk.bf16.mxu1 %vm460_vm1, %v4180_v53  ;;  %v4128_v63 = vmul.f32 %v13383_v16, %v15526_v6 }
 0xc15   : > { %v4149_v42 = vmul.f32 %v15616_v57, %v4129_v36 }
 0xc16   : > { %v13385_v0 = vpop.eup %13384  ;;  %v4181_v3 = vpack.c.bf16 %v4167_v34, %v4166_v30  ;;  %v4148_v35 = vmul.f32 %v15616_v57, %v4128_v63 }
 0xc17   : > { %v13387_v48 = vpop.eup %13386  ;;  %v4169_v37 = vadd.f32 %v15622_v38, %v4149_v42  ;;  %v4131_v40 = vmul.f32 %v13385_v0, %v15532_v11  ;;  %v13104_v11 = vld [vmem:[%s17673_s2] sm:$0xff]  }
 0xc18   : > { %11159 = vmatmul.mubr.msk.bf16.vlgmr.msra.gmra.mrb[72].mxu1 %vm460_vm1, %v4181_v3  ;;  %v4168_v22 = vadd.f32 %v15622_v38, %v4148_v35  ;;  %v4130_v15 = vmul.f32 %v13387_v48, %v15538_v62  ;;  %v13105_v62 = vld [vmem:[%s17673_s2 + $0x8] sm:$0xff]   ;;  %11174 = vmatprep.subr.bf16.mxu1 %v13104_v11 }
 0xc19   : > { %v4151_v39 = vmul.f32 %v15616_v57, %v4131_v40  ;;  %4454 = vrot.lane.b32.xlu1 %v13104_v11, %s13782_s8  ;;  %11175 = vmatpush3.bf16.msra.mxu1 %v13104_v11 }
 0xc1a   : > { %v4182_v6 = vpack.c.bf16 %v4169_v37, %v4168_v22  ;;  %v4150_v41 = vmul.f32 %v15616_v57, %v4130_v15  ;;  %4456 = vrot.lane.b32.xlu0 %v13105_v62, %s13782_s8  ;;  %11176 = vmatprep.subr.bf16.mxu1 %v13105_v62 }
 0xc1b   : > { %v4171_v29 = vadd.f32 %v15622_v38, %v4151_v39 }
 0xc1c   : > { %11162 = vmatprep.mubr.msk.bf16.mxu1 %vm460_vm1, %v4182_v6  ;;  %v4170_v17 = vadd.f32 %v15622_v38, %v4150_v41 }
 0xc1d   : > { %4458 = vrot.lane.b32.xlu1 %v15554_v23, %s13782_s8  ;;  %11177 = vmatpush3.bf16.msra.mxu1 %v13105_v62 }
 0xc1e   : > { %v4183_v2 = vpack.c.bf16 %v4171_v29, %v4170_v17 }
 0xc20   : > { %11163 = vmatmul.mubr.msk.bf16.gmra.mrb[76].mxu1 %vm460_vm1, %v4183_v2 }
 0xc21   : > { %4460 = vrot.lane.b32.xlu1 %v15561_v20, %s13782_s8 }
 0xc80   : > { %v4057_v47 = vpop.xlane.xlu0 %4056 }
 0xc81   : > { %v4085_v21 = vmul.f32 0.03125, %v4057_v47  ;;  %v4054_v45 = vpop.xlane.xlu1 %4053 }
 0xc82   : > { %v4084_v60 = vmul.f32 0.03125, %v4054_v45  ;;  %v17888_v45 = vld [vmem:[#allocation4_spill] sm:$0xff] }
 0xc83   : > { %v4101_v56 = vadd.f32 1e-05, %v4085_v21 }
 0xc84   : > { %v4100_v55 = vadd.f32 1e-05, %v4084_v60  ;;  %v4063_v51 = vpop.xlane.xlu0 %4062  ;;  %v17889_v60 = vld [vmem:[#allocation7_spill] sm:$0xff] }
 0xc85   : > { %13388 = vrsqrt.f32 %v4101_v56  ;;  %v4087_v7 = vmul.f32 0.03125, %v4063_v51  ;;  %v4060_v54 = vpop.xlane.xlu1 %4059  ;;  %v17892_v56 = vld [vmem:[#allocation16_spill] sm:$0xff]  ;;  %v17895_v51 = vld [vmem:[#allocation25_spill] sm:$0xff] }
 0xc86   : > { %13390 = vrsqrt.f32 %v4100_v55  ;;  %v4086_v24 = vmul.f32 0.03125, %v4060_v54  ;;  %v17893_v55 = vld [vmem:[#allocation19_spill] sm:$0xff] }
 0xc87   : > { %v4103_v10 = vadd.f32 1e-05, %v4087_v7  ;;  %v17896_v7 = vmov 0  }
 0xc88   : > { %v4102_v46 = vadd.f32 1e-05, %v4086_v24  ;;  %v4069_v13 = vpop.xlane.xlu0 %4068 }
 0xc89   : > { %13392 = vrsqrt.f32 %v4103_v10  ;;  %v4089_v23 = vmul.f32 0.03125, %v4069_v13  ;;  %v4066_v19 = vpop.xlane.xlu1 %4065 }
 0xc8a   : > { %13394 = vrsqrt.f32 %v4102_v46  ;;  %v4088_v20 = vmul.f32 0.03125, %v4066_v19 }
 0xc8b   : > { %v4105_v14 = vadd.f32 1e-05, %v4089_v23 }
 0xc8c   : > { %v4104_v32 = vadd.f32 1e-05, %v4088_v20  ;;  %v4075_v59 = vpop.xlane.xlu0 %4074 }
 0xc8d   : > { %13396 = vrsqrt.f32 %v4105_v14  ;;  %v4091_v31 = vmul.f32 0.03125, %v4075_v59  ;;  %v4072_v25 = vpop.xlane.xlu1 %4071 }
 0xc8e   : > { %13398 = vrsqrt.f32 %v4104_v32  ;;  %v4090_v1 = vmul.f32 0.03125, %v4072_v25 }
 0xc8f   : > { %v13389_v58 = vpop.eup %13388  ;;  %v4107_v12 = vadd.f32 1e-05, %v4091_v31 }
 0xc90   : > { %v13391_v44 = vpop.eup %13390  ;;  %v4106_v18 = vadd.f32 1e-05, %v4090_v1  ;;  %v4133_v9 = vmul.f32 %v13389_v58, %v15566_v27  ;;  %v4457_v22 = vpop.permute.xlu0 %4456 }
 0xc91   : > { %13400 = vrsqrt.f32 %v4107_v12  ;;  %v4132_v28 = vmul.f32 %v13391_v44, %v15569_v33  ;;  %v4455_v40 = vpop.permute.xlu1 %4454 }
 0xc92   : > { %13402 = vrsqrt.f32 %v4106_v18  ;;  %v4153_v8 = vmul.f32 %v15616_v57, %v4133_v9  ;;  %11194 = vmatprep.subr.bf16.mxu0 %v4455_v40 }
 0xc93   : > { %v13393_v52 = vpop.eup %13392  ;;  %v4152_v53 = vmul.f32 %v15616_v57, %v4132_v28  ;;  %11195 = vmatpush3.bf16.msra.mxu0 %v4455_v40 }
 0xc94   : > { %v13395_v16 = vpop.eup %13394  ;;  %v4173_v34 = vadd.f32 %v15622_v38, %v4153_v8  ;;  %v4135_v36 = vmul.f32 %v13393_v52, %v15576_v61  ;;  %11196 = vmatprep.subr.bf16.mxu0 %v4457_v22 }
 0xc95   : > { %v4172_v30 = vadd.f32 %v15622_v38, %v4152_v53  ;;  %v4134_v63 = vmul.f32 %v13395_v16, %v15580_v50  ;;  %v4459_v54 = vpop.permute.xlu1 %4458 }
 0xc96   : > { %v4155_v27 = vmul.f32 %v15616_v57, %v4135_v36 }
 0xc97   : > { %v13397_v42 = vpop.eup %13396  ;;  %v4184_v0 = vpack.c.bf16 %v4173_v34, %v4172_v30  ;;  %v4154_v33 = vmul.f32 %v15616_v57, %v4134_v63  ;;  %11197 = vmatpush3.bf16.msra.mxu0 %v4457_v22 }
 0xc98   : > { %v13399_v3 = vpop.eup %13398  ;;  %v4175_v35 = vadd.f32 %v15622_v38, %v4155_v27  ;;  %v4137_v48 = vmul.f32 %v13397_v42, %v15588_v5  ;;  %11198 = vmatprep.subr.bf16.mxu0 %v4459_v54 }
 0xc99   : > { %11166 = vmatprep.mubr.msk.bf16.mxu1 %vm460_vm1, %v4184_v0  ;;  %v4174_v37 = vadd.f32 %v15622_v38, %v4154_v33  ;;  %v4136_v61 = vmul.f32 %v13399_v3, %v15592_v43  ;;  %v4461_v24 = vpop.permute.xlu1 %4460 }
 0xc9a   : > { %v4157_v50 = vmul.f32 %v15616_v57, %v4137_v48 }
 0xc9b   : > { %v13401_v15 = vpop.eup %13400  ;;  %v4185_v39 = vpack.c.bf16 %v4175_v35, %v4174_v37  ;;  %v4156_v6 = vmul.f32 %v15616_v57, %v4136_v61  ;;  %11199 = vmatpush3.bf16.msra.mxu0 %v4459_v54 }
 0xc9c   : > { %v13403_v41 = vpop.eup %13402  ;;  %v4177_v29 = vadd.f32 %v15622_v38, %v4157_v50  ;;  %v4139_v5 = vmul.f32 %v13401_v15, %v15600_v49  ;;  %11200 = vmatprep.subr.bf16.mxu0 %v4461_v24 }
 0xc9d   : > { %11167 = vmatmul.mubr.msk.bf16.gmra.mrb[80].mxu1 %vm460_vm1, %v4185_v39  ;;  %v4176_v43 = vadd.f32 %v15622_v38, %v4156_v6  ;;  %v4138_v17 = vmul.f32 %v13403_v41, %v15604_v4  ;;  %v17890_v4 = vld [vmem:[#allocation10_spill] sm:$0xff] }
 0xc9e   : > { %v4159_v2 = vmul.f32 %v15616_v57, %v4139_v5 }
 0xc9f   : > { %v4186_v11 = vpack.c.bf16 %v4177_v29, %v4176_v43  ;;  %v4158_v62 = vmul.f32 %v15616_v57, %v4138_v17  ;;  %v17891_v57 = vld [vmem:[#allocation13_spill] sm:$0xff]  ;;  %11201 = vmatpush3.bf16.msra.mxu0 %v4461_v24 }
 0xca0   : > { %v4179_v47 = vadd.f32 %v15622_v38, %v4159_v2 }
 0xca1   : > { %11170 = vmatprep.mubr.msk.bf16.mxu1 %vm460_vm1, %v4186_v11  ;;  %v4178_v21 = vadd.f32 %v15622_v38, %v4158_v62  ;;  %v17894_v38 = vld [vmem:[#allocation22_spill] sm:$0xff] }
 0xca3   : > { %v4187_v49 = vpack.c.bf16 %v4179_v47, %v4178_v21 }
 0xca5   : > { %11171 = vmatmul.mubr.msk.bf16.gmra.mrb[84].mxu1 %vm460_vm1, %v4187_v49 }
 0xca6   : > { %11178 = vmatprep.mubr.msk.bf16.mxu1 %vm460_vm1, %v17888_v45 }
 0xcad   : > { %11179 = vmatmul.mubr.msk.bf16.vlgmr.msra.gmra.mrb[72].mxu1 %vm460_vm1, %v17889_v60 }
 0xcae   : > { %11182 = vmatprep.mubr.msk.bf16.mxu1 %vm460_vm1, %v17890_v4 }
 0xcb5   : > { %11183 = vmatmul.mubr.msk.bf16.gmra.mrb[76].mxu1 %vm460_vm1, %v17891_v57 }
 0xcb6   : > { %11186 = vmatprep.mubr.msk.bf16.mxu1 %vm460_vm1, %v17892_v56 }
 0xcbd   : > { %11187 = vmatmul.mubr.msk.bf16.gmra.mrb[80].mxu1 %vm460_vm1, %v17893_v55 }
 0xcbe   : > { %11190 = vmatprep.mubr.msk.bf16.mxu1 %vm460_vm1, %v17894_v38 }
 0xcc5   : > { %11191 = vmatmul.mubr.msk.bf16.gmra.mrb[84].mxu1 %vm460_vm1, %v17895_v51 }
 0xcc6   : > { %4933 = vmatprep.mubr.bf16.mxu1 %v17896_v7 }
 0xd80   : > { %v11180_v10 = vpop.f32.mrb[72].mxu1 }
 0xd81   : > { %v4367_v46 = vpop.f32.mrb[73].mxu1  ;;  %v4432_v23 = vmax.f32 %v11180_v10, 0.0 }
 0xd82   : > { %v11181_v13 = vpop.f32.mrb[74].mxu1  ;;  %v4430_v14 = vmax.f32 %v4367_v46, 0.0 }
 0xd83   : > { %v4433_v19 = vmax.f32 %v11181_v13, 0.0  ;;  %v4370_v20 = vpop.f32.mrb[75].mxu1 }
 0xd84   : > { %v4431_v32 = vmax.f32 %v4370_v20, 0.0 }
 0xd85   : > { %v4447_v59 = vpack.c.bf16 %v4433_v19, %v4432_v23 }
 0xd86   : > { %v4446_v31 = vpack.c.bf16 %v4431_v32, %v4430_v14 }
 0xd88   : > { %v11184_v25 = vpop.f32.mrb[76].mxu1  ;;  %11202 = vmatprep.mubr.msk.bf16.mxu0 %vm298_vm0, %v4446_v31 }
 0xd89   : > { %v4383_v1 = vpop.f32.mrb[77].mxu1  ;;  %11203 = vmatmul.mubr.msk.bf16.vlgmr.msra.gmra.mrb[56].mxu0 %vm298_vm0, %v4447_v59  ;;  %v4436_v12 = vmax.f32 %v11184_v25, 0.0 }
 0xd8a   : > { %v11185_v58 = vpop.f32.mrb[78].mxu1  ;;  %v4434_v9 = vmax.f32 %v4383_v1, 0.0 }
 0xd8b   : > { %v4437_v44 = vmax.f32 %v11185_v58, 0.0  ;;  %v4386_v18 = vpop.f32.mrb[79].mxu1 }
 0xd8c   : > { %v4435_v28 = vmax.f32 %v4386_v18, 0.0 }
 0xd8d   : > { %v4449_v8 = vpack.c.bf16 %v4437_v44, %v4436_v12 }
 0xd8e   : > { %v4448_v52 = vpack.c.bf16 %v4435_v28, %v4434_v9 }
 0xd90   : > { %v11188_v53 = vpop.f32.mrb[80].mxu1  ;;  %11206 = vmatprep.mubr.msk.bf16.mxu0 %vm298_vm0, %v4448_v52 }
 0xd91   : > { %v4399_v16 = vpop.f32.mrb[81].mxu1  ;;  %11207 = vmatmul.mubr.msk.bf16.gmra.mrb[60].mxu0 %vm298_vm0, %v4449_v8  ;;  %v4440_v36 = vmax.f32 %v11188_v53, 0.0 }
 0xd92   : > { %v11189_v34 = vpop.f32.mrb[82].mxu1  ;;  %v4438_v27 = vmax.f32 %v4399_v16, 0.0 }
 0xd93   : > { %v4441_v30 = vmax.f32 %v11189_v34, 0.0  ;;  %v4402_v63 = vpop.f32.mrb[83].mxu1 }
 0xd94   : > { %v4439_v42 = vmax.f32 %v4402_v63, 0.0 }
 0xd95   : > { %v4451_v0 = vpack.c.bf16 %v4441_v30, %v4440_v36 }
 0xd96   : > { %v4450_v33 = vpack.c.bf16 %v4439_v42, %v4438_v27 }
 0xd98   : > { %v11192_v3 = vpop.f32.mrb[84].mxu1  ;;  %11210 = vmatprep.mubr.msk.bf16.mxu0 %vm298_vm0, %v4450_v33 }
 0xd99   : > { %v4415_v35 = vpop.f32.mrb[85].mxu1  ;;  %11211 = vmatmul.mubr.msk.bf16.gmra.mrb[64].mxu0 %vm298_vm0, %v4451_v0  ;;  %v4444_v37 = vmax.f32 %v11192_v3, 0.0 }
 0xd9a   : > { %v11193_v48 = vpop.f32.mrb[86].mxu1  ;;  %v4442_v50 = vmax.f32 %v4415_v35, 0.0 }
 0xd9b   : > { %v4445_v61 = vmax.f32 %v11193_v48, 0.0  ;;  %v4418_v40 = vpop.f32.mrb[87].mxu1 }
 0xd9c   : > { %v4443_v22 = vmax.f32 %v4418_v40, 0.0 }
 0xd9d   : > { %v4453_v15 = vpack.c.bf16 %v4445_v61, %v4444_v37 }
 0xd9e   : > { %v4452_v39 = vpack.c.bf16 %v4443_v22, %v4442_v50 }
 0xda0   : > { %11214 = vmatprep.mubr.msk.bf16.mxu0 %vm298_vm0, %v4452_v39 }
 0xda1   : > { %11215 = vmatmul.mubr.msk.bf16.gmra.mrb[68].mxu0 %vm298_vm0, %v4453_v15 }
 0xda2   : > { %5014 = vmatprep.mubr.bf16.mxu0 %v17896_v7 }
 0xe5c   : > { %v15717_v6 = vpop.f32.mrb[56].mxu0 }
 0xe5d   : > { %v15719_v41 = vpop.f32.mrb[57].mxu0  ;;  %v4593_v23 = vsel %vm460_vm1, %v15717_v6, 0.0 }
 0xe5e   : > { %v15721_v29 = vpop.f32.mrb[58].mxu0  ;;  %v4587_v46 = vsel %vm460_vm1, %v15719_v41, 0.0 }
 0xe5f   : > { %v15723_v5 = vpop.f32.mrb[59].mxu0  ;;  %v4596_v14 = vsel %vm460_vm1, %v15721_v29, 0.0 }
 0xe60   : > { %v4590_v19 = vsel %vm460_vm1, %v15723_v5, 0.0 }
 0xe64   : > { %v15725_v43 = vpop.f32.mrb[60].mxu0 }
 0xe65   : > { %v15727_v17 = vpop.f32.mrb[61].mxu0  ;;  %v4605_v32 = vsel %vm460_vm1, %v15725_v43, 0.0 }
 0xe66   : > { %v15729_v2 = vpop.f32.mrb[62].mxu0  ;;  %v4599_v20 = vsel %vm460_vm1, %v15727_v17, 0.0 }
 0xe67   : > { %v15731_v11 = vpop.f32.mrb[63].mxu0  ;;  %v4608_v31 = vsel %vm460_vm1, %v15729_v2, 0.0 }
 0xe68   : > { %v4602_v59 = vsel %vm460_vm1, %v15731_v11, 0.0 }
 0xe6c   : > { %v11212_v62 = vpop.f32.mrb[64].mxu0 }
 0xe6d   : > { %v4556_v47 = vpop.f32.mrb[65].mxu0  ;;  %v4617_v4 = vsel %vm460_vm1, %v11212_v62, 0.0 }
 0xe6e   : > { %v11213_v21 = vpop.f32.mrb[66].mxu0  ;;  %v4611_v49 = vsel %vm460_vm1, %v4556_v47, 0.0 }
 0xe6f   : > { %4612 = vadd.xlane.f32.xlu0 %v4611_v49  ;;  %v4559_v45 = vpop.f32.mrb[67].mxu0  ;;  %v4620_v38 = vsel %vm460_vm1, %v11213_v21, 0.0 }
 0xe70   : > { %v4614_v60 = vsel %vm460_vm1, %v4559_v45, 0.0 }
 0xe71   : > { %4615 = vadd.xlane.f32.xlu1 %v4614_v60 }
 0xe73   : > { %4618 = vadd.xlane.f32.xlu0 %v4617_v4 }
 0xe74   : > { %v11216_v57 = vpop.f32.mrb[68].mxu0 }
 0xe75   : > { %v4572_v56 = vpop.f32.mrb[69].mxu0  ;;  %v4629_v24 = vsel %vm460_vm1, %v11216_v57, 0.0 }
 0xe76   : > { %v15736_v55 = vpop.f32.mrb[70].mxu0  ;;  %v4623_v51 = vsel %vm460_vm1, %v4572_v56, 0.0 }
 0xe77   : > { %4621 = vadd.xlane.f32.xlu0 %v4620_v38  ;;  %4624 = vadd.xlane.f32.xlu1 %v4623_v51  ;;  %v4575_v54 = vpop.f32.mrb[71].mxu0  ;;  %v4632_v13 = vsel %vm460_vm1, %v15736_v55, 0.0 }
 0xe78   : > { %v4626_v10 = vsel %vm460_vm1, %v4575_v54, 0.0 }
 0xe7b   : > { %4630 = vadd.xlane.f32.xlu1 %v4629_v24  ;;  %4627 = vadd.xlane.f32.xlu0 %v4626_v10 }
 0xe7f   : > { %4588 = vadd.xlane.f32.xlu1 %v4587_v46  ;;  %4633 = vadd.xlane.f32.xlu0 %v4632_v13 }
 0xe83   : > { %4594 = vadd.xlane.f32.xlu1 %v4593_v23  ;;  %4591 = vadd.xlane.f32.xlu0 %v4590_v19 }
 0xe87   : > { %4600 = vadd.xlane.f32.xlu1 %v4599_v20  ;;  %4597 = vadd.xlane.f32.xlu0 %v4596_v14 }
 0xe8b   : > { %4606 = vadd.xlane.f32.xlu1 %v4605_v32  ;;  %4603 = vadd.xlane.f32.xlu0 %v4602_v59 }
 0xe8f   : > { %4609 = vadd.xlane.f32.xlu0 %v4608_v31 }
 0xefc   : > { %v4613_v25 = vpop.xlane.xlu0 %4612 }
 0xefd   : > { %v4643_v1 = vmul.f32 0.03125, %v4613_v25 }
 0xefe   : > { %v4616_v58 = vpop.xlane.xlu1 %4615 }
 0xeff   : > { %v15760_v12 = vsub.f32 %v4556_v47, %v4643_v1  ;;  %v4644_v44 = vmul.f32 0.03125, %v4616_v58 }
 0xf00   : > { %v4619_v18 = vpop.xlane.xlu0 %4618 }
 0xf01   : > { %v15762_v9 = vsub.f32 %v4559_v45, %v4644_v44  ;;  %v4645_v28 = vmul.f32 0.03125, %v4619_v18  ;;  %v4675_v8 = vmul.f32 %v15760_v12, %v15760_v12 }
 0xf03   : > { %v15766_v52 = vsub.f32 %v11212_v62, %v4645_v28  ;;  %v4707_v53 = vsel %vm460_vm1, %v4675_v8, 0.0  ;;  %v4676_v16 = vmul.f32 %v15762_v9, %v15762_v9 }
 0xf04   : > { %v4622_v34 = vpop.xlane.xlu0 %4621  ;;  %4708 = vadd.xlane.f32.xlu1 %v4707_v53  ;;  %v4625_v36 = vpop.xlane.xlu1 %4624 }
 0xf05   : > { %v4646_v30 = vmul.f32 0.03125, %v4622_v34  ;;  %v4647_v63 = vmul.f32 0.03125, %v4625_v36  ;;  %v4710_v27 = vsel %vm460_vm1, %v4676_v16, 0.0  ;;  %v4677_v42 = vmul.f32 %v15766_v52, %v15766_v52 }
 0xf06   : > { %4711 = vadd.xlane.f32.xlu0 %v4710_v27 }
 0xf07   : > { %v15774_v0 = vsub.f32 %v11213_v21, %v4646_v30  ;;  %v15776_v33 = vsub.f32 %v4572_v56, %v4647_v63  ;;  %v4713_v3 = vsel %vm460_vm1, %v4677_v42, 0.0 }
 0xf08   : > { %4714 = vadd.xlane.f32.xlu1 %v4713_v3  ;;  %v4631_v35 = vpop.xlane.xlu1 %4630  ;;  %v4628_v48 = vpop.xlane.xlu0 %4627 }
 0xf09   : > { %v4649_v37 = vmul.f32 0.03125, %v4631_v35  ;;  %v4648_v61 = vmul.f32 0.03125, %v4628_v48  ;;  %v4679_v40 = vmul.f32 %v15776_v33, %v15776_v33  ;;  %v4678_v50 = vmul.f32 %v15774_v0, %v15774_v0 }
 0xf0b   : > { %v15783_v22 = vsub.f32 %v11216_v57, %v4649_v37  ;;  %v15785_v15 = vsub.f32 %v4575_v54, %v4648_v61  ;;  %v4719_v39 = vsel %vm460_vm1, %v4679_v40, 0.0  ;;  %v4716_v62 = vsel %vm460_vm1, %v4678_v50, 0.0  ;;  %v13108_v61 = vld [vmem:[%s17672_s1 + $0x24] ss:$8 sps:$4 sm:$0xff]   ;;  %v13111_v40 = vld [vmem:[%s17672_s1 + $0x34] ss:$8 sps:$4 sm:$0xff]  }
 0xf0c   : > { %4720 = vadd.xlane.f32.xlu1 %v4719_v39  ;;  %v4589_v47 = vpop.xlane.xlu1 %4588  ;;  %4717 = vadd.xlane.f32.xlu0 %v4716_v62  ;;  %v4634_v21 = vpop.xlane.xlu0 %4633  ;;  %v13109_v50 = vld [vmem:[%s17672_s1 + $0x30] ss:$8 sps:$4 sm:$0xff]  }
 0xf0d   : > { %v4635_v49 = vmul.f32 0.03125, %v4589_v47  ;;  %v4650_v45 = vmul.f32 0.03125, %v4634_v21  ;;  %v4681_v60 = vmul.f32 %v15783_v22, %v15783_v22  ;;  %v4680_v4 = vmul.f32 %v15785_v15, %v15785_v15  ;;  %4982 = vmatprep.subr.bf16.mxu0 %v13108_v61  ;;  %4901 = vmatprep.subr.bf16.mxu1 %v13108_v61 }
 0xf0f   : > { %v15794_v57 = vsub.f32 %v15719_v41, %v4635_v49  ;;  %v15797_v56 = vsub.f32 %v15736_v55, %v4650_v45  ;;  %v4725_v38 = vsel %vm460_vm1, %v4681_v60, 0.0  ;;  %v4722_v51 = vsel %vm460_vm1, %v4680_v4, 0.0 }
 0xf10   : > { %4726 = vadd.xlane.f32.xlu1 %v4725_v38  ;;  %v4595_v54 = vpop.xlane.xlu1 %4594  ;;  %4723 = vadd.xlane.f32.xlu0 %v4722_v51  ;;  %v4592_v24 = vpop.xlane.xlu0 %4591 }
 0xf11   : > { %v4637_v10 = vmul.f32 0.03125, %v4595_v54  ;;  %v4636_v46 = vmul.f32 0.03125, %v4592_v24  ;;  %v4667_v13 = vmul.f32 %v15794_v57, %v15794_v57  ;;  %v4682_v41 = vmul.f32 %v15797_v56, %v15797_v56 }
 0xf13   : > { %v15806_v23 = vsub.f32 %v15717_v6, %v4637_v10  ;;  %v15809_v55 = vsub.f32 %v15723_v5, %v4636_v46  ;;  %v4683_v19 = vsel %vm460_vm1, %v4667_v13, 0.0  ;;  %v4728_v20 = vsel %vm460_vm1, %v4682_v41, 0.0 }
 0xf14   : > { %4684 = vadd.xlane.f32.xlu1 %v4683_v19  ;;  %v4601_v14 = vpop.xlane.xlu1 %4600  ;;  %4729 = vadd.xlane.f32.xlu0 %v4728_v20  ;;  %v4598_v32 = vpop.xlane.xlu0 %4597 }
 0xf15   : > { %v4639_v59 = vmul.f32 0.03125, %v4601_v14  ;;  %v4638_v31 = vmul.f32 0.03125, %v4598_v32  ;;  %v4669_v25 = vmul.f32 %v15806_v23, %v15806_v23  ;;  %v4668_v6 = vmul.f32 %v15809_v55, %v15809_v55  ;;  %v15864_v32 = vld [vmem:[%s17675_s4 + $0x90] ss:$0 sm:$0xff] }
 0xf17   : > { %v15818_v1 = vsub.f32 %v15727_v17, %v4639_v59  ;;  %v15821_v5 = vsub.f32 %v15721_v29, %v4638_v31  ;;  %v4689_v58 = vsel %vm460_vm1, %v4669_v25, 0.0  ;;  %v4686_v44 = vsel %vm460_vm1, %v4668_v6, 0.0 }
 0xf18   : > { %4690 = vadd.xlane.f32.xlu1 %v4689_v58  ;;  %v4607_v18 = vpop.xlane.xlu1 %4606  ;;  %4687 = vadd.xlane.f32.xlu0 %v4686_v44  ;;  %v4604_v28 = vpop.xlane.xlu0 %4603 }
 0xf19   : > { %v4641_v8 = vmul.f32 0.03125, %v4607_v18  ;;  %v4640_v53 = vmul.f32 0.03125, %v4604_v28  ;;  %v4671_v16 = vmul.f32 %v15818_v1, %v15818_v1  ;;  %v4670_v17 = vmul.f32 %v15821_v5, %v15821_v5  ;;  %v15870_v18 = vld [vmem:[%s17675_s4 + $0x98] ss:$0 sm:$0xff] }
 0xf1b   : > { %v15830_v34 = vsub.f32 %v15725_v43, %v4641_v8  ;;  %v15833_v29 = vsub.f32 %v15731_v11, %v4640_v53  ;;  %v4695_v36 = vsel %vm460_vm1, %v4671_v16, 0.0  ;;  %v4692_v30 = vsel %vm460_vm1, %v4670_v17, 0.0 }
 0xf1c   : > { %4696 = vadd.xlane.f32.xlu1 %v4695_v36  ;;  %4693 = vadd.xlane.f32.xlu0 %v4692_v30  ;;  %v4610_v63 = vpop.xlane.xlu0 %4609 }
 0xf1d   : > { %v4642_v27 = vmul.f32 0.03125, %v4610_v63  ;;  %v4673_v42 = vmul.f32 %v15830_v34, %v15830_v34  ;;  %v4672_v3 = vmul.f32 %v15833_v29, %v15833_v29 }
 0xf1f   : > { %v15842_v43 = vsub.f32 %v15729_v2, %v4642_v27  ;;  %v4701_v11 = vsel %vm460_vm1, %v4673_v42, 0.0  ;;  %v4698_v35 = vsel %vm460_vm1, %v4672_v3, 0.0  ;;  %v13106_v2 = vld [vmem:[%s17672_s1 + $0x20] ss:$8 sps:$4 sm:$0xff]  }
 0xf20   : > { %4702 = vadd.xlane.f32.xlu1 %v4701_v11  ;;  %4699 = vadd.xlane.f32.xlu0 %v4698_v35 }
 0xf21   : > { %v4674_v48 = vmul.f32 %v15842_v43, %v15842_v43  ;;  %4983 = vmatpush1.bf16.msra.mxu0 %v13106_v2  ;;  %4902 = vmatpush1.bf16.msra.mxu1 %v13106_v2 }
 0xf22   : > { %4984 = vmatprep.subr.bf16.mxu0 %v13111_v40  ;;  %4903 = vmatprep.subr.bf16.mxu1 %v13111_v40 }
 0xf23   : > { %v4704_v37 = vsel %vm460_vm1, %v4674_v48, 0.0 }
 0xf24   : > { %4705 = vadd.xlane.f32.xlu0 %v4704_v37 }
 0xf25   : > { %4985 = vmatpush1.bf16.msra.mxu0 %v13109_v50  ;;  %4904 = vmatpush1.bf16.msra.mxu1 %v13109_v50 }
 0xf91   : > { %v4709_v39 = vpop.xlane.xlu1 %4708 }
 0xf92   : > { %v4739_v62 = vmul.f32 0.03125, %v4709_v39  ;;  %v17897_v39 = vld [vmem:[#allocation14_spill] sm:$0xff] }
 0xf93   : > { %v4712_v47 = vpop.xlane.xlu0 %4711 }
 0xf94   : > { %v4755_v21 = vadd.f32 1e-05, %v4739_v62  ;;  %v4740_v49 = vmul.f32 0.03125, %v4712_v47  ;;  %v17899_v47 = vld [vmem:[#allocation15_spill] sm:$0xff] }
 0xf95   : > { %v4715_v45 = vpop.xlane.xlu1 %4714 }
 0xf96   : > { %13404 = vrsqrt.f32 %v4755_v21  ;;  %v4756_v60 = vadd.f32 1e-05, %v4740_v49  ;;  %v4741_v4 = vmul.f32 0.03125, %v4715_v45 }
 0xf98   : > { %13406 = vrsqrt.f32 %v4756_v60  ;;  %v4757_v38 = vadd.f32 1e-05, %v4741_v4 }
 0xf99   : > { %v4721_v51 = vpop.xlane.xlu1 %4720  ;;  %v4718_v54 = vpop.xlane.xlu0 %4717 }
 0xf9a   : > { %13408 = vrsqrt.f32 %v4757_v38  ;;  %v4743_v24 = vmul.f32 0.03125, %v4721_v51  ;;  %v4742_v10 = vmul.f32 0.03125, %v4718_v54 }
 0xf9c   : > { %v4759_v46 = vadd.f32 1e-05, %v4743_v24  ;;  %v4758_v13 = vadd.f32 1e-05, %v4742_v10 }
 0xf9d   : > { %v4727_v41 = vpop.xlane.xlu1 %4726  ;;  %v4724_v19 = vpop.xlane.xlu0 %4723 }
 0xf9e   : > { %v4744_v20 = vmul.f32 0.03125, %v4724_v19  ;;  %13410 = vrsqrt.f32 %v4758_v13  ;;  %v4745_v59 = vmul.f32 0.03125, %v4727_v41 }
 0xf9f   : > { %13412 = vrsqrt.f32 %v4759_v46 }
 0xfa0   : > { %v13405_v14 = vpop.eup %13404  ;;  %v4760_v31 = vadd.f32 1e-05, %v4744_v20  ;;  %v4761_v36 = vadd.f32 1e-05, %v4745_v59 }
 0xfa1   : > { %v4787_v25 = vmul.f32 %v13405_v14, %v15760_v12  ;;  %v4685_v6 = vpop.xlane.xlu1 %4684  ;;  %v4730_v58 = vpop.xlane.xlu0 %4729 }
 0xfa2   : > { %v13407_v44 = vpop.eup %13406  ;;  %v4731_v28 = vmul.f32 0.03125, %v4685_v6  ;;  %v4746_v8 = vmul.f32 0.03125, %v4730_v58  ;;  %13414 = vrsqrt.f32 %v4760_v31 }
 0xfa3   : > { %v4807_v53 = vmul.f32 %v15864_v32, %v4787_v25  ;;  %v4788_v16 = vmul.f32 %v13407_v44, %v15762_v9  ;;  %v17902_v44 = vld [vmem:[#allocation17_spill] sm:$0xff] }
 0xfa4   : > { %v13409_v17 = vpop.eup %13408  ;;  %v4747_v30 = vadd.f32 1e-05, %v4731_v28  ;;  %v4762_v63 = vadd.f32 1e-05, %v4746_v8 }
 0xfa5   : > { %v4827_v12 = vadd.f32 %v15870_v18, %v4807_v53  ;;  %v4808_v27 = vmul.f32 %v15864_v32, %v4788_v16  ;;  %v4789_v42 = vmul.f32 %v13409_v17, %v15766_v52  ;;  %v4691_v3 = vpop.xlane.xlu1 %4690  ;;  %v4688_v11 = vpop.xlane.xlu0 %4687 }
 0xfa6   : > { %13416 = vrsqrt.f32 %v4747_v30  ;;  %v4733_v35 = vmul.f32 0.03125, %v4691_v3  ;;  %v4732_v48 = vmul.f32 0.03125, %v4688_v11 }
 0xfa7   : > { %v4828_v37 = vadd.f32 %v15870_v18, %v4808_v27  ;;  %13418 = vrsqrt.f32 %v4762_v63  ;;  %v15879_v62 = vadd.f32 %v4827_v12, %v17897_v39  ;;  %v4809_v52 = vmul.f32 %v15864_v32, %v4789_v42  ;;  %v17909_v39 = vld [vmem:[#allocation20_spill] sm:$0xff] }
 0xfa8   : > { %13420 = vrsqrt.f32 %v4761_v36  ;;  %v4749_v9 = vadd.f32 1e-05, %v4733_v35  ;;  %v4748_v61 = vadd.f32 1e-05, %v4732_v48  ;;  %v13411_v2 = vpop.eup %13410 }
 0xfa9   : > { %v4697_v40 = vpop.xlane.xlu1 %4696  ;;  %v4694_v50 = vpop.xlane.xlu0 %4693  ;;  %17898 = vst [vmem:[#allocation55_spill] sm:$0xff] %v15879_v62  ;;  %v15882_v21 = vadd.f32 %v4828_v37, %v17899_v47  ;;  %v4790_v45 = vmul.f32 %v13411_v2, %v15774_v0  ;;  %v4829_v0 = vadd.f32 %v15870_v18, %v4809_v52  ;;  %v17907_v37 = vld [vmem:[#allocation21_spill] sm:$0xff] }
 0xfaa   : > { %v13413_v49 = vpop.eup %13412  ;;  %13422 = vrsqrt.f32 %v4749_v9  ;;  %v4735_v60 = vmul.f32 0.03125, %v4697_v40  ;;  %v4734_v4 = vmul.f32 0.03125, %v4694_v50 }
 0xfab   : > { %17900 = vst [vmem:[#allocation56_spill] sm:$0xff] %v15882_v21  ;;  %13424 = vrsqrt.f32 %v4748_v61  ;;  %v15888_v38 = vpack.c.bf16 %v15882_v21, %v15879_v62  ;;  %v4810_v54 = vmul.f32 %v15864_v32, %v4790_v45  ;;  %v4791_v10 = vmul.f32 %v13413_v49, %v15776_v33 }
 0xfac   : > { %v4750_v51 = vadd.f32 1e-05, %v4734_v4  ;;  %v13415_v24 = vpop.eup %13414  ;;  %v4751_v41 = vadd.f32 1e-05, %v4735_v60  ;;  %v15901_v28 = vadd.f32 %v4829_v0, %v17902_v44  ;;  %v17912_v4 = vld [vmem:[#allocation2_spill] sm:$0xff] }
 0xfad   : > { %17901 = vst [vmem:[#allocation26_spill] sm:$0xff] %v15888_v38  ;;  %9850 = vmatmul.mubr.msk.bf16.vlgmr.msra.gmra.mrb[72].mxu0 %vm460_vm1, %v15888_v38  ;;  %v4700_v46 = vpop.xlane.xlu0 %4699  ;;  %v4792_v13 = vmul.f32 %v13415_v24, %v15785_v15  ;;  %v4703_v20 = vpop.xlane.xlu1 %4702  ;;  %v4830_v14 = vadd.f32 %v15870_v18, %v4810_v54  ;;  %v17904_v15 = vld [vmem:[#allocation18_spill] sm:$0xff]  ;;  %v4811_v53 = vmul.f32 %v15864_v32, %v4791_v10  ;;  %v17914_v54 = vld [vmem:[#allocation3_spill] sm:$0xff] }
 0xfae   : > { %v4736_v19 = vmul.f32 0.03125, %v4700_v46  ;;  %5024 = vmatprep.mubr.bf16.mxu0 %v17896_v7  ;;  %13426 = vrsqrt.f32 %v4750_v51  ;;  %17903 = vst [vmem:[#allocation27_spill] sm:$0xff] %v15901_v28  ;;  %v4737_v17 = vmul.f32 0.03125, %v4703_v20  ;;  %v17916_v20 = vld [vmem:[#allocation24_spill] sm:$0xff] }
 0xfaf   : > { %v4812_v33 = vmul.f32 %v15864_v32, %v4792_v13  ;;  %v15904_v8 = vadd.f32 %v4830_v14, %v17904_v15  ;;  %13428 = vrsqrt.f32 %v4751_v41  ;;  %v4831_v35 = vadd.f32 %v15870_v18, %v4811_v53 }
 0xfb0   : > { %v13417_v59 = vpop.eup %13416  ;;  %v4752_v31 = vadd.f32 1e-05, %v4736_v19  ;;  %v4753_v48 = vadd.f32 1e-05, %v4737_v17 }
 0xfb1   : > { %v13419_v25 = vpop.eup %13418  ;;  %v4779_v6 = vmul.f32 %v13417_v59, %v15794_v57  ;;  %v4706_v58 = vpop.xlane.xlu0 %4705  ;;  %17905 = vst [vmem:[#allocation29_spill] sm:$0xff] %v15904_v8  ;;  %v15910_v63 = vpack.c.bf16 %v15904_v8, %v15901_v28  ;;  %v4832_v57 = vadd.f32 %v15870_v18, %v4812_v33  ;;  %v15928_v47 = vadd.f32 %v4831_v35, %v17909_v39  ;;  %v17918_v33 = vld [vmem:[#allocation23_spill] sm:$0xff] }
 0xfb2   : > { %v13421_v16 = vpop.eup %13420  ;;  %v4738_v36 = vmul.f32 0.03125, %v4706_v58  ;;  %v4794_v30 = vmul.f32 %v13419_v25, %v15797_v56  ;;  %13430 = vrsqrt.f32 %v4752_v31  ;;  %v17920_v25 = vld [vmem:[#allocation5_spill] sm:$0xff] }
 0xfb3   : > { %17906 = vst [vmem:[#allocation28_spill] sm:$0xff] %v15910_v63  ;;  %v4799_v27 = vmul.f32 %v15864_v32, %v4779_v6  ;;  %v4793_v3 = vmul.f32 %v13421_v16, %v15783_v22  ;;  %v15921_v9 = vadd.f32 %v4832_v57, %v17907_v37  ;;  %17910 = vst [vmem:[#allocation36_spill] sm:$0xff] %v15928_v47 }
 0xfb4   : > { %v13423_v12 = vpop.eup %13422  ;;  %v4754_v11 = vadd.f32 1e-05, %v4738_v36  ;;  %v4814_v61 = vmul.f32 %v15864_v32, %v4794_v30 }
 0xfb5   : > { %v13425_v42 = vpop.eup %13424  ;;  %9851 = vmatmul.mubr.msk.bf16.gmra.mrb[76].mxu0 %vm460_vm1, %v15910_v63  ;;  %17908 = vst [vmem:[#allocation34_spill] sm:$0xff] %v15921_v9  ;;  %v4819_v2 = vadd.f32 %v15870_v18, %v4799_v27  ;;  %v4781_v22 = vmul.f32 %v13423_v12, %v15806_v23  ;;  %v15935_v45 = vpack.c.bf16 %v15921_v9, %v15928_v47 }
 0xfb6   : > { %v4780_v56 = vmul.f32 %v13425_v42, %v15809_v55  ;;  %5034 = vmatprep.mubr.bf16.mxu0 %v17896_v7  ;;  %13432 = vrsqrt.f32 %v4754_v11  ;;  %v4813_v55 = vmul.f32 %v15864_v32, %v4793_v3  ;;  %v4834_v23 = vadd.f32 %v15870_v18, %v4814_v61  ;;  %v17925_v42 = vld [vmem:[#allocation9_spill] sm:$0xff]  ;;  %v17927_v11 = vld [vmem:[#allocation8_spill] sm:$0xff] }
 0xfb7   : > { %13434 = vrsqrt.f32 %v4753_v48  ;;  %17911 = vst [vmem:[#allocation37_spill] sm:$0xff] %v15935_v45  ;;  %v15939_v51 = vadd.f32 %v4819_v2, %v17912_v4  ;;  %v4801_v10 = vmul.f32 %v15864_v32, %v4781_v22  ;;  %v17929_v61 = vld [vmem:[#allocation12_spill] sm:$0xff]  ;;  %v17931_v22 = vld [vmem:[#allocation11_spill] sm:$0xff] }
 0xfb8   : > { %v4800_v40 = vmul.f32 %v15864_v32, %v4780_v56  ;;  %v13427_v50 = vpop.eup %13426  ;;  %v15957_v14 = vadd.f32 %v4834_v23, %v17916_v20 }
 0xfb9   : > { %v4782_v49 = vmul.f32 %v13427_v50, %v15821_v5  ;;  %v13429_v60 = vpop.eup %13428  ;;  %17913 = vst [vmem:[#allocation31_spill] sm:$0xff] %v15939_v51  ;;  %v4833_v5 = vadd.f32 %v15870_v18, %v4813_v55  ;;  %v4821_v31 = vadd.f32 %v15870_v18, %v4801_v10 }
 0xfba   : > { %v4820_v52 = vadd.f32 %v15870_v18, %v4800_v40  ;;  %17917 = vst [vmem:[#allocation33_spill] sm:$0xff] %v15957_v14  ;;  %v4783_v59 = vmul.f32 %v13429_v60, %v15818_v1  ;;  %v17923_v1 = vld [vmem:[#allocation6_spill] sm:$0xff] }
 0xfbb   : > { %v4802_v46 = vmul.f32 %v15864_v32, %v4782_v49  ;;  %v15976_v53 = vadd.f32 %v4821_v31, %v17923_v1 }
 0xfbc   : > { %v15942_v24 = vadd.f32 %v4820_v52, %v17914_v54  ;;  %v13431_v0 = vpop.eup %13430  ;;  %v4803_v16 = vmul.f32 %v15864_v32, %v4783_v59 }
 0xfbd   : > { %9852 = vmatmul.mubr.msk.bf16.gmra.mrb[80].mxu0 %vm460_vm1, %v15935_v45  ;;  %v4784_v13 = vmul.f32 %v13431_v0, %v15833_v29  ;;  %v4822_v19 = vadd.f32 %v15870_v18, %v4802_v46  ;;  %v15964_v29 = vadd.f32 %v4833_v5, %v17918_v33  ;;  %17924 = vst [vmem:[#allocation42_spill] sm:$0xff] %v15976_v53 }
 0xfbe   : > { %17915 = vst [vmem:[#allocation30_spill] sm:$0xff] %v15942_v24  ;;  %v15952_v41 = vpack.c.bf16 %v15942_v24, %v15939_v51  ;;  %5044 = vmatprep.mubr.bf16.mxu0 %v17896_v7  ;;  %v4823_v27 = vadd.f32 %v15870_v18, %v4803_v16 }
 0xfbf   : > { %17919 = vst [vmem:[#allocation35_spill] sm:$0xff] %v15964_v29  ;;  %v15968_v6 = vadd.f32 %v4822_v19, %v17920_v25  ;;  %v4804_v58 = vmul.f32 %v15864_v32, %v4784_v13  ;;  %v15973_v15 = vpack.c.bf16 %v15957_v14, %v15964_v29 }
 0xfc0   : > { %9846 = vmatmul.mubr.msk.bf16.vlgmr.msra.gmra.mrb[88].mxu1 %vm460_vm1, %v15952_v41  ;;  %v13433_v44 = vpop.eup %13432  ;;  %v15997_v35 = vadd.f32 %v4823_v27, %v17927_v11 }
 0xfc1   : > { %4941 = vmatprep.mubr.bf16.mxu1 %v17896_v7  ;;  %17921 = vst [vmem:[#allocation39_spill] sm:$0xff] %v15968_v6  ;;  %17922 = vst [vmem:[#allocation40_spill] sm:$0xff] %v15973_v15  ;;  %v13435_v17 = vpop.eup %13434  ;;  %v4786_v36 = vmul.f32 %v13433_v44, %v15842_v43  ;;  %v15984_v30 = vpack.c.bf16 %v15968_v6, %v15976_v53  ;;  %v4824_v57 = vadd.f32 %v15870_v18, %v4804_v58 }
 0xfc2   : > { %v4785_v12 = vmul.f32 %v13435_v17, %v15830_v34  ;;  %17928 = vst [vmem:[#allocation43_spill] sm:$0xff] %v15997_v35 }
 0xfc3   : > { %v15993_v3 = vadd.f32 %v4824_v57, %v17925_v42  ;;  %v4806_v43 = vmul.f32 %v15864_v32, %v4786_v36 }
 0xfc4   : > { %v4805_v56 = vmul.f32 %v15864_v32, %v4785_v12 }
 0xfc5   : > { %9853 = vmatmul.mubr.msk.bf16.gmra.mrb[84].mxu0 %vm460_vm1, %v15973_v15  ;;  %17926 = vst [vmem:[#allocation45_spill] sm:$0xff] %v15993_v3  ;;  %v16002_v34 = vpack.c.bf16 %v15993_v3, %v15997_v35  ;;  %v4826_v48 = vadd.f32 %v15870_v18, %v4806_v43 }
 0xfc6   : > { %v4825_v37 = vadd.f32 %v15870_v18, %v4805_v56 }
 0xfc7   : > { %v16010_v2 = vadd.f32 %v4826_v48, %v17929_v61 }
 0xfc8   : > { %9847 = vmatmul.mubr.msk.bf16.gmra.mrb[92].mxu1 %vm460_vm1, %v15984_v30  ;;  %v16013_v40 = vadd.f32 %v4825_v37, %v17931_v22 }
 0xfc9   : > { %4949 = vmatprep.mubr.bf16.mxu1 %v17896_v7  ;;  %17930 = vst [vmem:[#allocation44_spill] sm:$0xff] %v16010_v2 }
 0xfca   : > { %17932 = vst [vmem:[#allocation46_spill] sm:$0xff] %v16013_v40  ;;  %v16017_v32 = vpack.c.bf16 %v16010_v2, %v16013_v40 }
 0xfd0   : > { %9848 = vmatmul.mubr.msk.bf16.gmra.mrb[96].mxu1 %vm460_vm1, %v16002_v34 }
 0xfd1   : > { %4957 = vmatprep.mubr.bf16.mxu1 %v17896_v7 }
 0xfd8   : > { %9849 = vmatmul.mubr.msk.bf16.gmra.mrb[100].mxu1 %vm460_vm1, %v16017_v32 }
0x1080   : > { %v5016_v50 = vpop.f32.mrb[72].mxu0 }
0x1081   : > { %v16021_v39 = vpop.f32.mrb[73].mxu0 }
0x1082   : > { %v5020_v55 = vpop.f32.mrb[74].mxu0 }
0x1083   : > { %v16023_v18 = vpack.i.bf16 %v5020_v55, %v5016_v50  ;;  %v16025_v52 = vpop.f32.mrb[75].mxu0  ;;  %v16027_v49 = vpack.c.bf16 %v5020_v55, %v5016_v50 }
0x1084   : > { %17933 = vst [vmem:[#allocation41_spill] sm:$0xff] %v16025_v52  ;;  %v12812_v23 = vpack.i.bf16 %v16025_v52, %v16021_v39 }
0x1086   : > { %12813 = vrot.lane.b32.xlu1 %v12812_v23, %s13778_s29 }
0x1088   : > { %v5026_v60 = vpop.f32.mrb[76].mxu0 }
0x1089   : > { %v16032_v4 = vpop.f32.mrb[77].mxu0 }
0x108a   : > { %17934 = vst [vmem:[#allocation53_spill] sm:$0xff] %v16032_v4  ;;  %v5030_v54 = vpop.f32.mrb[78].mxu0 }
0x108b   : > { %v16034_v10 = vpack.i.bf16 %v5030_v54, %v5026_v60  ;;  %v16036_v46 = vpop.f32.mrb[79].mxu0  ;;  %v16038_v0 = vpack.c.bf16 %v5030_v54, %v5026_v60 }
0x108c   : > { %17935 = vst [vmem:[#allocation47_spill] sm:$0xff] %v16036_v46  ;;  %v12817_v5 = vpack.i.bf16 %v16036_v46, %v16032_v4 }
0x108e   : > { %12818 = vrot.lane.b32.xlu0 %v12817_v5, %s13778_s29 }
0x1090   : > { %v5036_v13 = vpop.f32.mrb[80].mxu0 }
0x1091   : > { %v16043_v19 = vpop.f32.mrb[81].mxu0 }
0x1092   : > { %17936 = vst [vmem:[#allocation48_spill] sm:$0xff] %v16043_v19  ;;  %12833 = vrot.lane.b32.xlu0 %v12812_v23, %s13777_s28  ;;  %v5040_v20 = vpop.f32.mrb[82].mxu0 }
0x1093   : > { %v4935_v59 = vpop.f32.mrb[88].mxu1  ;;  %v16046_v31 = vpack.i.bf16 %v5040_v20, %v5036_v13  ;;  %v16048_v33 = vpop.f32.mrb[83].mxu0  ;;  %v16050_v25 = vpack.c.bf16 %v5040_v20, %v5036_v13 }
0x1094   : > { %17937 = vst [vmem:[#allocation49_spill] sm:$0xff] %v16048_v33  ;;  %v4936_v58 = vpop.f32.mrb[89].mxu1  ;;  %v12822_v44 = vpack.i.bf16 %v16048_v33, %v16043_v19 }
0x1095   : > { %v4938_v1 = vpop.f32.mrb[90].mxu1  ;;  %11234 = vmatprep.mubr.msk.f32.mxu1 %vm622_vm2, %v4936_v58 }
0x1096   : > { %v16055_v16 = vpop.f32.mrb[91].mxu1  ;;  %12823 = vrot.lane.b32.xlu1 %v12822_v44, %s13778_s29  ;;  %5320 = vrot.lane.b32.xlu0 %v4936_v58, %s13779_s30 }
0x1098   : > { %v5046_v17 = vpop.f32.mrb[84].mxu0 }
0x1099   : > { %v16059_v36 = vpop.f32.mrb[85].mxu0 }
0x109a   : > { %17938 = vst [vmem:[#allocation50_spill] sm:$0xff] %v16059_v36  ;;  %v5050_v57 = vpop.f32.mrb[86].mxu0  ;;  %12843 = vrot.lane.b32.xlu0 %v12817_v5, %s13777_s28 }
0x109b   : > { %v16062_v12 = vpack.i.bf16 %v5050_v57, %v5046_v17  ;;  %v4943_v27 = vpop.f32.mrb[92].mxu1  ;;  %v16064_v42 = vpop.f32.mrb[87].mxu0  ;;  %v16066_v43 = vpack.c.bf16 %v5050_v57, %v5046_v17 }
0x109c   : > { %17939 = vst [vmem:[#allocation51_spill] sm:$0xff] %v16064_v42  ;;  %v16068_v11 = vpop.f32.mrb[93].mxu1  ;;  %v12827_v56 = vpack.i.bf16 %v16064_v42, %v16059_v36 }
0x109d   : > { %v4946_v48 = vpop.f32.mrb[94].mxu1 }
0x109e   : > { %v16072_v37 = vpop.f32.mrb[95].mxu1  ;;  %12828 = vrot.lane.b32.xlu1 %v12827_v56, %s13778_s29  ;;  %12853 = vrot.lane.b32.xlu0 %v12822_v44, %s13777_s28 }
0x10a2   : > { %12838 = vrot.lane.b32.xlu1 %v12812_v23, %s13780_s6  ;;  %5324 = vrot.lane.b32.xlu0 %v16068_v11, %s13779_s30 }
0x10a3   : > { %v4951_v61 = vpop.f32.mrb[96].mxu1 }
0x10a4   : > { %v16079_v22 = vpop.f32.mrb[97].mxu1 }
0x10a5   : > { %v4954_v50 = vpop.f32.mrb[98].mxu1 }
0x10a6   : > { %v16081_v55 = vpop.f32.mrb[99].mxu1  ;;  %5322 = vrot.lane.b32.xlu1 %v16055_v16, %s13779_s30  ;;  %5328 = vrot.lane.b32.xlu0 %v16079_v22, %s13779_s30 }
0x10aa   : > { %12848 = vrot.lane.b32.xlu1 %v12817_v5, %s13780_s6  ;;  %12863 = vrot.lane.b32.xlu0 %v12827_v56, %s13777_s28 }
0x10ab   : > { %v4959_v60 = vpop.f32.mrb[100].mxu1 }
0x10ac   : > { %v16089_v54 = vpop.f32.mrb[101].mxu1 }
0x10ad   : > { %v4962_v13 = vpop.f32.mrb[102].mxu1 }
0x10ae   : > { %v16091_v20 = vpop.f32.mrb[103].mxu1  ;;  %12858 = vrot.lane.b32.xlu1 %v12822_v44, %s13780_s6  ;;  %5332 = vrot.lane.b32.xlu0 %v16089_v54, %s13779_s30 }
0x10b2   : > { %5326 = vrot.lane.b32.xlu1 %v16072_v37, %s13779_s30  ;;  %12873 = vrot.lane.b32.xlu0 %v12812_v23, %s13783_s9 }
0x10b6   : > { %12868 = vrot.lane.b32.xlu1 %v12827_v56, %s13780_s6  ;;  %5877 = vrot.lane.b32.xlu0 %v16055_v16, %s13781_s7 }
0x10ba   : > { %5330 = vrot.lane.b32.xlu1 %v16081_v55, %s13779_s30  ;;  %12883 = vrot.lane.b32.xlu0 %v12822_v44, %s13783_s9 }
0x10be   : > { %5881 = vrot.lane.b32.xlu0 %v16072_v37, %s13781_s7  ;;  %5334 = vrot.lane.b32.xlu1 %v16091_v20, %s13779_s30 }
0x10c2   : > { %5883 = vrot.lane.b32.xlu0 %v16079_v22, %s13781_s7  ;;  %5875 = vrot.lane.b32.xlu1 %v4936_v58, %s13781_s7 }
0x10c6   : > { %5887 = vrot.lane.b32.xlu0 %v16089_v54, %s13781_s7  ;;  %12878 = vrot.lane.b32.xlu1 %v12817_v5, %s13783_s9 }
0x10ca   : > { %6301 = vrot.lane.b32.xlu0 %v4936_v58, %s13784_s10  ;;  %5879 = vrot.lane.b32.xlu1 %v16068_v11, %s13781_s7 }
0x10ce   : > { %6305 = vrot.lane.b32.xlu0 %v16068_v11, %s13784_s10  ;;  %12888 = vrot.lane.b32.xlu1 %v12827_v56, %s13783_s9 }
0x10d2   : > { %6309 = vrot.lane.b32.xlu0 %v16079_v22, %s13784_s10  ;;  %5885 = vrot.lane.b32.xlu1 %v16081_v55, %s13781_s7 }
0x10d6   : > { %6313 = vrot.lane.b32.xlu0 %v16089_v54, %s13784_s10  ;;  %5889 = vrot.lane.b32.xlu1 %v16091_v20, %s13781_s7 }
0x10da   : > { %12898 = vrot.lane.b32.xlu0 %v16034_v10, %s13777_s28  ;;  %6303 = vrot.lane.b32.xlu1 %v16055_v16, %s13784_s10 }
0x10de   : > { %12913 = vrot.lane.b32.xlu0 %v16023_v18, %s13782_s8  ;;  %6307 = vrot.lane.b32.xlu1 %v16072_v37, %s13784_s10 }
0x10e2   : > { %12923 = vrot.lane.b32.xlu0 %v16046_v31, %s13782_s8  ;;  %6311 = vrot.lane.b32.xlu1 %v16081_v55, %s13784_s10 }
0x10e6   : > { %6315 = vrot.lane.b32.xlu1 %v16091_v20, %s13784_s10 }
0x10ea   : > { %12893 = vrot.lane.b32.xlu1 %v16023_v18, %s13777_s28 }
0x10ee   : > { %12903 = vrot.lane.b32.xlu1 %v16046_v31, %s13777_s28 }
0x10f2   : > { %12908 = vrot.lane.b32.xlu1 %v16062_v12, %s13777_s28 }
0x10f6   : > { %12918 = vrot.lane.b32.xlu1 %v16034_v10, %s13782_s8 }
0x10f8   : > { %v12814_v23 = vpop.permute.xlu1 %12813 }
0x10f9   : > { %v12816_v5 = vunpack.i.h.bf16 %v12814_v23  ;;  %v12815_v59 = vunpack.i.l.bf16 %v12814_v23 }
0x10fa   : > { %12928 = vrot.lane.b32.xlu1 %v16062_v12, %s13782_s8 }
0x10fb   : > { %v12090_v58 = vpack.c.bf16 %v12816_v5, %v12815_v59 }
0x10fd   : > { %12092 = vmatprep.subr.msk.bf16.mxu0 %vm14218_vm3, %v12090_v58 }
0x10fe   : > { %12095 = vmatpush3.bf16.xpose.msk.msra.mxu0 %vm14218_vm3, %v12090_v58 }
0x1100   : > { %v12819_v44 = vpop.permute.xlu0 %12818 }
0x1101   : > { %v12821_v1 = vunpack.i.h.bf16 %v12819_v44  ;;  %v12820_v17 = vunpack.i.l.bf16 %v12819_v44 }
0x1103   : > { %v12096_v57 = vpack.c.bf16 %v12821_v1, %v12820_v17 }
0x1104   : > { %v12834_v27 = vpop.permute.xlu0 %12833 }
0x1105   : > { %v12836_v56 = vunpack.i.h.bf16 %v12834_v27  ;;  %v12835_v48 = vunpack.i.l.bf16 %v12834_v27  ;;  %12098 = vmatprep.subr.msk.bf16.mxu0 %vm14218_vm3, %v12096_v57 }
0x1106   : > { %12101 = vmatpush3.bf16.xpose.msk.msra.mxu0 %vm14218_vm3, %v12096_v57 }
0x1107   : > { %v12066_v61 = vpack.c.bf16 %v12836_v56, %v12835_v48 }
0x1108   : > { %v12824_v50 = vpop.permute.xlu1 %12823  ;;  %v5321_v60 = vpop.permute.xlu0 %5320 }
0x1109   : > { %v12826_v13 = vunpack.i.h.bf16 %v12824_v50  ;;  %v12825_v23 = vunpack.i.l.bf16 %v12824_v50  ;;  %12068 = vmatprep.subr.msk.bf16.mxu1 %vm14218_vm3, %v12066_v61  ;;  %11262 = vmatprep.mubr.msk.f32.mxu0 %vm622_vm2, %v5321_v60 }
0x110a   : > { %12071 = vmatpush3.bf16.xpose.msk.msra.mxu1 %vm14218_vm3, %v12066_v61 }
0x110b   : > { %v12102_v5 = vpack.c.bf16 %v12826_v13, %v12825_v23 }
0x110c   : > { %v12844_v59 = vpop.permute.xlu0 %12843 }
0x110d   : > { %v12846_v58 = vunpack.i.h.bf16 %v12844_v59  ;;  %v12845_v44 = vunpack.i.l.bf16 %v12844_v59  ;;  %12104 = vmatprep.subr.msk.bf16.mxu0 %vm14218_vm3, %v12102_v5 }
0x110e   : > { %12107 = vmatpush3.bf16.xpose.msk.msra.mxu0 %vm14218_vm3, %v12102_v5 }
0x110f   : > { %v12072_v1 = vpack.c.bf16 %v12846_v58, %v12845_v44 }
0x1110   : > { %v12829_v17 = vpop.permute.xlu1 %12828  ;;  %v12854_v57 = vpop.permute.xlu0 %12853 }
0x1111   : > { %v12831_v27 = vunpack.i.h.bf16 %v12829_v17  ;;  %v12830_v56 = vunpack.i.l.bf16 %v12829_v17  ;;  %v12856_v48 = vunpack.i.h.bf16 %v12854_v57  ;;  %v12855_v50 = vunpack.i.l.bf16 %v12854_v57  ;;  %12074 = vmatprep.subr.msk.bf16.mxu1 %vm14218_vm3, %v12072_v1 }
0x1112   : > { %12077 = vmatpush3.bf16.xpose.msk.msra.mxu1 %vm14218_vm3, %v12072_v1 }
0x1113   : > { %v12108_v61 = vpack.c.bf16 %v12831_v27, %v12830_v56  ;;  %v12078_v60 = vpack.c.bf16 %v12856_v48, %v12855_v50 }
0x1114   : > { %v12839_v13 = vpop.permute.xlu1 %12838  ;;  %v5325_v23 = vpop.permute.xlu0 %5324 }
0x1115   : > { %v12841_v59 = vunpack.i.h.bf16 %v12839_v13  ;;  %v12840_v14 = vunpack.i.l.bf16 %v12839_v13  ;;  %12080 = vmatprep.subr.msk.bf16.mxu1 %vm14218_vm3, %v12078_v60  ;;  %12110 = vmatprep.subr.msk.bf16.mxu0 %vm14218_vm3, %v12108_v61 }
0x1116   : > { %12113 = vmatpush3.bf16.xpose.msk.msra.mxu0 %vm14218_vm3, %v12108_v61 }
0x1117   : > { %v12146_v5 = vpack.c.bf16 %v12841_v59, %v12840_v14 }
0x1118   : > { %v5323_v58 = vpop.permute.xlu1 %5322  ;;  %v5329_v44 = vpop.permute.xlu0 %5328 }
0x1119   : > { %12148 = vmatprep.subr.msk.bf16.mxu0 %vm14218_vm3, %v12146_v5 }
0x111a   : > { %12083 = vmatpush3.bf16.xpose.msk.msra.mxu1 %vm14218_vm3, %v12078_v60 }
0x111c   : > { %v12849_v1 = vpop.permute.xlu1 %12848  ;;  %v12864_v17 = vpop.permute.xlu0 %12863 }
0x111d   : > { %v12851_v57 = vunpack.i.h.bf16 %v12849_v1  ;;  %v12850_v27 = vunpack.i.l.bf16 %v12849_v1  ;;  %v12866_v56 = vunpack.i.h.bf16 %v12864_v17  ;;  %v12865_v48 = vunpack.i.l.bf16 %v12864_v17  ;;  %11263 = vmatmul.mubr.msk.f32.vlgmr.msra.gmra.mrb[88].mxu0 %vm622_vm2, %v5323_v58 }
0x111e   : > { %11265 = vmatprep.mubr.msk.f32.mxu0 %vm622_vm2, %v5325_v23  ;;  %12151 = vmatpush3.bf16.xpose.msk.msra.mxu0 %vm14218_vm3, %v12146_v5 }
0x111f   : > { %v12152_v14 = vpack.c.bf16 %v12851_v57, %v12850_v27  ;;  %v12084_v50 = vpack.c.bf16 %v12866_v56, %v12865_v48 }
0x1120   : > { %v12859_v61 = vpop.permute.xlu1 %12858  ;;  %v5333_v13 = vpop.permute.xlu0 %5332 }
0x1121   : > { %v12861_v59 = vunpack.i.h.bf16 %v12859_v61  ;;  %v12860_v29 = vunpack.i.l.bf16 %v12859_v61  ;;  %12086 = vmatprep.subr.msk.bf16.mxu1 %vm14218_vm3, %v12084_v50  ;;  %12154 = vmatprep.subr.msk.bf16.mxu0 %vm14218_vm3, %v12152_v14 }
0x1122   : > { %12089 = vmatpush3.bf16.xpose.msk.msra.mxu1 %vm14218_vm3, %v12084_v50 }
0x1123   : > { %v12158_v58 = vpack.c.bf16 %v12861_v59, %v12860_v29 }
0x1124   : > { %v5327_v60 = vpop.permute.xlu1 %5326  ;;  %v12874_v23 = vpop.permute.xlu0 %12873 }
0x1125   : > { %11266 = vmatmul.mubr.msk.f32.gmra.mrb[90].mxu0 %vm622_vm2, %v5327_v60  ;;  %v12875_v56 = vunpack.i.l.bf16 %v12874_v23 }
0x1126   : > { %11268 = vmatprep.mubr.msk.f32.mxu0 %vm622_vm2, %v5329_v44  ;;  %12157 = vmatpush3.bf16.xpose.msk.msra.mxu0 %vm14218_vm3, %v12152_v14 }
0x1127   : > { %12160 = vmatprep.subr.msk.bf16.mxu0 %vm14218_vm3, %v12158_v58 }
0x1128   : > { %v12869_v5 = vpop.permute.xlu1 %12868  ;;  %v5878_v1 = vpop.permute.xlu0 %5877 }
0x1129   : > { %11235 = vmatmul.mubr.msk.f32.vlgmr.msra.gmra.mrb[104].mxu1 %vm622_vm2, %v16055_v16  ;;  %v12871_v17 = vunpack.i.h.bf16 %v12869_v5  ;;  %v12870_v57 = vunpack.i.l.bf16 %v12869_v5 }
0x112a   : > { %11237 = vmatprep.mubr.msk.f32.mxu1 %vm622_vm2, %v16068_v11 }
0x112b   : > { %v12164_v44 = vpack.c.bf16 %v12871_v17, %v12870_v57 }
0x112c   : > { %v5331_v29 = vpop.permute.xlu1 %5330  ;;  %v12884_v27 = vpop.permute.xlu0 %12883 }
0x112d   : > { %11238 = vmatmul.mubr.msk.f32.gmra.mrb[106].mxu1 %vm622_vm2, %v16072_v37  ;;  %11269 = vmatmul.mubr.msk.f32.gmra.mrb[92].mxu0 %vm622_vm2, %v5331_v29  ;;  %v12876_v37 = vunpack.i.h.bf16 %v12874_v23  ;;  %v12886_v60 = vunpack.i.h.bf16 %v12884_v27  ;;  %v12885_v23 = vunpack.i.l.bf16 %v12884_v27 }
0x112e   : > { %11240 = vmatprep.mubr.msk.f32.mxu1 %vm622_vm2, %v16079_v22  ;;  %11271 = vmatprep.mubr.msk.f32.mxu0 %vm622_vm2, %v5333_v13 }
0x112f   : > { %12163 = vmatpush3.bf16.xpose.msk.msra.mxu0 %vm14218_vm3, %v12158_v58  ;;  %v12186_v48 = vpack.c.bf16 %v12876_v37, %v12875_v56  ;;  %v12198_v17 = vpack.c.bf16 %v12886_v60, %v12885_v23 }
0x1130   : > { %12166 = vmatprep.subr.msk.bf16.mxu0 %vm14218_vm3, %v12164_v44  ;;  %v5335_v16 = vpop.permute.xlu1 %5334  ;;  %v5882_v11 = vpop.permute.xlu0 %5881 }
0x1131   : > { %11241 = vmatmul.mubr.msk.f32.gmra.mrb[108].mxu1 %vm622_vm2, %v16081_v55  ;;  %11272 = vmatmul.mubr.msk.f32.gmra.mrb[94].mxu0 %vm622_vm2, %v5335_v16 }
0x1132   : > { %11243 = vmatprep.mubr.msk.f32.mxu1 %vm622_vm2, %v16089_v54 }
0x1134   : > { %v5876_v22 = vpop.permute.xlu1 %5875  ;;  %v5884_v14 = vpop.permute.xlu0 %5883 }
0x1135   : > { %11244 = vmatmul.mubr.msk.f32.gmra.mrb[110].mxu1 %vm622_vm2, %v16091_v20  ;;  %11346 = vmatprep.mubr.msk.f32.mxu0 %vm622_vm2, %v5876_v22 }
0x1137   : > { %12169 = vmatpush3.bf16.xpose.msk.msra.mxu0 %vm14218_vm3, %v12164_v44 }
0x1138   : > { %12188 = vmatprep.subr.msk.bf16.mxu0 %vm14218_vm3, %v12186_v48  ;;  %v12879_v55 = vpop.permute.xlu1 %12878  ;;  %v5888_v13 = vpop.permute.xlu0 %5887 }
0x1139   : > { %v12881_v50 = vunpack.i.h.bf16 %v12879_v55  ;;  %v12880_v61 = vunpack.i.l.bf16 %v12879_v55 }
0x113b   : > { %v12192_v54 = vpack.c.bf16 %v12881_v50, %v12880_v61 }
0x113c   : > { %v5880_v59 = vpop.permute.xlu1 %5879  ;;  %v6302_v58 = vpop.permute.xlu0 %6301 }
0x113e   : > { %11347 = vmatmul.mubr.msk.f32.vlgmr.msra.gmra.mrb[96].mxu0 %vm622_vm2, %v5878_v1 }
0x113f   : > { %11349 = vmatprep.mubr.msk.f32.mxu0 %vm622_vm2, %v5880_v59  ;;  %12191 = vmatpush3.bf16.xpose.msk.msra.mxu0 %vm14218_vm3, %v12186_v48 }
0x1140   : > { %12194 = vmatprep.subr.msk.bf16.mxu0 %vm14218_vm3, %v12192_v54  ;;  %v12889_v20 = vpop.permute.xlu1 %12888  ;;  %v6306_v1 = vpop.permute.xlu0 %6305 }
0x1141   : > { %v12891_v29 = vunpack.i.h.bf16 %v12889_v20  ;;  %v12890_v27 = vunpack.i.l.bf16 %v12889_v20 }
0x1142   : > { %11350 = vmatmul.mubr.msk.f32.gmra.mrb[98].mxu0 %vm622_vm2, %v5882_v11 }
0x1143   : > { %11352 = vmatprep.mubr.msk.f32.mxu0 %vm622_vm2, %v5884_v14  ;;  %v12204_v16 = vpack.c.bf16 %v12891_v29, %v12890_v27 }
0x1144   : > { %v5886_v5 = vpop.permute.xlu1 %5885  ;;  %v6310_v11 = vpop.permute.xlu0 %6309 }
0x1146   : > { %11353 = vmatmul.mubr.msk.f32.gmra.mrb[100].mxu0 %vm622_vm2, %v5886_v5 }
0x1147   : > { %11355 = vmatprep.mubr.msk.f32.mxu0 %vm622_vm2, %v5888_v13  ;;  %12197 = vmatpush3.bf16.xpose.msk.msra.mxu0 %vm14218_vm3, %v12192_v54 }
0x1148   : > { %12200 = vmatprep.subr.msk.bf16.mxu0 %vm14218_vm3, %v12198_v17  ;;  %v5890_v57 = vpop.permute.xlu1 %5889  ;;  %v6314_v56 = vpop.permute.xlu0 %6313 }
0x114a   : > { %11356 = vmatmul.mubr.msk.f32.gmra.mrb[102].mxu0 %vm622_vm2, %v5890_v57 }
0x114b   : > { %11402 = vmatprep.mubr.msk.f32.mxu0 %vm622_vm2, %v6302_v58 }
0x114c   : > { %v6304_v44 = vpop.permute.xlu1 %6303  ;;  %v12899_v14 = vpop.permute.xlu0 %12898 }
0x114d   : > { %v12901_v50 = vunpack.i.h.bf16 %v12899_v14  ;;  %v12900_v61 = vunpack.i.l.bf16 %v12899_v14 }
0x114f   : > { %12203 = vmatpush3.bf16.xpose.msk.msra.mxu0 %vm14218_vm3, %v12198_v17  ;;  %v12118_v58 = vpack.c.bf16 %v12901_v50, %v12900_v61 }
0x1150   : > { %12206 = vmatprep.subr.msk.bf16.mxu0 %vm14218_vm3, %v12204_v16  ;;  %v6308_v37 = vpop.permute.xlu1 %6307  ;;  %v16389_v4 = vpop.permute.xlu0 %12913 }
0x1154   : > { %v6312_v22 = vpop.permute.xlu1 %6311 }
0x1157   : > { %12209 = vmatpush3.bf16.xpose.msk.msra.mxu0 %vm14218_vm3, %v12204_v16 }
0x1158   : > { %v6316_v48 = vpop.permute.xlu1 %6315 }
0x115c   : > { %v12894_v55 = vpop.permute.xlu1 %12893 }
0x115d   : > { %v12896_v13 = vunpack.i.h.bf16 %v12894_v55  ;;  %v12895_v59 = vunpack.i.l.bf16 %v12894_v55 }
0x115e   : > { %11403 = vmatmul.mubr.msk.f32.vlgmr.msra.gmra.mrb[104].mxu0 %vm622_vm2, %v6304_v44 }
0x115f   : > { %11405 = vmatprep.mubr.msk.f32.mxu0 %vm622_vm2, %v6306_v1  ;;  %v12114_v54 = vpack.c.bf16 %v12896_v13, %v12895_v59 }
0x1160   : > { %v12904_v20 = vpop.permute.xlu1 %12903 }
0x1161   : > { %v12906_v60 = vunpack.i.h.bf16 %v12904_v20  ;;  %v12905_v23 = vunpack.i.l.bf16 %v12904_v20  ;;  %12115 = vmatprep.subr.bf16.mxu1 %v12114_v54 }
0x1162   : > { %11406 = vmatmul.mubr.msk.f32.gmra.mrb[106].mxu0 %vm622_vm2, %v6308_v37  ;;  %12117 = vmatpush3.bf16.msra.mxu1 %v12114_v54 }
0x1163   : > { %11408 = vmatprep.mubr.msk.f32.mxu0 %vm622_vm2, %v6310_v11  ;;  %12119 = vmatprep.subr.bf16.mxu1 %v12118_v58  ;;  %v12122_v29 = vpack.c.bf16 %v12906_v60, %v12905_v23 }
0x1164   : > { %v12909_v5 = vpop.permute.xlu1 %12908 }
0x1165   : > { %v12911_v17 = vunpack.i.h.bf16 %v12909_v5  ;;  %v12910_v57 = vunpack.i.l.bf16 %v12909_v5 }
0x1166   : > { %11409 = vmatmul.mubr.msk.f32.gmra.mrb[108].mxu0 %vm622_vm2, %v6312_v22  ;;  %12121 = vmatpush3.bf16.msra.mxu1 %v12118_v58 }
0x1167   : > { %11411 = vmatprep.mubr.msk.f32.mxu0 %vm622_vm2, %v6314_v56  ;;  %12123 = vmatprep.subr.bf16.mxu1 %v12122_v29  ;;  %v12126_v1 = vpack.c.bf16 %v12911_v17, %v12910_v57 }
0x116a   : > { %11412 = vmatmul.mubr.msk.f32.gmra.mrb[110].mxu0 %vm622_vm2, %v6316_v48  ;;  %12125 = vmatpush3.bf16.msra.mxu1 %v12122_v29 }
0x116b   : > { %12127 = vmatprep.subr.bf16.mxu1 %v12126_v1 }
0x116e   : > { %12129 = vmatpush3.bf16.msra.mxu1 %v12126_v1 }
0x116f   : > { %12131 = vmatprep.subr.bf16.mxu1 %v16027_v49 }
0x11f0   : > { %v11264_v27 = vpop.f32.mrb[88].mxu0 }
0x11f1   : > { %v16256_v44 = vmul.f32 0.35355338, %v11264_v27  ;;  %v5450_v16 = vpop.f32.mrb[89].mxu0 }
0x11f2   : > { %v16264_v50 = vmul.f32 0.35355338, %v5450_v16 }
0x11f3   : > { %v5500_v11 = vsel %vm298_vm0, %v16256_v44, -inf }
0x11f4   : > { %5501 = vmax.xlane.f32.xlu1 %v5500_v11  ;;  %v5497_v5 = vsel %vm298_vm0, %v16264_v50, -inf }
0x11f8   : > { %v11267_v37 = vpop.f32.mrb[90].mxu0 }
0x11f9   : > { %v5460_v22 = vpop.f32.mrb[91].mxu0  ;;  %v16272_v58 = vmul.f32 0.35355338, %v11267_v37 }
0x11fb   : > { %v5506_v37 = vsel %vm298_vm0, %v16272_v58, -inf }
0x11fc   : > { %v11236_v56 = vpop.f32.mrb[104].mxu1 }
0x11fd   : > { %v16260_v14 = vmul.f32 0.35355338, %v11236_v56  ;;  %v5185_v55 = vpop.f32.mrb[105].mxu1 }
0x11fe   : > { %v16262_v48 = vmul.f32 0.35355338, %v5185_v55 }
0x11ff   : > { %v5235_v61 = vsel %vm298_vm0, %v16260_v14, -inf }
0x1200   : > { %5236 = vmax.xlane.f32.xlu0 %v5235_v61  ;;  %v11239_v13 = vpop.f32.mrb[106].mxu1  ;;  %v11270_v59 = vpop.f32.mrb[92].mxu0  ;;  %v5232_v54 = vsel %vm298_vm0, %v16262_v48, -inf }
0x1201   : > { %v5195_v20 = vpop.f32.mrb[107].mxu1  ;;  %5233 = vmax.xlane.f32.xlu1 %v5232_v54  ;;  %v5470_v60 = vpop.f32.mrb[93].mxu0  ;;  %v16280_v11 = vmul.f32 0.35355338, %v11239_v13 }
0x1202   : > { %v16270_v23 = vmul.f32 0.35355338, %v5195_v20  ;;  %v16276_v17 = vmul.f32 0.35355338, %v5470_v60  ;;  %v16288_v20 = vmul.f32 0.35355338, %v5460_v22 }
0x1203   : > { %v5241_v60 = vsel %vm298_vm0, %v16280_v11, -inf }
0x1204   : > { %v11242_v57 = vpop.f32.mrb[108].mxu1  ;;  %5498 = vmax.xlane.f32.xlu0 %v5497_v5  ;;  %v11273_v29 = vpop.f32.mrb[94].mxu0  ;;  %v5238_v1 = vsel %vm298_vm0, %v16270_v23, -inf  ;;  %v5509_v61 = vsel %vm298_vm0, %v16276_v17, -inf }
0x1205   : > { %v5205_v27 = vpop.f32.mrb[109].mxu1  ;;  %5239 = vmax.xlane.f32.xlu1 %v5238_v1  ;;  %v5480_v16 = vpop.f32.mrb[95].mxu0  ;;  %v16296_v1 = vmul.f32 0.35355338, %v11270_v59  ;;  %v16304_v9 = vmul.f32 0.35355338, %v11242_v57 }
0x1206   : > { %v16284_v56 = vmul.f32 0.35355338, %v5205_v27  ;;  %v16292_v5 = vmul.f32 0.35355338, %v5480_v16  ;;  %v5503_v27 = vsel %vm298_vm0, %v16288_v20, -inf }
0x1207   : > { %v16312_v47 = vmul.f32 0.35355338, %v11273_v29 }
0x1208   : > { %v11245_v55 = vpop.f32.mrb[110].mxu1  ;;  %5507 = vmax.xlane.f32.xlu0 %v5506_v37  ;;  %v5244_v13 = vsel %vm298_vm0, %v16284_v56, -inf  ;;  %v5515_v22 = vsel %vm298_vm0, %v16292_v5, -inf }
0x1209   : > { %v5215_v54 = vpop.f32.mrb[111].mxu1  ;;  %5510 = vmax.xlane.f32.xlu1 %v5509_v61  ;;  %v16320_v62 = vmul.f32 0.35355338, %v11245_v55 }
0x120a   : > { %v16300_v37 = vmul.f32 0.35355338, %v5215_v54 }
0x120c   : > { %5242 = vmax.xlane.f32.xlu0 %v5241_v60  ;;  %v5512_v60 = vsel %vm298_vm0, %v16296_v1, -inf  ;;  %v5250_v59 = vsel %vm298_vm0, %v16300_v37, -inf }
0x120d   : > { %5245 = vmax.xlane.f32.xlu1 %v5244_v13 }
0x1210   : > { %5504 = vmax.xlane.f32.xlu0 %v5503_v27 }
0x1211   : > { %v11348_v61 = vpop.f32.mrb[96].mxu0  ;;  %5516 = vmax.xlane.f32.xlu1 %v5515_v22  ;;  %v5247_v22 = vsel %vm298_vm0, %v16304_v9, -inf }
0x1212   : > { %v6005_v16 = vpop.f32.mrb[97].mxu0  ;;  %v16328_v28 = vmul.f32 0.35355338, %v11348_v61 }
0x1213   : > { %v16308_v13 = vmul.f32 0.35355338, %v6005_v16 }
0x1214   : > { %5513 = vmax.xlane.f32.xlu0 %v5512_v60 }
0x1215   : > { %v11351_v54 = vpop.f32.mrb[98].mxu0  ;;  %5251 = vmax.xlane.f32.xlu1 %v5250_v59  ;;  %v6052_v57 = vsel %vm298_vm0, %v16308_v13, -inf  ;;  %v5518_v59 = vsel %vm298_vm0, %v16312_v47, -inf }
0x1216   : > { %v6015_v27 = vpop.f32.mrb[99].mxu0 }
0x1217   : > { %v16316_v21 = vmul.f32 0.35355338, %v6015_v27 }
0x1218   : > { %5248 = vmax.xlane.f32.xlu0 %v5247_v22 }
0x1219   : > { %v11354_v16 = vpop.f32.mrb[100].mxu0  ;;  %6053 = vmax.xlane.f32.xlu1 %v6052_v57  ;;  %v6058_v29 = vsel %vm298_vm0, %v16316_v21, -inf  ;;  %v5253_v57 = vsel %vm298_vm0, %v16320_v62, -inf }
0x121a   : > { %v6025_v60 = vpop.f32.mrb[101].mxu0 }
0x121b   : > { %v16324_v8 = vmul.f32 0.35355338, %v6025_v60  ;;  %v16336_v60 = vmul.f32 0.35355338, %v11351_v54 }
0x121c   : > { %5519 = vmax.xlane.f32.xlu0 %v5518_v59  ;;  %v6055_v59 = vsel %vm298_vm0, %v16328_v28, -inf }
0x121d   : > { %v11357_v27 = vpop.f32.mrb[102].mxu0  ;;  %6059 = vmax.xlane.f32.xlu1 %v6058_v29  ;;  %v6064_v55 = vsel %vm298_vm0, %v16324_v8, -inf  ;;  %v16342_v29 = vmul.f32 0.35355338, %v11354_v16 }
0x121e   : > { %v6035_v22 = vpop.f32.mrb[103].mxu0 }
0x121f   : > { %v16332_v15 = vmul.f32 0.35355338, %v6035_v22  ;;  %v6061_v22 = vsel %vm298_vm0, %v16336_v60, -inf  ;;  %v6067_v54 = vsel %vm298_vm0, %v16342_v29, -inf }
0x1220   : > { %5254 = vmax.xlane.f32.xlu0 %v5253_v57  ;;  %v16346_v57 = vmul.f32 0.35355338, %v11357_v27 }
0x1221   : > { %6065 = vmax.xlane.f32.xlu1 %v6064_v55  ;;  %v6070_v61 = vsel %vm298_vm0, %v16332_v15, -inf }
0x1222   : > { %v6073_v55 = vsel %vm298_vm0, %v16346_v57, -inf }
0x1224   : > { %6056 = vmax.xlane.f32.xlu0 %v6055_v59 }
0x1225   : > { %6071 = vmax.xlane.f32.xlu1 %v6070_v61 }
0x1228   : > { %6062 = vmax.xlane.f32.xlu0 %v6061_v22 }
0x122c   : > { %6068 = vmax.xlane.f32.xlu0 %v6067_v54 }
0x1230   : > { %6074 = vmax.xlane.f32.xlu0 %v6073_v55 }
0x1231   : > { %v11404_v59 = vpop.f32.mrb[104].mxu0 }
0x1232   : > { %v16352_v45 = vmul.f32 0.35355338, %v11404_v59  ;;  %v6431_v61 = vpop.f32.mrb[105].mxu0 }
0x1233   : > { %v16354_v16 = vmul.f32 0.35355338, %v6431_v61 }
0x1234   : > { %v6481_v63 = vsel %vm298_vm0, %v16352_v45, -inf }
0x1235   : > { %6482 = vmax.xlane.f32.xlu0 %v6481_v63  ;;  %v11407_v27 = vpop.f32.mrb[106].mxu0  ;;  %v6478_v22 = vsel %vm298_vm0, %v16354_v16, -inf }
0x1236   : > { %v16360_v38 = vmul.f32 0.35355338, %v11407_v27  ;;  %v6441_v54 = vpop.f32.mrb[107].mxu0  ;;  %6479 = vmax.xlane.f32.xlu1 %v6478_v22 }
0x1237   : > { %v16362_v26 = vmul.f32 0.35355338, %v6441_v54 }
0x1238   : > { %v6487_v55 = vsel %vm298_vm0, %v16360_v38, -inf }
0x1239   : > { %6488 = vmax.xlane.f32.xlu0 %v6487_v55  ;;  %v11410_v59 = vpop.f32.mrb[108].mxu0  ;;  %v6484_v61 = vsel %vm298_vm0, %v16362_v26, -inf }
0x123a   : > { %v16368_v42 = vmul.f32 0.35355338, %v11410_v59  ;;  %v6451_v63 = vpop.f32.mrb[109].mxu0  ;;  %6485 = vmax.xlane.f32.xlu1 %v6484_v61 }
0x123b   : > { %v16370_v33 = vmul.f32 0.35355338, %v6451_v63  ;;  %v16384_v63 = vpop.permute.xlu1 %12918 }
0x123c   : > { %v6493_v27 = vsel %vm298_vm0, %v16368_v42, -inf }
0x123d   : > { %6494 = vmax.xlane.f32.xlu0 %v6493_v27  ;;  %v11413_v22 = vpop.f32.mrb[110].mxu0  ;;  %v6490_v54 = vsel %vm298_vm0, %v16370_v33, -inf }
0x123e   : > { %v16376_v36 = vmul.f32 0.35355338, %v11413_v22  ;;  %v6461_v55 = vpop.f32.mrb[111].mxu0  ;;  %6491 = vmax.xlane.f32.xlu1 %v6490_v54 }
0x123f   : > { %v16378_v46 = vmul.f32 0.35355338, %v6461_v55  ;;  %v16386_v27 = vpop.permute.xlu1 %12928  ;;  %v16391_v55 = vpop.permute.xlu0 %12923 }
0x1240   : > { %v6499_v59 = vsel %vm298_vm0, %v16376_v36, -inf }
0x1241   : > { %6500 = vmax.xlane.f32.xlu0 %v6499_v59  ;;  %v6496_v61 = vsel %vm298_vm0, %v16378_v46, -inf }
0x1242   : > { %6497 = vmax.xlane.f32.xlu1 %v6496_v61 }
0x1281   : > { %v5502_v19 = vpop.xlane.xlu1 %5501 }
0x1282   : > { %v5522_v22 = vsub.f32 %v16256_v44, %v5502_v19 }
0x1284   : > { %v5531_v54 = vmul.f32 1.442695, %v5522_v22 }
0x1286   : > { %13436 = vpow2.f32 %v5531_v54 }
0x128d   : > { %v5237_v52 = vpop.xlane.xlu0 %5236 }
0x128e   : > { %v5257_v59 = vsub.f32 %v16260_v14, %v5237_v52  ;;  %v5234_v2 = vpop.xlane.xlu1 %5233 }
0x128f   : > { %v5256_v3 = vsub.f32 %v16262_v48, %v5234_v2 }
0x1290   : > { %v16394_v40 = vpop.eup %13436  ;;  %v5266_v61 = vmul.f32 1.442695, %v5257_v59 }
0x1291   : > { %v5499_v35 = vpop.xlane.xlu0 %5498  ;;  %v5548_v6 = vsel %vm298_vm0, %v16394_v40, 0.0  ;;  %v5264_v22 = vmul.f32 1.442695, %v5256_v3 }
0x1292   : > { %13438 = vpow2.f32 %v5266_v61  ;;  %v5521_v19 = vsub.f32 %v16264_v50, %v5499_v35  ;;  %v5240_v44 = vpop.xlane.xlu1 %5239  ;;  %5549 = vadd.xlane.f32.xlu0 %v5548_v6 }
0x1293   : > { %v5258_v59 = vsub.f32 %v16270_v23, %v5240_v44 }
0x1294   : > { %v5529_v54 = vmul.f32 1.442695, %v5521_v19 }
0x1295   : > { %v5508_v53 = vpop.xlane.xlu0 %5507  ;;  %v5268_v35 = vmul.f32 1.442695, %v5258_v59 }
0x1296   : > { %13440 = vpow2.f32 %v5529_v54  ;;  %v5524_v52 = vsub.f32 %v16272_v58, %v5508_v53  ;;  %v5511_v14 = vpop.xlane.xlu1 %5510 }
0x1297   : > { %13442 = vpow2.f32 %v5264_v22  ;;  %v5525_v59 = vsub.f32 %v16276_v17, %v5511_v14 }
0x1298   : > { %v5535_v2 = vmul.f32 1.442695, %v5524_v52 }
0x1299   : > { %v5243_v48 = vpop.xlane.xlu0 %5242 }
0x129a   : > { %13444 = vpow2.f32 %v5535_v2  ;;  %v5259_v24 = vsub.f32 %v16280_v11, %v5243_v48  ;;  %v5246_v61 = vpop.xlane.xlu1 %5245 }
0x129b   : > { %v5260_v19 = vsub.f32 %v16284_v56, %v5246_v61 }
0x129c   : > { %v16403_v51 = vpop.eup %13438  ;;  %v5270_v6 = vmul.f32 1.442695, %v5259_v24 }
0x129d   : > { %v5505_v3 = vpop.xlane.xlu0 %5504  ;;  %v5283_v50 = vsel %vm298_vm0, %v16403_v51, 0.0  ;;  %v5272_v2 = vmul.f32 1.442695, %v5260_v19 }
0x129e   : > { %13446 = vpow2.f32 %v5270_v6  ;;  %v5523_v53 = vsub.f32 %v16288_v20, %v5505_v3  ;;  %5284 = vadd.xlane.f32.xlu0 %v5283_v50  ;;  %v5517_v58 = vpop.xlane.xlu1 %5516  ;;  %v5537_v50 = vmul.f32 1.442695, %v5525_v59 }
0x129f   : > { %13448 = vpow2.f32 %v5268_v35 }
0x12a0   : > { %v16408_v23 = vpop.eup %13440  ;;  %v5533_v11 = vmul.f32 1.442695, %v5523_v53 }
0x12a1   : > { %v5514_v44 = vpop.xlane.xlu0 %5513  ;;  %v5545_v22 = vsel %vm298_vm0, %v16408_v23, 0.0  ;;  %v16413_v24 = vpop.eup %13442 }
0x12a2   : > { %13450 = vpow2.f32 %v5533_v11  ;;  %v5526_v54 = vsub.f32 %v16296_v1, %v5514_v44  ;;  %5546 = vadd.xlane.f32.xlu1 %v5545_v22  ;;  %v5252_v52 = vpop.xlane.xlu1 %5251  ;;  %v5280_v61 = vsel %vm298_vm0, %v16413_v24, 0.0 }
0x12a4   : > { %v16416_v20 = vpop.eup %13444  ;;  %v5539_v48 = vmul.f32 1.442695, %v5526_v54 }
0x12a5   : > { %v5249_v35 = vpop.xlane.xlu0 %5248  ;;  %v5554_v56 = vsel %vm298_vm0, %v16416_v20, 0.0 }
0x12a6   : > { %13452 = vpow2.f32 %v5539_v48  ;;  %v5261_v6 = vsub.f32 %v16304_v9, %v5249_v35  ;;  %5555 = vadd.xlane.f32.xlu0 %v5554_v56  ;;  %5281 = vadd.xlane.f32.xlu1 %v5280_v61  ;;  %v6054_v1 = vpop.xlane.xlu1 %6053  ;;  %v5527_v9 = vsub.f32 %v16292_v5, %v5517_v58  ;;  %v5262_v61 = vsub.f32 %v16300_v37, %v5252_v52 }
0x12a7   : > { %13454 = vpow2.f32 %v5272_v2 }
0x12a8   : > { %v16424_v3 = vpop.eup %13446  ;;  %v5274_v17 = vmul.f32 1.442695, %v5261_v6  ;;  %v5541_v56 = vmul.f32 1.442695, %v5527_v9 }
0x12a9   : > { %v5520_v14 = vpop.xlane.xlu0 %5519  ;;  %v5289_v53 = vsel %vm298_vm0, %v16424_v3, 0.0  ;;  %v16428_v19 = vpop.eup %13448 }
0x12aa   : > { %13456 = vpow2.f32 %v5274_v17  ;;  %v5528_v11 = vsub.f32 %v16312_v47, %v5520_v14  ;;  %5290 = vadd.xlane.f32.xlu0 %v5289_v53  ;;  %v6060_v54 = vpop.xlane.xlu1 %6059  ;;  %v5286_v2 = vsel %vm298_vm0, %v16428_v19, 0.0 }
0x12ab   : > { %13458 = vpow2.f32 %v5537_v50 }
0x12ac   : > { %v16431_v44 = vpop.eup %13450  ;;  %v5543_v22 = vmul.f32 1.442695, %v5528_v11 }
0x12ad   : > { %v5255_v59 = vpop.xlane.xlu0 %5254  ;;  %v5551_v48 = vsel %vm298_vm0, %v16431_v44, 0.0 }
0x12ae   : > { %13460 = vpow2.f32 %v5543_v22  ;;  %v5263_v35 = vsub.f32 %v16320_v62, %v5255_v59  ;;  %5287 = vadd.xlane.f32.xlu0 %v5286_v2  ;;  %5552 = vadd.xlane.f32.xlu1 %v5551_v48  ;;  %v16446_v17 = vpop.xlane.xlu1 %6065  ;;  %v5276_v62 = vmul.f32 1.442695, %v5262_v61  ;;  %v6076_v59 = vsub.f32 %v16308_v13, %v6054_v1 }
0x12b0   : > { %v16439_v47 = vpop.eup %13452  ;;  %v5278_v5 = vmul.f32 1.442695, %v5263_v35 }
0x12b1   : > { %v6057_v58 = vpop.xlane.xlu0 %6056  ;;  %v5560_v6 = vsel %vm298_vm0, %v16439_v47, 0.0  ;;  %v16444_v50 = vpop.eup %13454 }
0x12b2   : > { %13462 = vpow2.f32 %v5278_v5  ;;  %5561 = vadd.xlane.f32.xlu0 %v5560_v6  ;;  %v6077_v53 = vsub.f32 %v16328_v28, %v6057_v58  ;;  %v5292_v37 = vsel %vm298_vm0, %v16444_v50, 0.0  ;;  %v6072_v48 = vpop.xlane.xlu1 %6071  ;;  %v6084_v58 = vmul.f32 1.442695, %v6076_v59 }
0x12b3   : > { %13464 = vpow2.f32 %v5541_v56  ;;  %v6082_v61 = vsub.f32 %v16332_v15, %v6072_v48 }
0x12b4   : > { %v16448_v14 = vpop.eup %13456  ;;  %13466 = vpow2.f32 %v5276_v62  ;;  %v6086_v2 = vmul.f32 1.442695, %v6077_v53 }
0x12b5   : > { %v6063_v11 = vpop.xlane.xlu0 %6062  ;;  %v5295_v52 = vsel %vm298_vm0, %v16448_v14, 0.0  ;;  %v16455_v9 = vpop.eup %13458 }
0x12b6   : > { %5293 = vadd.xlane.f32.xlu0 %v5292_v37  ;;  %5296 = vadd.xlane.f32.xlu1 %v5295_v52  ;;  %v5557_v56 = vsel %vm298_vm0, %v16455_v9, 0.0  ;;  %13468 = vpow2.f32 %v6086_v2  ;;  %v6079_v6 = vsub.f32 %v16336_v60, %v6063_v11  ;;  %v6078_v37 = vsub.f32 %v16316_v21, %v6060_v54 }
0x12b7   : > { %v6096_v52 = vmul.f32 1.442695, %v6082_v61  ;;  %13470 = vpow2.f32 %v6084_v58 }
0x12b8   : > { %v16457_v22 = vpop.eup %13460  ;;  %v6090_v15 = vmul.f32 1.442695, %v6079_v6  ;;  %v6088_v11 = vmul.f32 1.442695, %v6078_v37  ;;  %v6080_v6 = vsub.f32 %v16324_v8, %v16446_v17 }
0x12b9   : > { %v6069_v35 = vpop.xlane.xlu0 %6068  ;;  %v5566_v28 = vsel %vm298_vm0, %v16457_v22, 0.0 }
0x12ba   : > { %5567 = vadd.xlane.f32.xlu0 %v5566_v28  ;;  %5558 = vadd.xlane.f32.xlu1 %v5557_v56  ;;  %v6081_v28 = vsub.f32 %v16342_v29, %v6069_v35 }
0x12bc   : > { %v16465_v5 = vpop.eup %13462 }
0x12bd   : > { %v6075_v13 = vpop.xlane.xlu0 %6074  ;;  %v5301_v1 = vsel %vm298_vm0, %v16465_v5, 0.0  ;;  %v16470_v62 = vpop.eup %13464 }
0x12be   : > { %v6083_v53 = vsub.f32 %v16346_v57, %v6075_v13  ;;  %5302 = vadd.xlane.f32.xlu0 %v5301_v1  ;;  %v5563_v59 = vsel %vm298_vm0, %v16470_v62, 0.0  ;;  %v16476_v2 = vpop.eup %13466  ;;  %v6094_v13 = vmul.f32 1.442695, %v6081_v28 }
0x12bf   : > { %v5298_v54 = vsel %vm298_vm0, %v16476_v2, 0.0 }
0x12c0   : > { %v6098_v48 = vmul.f32 1.442695, %v6083_v53  ;;  %v16482_v61 = vpop.eup %13468 }
0x12c1   : > { %v6103_v53 = vsel %vm298_vm0, %v16482_v61, 0.0  ;;  %v16490_v37 = vpop.eup %13470 }
0x12c2   : > { %13472 = vpow2.f32 %v6098_v48  ;;  %v6483_v60 = vpop.xlane.xlu0 %6482  ;;  %5564 = vadd.xlane.f32.xlu0 %v5563_v59 }
0x12c3   : > { %13474 = vpow2.f32 %v6096_v52  ;;  %v6503_v57 = vsub.f32 %v16352_v45, %v6483_v60  ;;  %v6480_v56 = vpop.xlane.xlu1 %6479 }
0x12c4   : > { %13476 = vpow2.f32 %v6090_v15  ;;  %v6092_v15 = vmul.f32 1.442695, %v6080_v6  ;;  %v6502_v48 = vsub.f32 %v16354_v16, %v6480_v56 }
0x12c5   : > { %v6512_v21 = vmul.f32 1.442695, %v6503_v57  ;;  %13478 = vpow2.f32 %v6088_v11  ;;  %v6100_v11 = vsel %vm298_vm0, %v16490_v37, 0.0 }
0x12c6   : > { %v6489_v58 = vpop.xlane.xlu0 %6488  ;;  %5299 = vadd.xlane.f32.xlu0 %v5298_v54  ;;  %v6510_v16 = vmul.f32 1.442695, %v6502_v48 }
0x12c7   : > { %v6505_v1 = vsub.f32 %v16360_v38, %v6489_v58  ;;  %v6486_v29 = vpop.xlane.xlu1 %6485  ;;  %13480 = vpow2.f32 %v6512_v21 }
0x12c8   : > { %v6504_v45 = vsub.f32 %v16362_v26, %v6486_v29  ;;  %13482 = vpow2.f32 %v6094_v13 }
0x12c9   : > { %v6516_v35 = vmul.f32 1.442695, %v6505_v1 }
0x12ca   : > { %v6495_v52 = vpop.xlane.xlu0 %6494  ;;  %6104 = vadd.xlane.f32.xlu0 %v6103_v53  ;;  %v6514_v38 = vmul.f32 1.442695, %v6504_v45 }
0x12cb   : > { %13484 = vpow2.f32 %v6516_v35  ;;  %v6507_v17 = vsub.f32 %v16368_v42, %v6495_v52  ;;  %v6492_v26 = vpop.xlane.xlu1 %6491 }
0x12cc   : > { %v16493_v8 = vpop.eup %13472  ;;  %13486 = vpow2.f32 %v6092_v15  ;;  %v6506_v56 = vsub.f32 %v16370_v33, %v6492_v26 }
0x12cd   : > { %v16496_v59 = vpop.eup %13474  ;;  %v6121_v60 = vsel %vm298_vm0, %v16493_v8, 0.0  ;;  %13488 = vpow2.f32 %v6514_v38  ;;  %v6520_v57 = vmul.f32 1.442695, %v6507_v17 }
0x12ce   : > { %v16502_v28 = vpop.eup %13476  ;;  %6122 = vadd.xlane.f32.xlu1 %v6121_v60  ;;  %6101 = vadd.xlane.f32.xlu0 %v6100_v11  ;;  %v6118_v54 = vsel %vm298_vm0, %v16496_v59, 0.0  ;;  %13490 = vpow2.f32 %v6510_v16  ;;  %v6518_v6 = vmul.f32 1.442695, %v6506_v56 }
0x12cf   : > { %v16505_v42 = vpop.eup %13478  ;;  %v6109_v21 = vsel %vm298_vm0, %v16502_v28, 0.0  ;;  %13492 = vpow2.f32 %v6520_v57  ;;  %v6501_v57 = vpop.xlane.xlu0 %6500 }
0x12d0   : > { %v6106_v33 = vsel %vm298_vm0, %v16505_v42, 0.0  ;;  %13494 = vpow2.f32 %v6518_v6  ;;  %v6498_v56 = vpop.xlane.xlu1 %6497 }
0x12d1   : > { %v16511_v58 = vpop.eup %13480 }
0x12d2   : > { %6110 = vadd.xlane.f32.xlu0 %v6109_v21  ;;  %6119 = vadd.xlane.f32.xlu1 %v6118_v54  ;;  %v16513_v13 = vpop.eup %13482  ;;  %v6529_v1 = vsel %vm298_vm0, %v16511_v58, 0.0  ;;  %v6509_v21 = vsub.f32 %v16376_v36, %v6501_v57  ;;  %v6508_v54 = vsub.f32 %v16378_v46, %v6498_v56 }
0x12d3   : > { %v6115_v35 = vsel %vm298_vm0, %v16513_v13, 0.0 }
0x12d4   : > { %v6524_v6 = vmul.f32 1.442695, %v6509_v21 }
0x12d5   : > { %v16519_v29 = vpop.eup %13484 }
0x12d6   : > { %6107 = vadd.xlane.f32.xlu0 %v6106_v33  ;;  %6530 = vadd.xlane.f32.xlu1 %v6529_v1  ;;  %v16521_v45 = vpop.eup %13486  ;;  %v6535_v53 = vsel %vm298_vm0, %v16519_v29, 0.0  ;;  %v6522_v33 = vmul.f32 1.442695, %v6508_v54  ;;  %13496 = vpow2.f32 %v6524_v6 }
0x12d7   : > { %v16527_v52 = vpop.eup %13488  ;;  %v6112_v48 = vsel %vm298_vm0, %v16521_v45, 0.0 }
0x12d8   : > { %v16529_v15 = vpop.eup %13490  ;;  %v6532_v38 = vsel %vm298_vm0, %v16527_v52, 0.0  ;;  %13498 = vpow2.f32 %v6522_v33 }
0x12d9   : > { %v16535_v17 = vpop.eup %13492  ;;  %v6526_v26 = vsel %vm298_vm0, %v16529_v15, 0.0 }
0x12da   : > { %6116 = vadd.xlane.f32.xlu0 %v6115_v35  ;;  %6536 = vadd.xlane.f32.xlu1 %v6535_v53  ;;  %v6541_v60 = vsel %vm298_vm0, %v16535_v17, 0.0  ;;  %v16541_v11 = vpop.eup %13494 }
0x12db   : > { %v6538_v16 = vsel %vm298_vm0, %v16541_v11, 0.0 }
0x12de   : > { %6113 = vadd.xlane.f32.xlu0 %v6112_v48  ;;  %6533 = vadd.xlane.f32.xlu1 %v6532_v38 }
0x12e0   : > { %v16553_v1 = vpop.eup %13496 }
0x12e2   : > { %6527 = vadd.xlane.f32.xlu0 %v6526_v26  ;;  %6542 = vadd.xlane.f32.xlu1 %v6541_v60  ;;  %v16555_v35 = vpop.eup %13498 }
0x12e6   : > { %6539 = vadd.xlane.f32.xlu0 %v6538_v16 }
0x12f3   : > { %12938 = vrot.lane.b32.xlu1 %v16034_v10, %s13785_s11  ;;  %v6547_v10 = vsel %vm298_vm0, %v16553_v1, 0.0 }
0x12f7   : > { %12943 = vrot.lane.b32.xlu1 %v16046_v31, %s13785_s11 }
0x12fc   : > { %12933 = vrot.lane.b32.xlu0 %v16023_v18, %s13785_s11  ;;  %v6544_v18 = vsel %vm298_vm0, %v16555_v35, 0.0 }
0x131b   : > { %6548 = vadd.xlane.f32.xlu0 %v6547_v10  ;;  %6545 = vadd.xlane.f32.xlu1 %v6544_v18  ;;  %v12915_v10 = vunpack.i.l.bf16 %v16389_v4 }
0x131f   : > { %v5550_v31 = vpop.xlane.xlu0 %5549 }
0x1320   : > { %13500 = vrcp.f32 %v5550_v31 }
0x132a   : > { %v13501_v26 = vpop.eup %13500 }
0x132b   : > { %v5285_v46 = vpop.xlane.xlu0 %5284  ;;  %v5578_v21 = vmul.f32 %v13501_v26, %v16394_v40  ;;  %v12916_v40 = vunpack.i.h.bf16 %v16389_v4 }
0x132c   : > { %12948 = vrot.lane.b32.xlu1 %v16062_v12, %s13785_s11 }
0x132f   : > { %v5547_v36 = vpop.xlane.xlu1 %5546 }
0x1330   : > { %13502 = vrcp.f32 %v5547_v36 }
0x1333   : > { %v5556_v53 = vpop.xlane.xlu0 %5555  ;;  %v5282_v48 = vpop.xlane.xlu1 %5281 }
0x1334   : > { %13504 = vrcp.f32 %v5556_v53  ;;  %v12170_v53 = vpack.c.bf16 %v12916_v40, %v12915_v10 }
0x1337   : > { %v5291_v38 = vpop.xlane.xlu0 %5290 }
0x133a   : > { %v13503_v60 = vpop.eup %13502 }
0x133b   : > { %v5288_v16 = vpop.xlane.xlu0 %5287  ;;  %v5553_v57 = vpop.xlane.xlu1 %5552  ;;  %v5577_v56 = vmul.f32 %v13503_v60, %v16408_v23 }
0x133c   : > { %13506 = vrcp.f32 %v5553_v57 }
0x133d   : > { %11290 = vmatprep.mubr.msk.f32.mxu1 %vm298_vm0, %v5577_v56 }
0x133e   : > { %11291 = vmatmul.mubr.msk.f32.vlgmr.msra.gmra.mrb[112].mxu1 %vm298_vm0, %v5578_v21  ;;  %v13505_v23 = vpop.eup %13504 }
0x133f   : > { %12133 = vmatpush3.bf16.msra.mxu1 %v16027_v49  ;;  %v5562_v12 = vpop.xlane.xlu0 %5561 }
0x1340   : > { %12135 = vmatprep.subr.bf16.mxu1 %v16038_v0  ;;  %13508 = vrcp.f32 %v5562_v12 }
0x1343   : > { %12137 = vmatpush3.bf16.msra.mxu1 %v16038_v0  ;;  %v5294_v54 = vpop.xlane.xlu0 %5293  ;;  %v5297_v6 = vpop.xlane.xlu1 %5296  ;;  %v5580_v0 = vmul.f32 %v13505_v23, %v16416_v20  ;;  %v12921_v23 = vunpack.i.h.bf16 %v16384_v63 }
0x1344   : > { %12139 = vmatprep.subr.bf16.mxu1 %v16050_v25 }
0x1346   : > { %v13507_v33 = vpop.eup %13506 }
0x1347   : > { %12141 = vmatpush3.bf16.msra.mxu1 %v16050_v25  ;;  %v5568_v18 = vpop.xlane.xlu0 %5567  ;;  %v5559_v31 = vpop.xlane.xlu1 %5558  ;;  %v5579_v49 = vmul.f32 %v13507_v33, %v16431_v44 }
0x1348   : > { %12143 = vmatprep.subr.bf16.mxu1 %v16066_v43  ;;  %13510 = vrcp.f32 %v5559_v31 }
0x1349   : > { %11293 = vmatprep.mubr.msk.f32.mxu1 %vm298_vm0, %v5579_v49  ;;  %13512 = vrcp.f32 %v5282_v48 }
0x134a   : > { %11294 = vmatmul.mubr.msk.f32.gmra.mrb[114].mxu1 %vm298_vm0, %v5580_v0  ;;  %13514 = vrcp.f32 %v5568_v18  ;;  %v13509_v25 = vpop.eup %13508  ;;  %v12925_v18 = vunpack.i.l.bf16 %v16391_v55 }
0x134b   : > { %v5303_v36 = vpop.xlane.xlu0 %5302  ;;  %12145 = vmatpush3.bf16.msra.mxu1 %v16066_v43  ;;  %v5582_v60 = vmul.f32 %v13509_v25, %v16439_v47 }
0x134c   : > { %12171 = vmatprep.subr.bf16.mxu1 %v12170_v53 }
0x134f   : > { %v5565_v4 = vpop.xlane.xlu0 %5564 }
0x1350   : > { %13516 = vrcp.f32 %v5565_v4  ;;  %v12930_v4 = vunpack.i.l.bf16 %v16386_v27 }
0x1351   : > { %13518 = vrcp.f32 %v5285_v46 }
0x1352   : > { %v13511_v26 = vpop.eup %13510  ;;  %13520 = vrcp.f32 %v5288_v16 }
0x1353   : > { %v5300_v44 = vpop.xlane.xlu0 %5299  ;;  %v5581_v20 = vmul.f32 %v13511_v26, %v16455_v9  ;;  %13522 = vrcp.f32 %v5291_v38  ;;  %v13513_v57 = vpop.eup %13512 }
0x1354   : > { %13524 = vrcp.f32 %v5294_v54  ;;  %v13515_v48 = vpop.eup %13514  ;;  %v5312_v38 = vmul.f32 %v13513_v57, %v16413_v24  ;;  %v12920_v54 = vunpack.i.l.bf16 %v16384_v63  ;;  %v12926_v24 = vunpack.i.h.bf16 %v16391_v55 }
0x1355   : > { %11296 = vmatprep.mubr.msk.f32.mxu1 %vm298_vm0, %v5581_v20  ;;  %13526 = vrcp.f32 %v5297_v6  ;;  %v5584_v9 = vmul.f32 %v13515_v48, %v16457_v22  ;;  %v12931_v55 = vunpack.i.h.bf16 %v16386_v27 }
0x1356   : > { %11297 = vmatmul.mubr.msk.f32.gmra.mrb[116].mxu1 %vm298_vm0, %v5582_v60  ;;  %13528 = vrcp.f32 %v5300_v44  ;;  %v12174_v63 = vpack.c.bf16 %v12921_v23, %v12920_v54 }
0x1357   : > { %v6105_v43 = vpop.xlane.xlu0 %6104  ;;  %13530 = vrcp.f32 %v5303_v36  ;;  %v12182_v27 = vpack.c.bf16 %v12931_v55, %v12930_v4 }
0x135a   : > { %v13517_v56 = vpop.eup %13516 }
0x135b   : > { %v6102_v21 = vpop.xlane.xlu0 %6101  ;;  %v16584_v12 = vpop.xlane.xlu1 %6122  ;;  %v5583_v46 = vmul.f32 %v13517_v56, %v16470_v62 }
0x135c   : > { %v13519_v47 = vpop.eup %13518  ;;  %13532 = vrcp.f32 %v6102_v21 }
0x135d   : > { %11299 = vmatprep.mubr.msk.f32.mxu1 %vm298_vm0, %v5583_v46  ;;  %v13521_v16 = vpop.eup %13520  ;;  %v5313_v33 = vmul.f32 %v13519_v47, %v16403_v51  ;;  %13534 = vrcp.f32 %v6105_v43 }
0x135e   : > { %11300 = vmatmul.mubr.msk.f32.gmra.mrb[118].mxu1 %vm298_vm0, %v5584_v9  ;;  %v13523_v22 = vpop.eup %13522  ;;  %v5314_v40 = vmul.f32 %v13521_v16, %v16428_v19 }
0x135f   : > { %v6111_v6 = vpop.xlane.xlu0 %6110  ;;  %11318 = vmatprep.mubr.msk.f32.mxu1 %vm298_vm0, %v5312_v38  ;;  %v6120_v62 = vpop.xlane.xlu1 %6119  ;;  %v5315_v51 = vmul.f32 %v13523_v22, %v16424_v3 }
0x1360   : > { %v13525_v10 = vpop.eup %13524 }
0x1361   : > { %v13527_v19 = vpop.eup %13526  ;;  %v5316_v0 = vmul.f32 %v13525_v10, %v16444_v50 }
0x1362   : > { %11319 = vmatmul.mubr.msk.f32.vlgmr.msra.gmra.mrb[112].mxu1 %vm298_vm0, %v5313_v33  ;;  %v13529_v36 = vpop.eup %13528  ;;  %v5317_v3 = vmul.f32 %v13527_v19, %v16448_v14 }
0x1363   : > { %12173 = vmatpush3.bf16.msra.mxu1 %v12170_v53  ;;  %v6108_v31 = vpop.xlane.xlu0 %6107  ;;  %11321 = vmatprep.mubr.msk.f32.mxu1 %vm298_vm0, %v5314_v40  ;;  %v16600_v49 = vpop.xlane.xlu1 %6530  ;;  %v12178_v53 = vpack.c.bf16 %v12926_v24, %v12925_v18  ;;  %v5318_v50 = vmul.f32 %v13529_v36, %v16476_v2 }
0x1364   : > { %13536 = vrcp.f32 %v6108_v31  ;;  %12175 = vmatprep.subr.bf16.mxu1 %v12174_v63  ;;  %v13531_v44 = vpop.eup %13530 }
0x1365   : > { %13538 = vrcp.f32 %v6111_v6  ;;  %v5319_v57 = vmul.f32 %v13531_v44, %v16465_v5 }
0x1366   : > { %11322 = vmatmul.mubr.msk.f32.gmra.mrb[114].mxu1 %vm298_vm0, %v5315_v51  ;;  %v13533_v20 = vpop.eup %13532 }
0x1367   : > { %12177 = vmatpush3.bf16.msra.mxu1 %v12174_v63  ;;  %v6117_v25 = vpop.xlane.xlu0 %6116  ;;  %11324 = vmatprep.mubr.msk.f32.mxu1 %vm298_vm0, %v5316_v0  ;;  %v16608_v26 = vpop.xlane.xlu1 %6536  ;;  %v6132_v14 = vmul.f32 %v13533_v20, %v16490_v37 }
0x1368   : > { %12179 = vmatprep.subr.bf16.mxu1 %v12178_v53  ;;  %13540 = vrcp.f32 %v6117_v25  ;;  %v13535_v48 = vpop.eup %13534 }
0x1369   : > { %13542 = vrcp.f32 %v6120_v62  ;;  %v6133_v46 = vmul.f32 %v13535_v48, %v16482_v61 }
0x136a   : > { %11325 = vmatmul.mubr.msk.f32.gmra.mrb[116].mxu1 %vm298_vm0, %v5317_v3 }
0x136b   : > { %12181 = vmatpush3.bf16.msra.mxu1 %v12178_v53  ;;  %v6114_v60 = vpop.xlane.xlu0 %6113  ;;  %11327 = vmatprep.mubr.msk.f32.mxu1 %vm298_vm0, %v5318_v50  ;;  %v6534_v43 = vpop.xlane.xlu1 %6533 }
0x136c   : > { %13544 = vrcp.f32 %v6114_v60  ;;  %12183 = vmatprep.subr.bf16.mxu1 %v12182_v27 }
0x136d   : > { %13546 = vrcp.f32 %v16584_v12 }
0x136e   : > { %v13537_v56 = vpop.eup %13536  ;;  %11328 = vmatmul.mubr.msk.f32.gmra.mrb[118].mxu1 %vm298_vm0, %v5319_v57 }
0x136f   : > { %12185 = vmatpush3.bf16.msra.mxu1 %v12182_v27  ;;  %v6528_v2 = vpop.xlane.xlu0 %6527  ;;  %11374 = vmatprep.mubr.msk.f32.mxu1 %vm298_vm0, %v6132_v14  ;;  %v6543_v21 = vpop.xlane.xlu1 %6542  ;;  %v6134_v47 = vmul.f32 %v13537_v56, %v16505_v42 }
0x1370   : > { %13548 = vrcp.f32 %v6528_v2  ;;  %v13539_v9 = vpop.eup %13538 }
0x1371   : > { %v6135_v12 = vmul.f32 %v13539_v9, %v16502_v28  ;;  %13550 = vrcp.f32 %v16600_v49 }
0x1372   : > { %11375 = vmatmul.mubr.msk.f32.vlgmr.msra.gmra.mrb[112].mxu1 %vm298_vm0, %v6133_v46  ;;  %v13541_v38 = vpop.eup %13540  ;;  %13552 = vrcp.f32 %v6534_v43 }
0x1373   : > { %v6540_v5 = vpop.xlane.xlu0 %6539  ;;  %11377 = vmatprep.mubr.msk.f32.mxu1 %vm298_vm0, %v6134_v47  ;;  %v12939_v37 = vpop.permute.xlu1 %12938  ;;  %v6137_v6 = vmul.f32 %v13541_v38, %v16513_v13  ;;  %13554 = vrcp.f32 %v16608_v26 }
0x1374   : > { %v13543_v16 = vpop.eup %13542  ;;  %v12941_v62 = vunpack.i.h.bf16 %v12939_v37  ;;  %v12940_v42 = vunpack.i.l.bf16 %v12939_v37  ;;  %13556 = vrcp.f32 %v6540_v5 }
0x1375   : > { %v6138_v24 = vmul.f32 %v13543_v16, %v16496_v59  ;;  %13558 = vrcp.f32 %v6543_v21 }
0x1376   : > { %v13545_v23 = vpop.eup %13544  ;;  %11378 = vmatmul.mubr.msk.f32.gmra.mrb[114].mxu1 %vm298_vm0, %v6135_v12  ;;  %v12214_v31 = vpack.c.bf16 %v12941_v62, %v12940_v42 }
0x1377   : > { %v12934_v54 = vpop.permute.xlu0 %12933  ;;  %v6136_v61 = vmul.f32 %v13545_v23, %v16521_v45  ;;  %v13547_v40 = vpop.eup %13546 }
0x1378   : > { %v12936_v33 = vunpack.i.h.bf16 %v12934_v54  ;;  %v12935_v22 = vunpack.i.l.bf16 %v12934_v54  ;;  %v12944_v10 = vpop.permute.xlu1 %12943  ;;  %v6139_v13 = vmul.f32 %v13547_v40, %v16493_v8 }
0x1379   : > { %11380 = vmatprep.mubr.msk.f32.mxu1 %vm298_vm0, %v6136_v61  ;;  %v12946_v63 = vunpack.i.h.bf16 %v12944_v10  ;;  %v12945_v45 = vunpack.i.l.bf16 %v12944_v10 }
0x137a   : > { %v13549_v28 = vpop.eup %13548  ;;  %11381 = vmatmul.mubr.msk.f32.gmra.mrb[116].mxu1 %vm298_vm0, %v6137_v6  ;;  %v12210_v18 = vpack.c.bf16 %v12936_v33, %v12935_v22 }
0x137b   : > { %11383 = vmatprep.mubr.msk.f32.mxu1 %vm298_vm0, %v6138_v24  ;;  %v6558_v51 = vmul.f32 %v13549_v28, %v16529_v15  ;;  %v12218_v59 = vpack.c.bf16 %v12946_v63, %v12945_v45  ;;  %v13551_v4 = vpop.eup %13550 }
0x137c   : > { %12211 = vmatprep.subr.bf16.mxu1 %v12210_v18  ;;  %v13553_v53 = vpop.eup %13552  ;;  %v6559_v25 = vmul.f32 %v13551_v4, %v16511_v58 }
0x137d   : > { %12213 = vmatpush3.bf16.msra.mxu1 %v12210_v18  ;;  %v13555_v49 = vpop.eup %13554  ;;  %v6560_v3 = vmul.f32 %v13553_v53, %v16527_v52 }
0x137e   : > { %11384 = vmatmul.mubr.msk.f32.gmra.mrb[118].mxu1 %vm298_vm0, %v6139_v13  ;;  %12215 = vmatprep.subr.bf16.mxu1 %v12214_v31  ;;  %v13557_v44 = vpop.eup %13556  ;;  %v6561_v26 = vmul.f32 %v13555_v49, %v16519_v29 }
0x137f   : > { %11430 = vmatprep.mubr.msk.f32.mxu1 %vm298_vm0, %v6558_v51  ;;  %v13559_v50 = vpop.eup %13558  ;;  %v6562_v20 = vmul.f32 %v13557_v44, %v16541_v11 }
0x1380   : > { %v6563_v58 = vmul.f32 %v13559_v50, %v16535_v17 }
0x1381   : > { %12217 = vmatpush3.bf16.msra.mxu1 %v12214_v31 }
0x1382   : > { %12219 = vmatprep.subr.bf16.mxu1 %v12218_v59 }
0x1385   : > { %12221 = vmatpush3.bf16.msra.mxu1 %v12218_v59 }
0x13a8   : > { %v6546_v19 = vpop.xlane.xlu1 %6545  ;;  %v6549_v15 = vpop.xlane.xlu0 %6548 }
0x13a9   : > { %13560 = vrcp.f32 %v6546_v19 }
0x13aa   : > { %13562 = vrcp.f32 %v6549_v15 }
0x13ac   : > { %v12949_v8 = vpop.permute.xlu1 %12948 }
0x13ad   : > { %v12951_v0 = vunpack.i.h.bf16 %v12949_v8  ;;  %v12950_v36 = vunpack.i.l.bf16 %v12949_v8 }
0x13af   : > { %v12222_v55 = vpack.c.bf16 %v12951_v0, %v12950_v36 }
0x13b1   : > { %12223 = vmatprep.subr.bf16.mxu1 %v12222_v55 }
0x13b2   : > { %12225 = vmatpush3.bf16.msra.mxu1 %v12222_v55 }
0x13b3   : > { %v13561_v27 = vpop.eup %13560 }
0x13b4   : > { %v13563_v60 = vpop.eup %13562  ;;  %v6564_v52 = vmul.f32 %v13561_v27, %v16555_v35 }
0x13b5   : > { %11431 = vmatmul.mubr.msk.f32.vlgmr.msra.gmra.mrb[112].mxu1 %vm298_vm0, %v6559_v25  ;;  %v6565_v43 = vmul.f32 %v13563_v60, %v16553_v1 }
0x13b6   : > { %11433 = vmatprep.mubr.msk.f32.mxu1 %vm298_vm0, %v6560_v3 }
0x13b9   : > { %11434 = vmatmul.mubr.msk.f32.gmra.mrb[114].mxu1 %vm298_vm0, %v6561_v26 }
0x13ba   : > { %11436 = vmatprep.mubr.msk.f32.mxu1 %vm298_vm0, %v6562_v20 }
0x13bd   : > { %11437 = vmatmul.mubr.msk.f32.gmra.mrb[116].mxu1 %vm298_vm0, %v6563_v58 }
0x13be   : > { %11439 = vmatprep.mubr.msk.f32.mxu1 %vm298_vm0, %v6564_v52  ;;  %v13112_v52 = vld [vmem:[%s17673_s2 + $0x30] sm:$0xff]  }
0x13bf   : > { %11442 = vmatprep.subr.bf16.mxu1 %v13112_v52 }
0x13c0   : > { %11443 = vmatpush3.bf16.msra.mxu1 %v13112_v52 }
0x13c1   : > { %11440 = vmatmul.mubr.msk.f32.gmra.mrb[118].mxu1 %vm298_vm0, %v6565_v43  ;;  %v13113_v43 = vld [vmem:[%s17673_s2 + $0x38] sm:$0xff]  }
0x13c2   : > { %11444 = vmatprep.subr.bf16.mxu1 %v13113_v43 }
0x13c4   : > { %11445 = vmatpush3.bf16.msra.mxu1 %v13113_v43 }
0x1488   : > { %v11432_v29 = vpop.f32.mrb[112].mxu1 }
0x1489   : > { %v6680_v11 = vpop.f32.mrb[113].mxu1  ;;  %v6734_v57 = vsel %vm460_vm1, %v11432_v29, 0.0 }
0x148a   : > { %6735 = vadd.xlane.f32.xlu0 %v6734_v57  ;;  %v6731_v48 = vsel %vm460_vm1, %v6680_v11, 0.0 }
0x148b   : > { %6732 = vadd.xlane.f32.xlu1 %v6731_v48 }
0x148c   : > { %v11435_v17 = vpop.f32.mrb[114].mxu1 }
0x148d   : > { %v6690_v14 = vpop.f32.mrb[115].mxu1  ;;  %v6740_v35 = vsel %vm460_vm1, %v11435_v17, 0.0 }
0x148e   : > { %6741 = vadd.xlane.f32.xlu0 %v6740_v35  ;;  %v6737_v21 = vsel %vm460_vm1, %v6690_v14, 0.0 }
0x1490   : > { %v11438_v56 = vpop.f32.mrb[116].mxu1 }
0x1491   : > { %v6700_v2 = vpop.f32.mrb[117].mxu1  ;;  %v6746_v9 = vsel %vm460_vm1, %v11438_v56, 0.0 }
0x1492   : > { %6738 = vadd.xlane.f32.xlu0 %v6737_v21  ;;  %v6743_v47 = vsel %vm460_vm1, %v6700_v2, 0.0 }
0x1494   : > { %v11441_v1 = vpop.f32.mrb[118].mxu1 }
0x1495   : > { %v6710_v46 = vpop.f32.mrb[119].mxu1  ;;  %v6752_v37 = vsel %vm460_vm1, %v11441_v1, 0.0 }
0x1496   : > { %6747 = vadd.xlane.f32.xlu0 %v6746_v9  ;;  %v6749_v5 = vsel %vm460_vm1, %v6710_v46, 0.0 }
0x149a   : > { %6744 = vadd.xlane.f32.xlu0 %v6743_v47 }
0x149e   : > { %6750 = vadd.xlane.f32.xlu0 %v6749_v5 }
0x14a2   : > { %6753 = vadd.xlane.f32.xlu0 %v6752_v37 }
0x1517   : > { %v6736_v38 = vpop.xlane.xlu0 %6735 }
0x1518   : > { %v6756_v12 = vmul.f32 0.03125, %v6736_v38  ;;  %v6733_v16 = vpop.xlane.xlu1 %6732 }
0x1519   : > { %v6755_v23 = vmul.f32 0.03125, %v6733_v16 }
0x151a   : > { %v16659_v54 = vsub.f32 %v11432_v29, %v6756_v12  ;;  %v16708_v29 = vld [vmem:[%s17673_s2 + $0x20] sm:$0xff]  }
0x151b   : > { %v16661_v61 = vsub.f32 %v6680_v11, %v6755_v23  ;;  %v6742_v6 = vpop.xlane.xlu0 %6741  ;;  %v16713_v11 = vld [vmem:[%s17673_s2 + $0x28] sm:$0xff]   ;;  %11454 = vmatprep.subr.bf16.mxu1 %v16708_v29  ;;  %v9950_v12 = vld [vmem:[%s17675_s4 + $0xa0] ss:$0 sm:$0xff] }
0x151c   : > { %v6758_v62 = vmul.f32 0.03125, %v6742_v6  ;;  %v6772_v42 = vmul.f32 %v16659_v54, %v16659_v54 }
0x151d   : > { %v6771_v33 = vmul.f32 %v16661_v61, %v16661_v61 }
0x151e   : > { %v16667_v22 = vsub.f32 %v11435_v17, %v6758_v62  ;;  %v6782_v40 = vsel %vm460_vm1, %v6772_v42, 0.0  ;;  %v9951_v42 = vld [vmem:[%s17675_s4 + $0xa8] ss:$0 sm:$0xff] }
0x151f   : > { %6783 = vadd.xlane.f32.xlu1 %v6782_v40  ;;  %v6739_v10 = vpop.xlane.xlu0 %6738  ;;  %v6779_v24 = vsel %vm460_vm1, %v6771_v33, 0.0 }
0x1520   : > { %v6757_v28 = vmul.f32 0.03125, %v6739_v10  ;;  %6780 = vadd.xlane.f32.xlu0 %v6779_v24  ;;  %v6774_v18 = vmul.f32 %v16667_v22, %v16667_v22 }
0x1522   : > { %v16673_v63 = vsub.f32 %v6690_v14, %v6757_v28  ;;  %v6788_v45 = vsel %vm460_vm1, %v6774_v18, 0.0 }
0x1523   : > { %6789 = vadd.xlane.f32.xlu1 %v6788_v45  ;;  %v6748_v13 = vpop.xlane.xlu0 %6747 }
0x1524   : > { %v6760_v31 = vmul.f32 0.03125, %v6748_v13  ;;  %v6773_v51 = vmul.f32 %v16673_v63, %v16673_v63 }
0x1526   : > { %v16678_v59 = vsub.f32 %v11438_v56, %v6760_v31  ;;  %v6785_v19 = vsel %vm460_vm1, %v6773_v51, 0.0 }
0x1527   : > { %v6745_v8 = vpop.xlane.xlu0 %6744  ;;  %6786 = vadd.xlane.f32.xlu0 %v6785_v19 }
0x1528   : > { %v6759_v0 = vmul.f32 0.03125, %v6745_v8  ;;  %v6776_v36 = vmul.f32 %v16678_v59, %v16678_v59 }
0x152a   : > { %v16683_v15 = vsub.f32 %v6700_v2, %v6759_v0  ;;  %v6794_v55 = vsel %vm460_vm1, %v6776_v36, 0.0 }
0x152b   : > { %6795 = vadd.xlane.f32.xlu1 %v6794_v55  ;;  %v6751_v4 = vpop.xlane.xlu0 %6750 }
0x152c   : > { %v6761_v53 = vmul.f32 0.03125, %v6751_v4  ;;  %v6775_v25 = vmul.f32 %v16683_v15, %v16683_v15 }
0x152e   : > { %v16688_v49 = vsub.f32 %v6710_v46, %v6761_v53  ;;  %v6791_v3 = vsel %vm460_vm1, %v6775_v25, 0.0 }
0x152f   : > { %6792 = vadd.xlane.f32.xlu0 %v6791_v3  ;;  %v6754_v44 = vpop.xlane.xlu0 %6753 }
0x1530   : > { %v6762_v26 = vmul.f32 0.03125, %v6754_v44  ;;  %v6777_v50 = vmul.f32 %v16688_v49, %v16688_v49 }
0x1532   : > { %v16693_v20 = vsub.f32 %v11441_v1, %v6762_v26  ;;  %v6797_v27 = vsel %vm460_vm1, %v6777_v50, 0.0 }
0x1533   : > { %6798 = vadd.xlane.f32.xlu0 %v6797_v27 }
0x1534   : > { %v6778_v58 = vmul.f32 %v16693_v20, %v16693_v20 }
0x1536   : > { %v6800_v60 = vsel %vm460_vm1, %v6778_v58, 0.0 }
0x1537   : > { %6801 = vadd.xlane.f32.xlu1 %v6800_v60 }
0x1548   : > { %7043 = vrot.lane.b32.xlu1 %v16713_v11, %s13782_s8 }
0x1549   : > { %7041 = vrot.lane.b32.xlu0 %v16708_v29, %s13782_s8 }
0x154c   : > { %7045 = vrot.lane.b32.xlu1 %v13112_v52, %s13782_s8 }
0x154d   : > { %7047 = vrot.lane.b32.xlu0 %v13113_v43, %s13782_s8 }
0x15ac   : > { %v6784_v57 = vpop.xlane.xlu1 %6783 }
0x15ad   : > { %v6804_v48 = vmul.f32 0.03125, %v6784_v57  ;;  %v6781_v17 = vpop.xlane.xlu0 %6780 }
0x15ae   : > { %v6803_v14 = vmul.f32 0.03125, %v6781_v17 }
0x15af   : > { %v6812_v35 = vadd.f32 1e-05, %v6804_v48 }
0x15b0   : > { %v6811_v56 = vadd.f32 1e-05, %v6803_v14  ;;  %v6790_v2 = vpop.xlane.xlu1 %6789 }
0x15b1   : > { %13564 = vrsqrt.f32 %v6812_v35  ;;  %v6806_v21 = vmul.f32 0.03125, %v6790_v2 }
0x15b2   : > { %13566 = vrsqrt.f32 %v6811_v56 }
0x15b3   : > { %v6814_v1 = vadd.f32 1e-05, %v6806_v21 }
0x15b4   : > { %v6787_v46 = vpop.xlane.xlu0 %6786 }
0x15b5   : > { %13568 = vrsqrt.f32 %v6814_v1  ;;  %v6805_v9 = vmul.f32 0.03125, %v6787_v46 }
0x15b7   : > { %v6813_v47 = vadd.f32 1e-05, %v6805_v9 }
0x15b8   : > { %v6796_v5 = vpop.xlane.xlu1 %6795 }
0x15b9   : > { %13570 = vrsqrt.f32 %v6813_v47  ;;  %v6808_v37 = vmul.f32 0.03125, %v6796_v5 }
0x15bb   : > { %v13565_v38 = vpop.eup %13564  ;;  %v6816_v16 = vadd.f32 1e-05, %v6808_v37 }
0x15bc   : > { %v13567_v23 = vpop.eup %13566  ;;  %v6793_v6 = vpop.xlane.xlu0 %6792  ;;  %v6828_v62 = vmul.f32 %v13565_v38, %v16659_v54 }
0x15bd   : > { %13572 = vrsqrt.f32 %v6816_v16  ;;  %v6807_v33 = vmul.f32 0.03125, %v6793_v6  ;;  %v6827_v40 = vmul.f32 %v13567_v23, %v16661_v61  ;;  %v13757_v6 = vld [vmem:[%s17672_s1 + $0x20] ss:$8 sps:$4 sm:$0xff]  }
0x15be   : > { %v6840_v10 = vmul.f32 %v9950_v12, %v6828_v62 }
0x15bf   : > { %v13569_v24 = vpop.eup %13568  ;;  %v6815_v28 = vadd.f32 1e-05, %v6807_v33  ;;  %v6839_v18 = vmul.f32 %v9950_v12, %v6827_v40  ;;  %v13758_v40 = vld [vmem:[%s17672_s1 + $0x34] ss:$8 sps:$4 sm:$0xff]  }
0x15c0   : > { %v6830_v45 = vmul.f32 %v13569_v24, %v16667_v22  ;;  %v6799_v13 = vpop.xlane.xlu0 %6798  ;;  %v6852_v31 = vadd.f32 %v9951_v42, %v6840_v10 }
0x15c1   : > { %13574 = vrsqrt.f32 %v6815_v28  ;;  %v6809_v51 = vmul.f32 0.03125, %v6799_v13  ;;  %v6851_v19 = vadd.f32 %v9951_v42, %v6839_v18 }
0x15c2   : > { %v6842_v36 = vmul.f32 %v9950_v12, %v6830_v45  ;;  %v13759_v45 = vld [vmem:[%s17672_s1 + $0x30] ss:$8 sps:$4 sm:$0xff]  }
0x15c3   : > { %v13571_v54 = vpop.eup %13570  ;;  %v6817_v8 = vadd.f32 1e-05, %v6809_v51  ;;  %v6859_v0 = vpack.c.bf16 %v6852_v31, %v6851_v19 }
0x15c4   : > { %v6829_v55 = vmul.f32 %v13571_v54, %v16673_v63  ;;  %v6802_v4 = vpop.xlane.xlu1 %6801  ;;  %v6854_v22 = vadd.f32 %v9951_v42, %v6842_v36  ;;  %v16739_v17 = vpop.permute.xlu0 %7041 }
0x15c5   : > { %13576 = vrsqrt.f32 %v6817_v8  ;;  %v6810_v61 = vmul.f32 0.03125, %v6802_v4  ;;  %11446 = vmatprep.mubr.msk.bf16.mxu1 %vm460_vm1, %v6859_v0  ;;  %11466 = vmatprep.subr.bf16.mxu0 %v16739_v17 }
0x15c6   : > { %v6841_v53 = vmul.f32 %v9950_v12, %v6829_v55  ;;  %11467 = vmatpush3.bf16.msra.mxu0 %v16739_v17 }
0x15c7   : > { %v13573_v25 = vpop.eup %13572  ;;  %v6818_v3 = vadd.f32 1e-05, %v6810_v61 }
0x15c8   : > { %v6853_v44 = vadd.f32 %v9951_v42, %v6841_v53  ;;  %v6832_v26 = vmul.f32 %v13573_v25, %v16678_v59  ;;  %v16743_v59 = vpop.permute.xlu1 %7043 }
0x15c9   : > { %13578 = vrsqrt.f32 %v6818_v3  ;;  %11468 = vmatprep.subr.bf16.mxu0 %v16743_v59 }
0x15ca   : > { %v6860_v50 = vpack.c.bf16 %v6854_v22, %v6853_v44  ;;  %v6844_v63 = vmul.f32 %v9950_v12, %v6832_v26  ;;  %11469 = vmatpush3.bf16.msra.mxu0 %v16743_v59 }
0x15cb   : > { %v13575_v27 = vpop.eup %13574 }
0x15cc   : > { %11447 = vmatmul.mubr.msk.bf16.vlgmr.msra.gmra.mrb[120].mxu1 %vm460_vm1, %v6860_v50  ;;  %v6831_v58 = vmul.f32 %v13575_v27, %v16683_v15  ;;  %v6856_v57 = vadd.f32 %v9951_v42, %v6844_v63 }
0x15cd   : > { %11455 = vmatpush3.bf16.msra.mxu1 %v16708_v29 }
0x15ce   : > { %v6843_v60 = vmul.f32 %v9950_v12, %v6831_v58  ;;  %11456 = vmatprep.subr.bf16.mxu1 %v16713_v11 }
0x15cf   : > { %v13577_v52 = vpop.eup %13576 }
0x15d0   : > { %v6855_v43 = vadd.f32 %v9951_v42, %v6843_v60  ;;  %v6833_v48 = vmul.f32 %v13577_v52, %v16688_v49  ;;  %v16749_v49 = vpop.permute.xlu1 %7045 }
0x15d1   : > { %11457 = vmatpush3.bf16.msra.mxu1 %v16713_v11  ;;  %11470 = vmatprep.subr.bf16.mxu0 %v16749_v49 }
0x15d2   : > { %v6861_v15 = vpack.c.bf16 %v6856_v57, %v6855_v43  ;;  %v6845_v35 = vmul.f32 %v9950_v12, %v6833_v48  ;;  %11471 = vmatpush3.bf16.msra.mxu0 %v16749_v49 }
0x15d3   : > { %v13579_v29 = vpop.eup %13578 }
0x15d4   : > { %11450 = vmatprep.mubr.msk.bf16.mxu1 %vm460_vm1, %v6861_v15  ;;  %v6834_v14 = vmul.f32 %v13579_v29, %v16693_v20  ;;  %v6857_v11 = vadd.f32 %v9951_v42, %v6845_v35  ;;  %v16765_v20 = vpop.permute.xlu0 %7047 }
0x15d5   : > { %11472 = vmatprep.subr.bf16.mxu0 %v16765_v20 }
0x15d6   : > { %v6846_v56 = vmul.f32 %v9950_v12, %v6834_v14  ;;  %11473 = vmatpush3.bf16.msra.mxu0 %v16765_v20 }
0x15d8   : > { %v6858_v2 = vadd.f32 %v9951_v42, %v6846_v56 }
0x15da   : > { %v6862_v21 = vpack.c.bf16 %v6858_v2, %v6857_v11 }
0x15dc   : > { %11451 = vmatmul.mubr.msk.bf16.gmra.mrb[124].mxu1 %vm460_vm1, %v6862_v21 }
0x15dd   : > { %11458 = vmatprep.mubr.msk.bf16.mxu1 %vm460_vm1, %v15952_v41  ;;  %v13756_v41 = vld [vmem:[%s17672_s1 + $0x24] ss:$8 sps:$4 sm:$0xff]  }
0x15de   : > { %7282 = vmatprep.subr.bf16.mxu0 %v13756_v41 }
0x15e4   : > { %11459 = vmatmul.mubr.msk.bf16.vlgmr.msra.gmra.mrb[120].mxu1 %vm460_vm1, %v15984_v30 }
0x15e5   : > { %11462 = vmatprep.mubr.msk.bf16.mxu1 %vm460_vm1, %v16002_v34 }
0x15ec   : > { %11463 = vmatmul.mubr.msk.bf16.gmra.mrb[124].mxu1 %vm460_vm1, %v16017_v32 }
0x15ed   : > { %11498 = vmatprep.mubr.msk.f32.mxu1 %vm622_vm2, %v16021_v39 }
0x16b7   : > { %v11460_v30 = vpop.f32.mrb[120].mxu1 }
0x16b8   : > { %v6998_v1 = vpop.f32.mrb[121].mxu1  ;;  %v7031_v46 = vmax.f32 %v11460_v30, 0.0 }
0x16b9   : > { %v11461_v34 = vpop.f32.mrb[122].mxu1  ;;  %v7029_v47 = vmax.f32 %v6998_v1, 0.0 }
0x16ba   : > { %v7032_v9 = vmax.f32 %v11461_v34, 0.0  ;;  %v7001_v32 = vpop.f32.mrb[123].mxu1 }
0x16bb   : > { %v7030_v5 = vmax.f32 %v7001_v32, 0.0 }
0x16bc   : > { %v7038_v37 = vpack.c.bf16 %v7032_v9, %v7031_v46 }
0x16bd   : > { %v7037_v38 = vpack.c.bf16 %v7030_v5, %v7029_v47 }
0x16bf   : > { %v11464_v12 = vpop.f32.mrb[124].mxu1  ;;  %11474 = vmatprep.mubr.msk.bf16.mxu0 %vm298_vm0, %v7037_v38 }
0x16c0   : > { %v7014_v16 = vpop.f32.mrb[125].mxu1  ;;  %11475 = vmatmul.mubr.msk.bf16.vlgmr.msra.gmra.mrb[112].mxu0 %vm298_vm0, %v7038_v37  ;;  %v7035_v62 = vmax.f32 %v11464_v12, 0.0 }
0x16c1   : > { %v11465_v23 = vpop.f32.mrb[126].mxu1  ;;  %7283 = vmatpush1.bf16.msra.mxu0 %v13757_v6  ;;  %v7033_v10 = vmax.f32 %v7014_v16, 0.0 }
0x16c2   : > { %v7036_v42 = vmax.f32 %v11465_v23, 0.0  ;;  %v7017_v33 = vpop.f32.mrb[127].mxu1  ;;  %7284 = vmatprep.subr.bf16.mxu0 %v13758_v40 }
0x16c3   : > { %v7034_v24 = vmax.f32 %v7017_v33, 0.0 }
0x16c4   : > { %v7040_v28 = vpack.c.bf16 %v7036_v42, %v7035_v62 }
0x16c5   : > { %v7039_v18 = vpack.c.bf16 %v7034_v24, %v7033_v10  ;;  %7285 = vmatpush1.bf16.msra.mxu0 %v13759_v45 }
0x16c7   : > { %11478 = vmatprep.mubr.msk.bf16.mxu0 %vm298_vm0, %v7039_v18 }
0x16c8   : > { %11479 = vmatmul.mubr.msk.bf16.gmra.mrb[116].mxu0 %vm298_vm0, %v7040_v28 }
0x16c9   : > { %7314 = vmatprep.mubr.bf16.mxu0 %v17896_v7 }
0x1793   : > { %v11476_v13 = vpop.f32.mrb[112].mxu0 }
0x1794   : > { %v7099_v31 = vpop.f32.mrb[113].mxu0  ;;  %v7136_v55 = vsel %vm460_vm1, %v11476_v13, 0.0 }
0x1795   : > { %v11477_v51 = vpop.f32.mrb[114].mxu0  ;;  %v7130_v19 = vsel %vm460_vm1, %v7099_v31, 0.0 }
0x1796   : > { %7131 = vadd.xlane.f32.xlu1 %v7130_v19  ;;  %v7102_v54 = vpop.f32.mrb[115].mxu0  ;;  %v7139_v0 = vsel %vm460_vm1, %v11477_v51, 0.0 }
0x1797   : > { %v7133_v8 = vsel %vm460_vm1, %v7102_v54, 0.0 }
0x1798   : > { %7134 = vadd.xlane.f32.xlu0 %v7133_v8 }
0x179a   : > { %7140 = vadd.xlane.f32.xlu1 %v7139_v0 }
0x179b   : > { %v11480_v36 = vpop.f32.mrb[116].mxu0 }
0x179c   : > { %7137 = vadd.xlane.f32.xlu0 %v7136_v55  ;;  %v7115_v4 = vpop.f32.mrb[117].mxu0  ;;  %v7148_v22 = vsel %vm460_vm1, %v11480_v36, 0.0 }
0x179d   : > { %v11481_v61 = vpop.f32.mrb[118].mxu0  ;;  %v7142_v25 = vsel %vm460_vm1, %v7115_v4, 0.0 }
0x179e   : > { %v7118_v53 = vpop.f32.mrb[119].mxu0  ;;  %v7151_v44 = vsel %vm460_vm1, %v11481_v61, 0.0 }
0x179f   : > { %v7145_v3 = vsel %vm460_vm1, %v7118_v53, 0.0 }
0x17a0   : > { %7143 = vadd.xlane.f32.xlu0 %v7142_v25  ;;  %7146 = vadd.xlane.f32.xlu1 %v7145_v3 }
0x17a4   : > { %7149 = vadd.xlane.f32.xlu0 %v7148_v22  ;;  %7152 = vadd.xlane.f32.xlu1 %v7151_v44 }
0x1823   : > { %v7132_v26 = vpop.xlane.xlu1 %7131 }
0x1824   : > { %v7154_v50 = vmul.f32 0.03125, %v7132_v26 }
0x1825   : > { %v7135_v27 = vpop.xlane.xlu0 %7134 }
0x1826   : > { %v16794_v58 = vsub.f32 %v7099_v31, %v7154_v50  ;;  %v7155_v63 = vmul.f32 0.03125, %v7135_v27 }
0x1827   : > { %v7141_v60 = vpop.xlane.xlu1 %7140 }
0x1828   : > { %v16796_v52 = vsub.f32 %v7102_v54, %v7155_v63  ;;  %v7157_v43 = vmul.f32 0.03125, %v7141_v60  ;;  %v7170_v57 = vmul.f32 %v16794_v58, %v16794_v58  ;;  %v9968_v63 = vld [vmem:[%s17675_s4 + $0xb0] ss:$0 sm:$0xff] }
0x1829   : > { %v7138_v48 = vpop.xlane.xlu0 %7137 }
0x182a   : > { %v16800_v15 = vsub.f32 %v11477_v51, %v7157_v43  ;;  %v7156_v29 = vmul.f32 0.03125, %v7138_v48  ;;  %v7178_v14 = vsel %vm460_vm1, %v7170_v57, 0.0  ;;  %v7171_v35 = vmul.f32 %v16796_v52, %v16796_v52 }
0x182b   : > { %7179 = vadd.xlane.f32.xlu0 %v7178_v14 }
0x182c   : > { %v16805_v56 = vsub.f32 %v11476_v13, %v7156_v29  ;;  %v7181_v11 = vsel %vm460_vm1, %v7171_v35, 0.0  ;;  %v7173_v2 = vmul.f32 %v16800_v15, %v16800_v15  ;;  %v9969_v29 = vld [vmem:[%s17675_s4 + $0xb8] ss:$0 sm:$0xff] }
0x182d   : > { %v7144_v21 = vpop.xlane.xlu0 %7143  ;;  %7182 = vadd.xlane.f32.xlu1 %v7181_v11  ;;  %v7147_v41 = vpop.xlane.xlu1 %7146 }
0x182e   : > { %v7158_v30 = vmul.f32 0.03125, %v7144_v21  ;;  %v7159_v1 = vmul.f32 0.03125, %v7147_v41  ;;  %v7172_v34 = vmul.f32 %v16805_v56, %v16805_v56  ;;  %v7187_v47 = vsel %vm460_vm1, %v7173_v2, 0.0 }
0x1830   : > { %v16812_v46 = vsub.f32 %v7115_v4, %v7158_v30  ;;  %v16814_v9 = vsub.f32 %v7118_v53, %v7159_v1  ;;  %v7184_v32 = vsel %vm460_vm1, %v7172_v34, 0.0 }
0x1831   : > { %7185 = vadd.xlane.f32.xlu0 %v7184_v32  ;;  %v7150_v5 = vpop.xlane.xlu0 %7149  ;;  %7188 = vadd.xlane.f32.xlu1 %v7187_v47  ;;  %v7153_v37 = vpop.xlane.xlu1 %7152  ;;  %v17940_v32 = vld [vmem:[#allocation31_spill] sm:$0xff] }
0x1832   : > { %v7160_v38 = vmul.f32 0.03125, %v7150_v5  ;;  %v7161_v12 = vmul.f32 0.03125, %v7153_v37  ;;  %v7174_v16 = vmul.f32 %v16812_v46, %v16812_v46  ;;  %v7175_v23 = vmul.f32 %v16814_v9, %v16814_v9  ;;  %v17941_v5 = vld [vmem:[#allocation30_spill] sm:$0xff] }
0x1834   : > { %v16822_v6 = vsub.f32 %v11480_v36, %v7160_v38  ;;  %v16824_v62 = vsub.f32 %v11481_v61, %v7161_v12  ;;  %v7190_v42 = vsel %vm460_vm1, %v7174_v16, 0.0  ;;  %v7193_v33 = vsel %vm460_vm1, %v7175_v23, 0.0 }
0x1835   : > { %7191 = vadd.xlane.f32.xlu0 %v7190_v42  ;;  %7194 = vadd.xlane.f32.xlu1 %v7193_v33 }
0x1836   : > { %v7176_v40 = vmul.f32 %v16822_v6, %v16822_v6  ;;  %v7177_v10 = vmul.f32 %v16824_v62, %v16824_v62 }
0x1838   : > { %v7196_v24 = vsel %vm460_vm1, %v7176_v40, 0.0  ;;  %v7199_v28 = vsel %vm460_vm1, %v7177_v10, 0.0 }
0x1839   : > { %7197 = vadd.xlane.f32.xlu0 %v7196_v24  ;;  %7200 = vadd.xlane.f32.xlu1 %v7199_v28 }
0x18b8   : > { %v7180_v18 = vpop.xlane.xlu0 %7179 }
0x18b9   : > { %v7202_v45 = vmul.f32 0.03125, %v7180_v18 }
0x18ba   : > { %v7183_v13 = vpop.xlane.xlu1 %7182 }
0x18bb   : > { %v7210_v31 = vadd.f32 1e-05, %v7202_v45  ;;  %v7203_v51 = vmul.f32 0.03125, %v7183_v13  ;;  %v17943_v45 = vld [vmem:[#allocation39_spill] sm:$0xff] }
0x18bd   : > { %13580 = vrsqrt.f32 %v7210_v31  ;;  %v7211_v19 = vadd.f32 1e-05, %v7203_v51 }
0x18be   : > { %v7186_v54 = vpop.xlane.xlu0 %7185  ;;  %v7189_v8 = vpop.xlane.xlu1 %7188 }
0x18bf   : > { %13582 = vrsqrt.f32 %v7211_v19  ;;  %v7204_v0 = vmul.f32 0.03125, %v7186_v54  ;;  %v7205_v36 = vmul.f32 0.03125, %v7189_v8  ;;  %v17944_v8 = vld [vmem:[#allocation43_spill] sm:$0xff] }
0x18c1   : > { %v7212_v55 = vadd.f32 1e-05, %v7204_v0  ;;  %v7213_v4 = vadd.f32 1e-05, %v7205_v36 }
0x18c2   : > { %v7192_v61 = vpop.xlane.xlu0 %7191  ;;  %v7195_v53 = vpop.xlane.xlu1 %7194 }
0x18c3   : > { %13584 = vrsqrt.f32 %v7212_v55  ;;  %v7206_v25 = vmul.f32 0.03125, %v7192_v61  ;;  %v7207_v3 = vmul.f32 0.03125, %v7195_v53  ;;  %v17945_v55 = vld [vmem:[#allocation45_spill] sm:$0xff] }
0x18c4   : > { %13586 = vrsqrt.f32 %v7213_v4 }
0x18c5   : > { %v7214_v22 = vadd.f32 1e-05, %v7206_v25  ;;  %v7215_v44 = vadd.f32 1e-05, %v7207_v3 }
0x18c6   : > { %v7198_v26 = vpop.xlane.xlu0 %7197  ;;  %v7201_v50 = vpop.xlane.xlu1 %7200 }
0x18c7   : > { %v13581_v27 = vpop.eup %13580  ;;  %13588 = vrsqrt.f32 %v7214_v22  ;;  %v7208_v60 = vmul.f32 0.03125, %v7198_v26  ;;  %v7209_v43 = vmul.f32 0.03125, %v7201_v50  ;;  %v17947_v22 = vld [vmem:[#allocation44_spill] sm:$0xff] }
0x18c8   : > { %v7226_v57 = vmul.f32 %v13581_v27, %v16794_v58  ;;  %13590 = vrsqrt.f32 %v7215_v44 }
0x18c9   : > { %v13583_v48 = vpop.eup %13582  ;;  %v7216_v14 = vadd.f32 1e-05, %v7208_v60  ;;  %v7217_v35 = vadd.f32 1e-05, %v7209_v43 }
0x18ca   : > { %v7238_v11 = vmul.f32 %v9968_v63, %v7226_v57  ;;  %v7227_v2 = vmul.f32 %v13583_v48, %v16796_v52 }
0x18cb   : > { %13592 = vrsqrt.f32 %v7216_v14 }
0x18cc   : > { %v7250_v21 = vadd.f32 %v9969_v29, %v7238_v11  ;;  %v7239_v41 = vmul.f32 %v9968_v63, %v7227_v2  ;;  %13594 = vrsqrt.f32 %v7217_v35 }
0x18cd   : > { %v13585_v30 = vpop.eup %13584 }
0x18ce   : > { %v13587_v58 = vpop.eup %13586  ;;  %v7251_v1 = vadd.f32 %v9969_v29, %v7239_v41  ;;  %v7228_v34 = vmul.f32 %v13585_v30, %v16805_v56  ;;  %v7258_v47 = vadd.f32 %v7250_v21, %v17940_v32 }
0x18cf   : > { %v7229_v52 = vmul.f32 %v13587_v58, %v16800_v15  ;;  %v17942_v15 = vld [vmem:[#allocation42_spill] sm:$0xff] }
0x18d0   : > { %v7259_v37 = vadd.f32 %v7251_v1, %v17941_v5  ;;  %9502 = vst.msk [vmem:[%s16847_s25] sm:$0xff] %vm460_vm1, %v7258_v47  ;;  %v7240_v38 = vmul.f32 %v9968_v63, %v7228_v34 }
0x18d1   : > { %v13589_v12 = vpop.eup %13588  ;;  %v7241_v16 = vmul.f32 %v9968_v63, %v7229_v52 }
0x18d2   : > { %v13591_v23 = vpop.eup %13590  ;;  %v7230_v42 = vmul.f32 %v13589_v12, %v16812_v46  ;;  %v7266_v33 = vpack.c.bf16 %v7259_v37, %v7258_v47  ;;  %9503 = vst.msk [vmem:[%s16847_s25 + $0x8] sm:$0xff] %vm460_vm1, %v7259_v37  ;;  %v7252_v56 = vadd.f32 %v9969_v29, %v7240_v38 }
0x18d3   : > { %v7231_v40 = vmul.f32 %v13591_v23, %v16814_v9  ;;  %v7253_v10 = vadd.f32 %v9969_v29, %v7241_v16 }
0x18d4   : > { %9970 = vmatmul.mubr.msk.bf16.vlgmr.msra.gmra.mrb[120].mxu0 %vm460_vm1, %v7266_v33  ;;  %v7260_v24 = vadd.f32 %v7252_v56, %v17942_v15  ;;  %v7242_v28 = vmul.f32 %v9968_v63, %v7230_v42  ;;  %v17948_v33 = vld [vmem:[#allocation41_spill] sm:$0xff]  ;;  %v17952_v15 = vld [vmem:[#allocation50_spill] sm:$0xff] }
0x18d5   : > { %v13593_v18 = vpop.eup %13592  ;;  %7324 = vmatprep.mubr.bf16.mxu0 %v17896_v7  ;;  %v7261_v13 = vadd.f32 %v7253_v10, %v17943_v45  ;;  %v7243_v46 = vmul.f32 %v9968_v63, %v7231_v40  ;;  %v17949_v56 = vld [vmem:[#allocation53_spill] sm:$0xff]  ;;  %v17950_v40 = vld [vmem:[#allocation48_spill] sm:$0xff]  ;;  %v17951_v10 = vld [vmem:[#allocation47_spill] sm:$0xff] }
0x18d6   : > { %v13595_v31 = vpop.eup %13594  ;;  %v7232_v51 = vmul.f32 %v13593_v18, %v16822_v6  ;;  %9504 = vst.msk [vmem:[%s16847_s25 + $0x10] sm:$0xff] %vm460_vm1, %v7260_v24  ;;  %v7254_v9 = vadd.f32 %v9969_v29, %v7242_v28  ;;  %v17954_v28 = vld [vmem:[#allocation51_spill] sm:$0xff] }
0x18d7   : > { %v7233_v19 = vmul.f32 %v13595_v31, %v16824_v62  ;;  %9505 = vst.msk [vmem:[%s16847_s25 + $0x18] sm:$0xff] %vm460_vm1, %v7261_v13  ;;  %v7255_v54 = vadd.f32 %v9969_v29, %v7243_v46  ;;  %v7267_v53 = vpack.c.bf16 %v7261_v13, %v7260_v24  ;;  %v17946_v62 = vld [vmem:[#allocation46_spill] sm:$0xff]  ;;  %v17953_v24 = vld [vmem:[#allocation49_spill] sm:$0xff] }
0x18d8   : > { %v7262_v0 = vadd.f32 %v7254_v9, %v17944_v8  ;;  %v7244_v36 = vmul.f32 %v9968_v63, %v7232_v51 }
0x18d9   : > { %v7263_v4 = vadd.f32 %v7255_v54, %v17945_v55  ;;  %v7245_v61 = vmul.f32 %v9968_v63, %v7233_v19 }
0x18da   : > { %9506 = vst.msk [vmem:[%s16847_s25 + $0x20] sm:$0xff] %vm460_vm1, %v7262_v0  ;;  %v7256_v6 = vadd.f32 %v9969_v29, %v7244_v36 }
0x18db   : > { %9507 = vst.msk [vmem:[%s16847_s25 + $0x28] sm:$0xff] %vm460_vm1, %v7263_v4  ;;  %v7257_v25 = vadd.f32 %v9969_v29, %v7245_v61  ;;  %v7268_v26 = vpack.c.bf16 %v7263_v4, %v7262_v0 }
0x18dc   : > { %9971 = vmatmul.mubr.msk.bf16.gmra.mrb[124].mxu0 %vm460_vm1, %v7267_v53  ;;  %v7264_v3 = vadd.f32 %v7256_v6, %v17946_v62 }
0x18dd   : > { %7334 = vmatprep.mubr.bf16.mxu0 %v17896_v7  ;;  %v7265_v44 = vadd.f32 %v7257_v25, %v17947_v22 }
0x18de   : > { %9508 = vst.msk [vmem:[%s16847_s25 + $0x30] sm:$0xff] %vm460_vm1, %v7264_v3 }
0x18df   : > { %9509 = vst.msk [vmem:[%s16847_s25 + $0x38] sm:$0xff] %vm460_vm1, %v7265_v44  ;;  %v7269_v50 = vpack.c.bf16 %v7265_v44, %v7264_v3 }
0x18e4   : > { %9972 = vmatmul.mubr.msk.bf16.gmra.mrb[128].mxu0 %vm460_vm1, %v7268_v26 }
0x18e5   : > { %7344 = vmatprep.mubr.bf16.mxu0 %v17896_v7 }
0x18ec   : > { %9973 = vmatmul.mubr.msk.bf16.gmra.mrb[132].mxu0 %vm460_vm1, %v7269_v50 }
0x19a7   : > { %v7316_v27 = vpop.f32.mrb[120].mxu0 }
0x19a8   : > { %v7318_v63 = vpop.f32.mrb[121].mxu0 }
0x19a9   : > { %v7320_v60 = vpop.f32.mrb[122].mxu0 }
0x19aa   : > { %v16886_v43 = vpack.i.bf16 %v7320_v60, %v7316_v27  ;;  %v7322_v57 = vpop.f32.mrb[123].mxu0  ;;  %v16888_v48 = vpack.c.bf16 %v7320_v60, %v7316_v27 }
0x19ab   : > { %v13012_v29 = vpack.i.bf16 %v7322_v57, %v7318_v63 }
0x19ad   : > { %12953 = vrot.lane.b32.xlu0 %v13012_v29, %s13778_s29 }
0x19af   : > { %v7326_v14 = vpop.f32.mrb[124].mxu0 }
0x19b0   : > { %v7328_v35 = vpop.f32.mrb[125].mxu0 }
0x19b1   : > { %v7330_v11 = vpop.f32.mrb[126].mxu0 }
0x19b2   : > { %v16891_v2 = vpack.i.bf16 %v7330_v11, %v7326_v14  ;;  %v7332_v7 = vpop.f32.mrb[127].mxu0  ;;  %v16893_v21 = vpack.c.bf16 %v7330_v11, %v7326_v14 }
0x19b3   : > { %v13017_v41 = vpack.i.bf16 %v7332_v7, %v7328_v35 }
0x19b5   : > { %12958 = vrot.lane.b32.xlu1 %v13017_v41, %s13778_s29 }
0x19b7   : > { %v7336_v30 = vpop.f32.mrb[128].mxu0 }
0x19b8   : > { %v7338_v58 = vpop.f32.mrb[129].mxu0 }
0x19b9   : > { %v7340_v1 = vpop.f32.mrb[130].mxu0 }
0x19ba   : > { %v16896_v34 = vpack.i.bf16 %v7340_v1, %v7336_v30  ;;  %v7342_v32 = vpop.f32.mrb[131].mxu0  ;;  %v16898_v47 = vpack.c.bf16 %v7340_v1, %v7336_v30 }
0x19bb   : > { %v13022_v52 = vpack.i.bf16 %v7342_v32, %v7338_v58 }
0x19bd   : > { %12963 = vrot.lane.b32.xlu1 %v13022_v52, %s13778_s29 }
0x19bf   : > { %v7346_v5 = vpop.f32.mrb[132].mxu0 }
0x19c0   : > { %v7348_v37 = vpop.f32.mrb[133].mxu0 }
0x19c1   : > { %12973 = vrot.lane.b32.xlu1 %v13012_v29, %s13777_s28  ;;  %v7350_v38 = vpop.f32.mrb[134].mxu0 }
0x19c2   : > { %v16902_v12 = vpack.i.bf16 %v7350_v38, %v7346_v5  ;;  %v7352_v16 = vpop.f32.mrb[135].mxu0  ;;  %v16904_v23 = vpack.c.bf16 %v7350_v38, %v7346_v5 }
0x19c3   : > { %v13027_v42 = vpack.i.bf16 %v7352_v16, %v7348_v37 }
0x19c5   : > { %7612 = vrot.lane.b32.xlu1 %v16021_v39, %s13779_s30  ;;  %12968 = vrot.lane.b32.xlu0 %v13027_v42, %s13778_s29 }
0x19c9   : > { %12983 = vrot.lane.b32.xlu1 %v13017_v41, %s13777_s28  ;;  %12978 = vrot.lane.b32.xlu0 %v13012_v29, %s13780_s6 }
0x19cd   : > { %12993 = vrot.lane.b32.xlu1 %v13022_v52, %s13777_s28  ;;  %7614 = vrot.lane.b32.xlu0 %v17948_v33, %s13779_s30 }
0x19d1   : > { %7616 = vrot.lane.b32.xlu1 %v17949_v56, %s13779_s30  ;;  %12988 = vrot.lane.b32.xlu0 %v13017_v41, %s13780_s6 }
0x19d5   : > { %7620 = vrot.lane.b32.xlu1 %v17950_v40, %s13779_s30  ;;  %12998 = vrot.lane.b32.xlu0 %v13022_v52, %s13780_s6 }
0x19d9   : > { %13003 = vrot.lane.b32.xlu1 %v13027_v42, %s13777_s28  ;;  %7618 = vrot.lane.b32.xlu0 %v17951_v10, %s13779_s30 }
0x19dd   : > { %7624 = vrot.lane.b32.xlu1 %v17952_v15, %s13779_s30  ;;  %13008 = vrot.lane.b32.xlu0 %v13027_v42, %s13780_s6 }
0x19e1   : > { %13013 = vrot.lane.b32.xlu1 %v13012_v29, %s13783_s9  ;;  %7622 = vrot.lane.b32.xlu0 %v17953_v24, %s13779_s30 }
0x19e5   : > { %8169 = vrot.lane.b32.xlu1 %v17948_v33, %s13781_s7  ;;  %7626 = vrot.lane.b32.xlu0 %v17954_v28, %s13779_s30 }
0x19e9   : > { %13023 = vrot.lane.b32.xlu1 %v13022_v52, %s13783_s9  ;;  %8167 = vrot.lane.b32.xlu0 %v16021_v39, %s13781_s7 }
0x19ed   : > { %8173 = vrot.lane.b32.xlu1 %v17951_v10, %s13781_s7  ;;  %13018 = vrot.lane.b32.xlu0 %v13017_v41, %s13783_s9 }
0x19f1   : > { %8175 = vrot.lane.b32.xlu1 %v17950_v40, %s13781_s7  ;;  %8171 = vrot.lane.b32.xlu0 %v17949_v56, %s13781_s7 }
0x19f5   : > { %8179 = vrot.lane.b32.xlu1 %v17952_v15, %s13781_s7  ;;  %13028 = vrot.lane.b32.xlu0 %v13027_v42, %s13783_s9 }
0x19f9   : > { %8593 = vrot.lane.b32.xlu1 %v16021_v39, %s13784_s10  ;;  %8177 = vrot.lane.b32.xlu0 %v17953_v24, %s13781_s7 }
0x19fd   : > { %8597 = vrot.lane.b32.xlu1 %v17949_v56, %s13784_s10  ;;  %8181 = vrot.lane.b32.xlu0 %v17954_v28, %s13781_s7 }
0x1a01   : > { %8601 = vrot.lane.b32.xlu1 %v17950_v40, %s13784_s10  ;;  %8595 = vrot.lane.b32.xlu0 %v17948_v33, %s13784_s10 }
0x1a05   : > { %8605 = vrot.lane.b32.xlu1 %v17952_v15, %s13784_s10  ;;  %8599 = vrot.lane.b32.xlu0 %v17951_v10, %s13784_s10 }
0x1a09   : > { %13038 = vrot.lane.b32.xlu1 %v16891_v2, %s13777_s28  ;;  %8603 = vrot.lane.b32.xlu0 %v17953_v24, %s13784_s10 }
0x1a0d   : > { %13048 = vrot.lane.b32.xlu1 %v16902_v12, %s13777_s28  ;;  %8607 = vrot.lane.b32.xlu0 %v17954_v28, %s13784_s10 }
0x1a11   : > { %13058 = vrot.lane.b32.xlu1 %v16891_v2, %s13782_s8  ;;  %13033 = vrot.lane.b32.xlu0 %v16886_v43, %s13777_s28 }
0x1a15   : > { %13068 = vrot.lane.b32.xlu1 %v16902_v12, %s13782_s8  ;;  %13043 = vrot.lane.b32.xlu0 %v16896_v34, %s13777_s28 }
0x1a19   : > { %13053 = vrot.lane.b32.xlu0 %v16886_v43, %s13782_s8 }
0x1a1d   : > { %13063 = vrot.lane.b32.xlu0 %v16896_v34, %s13782_s8 }
0x1a1f   : > { %v12954_v39 = vpop.permute.xlu0 %12953 }
0x1a20   : > { %v12956_v18 = vunpack.i.h.bf16 %v12954_v39  ;;  %v12955_v45 = vunpack.i.l.bf16 %v12954_v39 }
0x1a22   : > { %v12250_v13 = vpack.c.bf16 %v12956_v18, %v12955_v45 }
0x1a24   : > { %12252 = vmatprep.subr.msk.bf16.mxu0 %vm14218_vm3, %v12250_v13 }
0x1a25   : > { %12255 = vmatpush3.bf16.xpose.msk.msra.mxu0 %vm14218_vm3, %v12250_v13 }
0x1a27   : > { %v12959_v31 = vpop.permute.xlu1 %12958 }
0x1a28   : > { %v12961_v51 = vunpack.i.h.bf16 %v12959_v31  ;;  %v12960_v9 = vunpack.i.l.bf16 %v12959_v31 }
0x1a2a   : > { %v12256_v19 = vpack.c.bf16 %v12961_v51, %v12960_v9 }
0x1a2c   : > { %12258 = vmatprep.subr.msk.bf16.mxu0 %vm14218_vm3, %v12256_v19 }
0x1a2d   : > { %12261 = vmatpush3.bf16.xpose.msk.msra.mxu0 %vm14218_vm3, %v12256_v19 }
0x1a2f   : > { %v12964_v54 = vpop.permute.xlu1 %12963 }
0x1a30   : > { %v12966_v8 = vunpack.i.h.bf16 %v12964_v54  ;;  %v12965_v0 = vunpack.i.l.bf16 %v12964_v54 }
0x1a32   : > { %v12262_v36 = vpack.c.bf16 %v12966_v8, %v12965_v0 }
0x1a33   : > { %v12974_v55 = vpop.permute.xlu1 %12973 }
0x1a34   : > { %v12976_v4 = vunpack.i.h.bf16 %v12974_v55  ;;  %v12975_v61 = vunpack.i.l.bf16 %v12974_v55  ;;  %12264 = vmatprep.subr.msk.bf16.mxu0 %vm14218_vm3, %v12262_v36 }
0x1a35   : > { %12267 = vmatpush3.bf16.xpose.msk.msra.mxu0 %vm14218_vm3, %v12262_v36 }
0x1a36   : > { %v12226_v53 = vpack.c.bf16 %v12976_v4, %v12975_v61 }
0x1a37   : > { %v12969_v6 = vpop.permute.xlu0 %12968  ;;  %v7613_v25 = vpop.permute.xlu1 %7612 }
0x1a38   : > { %v12971_v62 = vunpack.i.h.bf16 %v12969_v6  ;;  %v12970_v3 = vunpack.i.l.bf16 %v12969_v6  ;;  %12228 = vmatprep.subr.msk.bf16.mxu1 %vm14218_vm3, %v12226_v53  ;;  %11526 = vmatprep.mubr.msk.f32.mxu0 %vm622_vm2, %v7613_v25 }
0x1a39   : > { %12231 = vmatpush3.bf16.xpose.msk.msra.mxu1 %vm14218_vm3, %v12226_v53 }
0x1a3a   : > { %v12268_v22 = vpack.c.bf16 %v12971_v62, %v12970_v3 }
0x1a3b   : > { %v12979_v44 = vpop.permute.xlu0 %12978  ;;  %v12984_v26 = vpop.permute.xlu1 %12983 }
0x1a3c   : > { %v12981_v50 = vunpack.i.h.bf16 %v12979_v44  ;;  %v12980_v27 = vunpack.i.l.bf16 %v12979_v44  ;;  %v12986_v63 = vunpack.i.h.bf16 %v12984_v26  ;;  %v12985_v60 = vunpack.i.l.bf16 %v12984_v26  ;;  %12270 = vmatprep.subr.msk.bf16.mxu0 %vm14218_vm3, %v12268_v22 }
0x1a3d   : > { %12273 = vmatpush3.bf16.xpose.msk.msra.mxu0 %vm14218_vm3, %v12268_v22 }
0x1a3e   : > { %v12306_v57 = vpack.c.bf16 %v12981_v50, %v12980_v27  ;;  %v12232_v29 = vpack.c.bf16 %v12986_v63, %v12985_v60 }
0x1a3f   : > { %v7615_v14 = vpop.permute.xlu0 %7614  ;;  %v12994_v35 = vpop.permute.xlu1 %12993 }
0x1a40   : > { %v12996_v11 = vunpack.i.h.bf16 %v12994_v35  ;;  %v12995_v7 = vunpack.i.l.bf16 %v12994_v35  ;;  %12234 = vmatprep.subr.msk.bf16.mxu1 %vm14218_vm3, %v12232_v29  ;;  %12308 = vmatprep.subr.msk.bf16.mxu0 %vm14218_vm3, %v12306_v57 }
0x1a41   : > { %12237 = vmatpush3.bf16.xpose.msk.msra.mxu1 %vm14218_vm3, %v12232_v29 }
0x1a42   : > { %v12238_v41 = vpack.c.bf16 %v12996_v11, %v12995_v7 }
0x1a43   : > { %v12989_v30 = vpop.permute.xlu0 %12988  ;;  %v7617_v58 = vpop.permute.xlu1 %7616 }
0x1a44   : > { %v12991_v1 = vunpack.i.h.bf16 %v12989_v30  ;;  %v12990_v32 = vunpack.i.l.bf16 %v12989_v30  ;;  %12240 = vmatprep.subr.msk.bf16.mxu1 %vm14218_vm3, %v12238_v41  ;;  %11527 = vmatmul.mubr.msk.f32.vlgmr.msra.gmra.mrb[136].mxu0 %vm622_vm2, %v7615_v14 }
0x1a45   : > { %11529 = vmatprep.mubr.msk.f32.mxu0 %vm622_vm2, %v7617_v58  ;;  %12311 = vmatpush3.bf16.xpose.msk.msra.mxu0 %vm14218_vm3, %v12306_v57 }
0x1a46   : > { %v12312_v52 = vpack.c.bf16 %v12991_v1, %v12990_v32 }
0x1a47   : > { %v12999_v5 = vpop.permute.xlu0 %12998  ;;  %v7621_v37 = vpop.permute.xlu1 %7620 }
0x1a48   : > { %v13001_v38 = vunpack.i.h.bf16 %v12999_v5  ;;  %v13000_v16 = vunpack.i.l.bf16 %v12999_v5  ;;  %12314 = vmatprep.subr.msk.bf16.mxu0 %vm14218_vm3, %v12312_v52 }
0x1a49   : > { %12243 = vmatpush3.bf16.xpose.msk.msra.mxu1 %vm14218_vm3, %v12238_v41 }
0x1a4a   : > { %v12318_v18 = vpack.c.bf16 %v13001_v38, %v13000_v16 }
0x1a4b   : > { %v7619_v42 = vpop.permute.xlu0 %7618  ;;  %v13004_v39 = vpop.permute.xlu1 %13003 }
0x1a4c   : > { %v13006_v45 = vunpack.i.h.bf16 %v13004_v39  ;;  %v13005_v13 = vunpack.i.l.bf16 %v13004_v39  ;;  %11530 = vmatmul.mubr.msk.f32.gmra.mrb[138].mxu0 %vm622_vm2, %v7619_v42 }
0x1a4d   : > { %11532 = vmatprep.mubr.msk.f32.mxu0 %vm622_vm2, %v7621_v37  ;;  %12317 = vmatpush3.bf16.xpose.msk.msra.mxu0 %vm14218_vm3, %v12312_v52 }
0x1a4e   : > { %v12244_v31 = vpack.c.bf16 %v13006_v45, %v13005_v13  ;;  %12320 = vmatprep.subr.msk.bf16.mxu0 %vm14218_vm3, %v12318_v18 }
0x1a4f   : > { %v13009_v51 = vpop.permute.xlu0 %13008  ;;  %v7625_v9 = vpop.permute.xlu1 %7624 }
0x1a50   : > { %v13011_v19 = vunpack.i.h.bf16 %v13009_v51  ;;  %v13010_v54 = vunpack.i.l.bf16 %v13009_v51  ;;  %12246 = vmatprep.subr.msk.bf16.mxu1 %vm14218_vm3, %v12244_v31 }
0x1a51   : > { %12249 = vmatpush3.bf16.xpose.msk.msra.mxu1 %vm14218_vm3, %v12244_v31 }
0x1a52   : > { %v12324_v36 = vpack.c.bf16 %v13011_v19, %v13010_v54 }
0x1a53   : > { %v7623_v8 = vpop.permute.xlu0 %7622  ;;  %v13014_v0 = vpop.permute.xlu1 %13013 }
0x1a54   : > { %11533 = vmatmul.mubr.msk.f32.gmra.mrb[140].mxu0 %vm622_vm2, %v7623_v8  ;;  %v13016_v61 = vunpack.i.h.bf16 %v13014_v0  ;;  %v13015_v53 = vunpack.i.l.bf16 %v13014_v0 }
0x1a55   : > { %11535 = vmatprep.mubr.msk.f32.mxu0 %vm622_vm2, %v7625_v9  ;;  %12323 = vmatpush3.bf16.xpose.msk.msra.mxu0 %vm14218_vm3, %v12318_v18 }
0x1a56   : > { %12326 = vmatprep.subr.msk.bf16.mxu0 %vm14218_vm3, %v12324_v36  ;;  %v12346_v62 = vpack.c.bf16 %v13016_v61, %v13015_v53 }
0x1a57   : > { %v7627_v55 = vpop.permute.xlu0 %7626  ;;  %v8170_v4 = vpop.permute.xlu1 %8169 }
0x1a58   : > { %11499 = vmatmul.mubr.msk.f32.vlgmr.msra.gmra.mrb[128].mxu1 %vm622_vm2, %v17948_v33  ;;  %11536 = vmatmul.mubr.msk.f32.gmra.mrb[142].mxu0 %vm622_vm2, %v7627_v55 }
0x1a59   : > { %11501 = vmatprep.mubr.msk.f32.mxu1 %vm622_vm2, %v17949_v56 }
0x1a5b   : > { %v8168_v6 = vpop.permute.xlu0 %8167  ;;  %v13024_v25 = vpop.permute.xlu1 %13023 }
0x1a5c   : > { %11502 = vmatmul.mubr.msk.f32.gmra.mrb[130].mxu1 %vm622_vm2, %v17951_v10  ;;  %11610 = vmatprep.mubr.msk.f32.mxu0 %vm622_vm2, %v8168_v6  ;;  %v13026_v50 = vunpack.i.h.bf16 %v13024_v25 }
0x1a5d   : > { %11504 = vmatprep.mubr.msk.f32.mxu1 %vm622_vm2, %v17950_v40  ;;  %12329 = vmatpush3.bf16.xpose.msk.msra.mxu0 %vm14218_vm3, %v12324_v36 }
0x1a5e   : > { %12348 = vmatprep.subr.msk.bf16.mxu0 %vm14218_vm3, %v12346_v62 }
0x1a5f   : > { %v13019_v33 = vpop.permute.xlu0 %13018  ;;  %v8174_v3 = vpop.permute.xlu1 %8173 }
0x1a60   : > { %v13021_v56 = vunpack.i.h.bf16 %v13019_v33  ;;  %v13020_v22 = vunpack.i.l.bf16 %v13019_v33  ;;  %11505 = vmatmul.mubr.msk.f32.gmra.mrb[132].mxu1 %vm622_vm2, %v17953_v24 }
0x1a61   : > { %11507 = vmatprep.mubr.msk.f32.mxu1 %vm622_vm2, %v17952_v15  ;;  %v13025_v15 = vunpack.i.l.bf16 %v13024_v25 }
0x1a62   : > { %v12352_v26 = vpack.c.bf16 %v13021_v56, %v13020_v22 }
0x1a63   : > { %v8172_v10 = vpop.permute.xlu0 %8171  ;;  %v8176_v44 = vpop.permute.xlu1 %8175  ;;  %v12358_v63 = vpack.c.bf16 %v13026_v50, %v13025_v15 }
0x1a64   : > { %11508 = vmatmul.mubr.msk.f32.gmra.mrb[134].mxu1 %vm622_vm2, %v17954_v28  ;;  %11611 = vmatmul.mubr.msk.f32.vlgmr.msra.gmra.mrb[144].mxu0 %vm622_vm2, %v8170_v4 }
0x1a65   : > { %11613 = vmatprep.mubr.msk.f32.mxu0 %vm622_vm2, %v8172_v10  ;;  %12351 = vmatpush3.bf16.xpose.msk.msra.mxu0 %vm14218_vm3, %v12346_v62 }
0x1a66   : > { %12354 = vmatprep.subr.msk.bf16.mxu0 %vm14218_vm3, %v12352_v26 }
0x1a67   : > { %v13029_v40 = vpop.permute.xlu0 %13028  ;;  %v8180_v24 = vpop.permute.xlu1 %8179 }
0x1a68   : > { %11614 = vmatmul.mubr.msk.f32.gmra.mrb[146].mxu0 %vm622_vm2, %v8174_v3  ;;  %v13031_v29 = vunpack.i.h.bf16 %v13029_v40  ;;  %v13030_v14 = vunpack.i.l.bf16 %v13029_v40 }
0x1a69   : > { %11616 = vmatprep.mubr.msk.f32.mxu0 %vm622_vm2, %v8176_v44 }
0x1a6a   : > { %v12364_v11 = vpack.c.bf16 %v13031_v29, %v13030_v14 }
0x1a6b   : > { %v8178_v27 = vpop.permute.xlu0 %8177  ;;  %v8594_v28 = vpop.permute.xlu1 %8593 }
0x1a6c   : > { %11617 = vmatmul.mubr.msk.f32.gmra.mrb[148].mxu0 %vm622_vm2, %v8178_v27 }
0x1a6d   : > { %11619 = vmatprep.mubr.msk.f32.mxu0 %vm622_vm2, %v8180_v24  ;;  %12357 = vmatpush3.bf16.xpose.msk.msra.mxu0 %vm14218_vm3, %v12352_v26 }
0x1a6e   : > { %12360 = vmatprep.subr.msk.bf16.mxu0 %vm14218_vm3, %v12358_v63 }
0x1a6f   : > { %v8182_v60 = vpop.permute.xlu0 %8181  ;;  %v8598_v57 = vpop.permute.xlu1 %8597 }
0x1a70   : > { %11620 = vmatmul.mubr.msk.f32.gmra.mrb[150].mxu0 %vm622_vm2, %v8182_v60 }
0x1a71   : > { %11666 = vmatprep.mubr.msk.f32.mxu0 %vm622_vm2, %v8594_v28 }
0x1a73   : > { %v8596_v35 = vpop.permute.xlu0 %8595  ;;  %v8602_v7 = vpop.permute.xlu1 %8601 }
0x1a75   : > { %12363 = vmatpush3.bf16.xpose.msk.msra.mxu0 %vm14218_vm3, %v12358_v63 }
0x1a76   : > { %12366 = vmatprep.subr.msk.bf16.mxu0 %vm14218_vm3, %v12364_v11 }
0x1a77   : > { %v8600_v41 = vpop.permute.xlu0 %8599  ;;  %v8606_v30 = vpop.permute.xlu1 %8605 }
0x1a7b   : > { %v8604_v58 = vpop.permute.xlu0 %8603  ;;  %v13039_v32 = vpop.permute.xlu1 %13038 }
0x1a7c   : > { %v13041_v5 = vunpack.i.h.bf16 %v13039_v32  ;;  %v13040_v37 = vunpack.i.l.bf16 %v13039_v32 }
0x1a7d   : > { %12369 = vmatpush3.bf16.xpose.msk.msra.mxu0 %vm14218_vm3, %v12364_v11 }
0x1a7e   : > { %11730 = vmatprep.subr.bf16.mxu0 %v16739_v17  ;;  %v12278_v45 = vpack.c.bf16 %v13041_v5, %v13040_v37 }
0x1a7f   : > { %v8608_v1 = vpop.permute.xlu0 %8607  ;;  %v13049_v13 = vpop.permute.xlu1 %13048 }
0x1a80   : > { %v13050_v31 = vunpack.i.l.bf16 %v13049_v13 }
0x1a83   : > { %v13034_v52 = vpop.permute.xlu0 %13033 }
0x1a84   : > { %v13036_v38 = vunpack.i.h.bf16 %v13034_v52  ;;  %v13035_v16 = vunpack.i.l.bf16 %v13034_v52  ;;  %11667 = vmatmul.mubr.msk.f32.vlgmr.msra.gmra.mrb[152].mxu0 %vm622_vm2, %v8596_v35 }
0x1a85   : > { %11669 = vmatprep.mubr.msk.f32.mxu0 %vm622_vm2, %v8598_v57  ;;  %11731 = vmatpush3.bf16.msra.mxu0 %v16739_v17  ;;  %v13051_v17 = vunpack.i.h.bf16 %v13049_v13 }
0x1a86   : > { %11732 = vmatprep.subr.bf16.mxu0 %v16743_v59  ;;  %v12274_v42 = vpack.c.bf16 %v13036_v38, %v13035_v16 }
0x1a87   : > { %v13044_v46 = vpop.permute.xlu0 %13043  ;;  %v12286_v9 = vpack.c.bf16 %v13051_v17, %v13050_v31 }
0x1a88   : > { %v13046_v39 = vunpack.i.h.bf16 %v13044_v46  ;;  %v13045_v18 = vunpack.i.l.bf16 %v13044_v46  ;;  %12275 = vmatprep.subr.bf16.mxu1 %v12274_v42  ;;  %11670 = vmatmul.mubr.msk.f32.gmra.mrb[154].mxu0 %vm622_vm2, %v8600_v41 }
0x1a89   : > { %12277 = vmatpush3.bf16.msra.mxu1 %v12274_v42  ;;  %11672 = vmatprep.mubr.msk.f32.mxu0 %vm622_vm2, %v8602_v7 }
0x1a8a   : > { %11733 = vmatpush3.bf16.msra.mxu0 %v16743_v59  ;;  %12279 = vmatprep.subr.bf16.mxu1 %v12278_v45  ;;  %v12282_v51 = vpack.c.bf16 %v13046_v39, %v13045_v18 }
0x1a8b   : > { %11734 = vmatprep.subr.bf16.mxu0 %v16749_v49 }
0x1a8c   : > { %11673 = vmatmul.mubr.msk.f32.gmra.mrb[156].mxu0 %vm622_vm2, %v8604_v58 }
0x1a8d   : > { %12281 = vmatpush3.bf16.msra.mxu1 %v12278_v45  ;;  %11675 = vmatprep.mubr.msk.f32.mxu0 %vm622_vm2, %v8606_v30 }
0x1a8e   : > { %11735 = vmatpush3.bf16.msra.mxu0 %v16749_v49  ;;  %12283 = vmatprep.subr.bf16.mxu1 %v12282_v51 }
0x1a8f   : > { %11736 = vmatprep.subr.bf16.mxu0 %v16765_v20 }
0x1a90   : > { %11676 = vmatmul.mubr.msk.f32.gmra.mrb[158].mxu0 %vm622_vm2, %v8608_v1 }
0x1a91   : > { %12285 = vmatpush3.bf16.msra.mxu1 %v12282_v51 }
0x1a92   : > { %11737 = vmatpush3.bf16.msra.mxu0 %v16765_v20  ;;  %12287 = vmatprep.subr.bf16.mxu1 %v12286_v9 }
0x1a95   : > { %12289 = vmatpush3.bf16.msra.mxu1 %v12286_v9 }
0x1a96   : > { %12291 = vmatprep.subr.bf16.mxu1 %v16888_v48 }
0x1b17   : > { %v11528_v59 = vpop.f32.mrb[136].mxu0 }
0x1b18   : > { %v17093_v19 = vmul.f32 0.35355338, %v11528_v59  ;;  %v7742_v54 = vpop.f32.mrb[137].mxu0 }
0x1b19   : > { %v17101_v62 = vmul.f32 0.35355338, %v7742_v54 }
0x1b1a   : > { %v7792_v49 = vsel %vm298_vm0, %v17093_v19, -inf }
0x1b1b   : > { %7793 = vmax.xlane.f32.xlu0 %v7792_v49  ;;  %v7789_v26 = vsel %vm298_vm0, %v17101_v62, -inf }
0x1b1f   : > { %v11531_v8 = vpop.f32.mrb[138].mxu0 }
0x1b20   : > { %v7752_v0 = vpop.f32.mrb[139].mxu0  ;;  %v17109_v44 = vmul.f32 0.35355338, %v11531_v8 }
0x1b21   : > { %v17105_v3 = vmul.f32 0.35355338, %v7752_v0 }
0x1b22   : > { %v7798_v28 = vsel %vm298_vm0, %v17109_v44, -inf }
0x1b23   : > { %v7795_v50 = vsel %vm298_vm0, %v17105_v3, -inf }
0x1b27   : > { %v11534_v36 = vpop.f32.mrb[140].mxu0 }
0x1b28   : > { %v7762_v55 = vpop.f32.mrb[141].mxu0  ;;  %v17125_v11 = vmul.f32 0.35355338, %v11534_v36 }
0x1b29   : > { %v17121_v63 = vmul.f32 0.35355338, %v7762_v55 }
0x1b2a   : > { %v7804_v52 = vsel %vm298_vm0, %v17125_v11, -inf }
0x1b2b   : > { %v11500_v4 = vpop.f32.mrb[128].mxu1  ;;  %v11537_v61 = vpop.f32.mrb[142].mxu0  ;;  %v7801_v58 = vsel %vm298_vm0, %v17121_v63, -inf }
0x1b2c   : > { %v17097_v53 = vmul.f32 0.35355338, %v11500_v4  ;;  %v7477_v20 = vpop.f32.mrb[129].mxu1  ;;  %v7772_v6 = vpop.f32.mrb[143].mxu0  ;;  %v17141_v42 = vmul.f32 0.35355338, %v11537_v61 }
0x1b2d   : > { %v17099_v25 = vmul.f32 0.35355338, %v7477_v20  ;;  %v17137_v5 = vmul.f32 0.35355338, %v7772_v6 }
0x1b2e   : > { %v7527_v33 = vsel %vm298_vm0, %v17097_v53, -inf  ;;  %v7810_v31 = vsel %vm298_vm0, %v17141_v42, -inf }
0x1b2f   : > { %7528 = vmax.xlane.f32.xlu1 %v7527_v33  ;;  %v11503_v56 = vpop.f32.mrb[130].mxu1  ;;  %v7524_v22 = vsel %vm298_vm0, %v17099_v25, -inf  ;;  %v7807_v45 = vsel %vm298_vm0, %v17137_v5, -inf }
0x1b30   : > { %v7487_v10 = vpop.f32.mrb[131].mxu1  ;;  %7525 = vmax.xlane.f32.xlu0 %v7524_v22  ;;  %v17117_v27 = vmul.f32 0.35355338, %v11503_v56 }
0x1b31   : > { %v17113_v40 = vmul.f32 0.35355338, %v7487_v10 }
0x1b32   : > { %v7533_v7 = vsel %vm298_vm0, %v17117_v27, -inf }
0x1b33   : > { %v11506_v24 = vpop.f32.mrb[132].mxu1  ;;  %7790 = vmax.xlane.f32.xlu1 %v7789_v26  ;;  %v7530_v29 = vsel %vm298_vm0, %v17113_v40, -inf }
0x1b34   : > { %v7497_v15 = vpop.f32.mrb[133].mxu1  ;;  %7796 = vmax.xlane.f32.xlu0 %v7795_v50  ;;  %v17133_v32 = vmul.f32 0.35355338, %v11506_v24 }
0x1b35   : > { %v17129_v41 = vmul.f32 0.35355338, %v7497_v15 }
0x1b36   : > { %v7539_v46 = vsel %vm298_vm0, %v17133_v32, -inf }
0x1b37   : > { %v11509_v60 = vpop.f32.mrb[134].mxu1  ;;  %7799 = vmax.xlane.f32.xlu1 %v7798_v28  ;;  %v11612_v57 = vpop.f32.mrb[144].mxu0  ;;  %v7536_v38 = vsel %vm298_vm0, %v17129_v41, -inf }
0x1b38   : > { %v7507_v14 = vpop.f32.mrb[135].mxu1  ;;  %7531 = vmax.xlane.f32.xlu0 %v7530_v29  ;;  %v8297_v35 = vpop.f32.mrb[145].mxu0  ;;  %v17149_v17 = vmul.f32 0.35355338, %v11509_v60  ;;  %v17157_v59 = vmul.f32 0.35355338, %v11612_v57 }
0x1b39   : > { %v17145_v39 = vmul.f32 0.35355338, %v7507_v14  ;;  %v17153_v51 = vmul.f32 0.35355338, %v8297_v35 }
0x1b3a   : > { %v7545_v54 = vsel %vm298_vm0, %v17149_v17, -inf  ;;  %v8347_v36 = vsel %vm298_vm0, %v17157_v59, -inf }
0x1b3b   : > { %7534 = vmax.xlane.f32.xlu1 %v7533_v7  ;;  %v11615_v30 = vpop.f32.mrb[146].mxu0  ;;  %v7542_v9 = vsel %vm298_vm0, %v17145_v39, -inf  ;;  %v8344_v8 = vsel %vm298_vm0, %v17153_v51, -inf }
0x1b3c   : > { %7802 = vmax.xlane.f32.xlu0 %v7801_v58  ;;  %v8307_v1 = vpop.f32.mrb[147].mxu0  ;;  %v17165_v0 = vmul.f32 0.35355338, %v11615_v30 }
0x1b3d   : > { %v17161_v49 = vmul.f32 0.35355338, %v8307_v1 }
0x1b3e   : > { %v8353_v20 = vsel %vm298_vm0, %v17165_v0, -inf }
0x1b3f   : > { %7805 = vmax.xlane.f32.xlu1 %v7804_v52  ;;  %v11618_v37 = vpop.f32.mrb[148].mxu0  ;;  %v8350_v4 = vsel %vm298_vm0, %v17161_v49, -inf }
0x1b40   : > { %7537 = vmax.xlane.f32.xlu0 %v7536_v38  ;;  %v8317_v16 = vpop.f32.mrb[149].mxu0  ;;  %v17173_v61 = vmul.f32 0.35355338, %v11618_v37 }
0x1b41   : > { %v17169_v55 = vmul.f32 0.35355338, %v8317_v16 }
0x1b42   : > { %v8359_v22 = vsel %vm298_vm0, %v17173_v61, -inf }
0x1b43   : > { %7540 = vmax.xlane.f32.xlu1 %v7539_v46  ;;  %v11621_v18 = vpop.f32.mrb[150].mxu0  ;;  %v8356_v33 = vsel %vm298_vm0, %v17169_v55, -inf }
0x1b44   : > { %v8327_v13 = vpop.f32.mrb[151].mxu0  ;;  %7808 = vmax.xlane.f32.xlu0 %v7807_v45  ;;  %v17181_v56 = vmul.f32 0.35355338, %v11621_v18 }
0x1b45   : > { %v17177_v6 = vmul.f32 0.35355338, %v8327_v13 }
0x1b46   : > { %v8365_v28 = vsel %vm298_vm0, %v17181_v56, -inf }
0x1b47   : > { %7811 = vmax.xlane.f32.xlu1 %v7810_v31  ;;  %v8362_v26 = vsel %vm298_vm0, %v17177_v6, -inf }
0x1b48   : > { %7543 = vmax.xlane.f32.xlu0 %v7542_v9 }
0x1b4b   : > { %7546 = vmax.xlane.f32.xlu1 %v7545_v54 }
0x1b4c   : > { %8345 = vmax.xlane.f32.xlu0 %v8344_v8  ;;  %v17221_v8 = vpop.permute.xlu0 %13053 }
0x1b4f   : > { %8348 = vmax.xlane.f32.xlu1 %v8347_v36 }
0x1b50   : > { %8351 = vmax.xlane.f32.xlu0 %v8350_v4  ;;  %v17223_v36 = vpop.permute.xlu0 %13063 }
0x1b53   : > { %8354 = vmax.xlane.f32.xlu1 %v8353_v20 }
0x1b54   : > { %8357 = vmax.xlane.f32.xlu0 %v8356_v33 }
0x1b57   : > { %8360 = vmax.xlane.f32.xlu1 %v8359_v22  ;;  %v11668_v10 = vpop.f32.mrb[152].mxu0  ;;  %v17226_v22 = vpop.permute.xlu1 %13058 }
0x1b58   : > { %v8723_v24 = vpop.f32.mrb[153].mxu0  ;;  %8363 = vmax.xlane.f32.xlu0 %v8362_v26  ;;  %v17189_v15 = vmul.f32 0.35355338, %v11668_v10 }
0x1b59   : > { %v17187_v50 = vmul.f32 0.35355338, %v8723_v24 }
0x1b5a   : > { %v8773_v7 = vsel %vm298_vm0, %v17189_v15, -inf }
0x1b5b   : > { %8366 = vmax.xlane.f32.xlu1 %v8365_v28  ;;  %v11671_v60 = vpop.f32.mrb[154].mxu0  ;;  %v8770_v57 = vsel %vm298_vm0, %v17187_v50, -inf  ;;  %v17230_v26 = vpop.permute.xlu1 %13068 }
0x1b5c   : > { %v8733_v29 = vpop.f32.mrb[155].mxu0  ;;  %8771 = vmax.xlane.f32.xlu0 %v8770_v57  ;;  %v17197_v35 = vmul.f32 0.35355338, %v11671_v60 }
0x1b5d   : > { %v17195_v14 = vmul.f32 0.35355338, %v8733_v29 }
0x1b5e   : > { %v8779_v38 = vsel %vm298_vm0, %v17197_v35, -inf }
0x1b5f   : > { %8774 = vmax.xlane.f32.xlu1 %v8773_v7  ;;  %v11674_v30 = vpop.f32.mrb[156].mxu0  ;;  %v8776_v58 = vsel %vm298_vm0, %v17195_v14, -inf }
0x1b60   : > { %v8743_v1 = vpop.f32.mrb[157].mxu0  ;;  %8777 = vmax.xlane.f32.xlu0 %v8776_v58  ;;  %v17205_v37 = vmul.f32 0.35355338, %v11674_v30 }
0x1b61   : > { %v17203_v52 = vmul.f32 0.35355338, %v8743_v1 }
0x1b62   : > { %v8785_v31 = vsel %vm298_vm0, %v17205_v37, -inf }
0x1b63   : > { %8780 = vmax.xlane.f32.xlu1 %v8779_v38  ;;  %v11677_v16 = vpop.f32.mrb[158].mxu0  ;;  %v8782_v46 = vsel %vm298_vm0, %v17203_v52, -inf }
0x1b64   : > { %v8753_v18 = vpop.f32.mrb[159].mxu0  ;;  %8783 = vmax.xlane.f32.xlu0 %v8782_v46  ;;  %v17213_v13 = vmul.f32 0.35355338, %v11677_v16 }
0x1b65   : > { %v17211_v45 = vmul.f32 0.35355338, %v8753_v18 }
0x1b66   : > { %v8791_v54 = vsel %vm298_vm0, %v17213_v13, -inf }
0x1b67   : > { %8786 = vmax.xlane.f32.xlu1 %v8785_v31  ;;  %v8788_v9 = vsel %vm298_vm0, %v17211_v45, -inf }
0x1b68   : > { %8789 = vmax.xlane.f32.xlu0 %v8788_v9 }
0x1b6b   : > { %8792 = vmax.xlane.f32.xlu1 %v8791_v54 }
0x1ba8   : > { %v7794_v4 = vpop.xlane.xlu0 %7793 }
0x1ba9   : > { %v7814_v20 = vsub.f32 %v17093_v19, %v7794_v4 }
0x1bab   : > { %v7823_v33 = vmul.f32 1.442695, %v7814_v20 }
0x1bad   : > { %13596 = vpow2.f32 %v7823_v33 }
0x1bb7   : > { %v17228_v10 = vpop.eup %13596 }
0x1bb8   : > { %v7840_v24 = vsel %vm298_vm0, %v17228_v10, 0.0 }
0x1bb9   : > { %7841 = vadd.xlane.f32.xlu1 %v7840_v24 }
0x1bbc   : > { %v7529_v28 = vpop.xlane.xlu1 %7528 }
0x1bbd   : > { %v7549_v60 = vsub.f32 %v17097_v53, %v7529_v28  ;;  %v7526_v57 = vpop.xlane.xlu0 %7525 }
0x1bbe   : > { %v7548_v7 = vsub.f32 %v17099_v25, %v7526_v57 }
0x1bbf   : > { %v7558_v29 = vmul.f32 1.442695, %v7549_v60 }
0x1bc0   : > { %v7791_v19 = vpop.xlane.xlu1 %7790  ;;  %v7556_v1 = vmul.f32 1.442695, %v7548_v7 }
0x1bc1   : > { %13598 = vpow2.f32 %v7558_v29  ;;  %v7813_v30 = vsub.f32 %v17101_v62, %v7791_v19  ;;  %v7797_v58 = vpop.xlane.xlu0 %7796 }
0x1bc2   : > { %v7815_v16 = vsub.f32 %v17105_v3, %v7797_v58 }
0x1bc3   : > { %v7821_v38 = vmul.f32 1.442695, %v7813_v30 }
0x1bc4   : > { %v7800_v46 = vpop.xlane.xlu1 %7799  ;;  %v7825_v9 = vmul.f32 1.442695, %v7815_v16 }
0x1bc5   : > { %13600 = vpow2.f32 %v7821_v38  ;;  %v7816_v18 = vsub.f32 %v17109_v44, %v7800_v46  ;;  %v7532_v31 = vpop.xlane.xlu0 %7531 }
0x1bc6   : > { %v7550_v53 = vsub.f32 %v17113_v40, %v7532_v31  ;;  %13602 = vpow2.f32 %v7556_v1 }
0x1bc7   : > { %v7827_v54 = vmul.f32 1.442695, %v7816_v18 }
0x1bc8   : > { %v7535_v25 = vpop.xlane.xlu1 %7534  ;;  %v7560_v20 = vmul.f32 1.442695, %v7550_v53 }
0x1bc9   : > { %13604 = vpow2.f32 %v7827_v54  ;;  %v7551_v4 = vsub.f32 %v17117_v27, %v7535_v25  ;;  %v7803_v62 = vpop.xlane.xlu0 %7802 }
0x1bca   : > { %v7817_v33 = vsub.f32 %v17121_v63, %v7803_v62  ;;  %13606 = vpow2.f32 %v7825_v9 }
0x1bcb   : > { %v17242_v24 = vpop.eup %13598  ;;  %v7562_v3 = vmul.f32 1.442695, %v7551_v4 }
0x1bcc   : > { %v7829_v28 = vmul.f32 1.442695, %v7817_v33  ;;  %v7806_v44 = vpop.xlane.xlu1 %7805  ;;  %v7575_v40 = vsel %vm298_vm0, %v17242_v24, 0.0 }
0x1bcd   : > { %13608 = vpow2.f32 %v7562_v3  ;;  %v7818_v60 = vsub.f32 %v17125_v11, %v7806_v44  ;;  %v7538_v57 = vpop.xlane.xlu0 %7537  ;;  %7576 = vadd.xlane.f32.xlu1 %v7575_v40 }
0x1bce   : > { %13610 = vpow2.f32 %v7560_v20  ;;  %v7552_v27 = vsub.f32 %v17129_v41, %v7538_v57 }
0x1bcf   : > { %v17248_v29 = vpop.eup %13600  ;;  %13612 = vpow2.f32 %v7829_v28  ;;  %v7831_v63 = vmul.f32 1.442695, %v7818_v60 }
0x1bd0   : > { %v7564_v7 = vmul.f32 1.442695, %v7552_v27  ;;  %v7541_v19 = vpop.xlane.xlu1 %7540  ;;  %v7837_v30 = vsel %vm298_vm0, %v17248_v29, 0.0  ;;  %v17252_v58 = vpop.eup %13602 }
0x1bd1   : > { %v7553_v1 = vsub.f32 %v17133_v32, %v7541_v19  ;;  %7838 = vadd.xlane.f32.xlu0 %v7837_v30  ;;  %v7809_v11 = vpop.xlane.xlu0 %7808  ;;  %13614 = vpow2.f32 %v7831_v63  ;;  %v7572_v18 = vsel %vm298_vm0, %v17252_v58, 0.0 }
0x1bd2   : > { %13616 = vpow2.f32 %v7564_v7  ;;  %v7819_v9 = vsub.f32 %v17137_v5, %v7809_v11 }
0x1bd3   : > { %v17255_v38 = vpop.eup %13604  ;;  %v7566_v41 = vmul.f32 1.442695, %v7553_v1 }
0x1bd4   : > { %v7812_v16 = vpop.xlane.xlu1 %7811  ;;  %v7846_v46 = vsel %vm298_vm0, %v17255_v38, 0.0  ;;  %v17261_v31 = vpop.eup %13606  ;;  %v7833_v44 = vmul.f32 1.442695, %v7819_v9 }
0x1bd5   : > { %v7820_v53 = vsub.f32 %v17141_v42, %v7812_v16  ;;  %7847 = vadd.xlane.f32.xlu1 %v7846_v46  ;;  %7573 = vadd.xlane.f32.xlu0 %v7572_v18  ;;  %v7544_v32 = vpop.xlane.xlu0 %7543  ;;  %13618 = vpow2.f32 %v7566_v41  ;;  %v7843_v42 = vsel %vm298_vm0, %v17261_v31, 0.0 }
0x1bd6   : > { %v7554_v4 = vsub.f32 %v17145_v39, %v7544_v32 }
0x1bd7   : > { %v17265_v54 = vpop.eup %13608  ;;  %v7835_v25 = vmul.f32 1.442695, %v7820_v53 }
0x1bd8   : > { %v17268_v62 = vpop.eup %13610  ;;  %v7547_v20 = vpop.xlane.xlu1 %7546  ;;  %v7581_v33 = vsel %vm298_vm0, %v17265_v54, 0.0  ;;  %v7568_v40 = vmul.f32 1.442695, %v7554_v4 }
0x1bd9   : > { %v17274_v3 = vpop.eup %13612  ;;  %v7555_v28 = vsub.f32 %v17149_v17, %v7547_v20  ;;  %7582 = vadd.xlane.f32.xlu1 %v7581_v33  ;;  %7844 = vadd.xlane.f32.xlu0 %v7843_v42  ;;  %v8346_v5 = vpop.xlane.xlu0 %8345  ;;  %13620 = vpow2.f32 %v7835_v25  ;;  %v7578_v27 = vsel %vm298_vm0, %v17268_v62, 0.0 }
0x1bda   : > { %v7849_v63 = vsel %vm298_vm0, %v17274_v3, 0.0  ;;  %v8368_v30 = vsub.f32 %v17153_v51, %v8346_v5 }
0x1bdb   : > { %v7570_v39 = vmul.f32 1.442695, %v7555_v28  ;;  %v17277_v60 = vpop.eup %13614 }
0x1bdc   : > { %v8349_v57 = vpop.xlane.xlu1 %8348  ;;  %v17283_v7 = vpop.eup %13616  ;;  %v7852_v41 = vsel %vm298_vm0, %v17277_v60, 0.0  ;;  %v8376_v53 = vmul.f32 1.442695, %v8368_v30 }
0x1bdd   : > { %13622 = vpow2.f32 %v7570_v39  ;;  %v8369_v17 = vsub.f32 %v17157_v59, %v8349_v57  ;;  %7579 = vadd.xlane.f32.xlu1 %v7578_v27  ;;  %7850 = vadd.xlane.f32.xlu0 %v7849_v63  ;;  %v8352_v19 = vpop.xlane.xlu0 %8351  ;;  %v7584_v16 = vsel %vm298_vm0, %v17283_v7, 0.0 }
0x1bde   : > { %13624 = vpow2.f32 %v7833_v44  ;;  %v8370_v32 = vsub.f32 %v17161_v49, %v8352_v19 }
0x1bdf   : > { %13626 = vpow2.f32 %v7568_v40  ;;  %v8378_v1 = vmul.f32 1.442695, %v8369_v17  ;;  %v17291_v46 = vpop.eup %13618 }
0x1be0   : > { %v8355_v11 = vpop.xlane.xlu1 %8354  ;;  %v7587_v25 = vsel %vm298_vm0, %v17291_v46, 0.0  ;;  %v8380_v28 = vmul.f32 1.442695, %v8370_v32 }
0x1be1   : > { %v8371_v18 = vsub.f32 %v17165_v0, %v8355_v11  ;;  %7853 = vadd.xlane.f32.xlu1 %v7852_v41  ;;  %7585 = vadd.xlane.f32.xlu0 %v7584_v16  ;;  %v8358_v59 = vpop.xlane.xlu0 %8357  ;;  %13628 = vpow2.f32 %v8378_v1 }
0x1be2   : > { %v8372_v0 = vsub.f32 %v17169_v55, %v8358_v59 }
0x1be3   : > { %v8382_v51 = vmul.f32 1.442695, %v8371_v18  ;;  %v17297_v4 = vpop.eup %13620 }
0x1be4   : > { %v8361_v9 = vpop.xlane.xlu1 %8360  ;;  %v7858_v39 = vsel %vm298_vm0, %v17297_v4, 0.0  ;;  %v8384_v63 = vmul.f32 1.442695, %v8372_v0 }
0x1be5   : > { %13630 = vpow2.f32 %v8382_v51  ;;  %v8373_v20 = vsub.f32 %v17173_v61, %v8361_v9  ;;  %7588 = vadd.xlane.f32.xlu1 %v7587_v25  ;;  %v8364_v33 = vpop.xlane.xlu0 %8363 }
0x1be6   : > { %13632 = vpow2.f32 %v8376_v53  ;;  %v8374_v49 = vsub.f32 %v17177_v6, %v8364_v33 }
0x1be7   : > { %v17301_v42 = vpop.eup %13622  ;;  %v8386_v5 = vmul.f32 1.442695, %v8373_v20 }
0x1be8   : > { %v17304_v44 = vpop.eup %13624  ;;  %v8367_v40 = vpop.xlane.xlu1 %8366  ;;  %v7593_v61 = vsel %vm298_vm0, %v17301_v42, 0.0  ;;  %v8388_v17 = vmul.f32 1.442695, %v8374_v49 }
0x1be9   : > { %v17310_v57 = vpop.eup %13626  ;;  %13634 = vpow2.f32 %v8386_v5  ;;  %v8375_v55 = vsub.f32 %v17181_v56, %v8367_v40  ;;  %7859 = vadd.xlane.f32.xlu1 %v7858_v39  ;;  %7594 = vadd.xlane.f32.xlu0 %v7593_v61  ;;  %v8772_v27 = vpop.xlane.xlu0 %8771  ;;  %v7855_v1 = vsel %vm298_vm0, %v17304_v44, 0.0 }
0x1bea   : > { %v8794_v6 = vsub.f32 %v17187_v50, %v8772_v27  ;;  %13636 = vpow2.f32 %v8380_v28  ;;  %v7590_v11 = vsel %vm298_vm0, %v17310_v57, 0.0 }
0x1beb   : > { %v8390_v19 = vmul.f32 1.442695, %v8375_v55  ;;  %v17318_v41 = vpop.eup %13628 }
0x1bec   : > { %v8775_v30 = vpop.xlane.xlu1 %8774  ;;  %v8802_v50 = vmul.f32 1.442695, %v8794_v6  ;;  %v8395_v51 = vsel %vm298_vm0, %v17318_v41, 0.0 }
0x1bed   : > { %13638 = vpow2.f32 %v8390_v19  ;;  %v8795_v56 = vsub.f32 %v17189_v15, %v8775_v30  ;;  %7856 = vadd.xlane.f32.xlu1 %v7855_v1  ;;  %7591 = vadd.xlane.f32.xlu0 %v7590_v11  ;;  %v8778_v16 = vpop.xlane.xlu0 %8777 }
0x1bee   : > { %13640 = vpow2.f32 %v8384_v63  ;;  %v8796_v0 = vsub.f32 %v17195_v14, %v8778_v16 }
0x1bef   : > { %v17321_v18 = vpop.eup %13630  ;;  %13642 = vpow2.f32 %v8388_v17  ;;  %v8804_v59 = vmul.f32 1.442695, %v8795_v56 }
0x1bf0   : > { %v8781_v53 = vpop.xlane.xlu1 %8780  ;;  %v8401_v32 = vsel %vm298_vm0, %v17321_v18, 0.0  ;;  %v17327_v9 = vpop.eup %13632  ;;  %13644 = vpow2.f32 %v8802_v50  ;;  %v8806_v61 = vmul.f32 1.442695, %v8796_v0 }
0x1bf1   : > { %v8797_v15 = vsub.f32 %v17197_v35, %v8781_v53  ;;  %8402 = vadd.xlane.f32.xlu1 %v8401_v32  ;;  %8396 = vadd.xlane.f32.xlu0 %v8395_v51  ;;  %v8784_v25 = vpop.xlane.xlu0 %8783  ;;  %13646 = vpow2.f32 %v8804_v59  ;;  %v8392_v35 = vsel %vm298_vm0, %v17327_v9, 0.0 }
0x1bf2   : > { %v8798_v20 = vsub.f32 %v17203_v52, %v8784_v25 }
0x1bf3   : > { %v17331_v33 = vpop.eup %13634  ;;  %v8808_v28 = vmul.f32 1.442695, %v8797_v15 }
0x1bf4   : > { %v8810_v5 = vmul.f32 1.442695, %v8798_v20  ;;  %v8787_v49 = vpop.xlane.xlu1 %8786  ;;  %v8407_v40 = vsel %vm298_vm0, %v17331_v33, 0.0  ;;  %v17338_v39 = vpop.eup %13636 }
0x1bf5   : > { %8408 = vadd.xlane.f32.xlu1 %v8407_v40  ;;  %8393 = vadd.xlane.f32.xlu0 %v8392_v35  ;;  %13648 = vpow2.f32 %v8808_v28  ;;  %v8799_v14 = vsub.f32 %v17205_v37, %v8787_v49  ;;  %v8398_v63 = vsel %vm298_vm0, %v17338_v39, 0.0 }
0x1bf6   : > { %13650 = vpow2.f32 %v8810_v5  ;;  %v8790_v5 = vpop.xlane.xlu0 %8789 }
0x1bf7   : > { %v17340_v52 = vpop.eup %13638  ;;  %13652 = vpow2.f32 %v8806_v61  ;;  %v8812_v17 = vmul.f32 1.442695, %v8799_v14  ;;  %v8800_v49 = vsub.f32 %v17211_v45, %v8790_v5  ;;  %v13055_v5 = vunpack.i.l.bf16 %v17221_v8 }
0x1bf8   : > { %v17343_v55 = vpop.eup %13640  ;;  %v8413_v27 = vsel %vm298_vm0, %v17340_v52, 0.0  ;;  %v8793_v20 = vpop.xlane.xlu1 %8792 }
0x1bf9   : > { %v17349_v6 = vpop.eup %13642  ;;  %8414 = vadd.xlane.f32.xlu1 %v8413_v27  ;;  %8399 = vadd.xlane.f32.xlu0 %v8398_v63  ;;  %v8404_v30 = vsel %vm298_vm0, %v17343_v55, 0.0  ;;  %13654 = vpow2.f32 %v8812_v17  ;;  %v8801_v0 = vsub.f32 %v17213_v13, %v8793_v20  ;;  %v8814_v40 = vmul.f32 1.442695, %v8800_v49 }
0x1bfa   : > { %v17351_v19 = vpop.eup %13644  ;;  %v8410_v37 = vsel %vm298_vm0, %v17349_v6, 0.0 }
0x1bfb   : > { %v17357_v1 = vpop.eup %13646  ;;  %v8818_v16 = vsel %vm298_vm0, %v17351_v19, 0.0  ;;  %v8816_v28 = vmul.f32 1.442695, %v8801_v0 }
0x1bfc   : > { %v8821_v56 = vsel %vm298_vm0, %v17357_v1, 0.0 }
0x1bfd   : > { %8405 = vadd.xlane.f32.xlu0 %v8404_v30  ;;  %8411 = vadd.xlane.f32.xlu1 %v8410_v37  ;;  %13656 = vpow2.f32 %v8816_v28 }
0x1bfe   : > { %13658 = vpow2.f32 %v8814_v40 }
0x1bff   : > { %v17359_v11 = vpop.eup %13648 }
0x1c00   : > { %v17365_v50 = vpop.eup %13650  ;;  %v8827_v59 = vsel %vm298_vm0, %v17359_v11, 0.0 }
0x1c01   : > { %8822 = vadd.xlane.f32.xlu1 %v8821_v56  ;;  %8819 = vadd.xlane.f32.xlu0 %v8818_v16  ;;  %v8830_v53 = vsel %vm298_vm0, %v17365_v50, 0.0  ;;  %v17371_v32 = vpop.eup %13652 }
0x1c02   : > { %v8824_v51 = vsel %vm298_vm0, %v17371_v32, 0.0 }
0x1c03   : > { %v17375_v15 = vpop.eup %13654 }
0x1c04   : > { %v8833_v25 = vsel %vm298_vm0, %v17375_v15, 0.0 }
0x1c05   : > { %8828 = vadd.xlane.f32.xlu1 %v8827_v59  ;;  %8831 = vadd.xlane.f32.xlu0 %v8830_v53 }
0x1c07   : > { %v17387_v35 = vpop.eup %13656 }
0x1c09   : > { %8825 = vadd.xlane.f32.xlu1 %v8824_v51 }
0x1c0d   : > { %8834 = vadd.xlane.f32.xlu1 %v8833_v25 }
0x1c1b   : > { %13073 = vrot.lane.b32.xlu0 %v16886_v43, %s13785_s11  ;;  %v8839_v43 = vsel %vm298_vm0, %v17387_v35, 0.0 }
0x1c1e   : > { %13078 = vrot.lane.b32.xlu1 %v16891_v2, %s13785_s11  ;;  %v17391_v2 = vpop.eup %13658 }
0x1c22   : > { %13083 = vrot.lane.b32.xlu1 %v16896_v34, %s13785_s11  ;;  %v8836_v34 = vsel %vm298_vm0, %v17391_v2, 0.0 }
0x1c3a   : > { %8840 = vadd.xlane.f32.xlu0 %v8839_v43 }
0x1c46   : > { %8837 = vadd.xlane.f32.xlu1 %v8836_v34  ;;  %v7842_v13 = vpop.xlane.xlu1 %7841 }
0x1c47   : > { %13660 = vrcp.f32 %v7842_v13 }
0x1c51   : > { %v13661_v30 = vpop.eup %13660 }
0x1c52   : > { %v7870_v53 = vmul.f32 %v13661_v30, %v17228_v10 }
0x1c57   : > { %13088 = vrot.lane.b32.xlu1 %v16902_v12, %s13785_s11 }
0x1c5a   : > { %v7577_v45 = vpop.xlane.xlu1 %7576 }
0x1c5e   : > { %v7839_v61 = vpop.xlane.xlu0 %7838 }
0x1c5f   : > { %13662 = vrcp.f32 %v7839_v61 }
0x1c62   : > { %v7848_v14 = vpop.xlane.xlu1 %7847  ;;  %v7574_v27 = vpop.xlane.xlu0 %7573 }
0x1c63   : > { %13664 = vrcp.f32 %v7848_v14 }
0x1c66   : > { %v7583_v63 = vpop.xlane.xlu1 %7582  ;;  %v7845_v17 = vpop.xlane.xlu0 %7844 }
0x1c67   : > { %13666 = vrcp.f32 %v7845_v17 }
0x1c69   : > { %v13663_v37 = vpop.eup %13662 }
0x1c6a   : > { %v7580_v56 = vpop.xlane.xlu1 %7579  ;;  %v7851_v16 = vpop.xlane.xlu0 %7850  ;;  %v7869_v59 = vmul.f32 %v13663_v37, %v17248_v29 }
0x1c6b   : > { %13668 = vrcp.f32 %v7851_v16  ;;  %v13061_v16 = vunpack.i.h.bf16 %v17226_v22 }
0x1c6c   : > { %11554 = vmatprep.mubr.msk.f32.mxu1 %vm298_vm0, %v7869_v59  ;;  %v13060_v59 = vunpack.i.l.bf16 %v17226_v22 }
0x1c6d   : > { %11555 = vmatmul.mubr.msk.f32.vlgmr.msra.gmra.mrb[136].mxu1 %vm298_vm0, %v7870_v53  ;;  %v13665_v51 = vpop.eup %13664 }
0x1c6e   : > { %12293 = vmatpush3.bf16.msra.mxu1 %v16888_v48  ;;  %v7854_v12 = vpop.xlane.xlu1 %7853  ;;  %v7586_v20 = vpop.xlane.xlu0 %7585  ;;  %v7872_v29 = vmul.f32 %v13665_v51, %v17255_v38  ;;  %v13056_v48 = vunpack.i.h.bf16 %v17221_v8  ;;  %v12334_v22 = vpack.c.bf16 %v13061_v16, %v13060_v59 }
0x1c6f   : > { %13670 = vrcp.f32 %v7854_v12  ;;  %12295 = vmatprep.subr.bf16.mxu1 %v16893_v21 }
0x1c70   : > { %13672 = vrcp.f32 %v7574_v27  ;;  %v12330_v43 = vpack.c.bf16 %v13056_v48, %v13055_v5  ;;  %v13070_v48 = vunpack.i.l.bf16 %v17230_v26 }
0x1c71   : > { %v13667_v25 = vpop.eup %13666 }
0x1c72   : > { %12297 = vmatpush3.bf16.msra.mxu1 %v16893_v21  ;;  %v7589_v0 = vpop.xlane.xlu1 %7588  ;;  %v7871_v10 = vmul.f32 %v13667_v25, %v17261_v31 }
0x1c73   : > { %12299 = vmatprep.subr.bf16.mxu1 %v16898_v47 }
0x1c74   : > { %11557 = vmatprep.mubr.msk.f32.mxu1 %vm298_vm0, %v7871_v10 }
0x1c75   : > { %v13669_v28 = vpop.eup %13668  ;;  %11558 = vmatmul.mubr.msk.f32.gmra.mrb[138].mxu1 %vm298_vm0, %v7872_v29 }
0x1c76   : > { %v7860_v49 = vpop.xlane.xlu1 %7859  ;;  %v7595_v40 = vpop.xlane.xlu0 %7594  ;;  %12301 = vmatpush3.bf16.msra.mxu1 %v16898_v47  ;;  %v7873_v21 = vmul.f32 %v13669_v28, %v17274_v3 }
0x1c77   : > { %12303 = vmatprep.subr.bf16.mxu1 %v16904_v23  ;;  %13674 = vrcp.f32 %v7860_v49 }
0x1c78   : > { %11560 = vmatprep.mubr.msk.f32.mxu1 %vm298_vm0, %v7873_v21 }
0x1c79   : > { %v13671_v31 = vpop.eup %13670 }
0x1c7a   : > { %v7857_v38 = vpop.xlane.xlu1 %7856  ;;  %v7592_v34 = vpop.xlane.xlu0 %7591  ;;  %v7874_v8 = vmul.f32 %v13671_v31, %v17277_v60  ;;  %12305 = vmatpush3.bf16.msra.mxu1 %v16904_v23 }
0x1c7b   : > { %13676 = vrcp.f32 %v7857_v38  ;;  %12331 = vmatprep.subr.bf16.mxu1 %v12330_v43  ;;  %v13673_v14 = vpop.eup %13672 }
0x1c7c   : > { %11561 = vmatmul.mubr.msk.f32.gmra.mrb[140].mxu1 %vm298_vm0, %v7874_v8  ;;  %13678 = vrcp.f32 %v7577_v45 }
0x1c7d   : > { %13680 = vrcp.f32 %v7580_v56 }
0x1c7e   : > { %v8403_v47 = vpop.xlane.xlu1 %8402  ;;  %v8397_v3 = vpop.xlane.xlu0 %8396  ;;  %13682 = vrcp.f32 %v7583_v63  ;;  %v7604_v63 = vmul.f32 %v13673_v14, %v17252_v58  ;;  %v13066_v58 = vunpack.i.h.bf16 %v17223_v36 }
0x1c7f   : > { %13684 = vrcp.f32 %v7586_v20  ;;  %v13065_v20 = vunpack.i.l.bf16 %v17223_v36  ;;  %v13071_v36 = vunpack.i.h.bf16 %v17230_v26 }
0x1c80   : > { %13686 = vrcp.f32 %v7589_v0 }
0x1c81   : > { %v13675_v27 = vpop.eup %13674  ;;  %13688 = vrcp.f32 %v7592_v34  ;;  %v12338_v5 = vpack.c.bf16 %v13066_v58, %v13065_v20  ;;  %v12342_v26 = vpack.c.bf16 %v13071_v36, %v13070_v48 }
0x1c82   : > { %v8409_v13 = vpop.xlane.xlu1 %8408  ;;  %v8394_v61 = vpop.xlane.xlu0 %8393  ;;  %v7876_v37 = vmul.f32 %v13675_v27, %v17297_v4  ;;  %13690 = vrcp.f32 %v7595_v40 }
0x1c83   : > { %13692 = vrcp.f32 %v8394_v61 }
0x1c84   : > { %13694 = vrcp.f32 %v8397_v3 }
0x1c85   : > { %v13677_v17 = vpop.eup %13676 }
0x1c86   : > { %v17418_v30 = vpop.xlane.xlu1 %8414  ;;  %v8400_v60 = vpop.xlane.xlu0 %8399  ;;  %v7875_v23 = vmul.f32 %v13677_v17, %v17304_v44 }
0x1c87   : > { %v13679_v45 = vpop.eup %13678  ;;  %13696 = vrcp.f32 %v8400_v60 }
0x1c88   : > { %11563 = vmatprep.mubr.msk.f32.mxu1 %vm298_vm0, %v7875_v23  ;;  %v13681_v56 = vpop.eup %13680  ;;  %v7605_v12 = vmul.f32 %v13679_v45, %v17242_v24  ;;  %13698 = vrcp.f32 %v8403_v47 }
0x1c89   : > { %11564 = vmatmul.mubr.msk.f32.gmra.mrb[142].mxu1 %vm298_vm0, %v7876_v37  ;;  %v13683_v4 = vpop.eup %13682  ;;  %v7606_v51 = vmul.f32 %v13681_v56, %v17268_v62 }
0x1c8a   : > { %v8412_v53 = vpop.xlane.xlu1 %8411  ;;  %11582 = vmatprep.mubr.msk.f32.mxu1 %vm298_vm0, %v7604_v63  ;;  %v8406_v44 = vpop.xlane.xlu0 %8405  ;;  %v7607_v24 = vmul.f32 %v13683_v4, %v17265_v54 }
0x1c8b   : > { %v13685_v25 = vpop.eup %13684  ;;  %13700 = vrcp.f32 %v8406_v44 }
0x1c8c   : > { %v13687_v62 = vpop.eup %13686  ;;  %v7608_v29 = vmul.f32 %v13685_v25, %v17283_v7  ;;  %13702 = vrcp.f32 %v8409_v13 }
0x1c8d   : > { %11583 = vmatmul.mubr.msk.f32.vlgmr.msra.gmra.mrb[136].mxu1 %vm298_vm0, %v7605_v12  ;;  %v13689_v28 = vpop.eup %13688  ;;  %v7609_v54 = vmul.f32 %v13687_v62, %v17291_v46  ;;  %13704 = vrcp.f32 %v8412_v53 }
0x1c8e   : > { %12333 = vmatpush3.bf16.msra.mxu1 %v12330_v43  ;;  %v17433_v0 = vpop.xlane.xlu1 %8822  ;;  %11585 = vmatprep.mubr.msk.f32.mxu1 %vm298_vm0, %v7606_v51  ;;  %v8820_v10 = vpop.xlane.xlu0 %8819  ;;  %v7610_v21 = vmul.f32 %v13689_v28, %v17310_v57  ;;  %13706 = vrcp.f32 %v17418_v30 }
0x1c8f   : > { %12335 = vmatprep.subr.bf16.mxu1 %v12334_v22  ;;  %v13691_v7 = vpop.eup %13690  ;;  %13708 = vrcp.f32 %v8820_v10 }
0x1c90   : > { %v13693_v31 = vpop.eup %13692  ;;  %v7611_v47 = vmul.f32 %v13691_v7, %v17301_v42  ;;  %13710 = vrcp.f32 %v17433_v0  ;;  %v13760_v0 = vld [vmem:[%s17673_s2 + $0x30] sm:$0xff]  }
0x1c91   : > { %11586 = vmatmul.mubr.msk.f32.gmra.mrb[138].mxu1 %vm298_vm0, %v7607_v24  ;;  %v13695_v46 = vpop.eup %13694  ;;  %v8424_v3 = vmul.f32 %v13693_v31, %v17327_v9 }
0x1c92   : > { %12337 = vmatpush3.bf16.msra.mxu1 %v12334_v22  ;;  %v17441_v49 = vpop.xlane.xlu1 %8828  ;;  %11588 = vmatprep.mubr.msk.f32.mxu1 %vm298_vm0, %v7608_v29  ;;  %v17444_v40 = vpop.xlane.xlu0 %8831  ;;  %v8425_v14 = vmul.f32 %v13695_v46, %v17318_v41 }
0x1c93   : > { %12339 = vmatprep.subr.bf16.mxu1 %v12338_v5  ;;  %v13697_v57 = vpop.eup %13696 }
0x1c94   : > { %v13699_v27 = vpop.eup %13698  ;;  %v8426_v42 = vmul.f32 %v13697_v57, %v17338_v39 }
0x1c95   : > { %11589 = vmatmul.mubr.msk.f32.gmra.mrb[140].mxu1 %vm298_vm0, %v7609_v54  ;;  %v13701_v17 = vpop.eup %13700  ;;  %v8427_v23 = vmul.f32 %v13699_v27, %v17321_v18 }
0x1c96   : > { %12341 = vmatpush3.bf16.msra.mxu1 %v12338_v5  ;;  %v8826_v38 = vpop.xlane.xlu1 %8825  ;;  %11591 = vmatprep.mubr.msk.f32.mxu1 %vm298_vm0, %v7610_v21  ;;  %v13074_v43 = vpop.permute.xlu0 %13073  ;;  %v8428_v45 = vmul.f32 %v13701_v17, %v17343_v55 }
0x1c97   : > { %12343 = vmatprep.subr.bf16.mxu1 %v12342_v26  ;;  %v13076_v34 = vunpack.i.h.bf16 %v13074_v43  ;;  %v13075_v8 = vunpack.i.l.bf16 %v13074_v43  ;;  %v13703_v37 = vpop.eup %13702  ;;  %13712 = vrcp.f32 %v8826_v38 }
0x1c98   : > { %v13705_v41 = vpop.eup %13704  ;;  %v8429_v59 = vmul.f32 %v13703_v37, %v17331_v33  ;;  %13714 = vrcp.f32 %v17441_v49 }
0x1c99   : > { %v12370_v61 = vpack.c.bf16 %v13076_v34, %v13075_v8  ;;  %11592 = vmatmul.mubr.msk.f32.gmra.mrb[142].mxu1 %vm298_vm0, %v7611_v47  ;;  %v13707_v53 = vpop.eup %13706  ;;  %v8430_v44 = vmul.f32 %v13705_v41, %v17349_v6  ;;  %13716 = vrcp.f32 %v17444_v40 }
0x1c9a   : > { %12345 = vmatpush3.bf16.msra.mxu1 %v12342_v26  ;;  %v8835_v13 = vpop.xlane.xlu1 %8834  ;;  %11638 = vmatprep.mubr.msk.f32.mxu1 %vm298_vm0, %v8424_v3  ;;  %v13709_v18 = vpop.eup %13708  ;;  %v8431_v55 = vmul.f32 %v13707_v53, %v17340_v52 }
0x1c9b   : > { %12371 = vmatprep.subr.bf16.mxu1 %v12370_v61  ;;  %v8850_v4 = vmul.f32 %v13709_v18, %v17351_v19  ;;  %13718 = vrcp.f32 %v8835_v13  ;;  %v13711_v19 = vpop.eup %13710 }
0x1c9c   : > { %v8851_v22 = vmul.f32 %v13711_v19, %v17357_v1  ;;  %v13761_v1 = vld [vmem:[%s17673_s2 + $0x38] sm:$0xff]  }
0x1c9d   : > { %11639 = vmatmul.mubr.msk.f32.vlgmr.msra.gmra.mrb[136].mxu1 %vm298_vm0, %v8425_v14 }
0x1c9e   : > { %12373 = vmatpush3.bf16.msra.mxu1 %v12370_v61  ;;  %v13079_v9 = vpop.permute.xlu1 %13078  ;;  %11641 = vmatprep.mubr.msk.f32.mxu1 %vm298_vm0, %v8426_v42 }
0x1c9f   : > { %v13081_v60 = vunpack.i.h.bf16 %v13079_v9  ;;  %v13080_v30 = vunpack.i.l.bf16 %v13079_v9 }
0x1ca1   : > { %v12374_v63 = vpack.c.bf16 %v13081_v60, %v13080_v30  ;;  %11642 = vmatmul.mubr.msk.f32.gmra.mrb[138].mxu1 %vm298_vm0, %v8427_v23  ;;  %v13713_v20 = vpop.eup %13712 }
0x1ca2   : > { %v13084_v56 = vpop.permute.xlu1 %13083  ;;  %11644 = vmatprep.mubr.msk.f32.mxu1 %vm298_vm0, %v8428_v45  ;;  %v13715_v10 = vpop.eup %13714  ;;  %v8852_v24 = vmul.f32 %v13713_v20, %v17371_v32 }
0x1ca3   : > { %v13086_v39 = vunpack.i.h.bf16 %v13084_v56  ;;  %v13085_v16 = vunpack.i.l.bf16 %v13084_v56  ;;  %12375 = vmatprep.subr.bf16.mxu1 %v12374_v63  ;;  %v13717_v62 = vpop.eup %13716  ;;  %v8853_v29 = vmul.f32 %v13715_v10, %v17359_v11  ;;  %v17492_v11 = vld [vmem:[%s17673_s2 + $0x20] sm:$0xff]  }
0x1ca4   : > { %12377 = vmatpush3.bf16.msra.mxu1 %v12374_v63  ;;  %v8854_v36 = vmul.f32 %v13717_v62, %v17365_v50 }
0x1ca5   : > { %v12378_v12 = vpack.c.bf16 %v13086_v39, %v13085_v16  ;;  %11645 = vmatmul.mubr.msk.f32.gmra.mrb[140].mxu1 %vm298_vm0, %v8429_v59  ;;  %v13719_v28 = vpop.eup %13718 }
0x1ca6   : > { %11647 = vmatprep.mubr.msk.f32.mxu1 %vm298_vm0, %v8430_v44  ;;  %v8855_v32 = vmul.f32 %v13719_v28, %v17375_v15 }
0x1ca7   : > { %12379 = vmatprep.subr.bf16.mxu1 %v12378_v12 }
0x1ca8   : > { %12381 = vmatpush3.bf16.msra.mxu1 %v12378_v12 }
0x1ca9   : > { %11648 = vmatmul.mubr.msk.f32.gmra.mrb[142].mxu1 %vm298_vm0, %v8431_v55 }
0x1caa   : > { %11694 = vmatprep.mubr.msk.f32.mxu1 %vm298_vm0, %v8850_v4 }
0x1cc7   : > { %v8841_v52 = vpop.xlane.xlu0 %8840 }
0x1cd3   : > { %v8838_v33 = vpop.xlane.xlu1 %8837 }
0x1cd4   : > { %13720 = vrcp.f32 %v8838_v33 }
0x1cd5   : > { %13722 = vrcp.f32 %v8841_v52 }
0x1cd7   : > { %v13089_v6 = vpop.permute.xlu1 %13088 }
0x1cd8   : > { %v13091_v51 = vunpack.i.h.bf16 %v13089_v6  ;;  %v13090_v25 = vunpack.i.l.bf16 %v13089_v6 }
0x1cda   : > { %v12382_v58 = vpack.c.bf16 %v13091_v51, %v13090_v25 }
0x1cdc   : > { %12383 = vmatprep.subr.bf16.mxu1 %v12382_v58 }
0x1cdd   : > { %12385 = vmatpush3.bf16.msra.mxu1 %v12382_v58 }
0x1cde   : > { %11706 = vmatprep.subr.bf16.mxu1 %v13760_v0  ;;  %v13721_v48 = vpop.eup %13720 }
0x1cdf   : > { %v13723_v5 = vpop.eup %13722  ;;  %v8856_v49 = vmul.f32 %v13721_v48, %v17391_v2 }
0x1ce0   : > { %11695 = vmatmul.mubr.msk.f32.vlgmr.msra.gmra.mrb[136].mxu1 %vm298_vm0, %v8851_v22  ;;  %v8857_v50 = vmul.f32 %v13723_v5, %v17387_v35 }
0x1ce1   : > { %11697 = vmatprep.mubr.msk.f32.mxu1 %vm298_vm0, %v8852_v24  ;;  %11707 = vmatpush3.bf16.msra.mxu1 %v13760_v0 }
0x1ce2   : > { %11708 = vmatprep.subr.bf16.mxu1 %v13761_v1 }
0x1ce4   : > { %11698 = vmatmul.mubr.msk.f32.gmra.mrb[138].mxu1 %vm298_vm0, %v8853_v29 }
0x1ce5   : > { %11700 = vmatprep.mubr.msk.f32.mxu1 %vm298_vm0, %v8854_v36  ;;  %11709 = vmatpush3.bf16.msra.mxu1 %v13761_v1 }
0x1ce6   : > { %11718 = vmatprep.subr.bf16.mxu1 %v17492_v11 }
0x1ce8   : > { %11701 = vmatmul.mubr.msk.f32.gmra.mrb[140].mxu1 %vm298_vm0, %v8855_v32 }
0x1ce9   : > { %11703 = vmatprep.mubr.msk.f32.mxu1 %vm298_vm0, %v8856_v49 }
0x1cec   : > { %11704 = vmatmul.mubr.msk.f32.gmra.mrb[142].mxu1 %vm298_vm0, %v8857_v50 }
0x1db3   : > { %v11696_v40 = vpop.f32.mrb[136].mxu1 }
0x1db4   : > { %v8972_v15 = vpop.f32.mrb[137].mxu1  ;;  %v9022_v54 = vsel %vm460_vm1, %v11696_v40, 0.0 }
0x1db5   : > { %9023 = vadd.xlane.f32.xlu0 %v9022_v54  ;;  %v9019_v7 = vsel %vm460_vm1, %v8972_v15, 0.0 }
0x1db6   : > { %9020 = vadd.xlane.f32.xlu1 %v9019_v7 }
0x1db7   : > { %v11699_v21 = vpop.f32.mrb[138].mxu1 }
0x1db8   : > { %v8982_v31 = vpop.f32.mrb[139].mxu1  ;;  %v9028_v2 = vsel %vm460_vm1, %v11699_v21, 0.0 }
0x1db9   : > { %9029 = vadd.xlane.f32.xlu0 %v9028_v2  ;;  %v9025_v43 = vsel %vm460_vm1, %v8982_v31, 0.0 }
0x1dbb   : > { %v11702_v26 = vpop.f32.mrb[140].mxu1 }
0x1dbc   : > { %v8992_v38 = vpop.f32.mrb[141].mxu1  ;;  %v9034_v8 = vsel %vm460_vm1, %v11702_v26, 0.0 }
0x1dbd   : > { %9026 = vadd.xlane.f32.xlu0 %v9025_v43  ;;  %v9031_v47 = vsel %vm460_vm1, %v8992_v38, 0.0 }
0x1dbf   : > { %v11705_v35 = vpop.f32.mrb[142].mxu1 }
0x1dc0   : > { %v9002_v34 = vpop.f32.mrb[143].mxu1  ;;  %v9040_v3 = vsel %vm460_vm1, %v11705_v35, 0.0 }
0x1dc1   : > { %9035 = vadd.xlane.f32.xlu0 %v9034_v8  ;;  %v9037_v46 = vsel %vm460_vm1, %v9002_v34, 0.0 }
0x1dc5   : > { %9032 = vadd.xlane.f32.xlu0 %v9031_v47 }
0x1dc9   : > { %9038 = vadd.xlane.f32.xlu0 %v9037_v46  ;;  %v13763_v46 = vld [vmem:[%s17675_s4 + $0xa0] ss:$0 sm:$0xff] }
0x1dcd   : > { %9041 = vadd.xlane.f32.xlu0 %v9040_v3 }
0x1e42   : > { %v9024_v57 = vpop.xlane.xlu0 %9023 }
0x1e43   : > { %v9044_v61 = vmul.f32 0.03125, %v9024_v57  ;;  %v9021_v13 = vpop.xlane.xlu1 %9020 }
0x1e44   : > { %v9043_v14 = vmul.f32 0.03125, %v9021_v13 }
0x1e45   : > { %v17508_v27 = vsub.f32 %v11696_v40, %v9044_v61 }
0x1e46   : > { %v17510_v42 = vsub.f32 %v8972_v15, %v9043_v14  ;;  %v9030_v17 = vpop.xlane.xlu0 %9029 }
0x1e47   : > { %v9046_v9 = vmul.f32 0.03125, %v9030_v17  ;;  %v9060_v60 = vmul.f32 %v17508_v27, %v17508_v27 }
0x1e48   : > { %v9059_v30 = vmul.f32 %v17510_v42, %v17510_v42 }
0x1e49   : > { %v17516_v23 = vsub.f32 %v11699_v21, %v9046_v9  ;;  %v9070_v37 = vsel %vm460_vm1, %v9060_v60, 0.0 }
0x1e4a   : > { %9071 = vadd.xlane.f32.xlu1 %v9070_v37  ;;  %v9027_v45 = vpop.xlane.xlu0 %9026  ;;  %v9067_v41 = vsel %vm460_vm1, %v9059_v30, 0.0 }
0x1e4b   : > { %v9045_v63 = vmul.f32 0.03125, %v9027_v45  ;;  %9068 = vadd.xlane.f32.xlu0 %v9067_v41  ;;  %v9062_v56 = vmul.f32 %v17516_v23, %v17516_v23 }
0x1e4d   : > { %v17522_v39 = vsub.f32 %v8982_v31, %v9045_v63  ;;  %v9076_v16 = vsel %vm460_vm1, %v9062_v56, 0.0 }
0x1e4e   : > { %9077 = vadd.xlane.f32.xlu1 %v9076_v16  ;;  %v9036_v59 = vpop.xlane.xlu0 %9035 }
0x1e4f   : > { %v9048_v53 = vmul.f32 0.03125, %v9036_v59  ;;  %v9061_v44 = vmul.f32 %v17522_v39, %v17522_v39 }
0x1e51   : > { %v17527_v18 = vsub.f32 %v11702_v26, %v9048_v53  ;;  %v9073_v12 = vsel %vm460_vm1, %v9061_v44, 0.0 }
0x1e52   : > { %v9033_v55 = vpop.xlane.xlu0 %9032  ;;  %9074 = vadd.xlane.f32.xlu0 %v9073_v12 }
0x1e53   : > { %v9047_v4 = vmul.f32 0.03125, %v9033_v55  ;;  %v9064_v33 = vmul.f32 %v17527_v18, %v17527_v18 }
0x1e55   : > { %v17532_v6 = vsub.f32 %v8992_v38, %v9047_v4  ;;  %v9082_v51 = vsel %vm460_vm1, %v9064_v33, 0.0 }
0x1e56   : > { %9083 = vadd.xlane.f32.xlu1 %v9082_v51  ;;  %v9039_v25 = vpop.xlane.xlu0 %9038 }
0x1e57   : > { %v9049_v52 = vmul.f32 0.03125, %v9039_v25  ;;  %v9063_v58 = vmul.f32 %v17532_v6, %v17532_v6 }
0x1e59   : > { %v17537_v19 = vsub.f32 %v9002_v34, %v9049_v52  ;;  %v9079_v20 = vsel %vm460_vm1, %v9063_v58, 0.0  ;;  %v13765_v52 = vld [vmem:[%s17673_s2 + $0x28] sm:$0xff]  }
0x1e5a   : > { %9080 = vadd.xlane.f32.xlu0 %v9079_v20  ;;  %v9042_v22 = vpop.xlane.xlu0 %9041 }
0x1e5b   : > { %v9050_v0 = vmul.f32 0.03125, %v9042_v22  ;;  %v9065_v10 = vmul.f32 %v17537_v19, %v17537_v19 }
0x1e5d   : > { %v17542_v24 = vsub.f32 %v11705_v35, %v9050_v0  ;;  %v9085_v62 = vsel %vm460_vm1, %v9065_v10, 0.0 }
0x1e5e   : > { %9086 = vadd.xlane.f32.xlu0 %v9085_v62 }
0x1e5f   : > { %v9066_v29 = vmul.f32 %v17542_v24, %v17542_v24 }
0x1e61   : > { %v9088_v1 = vsel %vm460_vm1, %v9066_v29, 0.0 }
0x1e62   : > { %9089 = vadd.xlane.f32.xlu1 %v9088_v1 }
0x1ed7   : > { %v9072_v28 = vpop.xlane.xlu1 %9071 }
0x1ed8   : > { %v9092_v36 = vmul.f32 0.03125, %v9072_v28  ;;  %v9069_v48 = vpop.xlane.xlu0 %9068 }
0x1ed9   : > { %v9091_v32 = vmul.f32 0.03125, %v9069_v48  ;;  %v17958_v48 = vld [vmem:[#allocation37_spill] sm:$0xff] }
0x1eda   : > { %v9100_v5 = vadd.f32 1e-05, %v9092_v36  ;;  %v17956_v36 = vld [vmem:[#allocation26_spill] sm:$0xff] }
0x1edb   : > { %v9099_v49 = vadd.f32 1e-05, %v9091_v32  ;;  %v9078_v50 = vpop.xlane.xlu1 %9077  ;;  %v17959_v32 = vld [vmem:[#allocation40_spill] sm:$0xff] }
0x1edc   : > { %13724 = vrsqrt.f32 %v9100_v5  ;;  %v9094_v40 = vmul.f32 0.03125, %v9078_v50 }
0x1edd   : > { %13726 = vrsqrt.f32 %v9099_v49 }
0x1ede   : > { %v9102_v15 = vadd.f32 1e-05, %v9094_v40 }
0x1edf   : > { %v9075_v54 = vpop.xlane.xlu0 %9074 }
0x1ee0   : > { %13728 = vrsqrt.f32 %v9102_v15  ;;  %v9093_v7 = vmul.f32 0.03125, %v9075_v54 }
0x1ee2   : > { %v9101_v21 = vadd.f32 1e-05, %v9093_v7 }
0x1ee3   : > { %v9084_v31 = vpop.xlane.xlu1 %9083 }
0x1ee4   : > { %13730 = vrsqrt.f32 %v9101_v21  ;;  %v9096_v2 = vmul.f32 0.03125, %v9084_v31 }
0x1ee6   : > { %v13725_v26 = vpop.eup %13724  ;;  %v9104_v38 = vadd.f32 1e-05, %v9096_v2 }
0x1ee7   : > { %v13727_v43 = vpop.eup %13726  ;;  %v9116_v35 = vmul.f32 %v13725_v26, %v17508_v27  ;;  %v9081_v34 = vpop.xlane.xlu0 %9080  ;;  %v13764_v27 = vld [vmem:[%s17675_s4 + $0xa8] ss:$0 sm:$0xff] }
0x1ee8   : > { %v9115_v8 = vmul.f32 %v13727_v43, %v17510_v42  ;;  %13732 = vrsqrt.f32 %v9104_v38  ;;  %v9095_v47 = vmul.f32 0.03125, %v9081_v34 }
0x1ee9   : > { %v9124_v3 = vmul.f32 %v13763_v46, %v9116_v35 }
0x1eea   : > { %v13729_v57 = vpop.eup %13728  ;;  %v9103_v61 = vadd.f32 1e-05, %v9095_v47  ;;  %v9123_v13 = vmul.f32 %v13763_v46, %v9115_v8 }
0x1eeb   : > { %v9118_v14 = vmul.f32 %v13729_v57, %v17516_v23  ;;  %v9087_v17 = vpop.xlane.xlu0 %9086  ;;  %v9132_v9 = vadd.f32 %v13764_v27, %v9124_v3 }
0x1eec   : > { %13734 = vrsqrt.f32 %v9103_v61  ;;  %v9097_v42 = vmul.f32 0.03125, %v9087_v17  ;;  %v9131_v60 = vadd.f32 %v13764_v27, %v9123_v13 }
0x1eed   : > { %v9126_v41 = vmul.f32 %v13763_v46, %v9118_v14 }
0x1eee   : > { %v13731_v30 = vpop.eup %13730  ;;  %v9105_v37 = vadd.f32 1e-05, %v9097_v42  ;;  %v9139_v45 = vpack.c.bf16 %v9132_v9, %v9131_v60 }
0x1eef   : > { %v9117_v63 = vmul.f32 %v13731_v30, %v17522_v39  ;;  %v9090_v56 = vpop.xlane.xlu1 %9089  ;;  %v9134_v44 = vadd.f32 %v13764_v27, %v9126_v41 }
0x1ef0   : > { %13736 = vrsqrt.f32 %v9105_v37  ;;  %v9098_v16 = vmul.f32 0.03125, %v9090_v56  ;;  %11710 = vmatprep.mubr.msk.bf16.mxu1 %vm460_vm1, %v9139_v45 }
0x1ef1   : > { %v9125_v23 = vmul.f32 %v13763_v46, %v9117_v63 }
0x1ef2   : > { %v13733_v59 = vpop.eup %13732  ;;  %v9106_v53 = vadd.f32 1e-05, %v9098_v16 }
0x1ef3   : > { %v9133_v12 = vadd.f32 %v13764_v27, %v9125_v23  ;;  %v9120_v55 = vmul.f32 %v13733_v59, %v17527_v18 }
0x1ef4   : > { %13738 = vrsqrt.f32 %v9106_v53 }
0x1ef5   : > { %v9140_v4 = vpack.c.bf16 %v9134_v44, %v9133_v12  ;;  %v9128_v39 = vmul.f32 %v13763_v46, %v9120_v55 }
0x1ef6   : > { %v13735_v33 = vpop.eup %13734 }
0x1ef7   : > { %v9119_v51 = vmul.f32 %v13735_v33, %v17532_v6  ;;  %11711 = vmatmul.mubr.msk.bf16.vlgmr.msra.gmra.mrb[144].mxu1 %vm460_vm1, %v9140_v4  ;;  %v9136_v22 = vadd.f32 %v13764_v27, %v9128_v39 }
0x1ef8   : > { %11719 = vmatpush3.bf16.msra.mxu1 %v17492_v11 }
0x1ef9   : > { %v9127_v25 = vmul.f32 %v13763_v46, %v9119_v51  ;;  %11720 = vmatprep.subr.bf16.mxu1 %v13765_v52 }
0x1efa   : > { %v13737_v58 = vpop.eup %13736 }
0x1efb   : > { %v9121_v20 = vmul.f32 %v13737_v58, %v17537_v19  ;;  %v9135_v18 = vadd.f32 %v13764_v27, %v9127_v25  ;;  %v17957_v19 = vld [vmem:[#allocation28_spill] sm:$0xff] }
0x1efc   : > { %11721 = vmatpush3.bf16.msra.mxu1 %v13765_v52 }
0x1efd   : > { %v9141_v0 = vpack.c.bf16 %v9136_v22, %v9135_v18  ;;  %v9129_v62 = vmul.f32 %v13763_v46, %v9121_v20 }
0x1efe   : > { %v13739_v10 = vpop.eup %13738 }
0x1eff   : > { %v9122_v6 = vmul.f32 %v13739_v10, %v17542_v24  ;;  %11714 = vmatprep.mubr.msk.bf16.mxu1 %vm460_vm1, %v9141_v0  ;;  %v9137_v29 = vadd.f32 %v13764_v27, %v9129_v62 }
0x1f01   : > { %v9130_v11 = vmul.f32 %v13763_v46, %v9122_v6 }
0x1f03   : > { %v9138_v1 = vadd.f32 %v13764_v27, %v9130_v11 }
0x1f05   : > { %v9142_v28 = vpack.c.bf16 %v9138_v1, %v9137_v29 }
0x1f07   : > { %11715 = vmatmul.mubr.msk.bf16.gmra.mrb[148].mxu1 %vm460_vm1, %v9142_v28 }
0x1f08   : > { %11722 = vmatprep.mubr.msk.bf16.mxu1 %vm460_vm1, %v17956_v36 }
0x1f0f   : > { %11723 = vmatmul.mubr.msk.bf16.vlgmr.msra.gmra.mrb[144].mxu1 %vm460_vm1, %v17957_v19 }
0x1f10   : > { %11726 = vmatprep.mubr.msk.bf16.mxu1 %vm460_vm1, %v17958_v48 }
0x1f17   : > { %11727 = vmatmul.mubr.msk.bf16.gmra.mrb[148].mxu1 %vm460_vm1, %v17959_v32 }
0x1fe2   : > { %v11724_v24 = vpop.f32.mrb[144].mxu1 }
0x1fe3   : > { %v9254_v5 = vpop.f32.mrb[145].mxu1  ;;  %v9287_v50 = vmax.f32 %v11724_v24, 0.0 }
0x1fe4   : > { %v11725_v49 = vpop.f32.mrb[146].mxu1  ;;  %v9285_v54 = vmax.f32 %v9254_v5, 0.0 }
0x1fe5   : > { %v9288_v40 = vmax.f32 %v11725_v49, 0.0  ;;  %v9257_v15 = vpop.f32.mrb[147].mxu1 }
0x1fe6   : > { %v9286_v7 = vmax.f32 %v9257_v15, 0.0 }
0x1fe7   : > { %v9294_v21 = vpack.c.bf16 %v9288_v40, %v9287_v50 }
0x1fe8   : > { %v9293_v31 = vpack.c.bf16 %v9286_v7, %v9285_v54 }
0x1fea   : > { %v11728_v2 = vpop.f32.mrb[148].mxu1  ;;  %11738 = vmatprep.mubr.msk.bf16.mxu0 %vm298_vm0, %v9293_v31 }
0x1feb   : > { %v9270_v26 = vpop.f32.mrb[149].mxu1  ;;  %11739 = vmatmul.mubr.msk.bf16.vlgmr.msra.gmra.mrb[160].mxu0 %vm298_vm0, %v9294_v21  ;;  %v9291_v43 = vmax.f32 %v11728_v2, 0.0 }
0x1fec   : > { %v11729_v38 = vpop.f32.mrb[150].mxu1  ;;  %v9289_v8 = vmax.f32 %v9270_v26, 0.0 }
0x1fed   : > { %v9292_v35 = vmax.f32 %v11729_v38, 0.0  ;;  %v9273_v34 = vpop.f32.mrb[151].mxu1 }
0x1fee   : > { %v9290_v47 = vmax.f32 %v9273_v34, 0.0 }
0x1fef   : > { %v9296_v46 = vpack.c.bf16 %v9292_v35, %v9291_v43 }
0x1ff0   : > { %v9295_v3 = vpack.c.bf16 %v9290_v47, %v9289_v8 }
0x1ff2   : > { %11742 = vmatprep.mubr.msk.bf16.mxu0 %vm298_vm0, %v9295_v3 }
0x1ff3   : > { %11743 = vmatmul.mubr.msk.bf16.gmra.mrb[164].mxu0 %vm298_vm0, %v9296_v46 }
0x20be   : > { %v11740_v57 = vpop.f32.mrb[160].mxu0 }
0x20bf   : > { %v9343_v61 = vpop.f32.mrb[161].mxu0  ;;  %v9380_v13 = vsel %vm460_vm1, %v11740_v57, 0.0 }
0x20c0   : > { %9381 = vadd.xlane.f32.xlu0 %v9380_v13  ;;  %v11741_v14 = vpop.f32.mrb[162].mxu0  ;;  %v9374_v9 = vsel %vm460_vm1, %v9343_v61, 0.0 }
0x20c1   : > { %v9346_v17 = vpop.f32.mrb[163].mxu0  ;;  %v9383_v27 = vsel %vm460_vm1, %v11741_v14, 0.0 }
0x20c2   : > { %9384 = vadd.xlane.f32.xlu1 %v9383_v27  ;;  %v9377_v42 = vsel %vm460_vm1, %v9346_v17, 0.0 }
0x20c4   : > { %9375 = vadd.xlane.f32.xlu0 %v9374_v9 }
0x20c6   : > { %9378 = vadd.xlane.f32.xlu1 %v9377_v42  ;;  %v11744_v60 = vpop.f32.mrb[164].mxu0 }
0x20c7   : > { %v9359_v30 = vpop.f32.mrb[165].mxu0  ;;  %v9392_v56 = vsel %vm460_vm1, %v11744_v60, 0.0 }
0x20c8   : > { %v11745_v37 = vpop.f32.mrb[166].mxu0  ;;  %v9386_v45 = vsel %vm460_vm1, %v9359_v30, 0.0 }
0x20c9   : > { %9387 = vadd.xlane.f32.xlu0 %v9386_v45  ;;  %v9362_v41 = vpop.f32.mrb[167].mxu0  ;;  %v9395_v16 = vsel %vm460_vm1, %v11745_v37, 0.0 }
0x20ca   : > { %v9389_v63 = vsel %vm460_vm1, %v9362_v41, 0.0 }
0x20cb   : > { %9390 = vadd.xlane.f32.xlu1 %v9389_v63 }
0x20cd   : > { %9393 = vadd.xlane.f32.xlu0 %v9392_v56 }
0x20cf   : > { %9396 = vadd.xlane.f32.xlu1 %v9395_v16 }
0x214d   : > { %v9382_v23 = vpop.xlane.xlu0 %9381 }
0x214e   : > { %v9400_v59 = vmul.f32 0.03125, %v9382_v23 }
0x214f   : > { %v9385_v53 = vpop.xlane.xlu1 %9384 }
0x2150   : > { %v17590_v44 = vsub.f32 %v11740_v57, %v9400_v59  ;;  %v9401_v12 = vmul.f32 0.03125, %v9385_v53  ;;  %v13766_v53 = vld [vmem:[%s17675_s4 + $0xb0] ss:$0 sm:$0xff] }
0x2151   : > { %v9376_v55 = vpop.xlane.xlu0 %9375 }
0x2152   : > { %v17592_v4 = vsub.f32 %v11741_v14, %v9401_v12  ;;  %v9398_v33 = vmul.f32 0.03125, %v9376_v55  ;;  %v9416_v51 = vmul.f32 %v17590_v44, %v17590_v44 }
0x2153   : > { %v9379_v39 = vpop.xlane.xlu1 %9378 }
0x2154   : > { %v17596_v25 = vsub.f32 %v9343_v61, %v9398_v33  ;;  %v9399_v52 = vmul.f32 0.03125, %v9379_v39  ;;  %v9428_v58 = vsel %vm460_vm1, %v9416_v51, 0.0  ;;  %v9417_v20 = vmul.f32 %v17592_v4, %v17592_v4  ;;  %v13767_v39 = vld [vmem:[%s17675_s4 + $0xb8] ss:$0 sm:$0xff] }
0x2155   : > { %9429 = vadd.xlane.f32.xlu0 %v9428_v58 }
0x2156   : > { %v17601_v18 = vsub.f32 %v9346_v17, %v9399_v52  ;;  %v9388_v22 = vpop.xlane.xlu0 %9387  ;;  %v9431_v0 = vsel %vm460_vm1, %v9417_v20, 0.0  ;;  %v9414_v10 = vmul.f32 %v17596_v25, %v17596_v25 }
0x2157   : > { %v9402_v6 = vmul.f32 0.03125, %v9388_v22  ;;  %9432 = vadd.xlane.f32.xlu1 %v9431_v0  ;;  %v17960_v22 = vld [vmem:[#allocation27_spill] sm:$0xff] }
0x2158   : > { %v9391_v62 = vpop.xlane.xlu1 %9390  ;;  %v9422_v11 = vsel %vm460_vm1, %v9414_v10, 0.0  ;;  %v9415_v29 = vmul.f32 %v17601_v18, %v17601_v18 }
0x2159   : > { %v17609_v1 = vsub.f32 %v9359_v30, %v9402_v6  ;;  %v9403_v28 = vmul.f32 0.03125, %v9391_v62  ;;  %9423 = vadd.xlane.f32.xlu0 %v9422_v11  ;;  %v17961_v11 = vld [vmem:[#allocation29_spill] sm:$0xff] }
0x215a   : > { %v9394_v36 = vpop.xlane.xlu0 %9393  ;;  %v9425_v19 = vsel %vm460_vm1, %v9415_v29, 0.0 }
0x215b   : > { %v17612_v48 = vsub.f32 %v9362_v41, %v9403_v28  ;;  %v9404_v32 = vmul.f32 0.03125, %v9394_v36  ;;  %9426 = vadd.xlane.f32.xlu1 %v9425_v19  ;;  %v9418_v24 = vmul.f32 %v17609_v1, %v17609_v1 }
0x215c   : > { %v9397_v5 = vpop.xlane.xlu1 %9396 }
0x215d   : > { %v17616_v49 = vsub.f32 %v11744_v60, %v9404_v32  ;;  %v9405_v50 = vmul.f32 0.03125, %v9397_v5  ;;  %v9434_v40 = vsel %vm460_vm1, %v9418_v24, 0.0  ;;  %v9419_v15 = vmul.f32 %v17612_v48, %v17612_v48  ;;  %v17962_v32 = vld [vmem:[#allocation55_spill] sm:$0xff] }
0x215e   : > { %9435 = vadd.xlane.f32.xlu0 %v9434_v40 }
0x215f   : > { %v17621_v54 = vsub.f32 %v11745_v37, %v9405_v50  ;;  %v9437_v7 = vsel %vm460_vm1, %v9419_v15, 0.0  ;;  %v9420_v21 = vmul.f32 %v17616_v49, %v17616_v49  ;;  %v17963_v15 = vld [vmem:[#allocation56_spill] sm:$0xff] }
0x2160   : > { %9438 = vadd.xlane.f32.xlu1 %v9437_v7 }
0x2161   : > { %v9440_v31 = vsel %vm460_vm1, %v9420_v21, 0.0  ;;  %v9421_v2 = vmul.f32 %v17621_v54, %v17621_v54 }
0x2162   : > { %9441 = vadd.xlane.f32.xlu0 %v9440_v31 }
0x2163   : > { %v9443_v26 = vsel %vm460_vm1, %v9421_v2, 0.0 }
0x2164   : > { %9444 = vadd.xlane.f32.xlu1 %v9443_v26  ;;  %v17964_v26 = vld [vmem:[#allocation36_spill] sm:$0xff] }
0x21e2   : > { %v9430_v38 = vpop.xlane.xlu0 %9429 }
0x21e3   : > { %v9448_v43 = vmul.f32 0.03125, %v9430_v38 }
0x21e4   : > { %v9433_v35 = vpop.xlane.xlu1 %9432 }
0x21e5   : > { %v9456_v34 = vadd.f32 1e-05, %v9448_v43  ;;  %v9449_v8 = vmul.f32 0.03125, %v9433_v35 }
0x21e6   : > { %v9424_v47 = vpop.xlane.xlu0 %9423 }
0x21e7   : > { %13740 = vrsqrt.f32 %v9456_v34  ;;  %v9457_v46 = vadd.f32 1e-05, %v9449_v8  ;;  %v9446_v3 = vmul.f32 0.03125, %v9424_v47  ;;  %v17965_v34 = vld [vmem:[#allocation34_spill] sm:$0xff] }
0x21e8   : > { %v9427_v57 = vpop.xlane.xlu1 %9426 }
0x21e9   : > { %13742 = vrsqrt.f32 %v9457_v46  ;;  %v9454_v61 = vadd.f32 1e-05, %v9446_v3  ;;  %v9447_v13 = vmul.f32 0.03125, %v9427_v57  ;;  %v17966_v3 = vld [vmem:[#allocation35_spill] sm:$0xff] }
0x21eb   : > { %13744 = vrsqrt.f32 %v9454_v61  ;;  %v9455_v14 = vadd.f32 1e-05, %v9447_v13  ;;  %v9436_v17 = vpop.xlane.xlu0 %9435  ;;  %v17967_v61 = vld [vmem:[#allocation33_spill] sm:$0xff] }
0x21ec   : > { %v9450_v27 = vmul.f32 0.03125, %v9436_v17 }
0x21ed   : > { %13746 = vrsqrt.f32 %v9455_v14  ;;  %v9439_v9 = vpop.xlane.xlu1 %9438 }
0x21ee   : > { %v9458_v42 = vadd.f32 1e-05, %v9450_v27  ;;  %v9451_v60 = vmul.f32 0.03125, %v9439_v9 }
0x21ef   : > { %v9442_v30 = vpop.xlane.xlu0 %9441 }
0x21f0   : > { %13748 = vrsqrt.f32 %v9458_v42  ;;  %v9459_v37 = vadd.f32 1e-05, %v9451_v60  ;;  %v9452_v45 = vmul.f32 0.03125, %v9442_v30 }
0x21f1   : > { %v13741_v41 = vpop.eup %13740  ;;  %v9445_v63 = vpop.xlane.xlu1 %9444 }
0x21f2   : > { %v9472_v56 = vmul.f32 %v13741_v41, %v17590_v44  ;;  %13750 = vrsqrt.f32 %v9459_v37  ;;  %v9460_v16 = vadd.f32 1e-05, %v9452_v45  ;;  %v9453_v23 = vmul.f32 0.03125, %v9445_v63 }
0x21f3   : > { %v13743_v59 = vpop.eup %13742 }
0x21f4   : > { %v9480_v12 = vmul.f32 %v13766_v53, %v9472_v56  ;;  %v9473_v55 = vmul.f32 %v13743_v59, %v17592_v4  ;;  %13752 = vrsqrt.f32 %v9460_v16  ;;  %v9461_v33 = vadd.f32 1e-05, %v9453_v23 }
0x21f5   : > { %v13745_v51 = vpop.eup %13744 }
0x21f6   : > { %v9488_v44 = vadd.f32 %v13767_v39, %v9480_v12  ;;  %v9481_v52 = vmul.f32 %v13766_v53, %v9473_v55  ;;  %v9470_v58 = vmul.f32 %v13745_v51, %v17596_v25  ;;  %13754 = vrsqrt.f32 %v9461_v33 }
0x21f7   : > { %v13747_v20 = vpop.eup %13746 }
0x21f8   : > { %v9496_v0 = vadd.f32 %v9488_v44, %v17960_v22  ;;  %v9489_v10 = vadd.f32 %v13767_v39, %v9481_v52  ;;  %v9478_v6 = vmul.f32 %v13766_v53, %v9470_v58  ;;  %v9471_v4 = vmul.f32 %v13747_v20, %v17601_v18 }
0x21fa   : > { %v13749_v62 = vpop.eup %13748  ;;  %9512 = vst.msk [vmem:[%s16847_s25 + $0x50] sm:$0xff] %vm460_vm1, %v9496_v0  ;;  %v9497_v29 = vadd.f32 %v9489_v10, %v17961_v11  ;;  %v9486_v28 = vadd.f32 %v13767_v39, %v9478_v6  ;;  %v9479_v36 = vmul.f32 %v13766_v53, %v9471_v4 }
0x21fb   : > { %v9474_v19 = vmul.f32 %v13749_v62, %v17609_v1 }
0x21fc   : > { %v13751_v25 = vpop.eup %13750  ;;  %9513 = vst.msk [vmem:[%s16847_s25 + $0x58] sm:$0xff] %vm460_vm1, %v9497_v29  ;;  %v9494_v24 = vadd.f32 %v9486_v28, %v17962_v32  ;;  %v9487_v5 = vadd.f32 %v13767_v39, %v9479_v36 }
0x21fd   : > { %v9482_v50 = vmul.f32 %v13766_v53, %v9474_v19  ;;  %v9475_v18 = vmul.f32 %v13751_v25, %v17612_v48 }
0x21fe   : > { %v13753_v40 = vpop.eup %13752  ;;  %9510 = vst.msk [vmem:[%s16847_s25 + $0x40] sm:$0xff] %vm460_vm1, %v9494_v24  ;;  %v9495_v7 = vadd.f32 %v9487_v5, %v17963_v15 }
0x21ff   : > { %v9490_v21 = vadd.f32 %v13767_v39, %v9482_v50  ;;  %v9483_v31 = vmul.f32 %v13766_v53, %v9475_v18  ;;  %v9476_v1 = vmul.f32 %v13753_v40, %v17616_v49 }
0x2200   : > { %v13755_v2 = vpop.eup %13754  ;;  %9511 = vst.msk [vmem:[%s16847_s25 + $0x48] sm:$0xff] %vm460_vm1, %v9495_v7 }
0x2201   : > { %v9498_v38 = vadd.f32 %v9490_v21, %v17964_v26  ;;  %v9491_v43 = vadd.f32 %v13767_v39, %v9483_v31  ;;  %v9484_v35 = vmul.f32 %v13766_v53, %v9476_v1  ;;  %v9477_v48 = vmul.f32 %v13755_v2, %v17621_v54 }
0x2203   : > { %9514 = vst.msk [vmem:[%s16847_s25 + $0x60] sm:$0xff] %vm460_vm1, %v9498_v38  ;;  %v9499_v8 = vadd.f32 %v9491_v43, %v17965_v34  ;;  %v9492_v47 = vadd.f32 %v13767_v39, %v9484_v35  ;;  %v9485_v46 = vmul.f32 %v13766_v53, %v9477_v48 }
0x2205   : > { %9515 = vst.msk [vmem:[%s16847_s25 + $0x68] sm:$0xff] %vm460_vm1, %v9499_v8  ;;  %v9500_v49 = vadd.f32 %v9492_v47, %v17966_v3  ;;  %v9493_v57 = vadd.f32 %v13767_v39, %v9485_v46 }
0x2207   : > { %9516 = vst.msk [vmem:[%s16847_s25 + $0x70] sm:$0xff] %vm460_vm1, %v9500_v49  ;;  %v9501_v13 = vadd.f32 %v9493_v57, %v17967_v61 }
0x2209   : > { %9517 = vst.msk [vmem:[%s16847_s25 + $0x78] sm:$0xff] %vm460_vm1, %v9501_v13 }
0x220a PF: > { %s15_s18 = sadd.s32 1, %s13774_s18  }
0x220b   : > { %p12_p4 = scmp.ge.s32.totalorder %s15_s18, 4  }
0x220d   :  { %14 = sbr.rel (!%p12_p4) target bundleno = 1 (0x1), region = 72 }

</bundles_post_ra>
